<compile_context>
chip_gen: v6e
topology: v6e:2x2x1
jax: 0.10.0
libtpu: 0.0.40
codegen_flags: <defaults>
</compile_context>

<pallas_src>
import functools
import math

import jax
import jax.numpy as jnp
from jax.experimental import pallas as pl
from jax.experimental.pallas import tpu as pltpu

BN_EPS = 1e-5
LANE = 128                      # channel padding target (TPU lane width)
MAX_ROW_TILE = 256              # row tile for the matmul kernels
VMEM_LIMIT = 32 * 1024 * 1024   # portable across v5e / v6e / v7x
_VMEM = pl.BlockSpec(memory_space=pltpu.MemorySpace.VMEM)


def _round_up(v, m):
    return -(-v // m) * m


def make_divisible(value, divisor, min_value=None, round_down_protect=True):
    if min_value is None:
        min_value = divisor
    new_value = max(min_value, int(value + divisor / 2) // divisor * divisor)
    if round_down_protect and new_value < 0.9 * value:
        new_value += divisor
    return new_value


# --------------------------------------------------------------------------- #
# fused matmul (+ batch-norm + relu + residual), row-tiled & pipelined
# --------------------------------------------------------------------------- #
def _linear_stats_kernel(x_ref, w_ref, sum_ref, sq_ref):
    """Accumulate per-output-channel sum / sum-of-squares of y = x @ w."""
    @pl.when(pl.program_id(0) == 0)
    def _init():
        sum_ref[...] = jnp.zeros_like(sum_ref)
        sq_ref[...] = jnp.zeros_like(sq_ref)

    y = jnp.dot(x_ref[...], w_ref[...], preferred_element_type=jnp.float32)
    sum_ref[...] += jnp.sum(y, axis=0, keepdims=True)
    sq_ref[...] += jnp.sum(y * y, axis=0, keepdims=True)


def _make_linear_apply_kernel(relu, has_residual):
    def kernel(*refs):
        if has_residual:
            x_ref, w_ref, scale_ref, shift_ref, r_ref, o_ref = refs
        else:
            x_ref, w_ref, scale_ref, shift_ref, o_ref = refs
            r_ref = None
        y = jnp.dot(x_ref[...], w_ref[...], preferred_element_type=jnp.float32)
        y = y * scale_ref[...] + shift_ref[...]        # folded BN (f32 epilogue)
        if relu:
            y = jnp.maximum(y, 0.0)
        if r_ref is not None:
            y = y + r_ref[...].astype(jnp.float32)
        o_ref[...] = y.astype(o_ref.dtype)

    return kernel


def linear_bn_act(x_rows, w, gamma, beta, *, relu, residual=None,
                  out_dtype=jnp.bfloat16):
    """(1x1 / im2col) conv + training-mode BatchNorm + ReLU (+residual).

    x_rows: (N, K) rows, w: (K, M).  Returns (N, Mp) with Mp = M rounded up to
    a multiple of 128; padded output channels are exactly zero because the
    padded gamma/beta are zero.
    """
    N, K = x_rows.shape
    M = w.shape[1]
    Kp = _round_up(K, LANE)
    Mp = _round_up(M, LANE)
    tile = min(MAX_ROW_TILE, _round_up(N, 16))
    Np = _round_up(N, tile)
    grid = (Np // tile,)

    x_p = jnp.pad(x_rows.astype(jnp.bfloat16), ((0, Np - N), (0, Kp - K)))
    w_p = jnp.pad(w.astype(jnp.bfloat16), ((0, Kp - K), (0, Mp - M)))
    g_p = jnp.pad(gamma.astype(jnp.float32), (0, Mp - M)).reshape(1, Mp)
    b_p = jnp.pad(beta.astype(jnp.float32), (0, Mp - M)).reshape(1, Mp)

    row_spec = pl.BlockSpec((tile, Kp), lambda i: (i, 0))
    w_spec = pl.BlockSpec((Kp, Mp), lambda i: (0, 0))   # weight stays resident
    col_spec = pl.BlockSpec((1, Mp), lambda i: (0, 0))
    out_spec = pl.BlockSpec((tile, Mp), lambda i: (i, 0))

    cost = pl.CostEstimate(
        flops=2 * Np * Kp * Mp, transcendentals=0,
        bytes_accessed=2 * (Np * Kp + Kp * Mp + Np * Mp))

    # pass 1: batch statistics of the pre-BN output.  Zero-padded rows
    # contribute nothing; we divide by the true row count N below.
    tot, tot_sq = pl.pallas_call(
        _linear_stats_kernel,
        grid=grid,
        in_specs=[row_spec, w_spec],
        out_specs=(col_spec, col_spec),
        out_shape=(jax.ShapeDtypeStruct((1, Mp), jnp.float32),
                   jax.ShapeDtypeStruct((1, Mp), jnp.float32)),
        compiler_params=pltpu.CompilerParams(
            dimension_semantics=("arbitrary",), vmem_limit_bytes=VMEM_LIMIT),
        cost_estimate=cost,
    )(x_p, w_p)

    mean = tot / N
    var = jnp.maximum(tot_sq / N - mean * mean, 0.0)
    scale = g_p * jax.lax.rsqrt(var + BN_EPS)
    shift = b_p - mean * scale

    # pass 2: recompute the matmul tile-by-tile and apply the folded BN,
    # activation and (optional) residual.  Row grid is parallel (megacore).
    args = [x_p, w_p, scale, shift]
    in_specs = [row_spec, w_spec, col_spec, col_spec]
    if residual is not None:
        r_p = jnp.pad(residual.astype(jnp.bfloat16),
                      ((0, Np - N), (0, Mp - residual.shape[1])))
        args.append(r_p)
        in_specs.append(out_spec)

    y = pl.pallas_call(
        _make_linear_apply_kernel(relu, residual is not None),
        grid=grid,
        in_specs=in_specs,
        out_specs=out_spec,
        out_shape=jax.ShapeDtypeStruct((Np, Mp), out_dtype),
        compiler_params=pltpu.CompilerParams(
            dimension_semantics=("parallel",), vmem_limit_bytes=VMEM_LIMIT),
        cost_estimate=cost,
    )(*args)
    return y[:N]


# --------------------------------------------------------------------------- #
# depthwise conv + BN (+ReLU), channel-tiled, no k*k HBM duplication
# --------------------------------------------------------------------------- #
def _make_dw_kernel(k, s, nb, ho, wo, relu):
    """Depthwise conv + exact train-mode BN (+ReLU) for one 128-channel tile."""

    def kernel(xs_ref, w_ref, g_ref, b_ref, o_ref):
        tc = o_ref.shape[-1]
        acc = jnp.zeros((nb, ho, wo, tc), jnp.float32)
        for i in range(k):
            for j in range(k):
                ph = (i % s) * s + (j % s)       # stride phase of this tap
                oi, oj = i // s, j // s          # offset inside the phase
                t = i * k + j
                tap = xs_ref[ph * nb:(ph + 1) * nb,
                             oi:oi + ho, oj:oj + wo, :].astype(jnp.float32)
                wt = w_ref[t:t + 1, :].astype(jnp.float32)       # (1, tc)
                acc = acc + tap * wt
        cnt = float(nb * ho * wo)
        red = jnp.sum(jnp.sum(acc, axis=0), axis=0)              # (wo, tc)
        mean = jnp.sum(red, axis=0, keepdims=True) / cnt         # (1, tc)
        red2 = jnp.sum(jnp.sum(acc * acc, axis=0), axis=0)
        var = jnp.maximum(
            jnp.sum(red2, axis=0, keepdims=True) / cnt - mean * mean, 0.0)
        scale = g_ref[...] * jax.lax.rsqrt(var + BN_EPS)         # (1, tc)
        shift = b_ref[...] - mean * scale
        y = acc * scale + shift
        if relu:
            y = jnp.maximum(y, 0.0)
        o_ref[...] = y.astype(o_ref.dtype)

    return kernel


def dw_conv_bn(x, w, gamma, beta, *, k, s, relu):
    """Depthwise conv (groups=C) + BN (+ReLU).  x: (B, H, W, Cp), Cp % 128 == 0.

    The padded input is split into its s*s stride phases on the host (same
    total bytes) and the k*k taps are formed inside the kernel with static
    offset slices -- no im2col duplication in HBM.
    """
    B, H, W, Cp = x.shape
    C = w.shape[-1]
    p = (k - 1) // 2
    Ho = (H + 2 * p - k) // s + 1
    Wo = (W + 2 * p - k) // s + 1
    Hp, Wp = H + 2 * p, W + 2 * p
    Hp2, Wp2 = _round_up(Hp, s), _round_up(Wp, s)
    xp = jnp.pad(x.astype(jnp.bfloat16),
                 ((0, 0), (p, p + Hp2 - Hp), (p, p + Wp2 - Wp), (0, 0)))
    if s > 1:
        xs = jnp.concatenate(
            [xp[:, pi::s, pj::s, :] for pi in range(s) for pj in range(s)],
            axis=0)
    else:
        xs = xp
    P = s * s
    Hph, Wph = Hp2 // s, Wp2 // s

    w_t = jnp.pad(w.reshape(k * k, C), ((0, 0), (0, Cp - C))).astype(jnp.bfloat16)
    g_p = jnp.pad(gamma.astype(jnp.float32), (0, Cp - C)).reshape(1, Cp)
    b_p = jnp.pad(beta.astype(jnp.float32), (0, Cp - C)).reshape(1, Cp)

    grid = (Cp // LANE,)
    return pl.pallas_call(
        _make_dw_kernel(k, s, B, Ho, Wo, relu),
        grid=grid,
        in_specs=[
            pl.BlockSpec((P * B, Hph, Wph, LANE), lambda c: (0, 0, 0, c)),
            pl.BlockSpec((k * k, LANE), lambda c: (0, c)),
            pl.BlockSpec((1, LANE), lambda c: (0, c)),
            pl.BlockSpec((1, LANE), lambda c: (0, c)),
        ],
        out_specs=pl.BlockSpec((B, Ho, Wo, LANE), lambda c: (0, 0, 0, c)),
        out_shape=jax.ShapeDtypeStruct((B, Ho, Wo, Cp), jnp.bfloat16),
        compiler_params=pltpu.CompilerParams(
            dimension_semantics=("parallel",), vmem_limit_bytes=VMEM_LIMIT),
    )(xs, w_t, g_p, b_p)


# --------------------------------------------------------------------------- #
# fused head: avgpool + ConvBN(c, 1280, 1) + classifier in one kernel
# --------------------------------------------------------------------------- #
def _head_kernel(x_ref, wh_ref, g_ref, b_ref, wc_ref, bc_ref, o_ref):
    pooled = jnp.mean(x_ref[...].astype(jnp.float32), axis=1)           # (B, Cp)
    h = jnp.dot(pooled.astype(jnp.bfloat16), wh_ref[...],
                preferred_element_type=jnp.float32)                     # (B, hid)
    mean = jnp.mean(h, axis=0, keepdims=True)
    var = jnp.maximum(jnp.mean(h * h, axis=0, keepdims=True) - mean * mean, 0.0)
    h = (h - mean) * jax.lax.rsqrt(var + BN_EPS)
    h = jnp.maximum(h * g_ref[...] + b_ref[...], 0.0)
    o_ref[...] = jnp.dot(h.astype(jnp.bfloat16), wc_ref[...],
                         preferred_element_type=jnp.float32) + bc_ref[...]


def head_forward(x, head_p, cls_p):
    """Fused AdaptiveAvgPool2d((1,1)) + ConvBN(c, 1280, 1) + Linear."""
    B, H, W, Cp = x.shape
    C, hidden = head_p["w"].shape
    ncls = cls_p["w"].shape[1]
    ncls_p = _round_up(ncls, LANE)

    wh = jnp.pad(head_p["w"].astype(jnp.bfloat16), ((0, Cp - C), (0, 0)))
    g = head_p["gamma"].astype(jnp.float32).reshape(1, hidden)
    b = head_p["beta"].astype(jnp.float32).reshape(1, hidden)
    wc = jnp.pad(cls_p["w"].astype(jnp.bfloat16), ((0, 0), (0, ncls_p - ncls)))
    bc = jnp.pad(cls_p["b"].astype(jnp.float32), (0, ncls_p - ncls)).reshape(1, ncls_p)

    logits = pl.pallas_call(
        _head_kernel,
        in_specs=[_VMEM] * 6,
        out_specs=_VMEM,
        out_shape=jax.ShapeDtypeStruct((B, ncls_p), jnp.float32),
        compiler_params=pltpu.CompilerParams(vmem_limit_bytes=VMEM_LIMIT),
    )(x.reshape(B, H * W, Cp).astype(jnp.bfloat16), wh, g, b, wc, bc)
    return logits[:, :ncls]


# --------------------------------------------------------------------------- #
# layer forwards
# --------------------------------------------------------------------------- #
def conv_bn_forward(x, p):
    """Regular ConvBN (stem).  The im2col of the 3-channel image is tiny, so
    the (N, k*k*3) cols matrix is built host-side and fed to the row-tiled
    matmul kernel (contraction dim is zero-padded to 128 inside the wrapper)."""
    k, s = p["k"], p["s"]
    B, H, W, C = x.shape
    pad = (k - 1) // 2
    xp = jnp.pad(x.astype(jnp.bfloat16), ((0, 0), (pad, pad), (pad, pad), (0, 0)))
    Ho = (H + 2 * pad - k) // s + 1
    Wo = (W + 2 * pad - k) // s + 1
    taps = [xp[:, i:i + (Ho - 1) * s + 1:s, j:j + (Wo - 1) * s + 1:s, :]
            for i in range(k) for j in range(k)]
    cols = jnp.stack(taps, axis=3).reshape(B * Ho * Wo, k * k * C)
    wm = p["w"].reshape(k * k * C, -1)
    y = linear_bn_act(cols, wm, p["gamma"], p["beta"], relu=True)
    return y.reshape(B, Ho, Wo, -1)


def uib_forward(x, p):
    shortcut = x
    # start depthwise (no activation), stride 1 (middle_dw_downsample default)
    if p["start_k"]:
        sp = p["start_dw"]
        x = dw_conv_bn(x, sp["w"], sp["gamma"], sp["beta"],
                       k=p["start_k"], s=sp["s"], relu=False)
    # expand 1x1 conv + BN + ReLU
    B, H, W, Cp = x.shape
    w_e = jnp.pad(p["expand_w"], ((0, Cp - p["expand_w"].shape[0]), (0, 0)))
    x = linear_bn_act(x.reshape(B * H * W, Cp), w_e,
                      p["expand_gamma"], p["expand_beta"], relu=True)
    x = x.reshape(B, H, W, -1)
    # middle depthwise + BN + ReLU (carries the block stride)
    if p["middle_k"]:
        mp = p["middle_dw"]
        x = dw_conv_bn(x, mp["w"], mp["gamma"], mp["beta"],
                       k=p["middle_k"], s=mp["s"], relu=True)
    # projection 1x1 conv + BN (+ residual fused into the kernel epilogue)
    B, H, W, Cep = x.shape
    w_p = jnp.pad(p["proj_w"], ((0, Cep - p["proj_w"].shape[0]), (0, 0)))
    res = shortcut.reshape(B * H * W, -1) if p["identity"] else None
    x = linear_bn_act(x.reshape(B * H * W, Cep), w_p,
                      p["proj_gamma"], p["proj_beta"], relu=False, residual=res)
    return x.reshape(B, H, W, -1)


def mobilenetv4_forward(params, x_nchw):
    x = jnp.transpose(x_nchw, (0, 2, 3, 1))                     # NCHW -> NHWC
    for p in params["features"]:
        if p["type"] == "conv_bn":
            x = conv_bn_forward(x, p)
        else:
            x = uib_forward(x, p)
    return head_forward(x, params["head_conv"], params["classifier"])


# --------------------------------------------------------------------------- #
# deterministic parameter construction (mirrors MobileNetV4._initialize_weights)
# --------------------------------------------------------------------------- #
def _conv_init(key, k, cin, cout):
    std = math.sqrt(2.0 / (k * k * cout))
    return jax.random.normal(key, (k, k, cin, cout), jnp.float32) * std   # HWIO


def _dw_init(key, k, c):
    std = math.sqrt(2.0 / (k * k * c))
    return jax.random.normal(key, (k, k, c), jnp.float32) * std


def build_mobilenetv4_params(key, block_specs, num_classes):
    params = {"features": []}
    c = 3
    for spec in block_specs:
        block_type, *cfg = spec
        key, sub = jax.random.split(key)
        if block_type == "conv_bn":
            k, s, f = cfg
            p = {
                "type": "conv_bn", "k": k, "s": s,
                "w": _conv_init(sub, k, c, f),
                "gamma": jnp.ones((f,), jnp.float32),
                "beta": jnp.zeros((f,), jnp.float32),
            }
        elif block_type == "uib":
            start_k, middle_k, s, f, e = cfg
            expand_c = make_divisible(c * e, 8)
            ks = jax.random.split(sub, 4)
            p = {
                "type": "uib",
                "start_k": start_k,
                "middle_k": middle_k,
                "identity": (s == 1 and c == f),
            }
            if start_k:
                p["start_dw"] = {
                    "w": _dw_init(ks[0], start_k, c),
                    "gamma": jnp.ones((c,), jnp.float32),
                    "beta": jnp.zeros((c,), jnp.float32),
                    "s": 1,          # middle_dw_downsample=True (default)
                }
            p["expand_w"] = _conv_init(ks[1], 1, c, expand_c).reshape(c, expand_c)
            p["expand_gamma"] = jnp.ones((expand_c,), jnp.float32)
            p["expand_beta"] = jnp.zeros((expand_c,), jnp.float32)
            if middle_k:
                p["middle_dw"] = {
                    "w": _dw_init(ks[2], middle_k, expand_c),
                    "gamma": jnp.ones((expand_c,), jnp.float32),
                    "beta": jnp.zeros((expand_c,), jnp.float32),
                    "s": s,
                }
            p["proj_w"] = _conv_init(ks[3], 1, expand_c, f).reshape(expand_c, f)
            p["proj_gamma"] = jnp.ones((f,), jnp.float32)
            p["proj_beta"] = jnp.zeros((f,), jnp.float32)
        else:
            raise NotImplementedError(block_type)
        params["features"].append(p)
        c = f

    hidden = 1280  # hardcoded in MobileNetV4.__init__
    key, k1, k2 = jax.random.split(key, 3)
    params["head_conv"] = {
        "w": _conv_init(k1, 1, c, hidden).reshape(c, hidden),
        "gamma": jnp.ones((hidden,), jnp.float32),
        "beta": jnp.zeros((hidden,), jnp.float32),
    }
    params["classifier"] = {
        "w": jax.random.normal(k2, (hidden, num_classes), jnp.float32) * 0.01,
        "b": jnp.zeros((num_classes,), jnp.float32),
    }
    return params


# --------------------------------------------------------------------------- #
# main
# --------------------------------------------------------------------------- #
if __name__ == "__main__":
    # small MobileNetV4-style block spec (block_type, *cfg) as in the PyTorch code
    BLOCK_SPECS = [
        ("conv_bn", 3, 2, 16),        # k=3, s=2, f=16           -> 8x8
        ("uib", 3, 3, 2, 24, 4.0),    # start+middle dw, stride 2 -> 4x4
        ("uib", 0, 3, 1, 24, 2.0),    # no start dw, identity residual
        ("uib", 3, 0, 1, 32, 2.0),    # no middle dw
    ]
    NUM_CLASSES = 10

    key = jax.random.PRNGKey(0)
    key, pkey, xkey = jax.random.split(key, 3)
    params = build_mobilenetv4_params(pkey, BLOCK_SPECS, NUM_CLASSES)

    x = jax.random.normal(xkey, (2, 3, 16, 16), jnp.float32)  # NCHW like PyTorch
    fwd = jax.jit(functools.partial(mobilenetv4_forward, params))
    logits = jax.block_until_ready(fwd(x))
    assert logits.shape == (2, NUM_CLASSES)
    assert bool(jnp.all(jnp.isfinite(logits)))
    # TODO(synk): BatchNorm running-stat updates are a training-time side effect
    # that does not change the forward output; they are intentionally omitted.
    print("KERNEL_OK")
</pallas_src>

<mosaic_0001>
module attributes {stable_mosaic.version = 11 : i64} {
  func.func @kernel(%arg0: i32, %arg1: memref<128x128xbf16, #tpu.memory_space<vmem>>, %arg2: memref<128x128xbf16, #tpu.memory_space<vmem>>, %arg3: memref<1x128xf32, #tpu.memory_space<vmem>>, %arg4: memref<1x128xf32, #tpu.memory_space<vmem>>, %arg5: memref<128x128xbf16, #tpu.memory_space<vmem>>) attributes {dimension_semantics = [#tpu.dimension_semantics<parallel>], iteration_bounds = array<i64: 1>, scalar_prefetch = 0 : i64, scratch_operands = 0 : i64, tpu.core_type = #tpu.core_type<tc>, window_params = [{transform_indices = @transform_0, window_bounds = array<i64: 128, 128>}, {pipeline_mode = #tpu.pipeline_mode<synchronous>, transform_indices = @transform_1, window_bounds = array<i64: 128, 128>}, {pipeline_mode = #tpu.pipeline_mode<synchronous>, transform_indices = @transform_2, window_bounds = array<i64: 1, 128>}, {pipeline_mode = #tpu.pipeline_mode<synchronous>, transform_indices = @transform_3, window_bounds = array<i64: 1, 128>}, {transform_indices = @transform_4, window_bounds = array<i64: 128, 128>}]} {
    %c0 = arith.constant 0 : index
    %c0_0 = arith.constant 0 : index
    %0 = vector.load %arg1[%c0, %c0_0] : memref<128x128xbf16, #tpu.memory_space<vmem>>, vector<128x128xbf16>
    %c0_1 = arith.constant 0 : index
    %c0_2 = arith.constant 0 : index
    %1 = vector.load %arg2[%c0_1, %c0_2] : memref<128x128xbf16, #tpu.memory_space<vmem>>, vector<128x128xbf16>
    %cst = arith.constant dense<0.000000e+00> : vector<128x128xf32>
    %2 = tpu.matmul %0, %1, %cst {dimension_numbers = #tpu.dot_dimension_numbers<[1], [0], [0], [1], [0, 0, 1, 1], [], []>} : vector<128x128xbf16>, vector<128x128xbf16>, vector<128x128xf32> -> vector<128x128xf32>
    %c0_3 = arith.constant 0 : index
    %c0_4 = arith.constant 0 : index
    %3 = vector.load %arg3[%c0_3, %c0_4] : memref<1x128xf32, #tpu.memory_space<vmem>>, vector<1x128xf32>
    %4 = vector.broadcast %3 : vector<1x128xf32> to vector<128x128xf32>
    %5 = arith.mulf %2, %4 : vector<128x128xf32>
    %c0_5 = arith.constant 0 : index
    %c0_6 = arith.constant 0 : index
    %6 = vector.load %arg4[%c0_5, %c0_6] : memref<1x128xf32, #tpu.memory_space<vmem>>, vector<1x128xf32>
    %7 = vector.broadcast %6 : vector<1x128xf32> to vector<128x128xf32>
    %8 = arith.addf %5, %7 : vector<128x128xf32>
    %cst_7 = arith.constant 0.000000e+00 : f32
    %9 = vector.broadcast %cst_7 : f32 to vector<128x128xf32>
    %10 = arith.maximumf %8, %9 : vector<128x128xf32>
    %11 = arith.truncf %10 : vector<128x128xf32> to vector<128x128xbf16>
    %c0_8 = arith.constant 0 : index
    %c0_9 = arith.constant 0 : index
    %12 = vector.load %arg5[%c0_8, %c0_9] : memref<128x128xbf16, #tpu.memory_space<vmem>>, vector<128x128xbf16>
    tpu.vector_store %arg5[%c0_8, %c0_9], %11 {strides = array<i32>} : memref<128x128xbf16, #tpu.memory_space<vmem>>, vector<128x128xbf16>,
    return
  }
  func.func @transform_0(%arg0: i32) -> (i32, i32) {
    %c0_i32 = arith.constant 0 : i32
    %c0_i32_0 = arith.constant 0 : i32
    return %arg0, %c0_i32 : i32, i32
  }
  func.func @transform_1(%arg0: i32) -> (i32, i32) {
    %c0_i32 = arith.constant 0 : i32
    %c0_i32_0 = arith.constant 0 : i32
    %c0_i32_1 = arith.constant 0 : i32
    return %c0_i32, %c0_i32_0 : i32, i32
  }
  func.func @transform_2(%arg0: i32) -> (i32, i32) {
    %c0_i32 = arith.constant 0 : i32
    %c0_i32_0 = arith.constant 0 : i32
    %c0_i32_1 = arith.constant 0 : i32
    return %c0_i32, %c0_i32_0 : i32, i32
  }
  func.func @transform_3(%arg0: i32) -> (i32, i32) {
    %c0_i32 = arith.constant 0 : i32
    %c0_i32_0 = arith.constant 0 : i32
    %c0_i32_1 = arith.constant 0 : i32
    return %c0_i32, %c0_i32_0 : i32, i32
  }
  func.func @transform_4(%arg0: i32) -> (i32, i32) {
    %c0_i32 = arith.constant 0 : i32
    %c0_i32_0 = arith.constant 0 : i32
    return %arg0, %c0_i32 : i32, i32
  }
}

module attributes {stable_mosaic.version = 11 : i64} {
  func.func @_linear_stats_kernel(%arg0: i32, %arg1: memref<128x128xbf16, #tpu.memory_space<vmem>>, %arg2: memref<128x128xbf16, #tpu.memory_space<vmem>>, %arg3: memref<1x128xf32, #tpu.memory_space<vmem>>, %arg4: memref<1x128xf32, #tpu.memory_space<vmem>>) attributes {dimension_semantics = [#tpu.dimension_semantics<arbitrary>], iteration_bounds = array<i64: 1>, scalar_prefetch = 0 : i64, scratch_operands = 0 : i64, tpu.core_type = #tpu.core_type<tc>, window_params = [{transform_indices = @transform_0, window_bounds = array<i64: 128, 128>}, {pipeline_mode = #tpu.pipeline_mode<synchronous>, transform_indices = @transform_1, window_bounds = array<i64: 128, 128>}, {pipeline_mode = #tpu.pipeline_mode<synchronous>, transform_indices = @transform_2, window_bounds = array<i64: 1, 128>}, {pipeline_mode = #tpu.pipeline_mode<synchronous>, transform_indices = @transform_3, window_bounds = array<i64: 1, 128>}]} {
    %c0_i32 = arith.constant 0 : i32
    %0 = arith.cmpi eq, %arg0, %c0_i32 : i32
    %1 = arith.extui %0 : i1 to i32
    %c0_i32_0 = arith.constant 0 : i32
    %2 = arith.cmpi ne, %1, %c0_i32_0 : i32
    scf.if %2 {
      %cst_14 = arith.constant 0.000000e+00 : f32
      %17 = vector.broadcast %cst_14 : f32 to vector<1x128xf32>
      %c0_15 = arith.constant 0 : index
      %c0_16 = arith.constant 0 : index
      %18 = vector.load %arg3[%c0_15, %c0_16] : memref<1x128xf32, #tpu.memory_space<vmem>>, vector<1x128xf32>
      tpu.vector_store %arg3[%c0_15, %c0_16], %17 {strides = array<i32>} : memref<1x128xf32, #tpu.memory_space<vmem>>, vector<1x128xf32>,
      %cst_17 = arith.constant 0.000000e+00 : f32
      %19 = vector.broadcast %cst_17 : f32 to vector<1x128xf32>
      %c0_18 = arith.constant 0 : index
      %c0_19 = arith.constant 0 : index
      %20 = vector.load %arg4[%c0_18, %c0_19] : memref<1x128xf32, #tpu.memory_space<vmem>>, vector<1x128xf32>
      tpu.vector_store %arg4[%c0_18, %c0_19], %19 {strides = array<i32>} : memref<1x128xf32, #tpu.memory_space<vmem>>, vector<1x128xf32>,
    } else {
    }
    %c0 = arith.constant 0 : index
    %c0_1 = arith.constant 0 : index
    %3 = vector.load %arg1[%c0, %c0_1] : memref<128x128xbf16, #tpu.memory_space<vmem>>, vector<128x128xbf16>
    %c0_2 = arith.constant 0 : index
    %c0_3 = arith.constant 0 : index
    %4 = vector.load %arg2[%c0_2, %c0_3] : memref<128x128xbf16, #tpu.memory_space<vmem>>, vector<128x128xbf16>
    %cst = arith.constant dense<0.000000e+00> : vector<128x128xf32>
    %5 = tpu.matmul %3, %4, %cst {dimension_numbers = #tpu.dot_dimension_numbers<[1], [0], [0], [1], [0, 0, 1, 1], [], []>} : vector<128x128xbf16>, vector<128x128xbf16>, vector<128x128xf32> -> vector<128x128xf32>
    %c0_4 = arith.constant 0 : index
    %c0_5 = arith.constant 0 : index
    %6 = vector.load %arg3[%c0_4, %c0_5] : memref<1x128xf32, #tpu.memory_space<vmem>>, vector<1x128xf32>
    %cst_6 = arith.constant dense<0.000000e+00> : vector<128xf32>
    %7 = vector.multi_reduction <add>, %5, %cst_6 [0] : vector<128x128xf32> to vector<128xf32>
    %8 = vector.shape_cast %7 : vector<128xf32> to vector<1x128xf32>
    %9 = arith.addf %6, %8 : vector<1x128xf32>
    %c0_7 = arith.constant 0 : index
    %c0_8 = arith.constant 0 : index
    %10 = vector.load %arg3[%c0_7, %c0_8] : memref<1x128xf32, #tpu.memory_space<vmem>>, vector<1x128xf32>
    tpu.vector_store %arg3[%c0_7, %c0_8], %9 {strides = array<i32>} : memref<1x128xf32, #tpu.memory_space<vmem>>, vector<1x128xf32>,
    %c0_9 = arith.constant 0 : index
    %c0_10 = arith.constant 0 : index
    %11 = vector.load %arg4[%c0_9, %c0_10] : memref<1x128xf32, #tpu.memory_space<vmem>>, vector<1x128xf32>
    %12 = arith.mulf %5, %5 : vector<128x128xf32>
    %cst_11 = arith.constant dense<0.000000e+00> : vector<128xf32>
    %13 = vector.multi_reduction <add>, %12, %cst_11 [0] : vector<128x128xf32> to vector<128xf32>
    %14 = vector.shape_cast %13 : vector<128xf32> to vector<1x128xf32>
    %15 = arith.addf %11, %14 : vector<1x128xf32>
    %c0_12 = arith.constant 0 : index
    %c0_13 = arith.constant 0 : index
    %16 = vector.load %arg4[%c0_12, %c0_13] : memref<1x128xf32, #tpu.memory_space<vmem>>, vector<1x128xf32>
    tpu.vector_store %arg4[%c0_12, %c0_13], %15 {strides = array<i32>} : memref<1x128xf32, #tpu.memory_space<vmem>>, vector<1x128xf32>,
    return
  }
  func.func @transform_0(%arg0: i32) -> (i32, i32) {
    %c0_i32 = arith.constant 0 : i32
    %c0_i32_0 = arith.constant 0 : i32
    return %arg0, %c0_i32 : i32, i32
  }
  func.func @transform_1(%arg0: i32) -> (i32, i32) {
    %c0_i32 = arith.constant 0 : i32
    %c0_i32_0 = arith.constant 0 : i32
    %c0_i32_1 = arith.constant 0 : i32
    return %c0_i32, %c0_i32_0 : i32, i32
  }
  func.func @transform_2(%arg0: i32) -> (i32, i32) {
    %c0_i32 = arith.constant 0 : i32
    %c0_i32_0 = arith.constant 0 : i32
    %c0_i32_1 = arith.constant 0 : i32
    return %c0_i32, %c0_i32_0 : i32, i32
  }
  func.func @transform_3(%arg0: i32) -> (i32, i32) {
    %c0_i32 = arith.constant 0 : i32
    %c0_i32_0 = arith.constant 0 : i32
    %c0_i32_1 = arith.constant 0 : i32
    return %c0_i32, %c0_i32_0 : i32, i32
  }
}

module attributes {stable_mosaic.version = 11 : i64} {
  func.func @kernel(%arg0: i32, %arg1: memref<2x10x10x128xbf16, #tpu.memory_space<vmem>>, %arg2: memref<9x128xbf16, #tpu.memory_space<vmem>>, %arg3: memref<1x128xf32, #tpu.memory_space<vmem>>, %arg4: memref<1x128xf32, #tpu.memory_space<vmem>>, %arg5: memref<2x8x8x128xbf16, #tpu.memory_space<vmem>>) attributes {dimension_semantics = [#tpu.dimension_semantics<parallel>], iteration_bounds = array<i64: 1>, scalar_prefetch = 0 : i64, scratch_operands = 0 : i64, tpu.core_type = #tpu.core_type<tc>, window_params = [{transform_indices = @transform_0, window_bounds = array<i64: 2, 10, 10, 128>}, {transform_indices = @transform_1, window_bounds = array<i64: 9, 128>}, {transform_indices = @transform_2, window_bounds = array<i64: 1, 128>}, {transform_indices = @transform_3, window_bounds = array<i64: 1, 128>}, {transform_indices = @transform_4, window_bounds = array<i64: 2, 8, 8, 128>}]} {
    %cst = arith.constant 0.000000e+00 : f32
    %0 = vector.broadcast %cst : f32 to vector<2x8x8x128xf32>
    %c0 = arith.constant 0 : index
    %c0_0 = arith.constant 0 : index
    %c0_1 = arith.constant 0 : index
    %c0_2 = arith.constant 0 : index
    %1 = vector.load %arg1[%c0, %c0_0, %c0_1, %c0_2] : memref<2x10x10x128xbf16, #tpu.memory_space<vmem>>, vector<2x8x8x128xbf16>
    %2 = arith.extf %1 : vector<2x8x8x128xbf16> to vector<2x8x8x128xf32>
    %c0_3 = arith.constant 0 : index
    %c0_4 = arith.constant 0 : index
    %3 = vector.load %arg2[%c0_3, %c0_4] : memref<9x128xbf16, #tpu.memory_space<vmem>>, vector<1x128xbf16>
    %4 = arith.extf %3 : vector<1x128xbf16> to vector<1x128xf32>
    %5 = vector.shape_cast %4 : vector<1x128xf32> to vector<1x1x1x128xf32>
    %6 = vector.broadcast %5 : vector<1x1x1x128xf32> to vector<2x8x8x128xf32>
    %7 = arith.mulf %2, %6 : vector<2x8x8x128xf32>
    %8 = arith.addf %0, %7 : vector<2x8x8x128xf32>
    %c0_5 = arith.constant 0 : index
    %c0_6 = arith.constant 0 : index
    %c1 = arith.constant 1 : index
    %c0_7 = arith.constant 0 : index
    %9 = vector.load %arg1[%c0_5, %c0_6, %c1, %c0_7] : memref<2x10x10x128xbf16, #tpu.memory_space<vmem>>, vector<2x8x8x128xbf16>
    %10 = arith.extf %9 : vector<2x8x8x128xbf16> to vector<2x8x8x128xf32>
    %c1_8 = arith.constant 1 : index
    %c0_9 = arith.constant 0 : index
    %11 = vector.load %arg2[%c1_8, %c0_9] : memref<9x128xbf16, #tpu.memory_space<vmem>>, vector<1x128xbf16>
    %12 = arith.extf %11 : vector<1x128xbf16> to vector<1x128xf32>
    %13 = vector.shape_cast %12 : vector<1x128xf32> to vector<1x1x1x128xf32>
    %14 = vector.broadcast %13 : vector<1x1x1x128xf32> to vector<2x8x8x128xf32>
    %15 = arith.mulf %10, %14 : vector<2x8x8x128xf32>
    %16 = arith.addf %8, %15 : vector<2x8x8x128xf32>
    %c0_10 = arith.constant 0 : index
    %c0_11 = arith.constant 0 : index
    %c2 = arith.constant 2 : index
    %c0_12 = arith.constant 0 : index
    %17 = vector.load %arg1[%c0_10, %c0_11, %c2, %c0_12] : memref<2x10x10x128xbf16, #tpu.memory_space<vmem>>, vector<2x8x8x128xbf16>
    %18 = arith.extf %17 : vector<2x8x8x128xbf16> to vector<2x8x8x128xf32>
    %c2_13 = arith.constant 2 : index
    %c0_14 = arith.constant 0 : index
    %19 = vector.load %arg2[%c2_13, %c0_14] : memref<9x128xbf16, #tpu.memory_space<vmem>>, vector<1x128xbf16>
    %20 = arith.extf %19 : vector<1x128xbf16> to vector<1x128xf32>
    %21 = vector.shape_cast %20 : vector<1x128xf32> to vector<1x1x1x128xf32>
    %22 = vector.broadcast %21 : vector<1x1x1x128xf32> to vector<2x8x8x128xf32>
    %23 = arith.mulf %18, %22 : vector<2x8x8x128xf32>
    %24 = arith.addf %16, %23 : vector<2x8x8x128xf32>
    %c0_15 = arith.constant 0 : index
    %c1_16 = arith.constant 1 : index
    %c0_17 = arith.constant 0 : index
    %c0_18 = arith.constant 0 : index
    %25 = vector.load %arg1[%c0_15, %c1_16, %c0_17, %c0_18] : memref<2x10x10x128xbf16, #tpu.memory_space<vmem>>, vector<2x8x8x128xbf16>
    %26 = arith.extf %25 : vector<2x8x8x128xbf16> to vector<2x8x8x128xf32>
    %c3 = arith.constant 3 : index
    %c0_19 = arith.constant 0 : index
    %27 = vector.load %arg2[%c3, %c0_19] : memref<9x128xbf16, #tpu.memory_space<vmem>>, vector<1x128xbf16>
    %28 = arith.extf %27 : vector<1x128xbf16> to vector<1x128xf32>
    %29 = vector.shape_cast %28 : vector<1x128xf32> to vector<1x1x1x128xf32>
    %30 = vector.broadcast %29 : vector<1x1x1x128xf32> to vector<2x8x8x128xf32>
    %31 = arith.mulf %26, %30 : vector<2x8x8x128xf32>
    %32 = arith.addf %24, %31 : vector<2x8x8x128xf32>
    %c0_20 = arith.constant 0 : index
    %c1_21 = arith.constant 1 : index
    %c1_22 = arith.constant 1 : index
    %c0_23 = arith.constant 0 : index
    %33 = vector.load %arg1[%c0_20, %c1_21, %c1_22, %c0_23] : memref<2x10x10x128xbf16, #tpu.memory_space<vmem>>, vector<2x8x8x128xbf16>
    %34 = arith.extf %33 : vector<2x8x8x128xbf16> to vector<2x8x8x128xf32>
    %c4 = arith.constant 4 : index
    %c0_24 = arith.constant 0 : index
    %35 = vector.load %arg2[%c4, %c0_24] : memref<9x128xbf16, #tpu.memory_space<vmem>>, vector<1x128xbf16>
    %36 = arith.extf %35 : vector<1x128xbf16> to vector<1x128xf32>
    %37 = vector.shape_cast %36 : vector<1x128xf32> to vector<1x1x1x128xf32>
    %38 = vector.broadcast %37 : vector<1x1x1x128xf32> to vector<2x8x8x128xf32>
    %39 = arith.mulf %34, %38 : vector<2x8x8x128xf32>
    %40 = arith.addf %32, %39 : vector<2x8x8x128xf32>
    %c0_25 = arith.constant 0 : index
    %c1_26 = arith.constant 1 : index
    %c2_27 = arith.constant 2 : index
    %c0_28 = arith.constant 0 : index
    %41 = vector.load %arg1[%c0_25, %c1_26, %c2_27, %c0_28] : memref<2x10x10x128xbf16, #tpu.memory_space<vmem>>, vector<2x8x8x128xbf16>
    %42 = arith.extf %41 : vector<2x8x8x128xbf16> to vector<2x8x8x128xf32>
    %c5 = arith.constant 5 : index
    %c0_29 = arith.constant 0 : index
    %43 = vector.load %arg2[%c5, %c0_29] : memref<9x128xbf16, #tpu.memory_space<vmem>>, vector<1x128xbf16>
    %44 = arith.extf %43 : vector<1x128xbf16> to vector<1x128xf32>
    %45 = vector.shape_cast %44 : vector<1x128xf32> to vector<1x1x1x128xf32>
    %46 = vector.broadcast %45 : vector<1x1x1x128xf32> to vector<2x8x8x128xf32>
    %47 = arith.mulf %42, %46 : vector<2x8x8x128xf32>
    %48 = arith.addf %40, %47 : vector<2x8x8x128xf32>
    %c0_30 = arith.constant 0 : index
    %c2_31 = arith.constant 2 : index
    %c0_32 = arith.constant 0 : index
    %c0_33 = arith.constant 0 : index
    %49 = vector.load %arg1[%c0_30, %c2_31, %c0_32, %c0_33] : memref<2x10x10x128xbf16, #tpu.memory_space<vmem>>, vector<2x8x8x128xbf16>
    %50 = arith.extf %49 : vector<2x8x8x128xbf16> to vector<2x8x8x128xf32>
    %c6 = arith.constant 6 : index
    %c0_34 = arith.constant 0 : index
    %51 = vector.load %arg2[%c6, %c0_34] : memref<9x128xbf16, #tpu.memory_space<vmem>>, vector<1x128xbf16>
    %52 = arith.extf %51 : vector<1x128xbf16> to vector<1x128xf32>
    %53 = vector.shape_cast %52 : vector<1x128xf32> to vector<1x1x1x128xf32>
    %54 = vector.broadcast %53 : vector<1x1x1x128xf32> to vector<2x8x8x128xf32>
    %55 = arith.mulf %50, %54 : vector<2x8x8x128xf32>
    %56 = arith.addf %48, %55 : vector<2x8x8x128xf32>
    %c0_35 = arith.constant 0 : index
    %c2_36 = arith.constant 2 : index
    %c1_37 = arith.constant 1 : index
    %c0_38 = arith.constant 0 : index
    %57 = vector.load %arg1[%c0_35, %c2_36, %c1_37, %c0_38] : memref<2x10x10x128xbf16, #tpu.memory_space<vmem>>, vector<2x8x8x128xbf16>
    %58 = arith.extf %57 : vector<2x8x8x128xbf16> to vector<2x8x8x128xf32>
    %c7 = arith.constant 7 : index
    %c0_39 = arith.constant 0 : index
    %59 = vector.load %arg2[%c7, %c0_39] : memref<9x128xbf16, #tpu.memory_space<vmem>>, vector<1x128xbf16>
    %60 = arith.extf %59 : vector<1x128xbf16> to vector<1x128xf32>
    %61 = vector.shape_cast %60 : vector<1x128xf32> to vector<1x1x1x128xf32>
    %62 = vector.broadcast %61 : vector<1x1x1x128xf32> to vector<2x8x8x128xf32>
    %63 = arith.mulf %58, %62 : vector<2x8x8x128xf32>
    %64 = arith.addf %56, %63 : vector<2x8x8x128xf32>
    %c0_40 = arith.constant 0 : index
    %c2_41 = arith.constant 2 : index
    %c2_42 = arith.constant 2 : index
    %c0_43 = arith.constant 0 : index
    %65 = vector.load %arg1[%c0_40, %c2_41, %c2_42, %c0_43] : memref<2x10x10x128xbf16, #tpu.memory_space<vmem>>, vector<2x8x8x128xbf16>
    %66 = arith.extf %65 : vector<2x8x8x128xbf16> to vector<2x8x8x128xf32>
    %c8 = arith.constant 8 : index
    %c0_44 = arith.constant 0 : index
    %67 = vector.load %arg2[%c8, %c0_44] : memref<9x128xbf16, #tpu.memory_space<vmem>>, vector<1x128xbf16>
    %68 = arith.extf %67 : vector<1x128xbf16> to vector<1x128xf32>
    %69 = vector.shape_cast %68 : vector<1x128xf32> to vector<1x1x1x128xf32>
    %70 = vector.broadcast %69 : vector<1x1x1x128xf32> to vector<2x8x8x128xf32>
    %71 = arith.mulf %66, %70 : vector<2x8x8x128xf32>
    %72 = arith.addf %64, %71 : vector<2x8x8x128xf32>
    %cst_45 = arith.constant dense<0.000000e+00> : vector<8x8x128xf32>
    %73 = vector.multi_reduction <add>, %72, %cst_45 [0] : vector<2x8x8x128xf32> to vector<8x8x128xf32>
    %cst_46 = arith.constant dense<0.000000e+00> : vector<8x128xf32>
    %74 = vector.multi_reduction <add>, %73, %cst_46 [0] : vector<8x8x128xf32> to vector<8x128xf32>
    %cst_47 = arith.constant dense<0.000000e+00> : vector<128xf32>
    %75 = vector.multi_reduction <add>, %74, %cst_47 [0] : vector<8x128xf32> to vector<128xf32>
    %76 = vector.shape_cast %75 : vector<128xf32> to vector<1x128xf32>
    %cst_48 = arith.constant 1.280000e+02 : f32
    %77 = vector.broadcast %cst_48 : f32 to vector<1x128xf32>
    %78 = arith.divf %76, %77 : vector<1x128xf32>
    %79 = arith.mulf %72, %72 : vector<2x8x8x128xf32>
    %cst_49 = arith.constant dense<0.000000e+00> : vector<8x8x128xf32>
    %80 = vector.multi_reduction <add>, %79, %cst_49 [0] : vector<2x8x8x128xf32> to vector<8x8x128xf32>
    %cst_50 = arith.constant dense<0.000000e+00> : vector<8x128xf32>
    %81 = vector.multi_reduction <add>, %80, %cst_50 [0] : vector<8x8x128xf32> to vector<8x128xf32>
    %cst_51 = arith.constant dense<0.000000e+00> : vector<128xf32>
    %82 = vector.multi_reduction <add>, %81, %cst_51 [0] : vector<8x128xf32> to vector<128xf32>
    %83 = vector.shape_cast %82 : vector<128xf32> to vector<1x128xf32>
    %cst_52 = arith.constant 1.280000e+02 : f32
    %84 = vector.broadcast %cst_52 : f32 to vector<1x128xf32>
    %85 = arith.divf %83, %84 : vector<1x128xf32>
    %86 = arith.mulf %78, %78 : vector<1x128xf32>
    %87 = arith.subf %85, %86 : vector<1x128xf32>
    %cst_53 = arith.constant 0.000000e+00 : f32
    %88 = vector.broadcast %cst_53 : f32 to vector<1x128xf32>
    %89 = arith.maximumf %87, %88 : vector<1x128xf32>
    %c0_54 = arith.constant 0 : index
    %c0_55 = arith.constant 0 : index
    %90 = vector.load %arg3[%c0_54, %c0_55] : memref<1x128xf32, #tpu.memory_space<vmem>>, vector<1x128xf32>
    %cst_56 = arith.constant 9.99999974E-6 : f32
    %91 = vector.broadcast %cst_56 : f32 to vector<1x128xf32>
    %92 = arith.addf %89, %91 : vector<1x128xf32>
    %93 = math.rsqrt %92 : vector<1x128xf32>
    %94 = arith.mulf %90, %93 : vector<1x128xf32>
    %c0_57 = arith.constant 0 : index
    %c0_58 = arith.constant 0 : index
    %95 = vector.load %arg4[%c0_57, %c0_58] : memref<1x128xf32, #tpu.memory_space<vmem>>, vector<1x128xf32>
    %96 = arith.mulf %78, %94 : vector<1x128xf32>
    %97 = arith.subf %95, %96 : vector<1x128xf32>
    %98 = vector.shape_cast %94 : vector<1x128xf32> to vector<1x1x1x128xf32>
    %99 = vector.broadcast %98 : vector<1x1x1x128xf32> to vector<2x8x8x128xf32>
    %100 = arith.mulf %72, %99 : vector<2x8x8x128xf32>
    %101 = vector.shape_cast %97 : vector<1x128xf32> to vector<1x1x1x128xf32>
    %102 = vector.broadcast %101 : vector<1x1x1x128xf32> to vector<2x8x8x128xf32>
    %103 = arith.addf %100, %102 : vector<2x8x8x128xf32>
    %104 = arith.truncf %103 : vector<2x8x8x128xf32> to vector<2x8x8x128xbf16>
    %c0_59 = arith.constant 0 : index
    %c0_60 = arith.constant 0 : index
    %c0_61 = arith.constant 0 : index
    %c0_62 = arith.constant 0 : index
    %105 = vector.load %arg5[%c0_59, %c0_60, %c0_61, %c0_62] : memref<2x8x8x128xbf16, #tpu.memory_space<vmem>>, vector<2x8x8x128xbf16>
    tpu.vector_store %arg5[%c0_59, %c0_60, %c0_61, %c0_62], %104 {strides = array<i32>} : memref<2x8x8x128xbf16, #tpu.memory_space<vmem>>, vector<2x8x8x128xbf16>,
    return
  }
  func.func @transform_0(%arg0: i32) -> (i32, i32, i32, i32) {
    %c0_i32 = arith.constant 0 : i32
    %c0_i32_0 = arith.constant 0 : i32
    %c0_i32_1 = arith.constant 0 : i32
    %c0_i32_2 = arith.constant 0 : i32
    return %c0_i32, %c0_i32_0, %c0_i32_1, %arg0 : i32, i32, i32, i32
  }
  func.func @transform_1(%arg0: i32) -> (i32, i32) {
    %c0_i32 = arith.constant 0 : i32
    %c0_i32_0 = arith.constant 0 : i32
    return %c0_i32, %arg0 : i32, i32
  }
  func.func @transform_2(%arg0: i32) -> (i32, i32) {
    %c0_i32 = arith.constant 0 : i32
    %c0_i32_0 = arith.constant 0 : i32
    return %c0_i32, %arg0 : i32, i32
  }
  func.func @transform_3(%arg0: i32) -> (i32, i32) {
    %c0_i32 = arith.constant 0 : i32
    %c0_i32_0 = arith.constant 0 : i32
    return %c0_i32, %arg0 : i32, i32
  }
  func.func @transform_4(%arg0: i32) -> (i32, i32, i32, i32) {
    %c0_i32 = arith.constant 0 : i32
    %c0_i32_0 = arith.constant 0 : i32
    %c0_i32_1 = arith.constant 0 : i32
    %c0_i32_2 = arith.constant 0 : i32
    return %c0_i32, %c0_i32_0, %c0_i32_1, %arg0 : i32, i32, i32, i32
  }
}

module attributes {stable_mosaic.version = 11 : i64} {
  func.func @_linear_stats_kernel(%arg0: i32, %arg1: memref<32x128xbf16, #tpu.memory_space<vmem>>, %arg2: memref<128x128xbf16, #tpu.memory_space<vmem>>, %arg3: memref<1x128xf32, #tpu.memory_space<vmem>>, %arg4: memref<1x128xf32, #tpu.memory_space<vmem>>) attributes {dimension_semantics = [#tpu.dimension_semantics<arbitrary>], iteration_bounds = array<i64: 1>, scalar_prefetch = 0 : i64, scratch_operands = 0 : i64, tpu.core_type = #tpu.core_type<tc>, window_params = [{transform_indices = @transform_0, window_bounds = array<i64: 32, 128>}, {pipeline_mode = #tpu.pipeline_mode<synchronous>, transform_indices = @transform_1, window_bounds = array<i64: 128, 128>}, {pipeline_mode = #tpu.pipeline_mode<synchronous>, transform_indices = @transform_2, window_bounds = array<i64: 1, 128>}, {pipeline_mode = #tpu.pipeline_mode<synchronous>, transform_indices = @transform_3, window_bounds = array<i64: 1, 128>}]} {
    %c0_i32 = arith.constant 0 : i32
    %0 = arith.cmpi eq, %arg0, %c0_i32 : i32
    %1 = arith.extui %0 : i1 to i32
    %c0_i32_0 = arith.constant 0 : i32
    %2 = arith.cmpi ne, %1, %c0_i32_0 : i32
    scf.if %2 {
      %cst_14 = arith.constant 0.000000e+00 : f32
      %17 = vector.broadcast %cst_14 : f32 to vector<1x128xf32>
      %c0_15 = arith.constant 0 : index
      %c0_16 = arith.constant 0 : index
      %18 = vector.load %arg3[%c0_15, %c0_16] : memref<1x128xf32, #tpu.memory_space<vmem>>, vector<1x128xf32>
      tpu.vector_store %arg3[%c0_15, %c0_16], %17 {strides = array<i32>} : memref<1x128xf32, #tpu.memory_space<vmem>>, vector<1x128xf32>,
      %cst_17 = arith.constant 0.000000e+00 : f32
      %19 = vector.broadcast %cst_17 : f32 to vector<1x128xf32>
      %c0_18 = arith.constant 0 : index
      %c0_19 = arith.constant 0 : index
      %20 = vector.load %arg4[%c0_18, %c0_19] : memref<1x128xf32, #tpu.memory_space<vmem>>, vector<1x128xf32>
      tpu.vector_store %arg4[%c0_18, %c0_19], %19 {strides = array<i32>} : memref<1x128xf32, #tpu.memory_space<vmem>>, vector<1x128xf32>,
    } else {
    }
    %c0 = arith.constant 0 : index
    %c0_1 = arith.constant 0 : index
    %3 = vector.load %arg1[%c0, %c0_1] : memref<32x128xbf16, #tpu.memory_space<vmem>>, vector<32x128xbf16>
    %c0_2 = arith.constant 0 : index
    %c0_3 = arith.constant 0 : index
    %4 = vector.load %arg2[%c0_2, %c0_3] : memref<128x128xbf16, #tpu.memory_space<vmem>>, vector<128x128xbf16>
    %cst = arith.constant dense<0.000000e+00> : vector<32x128xf32>
    %5 = tpu.matmul %3, %4, %cst {dimension_numbers = #tpu.dot_dimension_numbers<[1], [0], [0], [1], [0, 0, 1, 1], [], []>} : vector<32x128xbf16>, vector<128x128xbf16>, vector<32x128xf32> -> vector<32x128xf32>
    %c0_4 = arith.constant 0 : index
    %c0_5 = arith.constant 0 : index
    %6 = vector.load %arg3[%c0_4, %c0_5] : memref<1x128xf32, #tpu.memory_space<vmem>>, vector<1x128xf32>
    %cst_6 = arith.constant dense<0.000000e+00> : vector<128xf32>
    %7 = vector.multi_reduction <add>, %5, %cst_6 [0] : vector<32x128xf32> to vector<128xf32>
    %8 = vector.shape_cast %7 : vector<128xf32> to vector<1x128xf32>
    %9 = arith.addf %6, %8 : vector<1x128xf32>
    %c0_7 = arith.constant 0 : index
    %c0_8 = arith.constant 0 : index
    %10 = vector.load %arg3[%c0_7, %c0_8] : memref<1x128xf32, #tpu.memory_space<vmem>>, vector<1x128xf32>
    tpu.vector_store %arg3[%c0_7, %c0_8], %9 {strides = array<i32>} : memref<1x128xf32, #tpu.memory_space<vmem>>, vector<1x128xf32>,
    %c0_9 = arith.constant 0 : index
    %c0_10 = arith.constant 0 : index
    %11 = vector.load %arg4[%c0_9, %c0_10] : memref<1x128xf32, #tpu.memory_space<vmem>>, vector<1x128xf32>
    %12 = arith.mulf %5, %5 : vector<32x128xf32>
    %cst_11 = arith.constant dense<0.000000e+00> : vector<128xf32>
    %13 = vector.multi_reduction <add>, %12, %cst_11 [0] : vector<32x128xf32> to vector<128xf32>
    %14 = vector.shape_cast %13 : vector<128xf32> to vector<1x128xf32>
    %15 = arith.addf %11, %14 : vector<1x128xf32>
    %c0_12 = arith.constant 0 : index
    %c0_13 = arith.constant 0 : index
    %16 = vector.load %arg4[%c0_12, %c0_13] : memref<1x128xf32, #tpu.memory_space<vmem>>, vector<1x128xf32>
    tpu.vector_store %arg4[%c0_12, %c0_13], %15 {strides = array<i32>} : memref<1x128xf32, #tpu.memory_space<vmem>>, vector<1x128xf32>,
    return
  }
  func.func @transform_0(%arg0: i32) -> (i32, i32) {
    %c0_i32 = arith.constant 0 : i32
    %c0_i32_0 = arith.constant 0 : i32
    return %arg0, %c0_i32 : i32, i32
  }
  func.func @transform_1(%arg0: i32) -> (i32, i32) {
    %c0_i32 = arith.constant 0 : i32
    %c0_i32_0 = arith.constant 0 : i32
    %c0_i32_1 = arith.constant 0 : i32
    return %c0_i32, %c0_i32_0 : i32, i32
  }
  func.func @transform_2(%arg0: i32) -> (i32, i32) {
    %c0_i32 = arith.constant 0 : i32
    %c0_i32_0 = arith.constant 0 : i32
    %c0_i32_1 = arith.constant 0 : i32
    return %c0_i32, %c0_i32_0 : i32, i32
  }
  func.func @transform_3(%arg0: i32) -> (i32, i32) {
    %c0_i32 = arith.constant 0 : i32
    %c0_i32_0 = arith.constant 0 : i32
    %c0_i32_1 = arith.constant 0 : i32
    return %c0_i32, %c0_i32_0 : i32, i32
  }
}

module attributes {stable_mosaic.version = 11 : i64} {
  func.func @kernel(%arg0: i32, %arg1: memref<8x5x5x128xbf16, #tpu.memory_space<vmem>>, %arg2: memref<9x128xbf16, #tpu.memory_space<vmem>>, %arg3: memref<1x128xf32, #tpu.memory_space<vmem>>, %arg4: memref<1x128xf32, #tpu.memory_space<vmem>>, %arg5: memref<2x4x4x128xbf16, #tpu.memory_space<vmem>>) attributes {dimension_semantics = [#tpu.dimension_semantics<parallel>], iteration_bounds = array<i64: 1>, scalar_prefetch = 0 : i64, scratch_operands = 0 : i64, tpu.core_type = #tpu.core_type<tc>, window_params = [{transform_indices = @transform_0, window_bounds = array<i64: 8, 5, 5, 128>}, {transform_indices = @transform_1, window_bounds = array<i64: 9, 128>}, {transform_indices = @transform_2, window_bounds = array<i64: 1, 128>}, {transform_indices = @transform_3, window_bounds = array<i64: 1, 128>}, {transform_indices = @transform_4, window_bounds = array<i64: 2, 4, 4, 128>}]} {
    %cst = arith.constant 0.000000e+00 : f32
    %0 = vector.broadcast %cst : f32 to vector<2x4x4x128xf32>
    %c0 = arith.constant 0 : index
    %c0_0 = arith.constant 0 : index
    %c0_1 = arith.constant 0 : index
    %c0_2 = arith.constant 0 : index
    %1 = vector.load %arg1[%c0, %c0_0, %c0_1, %c0_2] : memref<8x5x5x128xbf16, #tpu.memory_space<vmem>>, vector<2x4x4x128xbf16>
    %2 = arith.extf %1 : vector<2x4x4x128xbf16> to vector<2x4x4x128xf32>
    %c0_3 = arith.constant 0 : index
    %c0_4 = arith.constant 0 : index
    %3 = vector.load %arg2[%c0_3, %c0_4] : memref<9x128xbf16, #tpu.memory_space<vmem>>, vector<1x128xbf16>
    %4 = arith.extf %3 : vector<1x128xbf16> to vector<1x128xf32>
    %5 = vector.shape_cast %4 : vector<1x128xf32> to vector<1x1x1x128xf32>
    %6 = vector.broadcast %5 : vector<1x1x1x128xf32> to vector<2x4x4x128xf32>
    %7 = arith.mulf %2, %6 : vector<2x4x4x128xf32>
    %8 = arith.addf %0, %7 : vector<2x4x4x128xf32>
    %c2 = arith.constant 2 : index
    %c0_5 = arith.constant 0 : index
    %c0_6 = arith.constant 0 : index
    %c0_7 = arith.constant 0 : index
    %9 = vector.load %arg1[%c2, %c0_5, %c0_6, %c0_7] : memref<8x5x5x128xbf16, #tpu.memory_space<vmem>>, vector<2x4x4x128xbf16>
    %10 = arith.extf %9 : vector<2x4x4x128xbf16> to vector<2x4x4x128xf32>
    %c1 = arith.constant 1 : index
    %c0_8 = arith.constant 0 : index
    %11 = vector.load %arg2[%c1, %c0_8] : memref<9x128xbf16, #tpu.memory_space<vmem>>, vector<1x128xbf16>
    %12 = arith.extf %11 : vector<1x128xbf16> to vector<1x128xf32>
    %13 = vector.shape_cast %12 : vector<1x128xf32> to vector<1x1x1x128xf32>
    %14 = vector.broadcast %13 : vector<1x1x1x128xf32> to vector<2x4x4x128xf32>
    %15 = arith.mulf %10, %14 : vector<2x4x4x128xf32>
    %16 = arith.addf %8, %15 : vector<2x4x4x128xf32>
    %c0_9 = arith.constant 0 : index
    %c0_10 = arith.constant 0 : index
    %c1_11 = arith.constant 1 : index
    %c0_12 = arith.constant 0 : index
    %17 = vector.load %arg1[%c0_9, %c0_10, %c1_11, %c0_12] : memref<8x5x5x128xbf16, #tpu.memory_space<vmem>>, vector<2x4x4x128xbf16>
    %18 = arith.extf %17 : vector<2x4x4x128xbf16> to vector<2x4x4x128xf32>
    %c2_13 = arith.constant 2 : index
    %c0_14 = arith.constant 0 : index
    %19 = vector.load %arg2[%c2_13, %c0_14] : memref<9x128xbf16, #tpu.memory_space<vmem>>, vector<1x128xbf16>
    %20 = arith.extf %19 : vector<1x128xbf16> to vector<1x128xf32>
    %21 = vector.shape_cast %20 : vector<1x128xf32> to vector<1x1x1x128xf32>
    %22 = vector.broadcast %21 : vector<1x1x1x128xf32> to vector<2x4x4x128xf32>
    %23 = arith.mulf %18, %22 : vector<2x4x4x128xf32>
    %24 = arith.addf %16, %23 : vector<2x4x4x128xf32>
    %c4 = arith.constant 4 : index
    %c0_15 = arith.constant 0 : index
    %c0_16 = arith.constant 0 : index
    %c0_17 = arith.constant 0 : index
    %25 = vector.load %arg1[%c4, %c0_15, %c0_16, %c0_17] : memref<8x5x5x128xbf16, #tpu.memory_space<vmem>>, vector<2x4x4x128xbf16>
    %26 = arith.extf %25 : vector<2x4x4x128xbf16> to vector<2x4x4x128xf32>
    %c3 = arith.constant 3 : index
    %c0_18 = arith.constant 0 : index
    %27 = vector.load %arg2[%c3, %c0_18] : memref<9x128xbf16, #tpu.memory_space<vmem>>, vector<1x128xbf16>
    %28 = arith.extf %27 : vector<1x128xbf16> to vector<1x128xf32>
    %29 = vector.shape_cast %28 : vector<1x128xf32> to vector<1x1x1x128xf32>
    %30 = vector.broadcast %29 : vector<1x1x1x128xf32> to vector<2x4x4x128xf32>
    %31 = arith.mulf %26, %30 : vector<2x4x4x128xf32>
    %32 = arith.addf %24, %31 : vector<2x4x4x128xf32>
    %c6 = arith.constant 6 : index
    %c0_19 = arith.constant 0 : index
    %c0_20 = arith.constant 0 : index
    %c0_21 = arith.constant 0 : index
    %33 = vector.load %arg1[%c6, %c0_19, %c0_20, %c0_21] : memref<8x5x5x128xbf16, #tpu.memory_space<vmem>>, vector<2x4x4x128xbf16>
    %34 = arith.extf %33 : vector<2x4x4x128xbf16> to vector<2x4x4x128xf32>
    %c4_22 = arith.constant 4 : index
    %c0_23 = arith.constant 0 : index
    %35 = vector.load %arg2[%c4_22, %c0_23] : memref<9x128xbf16, #tpu.memory_space<vmem>>, vector<1x128xbf16>
    %36 = arith.extf %35 : vector<1x128xbf16> to vector<1x128xf32>
    %37 = vector.shape_cast %36 : vector<1x128xf32> to vector<1x1x1x128xf32>
    %38 = vector.broadcast %37 : vector<1x1x1x128xf32> to vector<2x4x4x128xf32>
    %39 = arith.mulf %34, %38 : vector<2x4x4x128xf32>
    %40 = arith.addf %32, %39 : vector<2x4x4x128xf32>
    %c4_24 = arith.constant 4 : index
    %c0_25 = arith.constant 0 : index
    %c1_26 = arith.constant 1 : index
    %c0_27 = arith.constant 0 : index
    %41 = vector.load %arg1[%c4_24, %c0_25, %c1_26, %c0_27] : memref<8x5x5x128xbf16, #tpu.memory_space<vmem>>, vector<2x4x4x128xbf16>
    %42 = arith.extf %41 : vector<2x4x4x128xbf16> to vector<2x4x4x128xf32>
    %c5 = arith.constant 5 : index
    %c0_28 = arith.constant 0 : index
    %43 = vector.load %arg2[%c5, %c0_28] : memref<9x128xbf16, #tpu.memory_space<vmem>>, vector<1x128xbf16>
    %44 = arith.extf %43 : vector<1x128xbf16> to vector<1x128xf32>
    %45 = vector.shape_cast %44 : vector<1x128xf32> to vector<1x1x1x128xf32>
    %46 = vector.broadcast %45 : vector<1x1x1x128xf32> to vector<2x4x4x128xf32>
    %47 = arith.mulf %42, %46 : vector<2x4x4x128xf32>
    %48 = arith.addf %40, %47 : vector<2x4x4x128xf32>
    %c0_29 = arith.constant 0 : index
    %c1_30 = arith.constant 1 : index
    %c0_31 = arith.constant 0 : index
    %c0_32 = arith.constant 0 : index
    %49 = vector.load %arg1[%c0_29, %c1_30, %c0_31, %c0_32] : memref<8x5x5x128xbf16, #tpu.memory_space<vmem>>, vector<2x4x4x128xbf16>
    %50 = arith.extf %49 : vector<2x4x4x128xbf16> to vector<2x4x4x128xf32>
    %c6_33 = arith.constant 6 : index
    %c0_34 = arith.constant 0 : index
    %51 = vector.load %arg2[%c6_33, %c0_34] : memref<9x128xbf16, #tpu.memory_space<vmem>>, vector<1x128xbf16>
    %52 = arith.extf %51 : vector<1x128xbf16> to vector<1x128xf32>
    %53 = vector.shape_cast %52 : vector<1x128xf32> to vector<1x1x1x128xf32>
    %54 = vector.broadcast %53 : vector<1x1x1x128xf32> to vector<2x4x4x128xf32>
    %55 = arith.mulf %50, %54 : vector<2x4x4x128xf32>
    %56 = arith.addf %48, %55 : vector<2x4x4x128xf32>
    %c2_35 = arith.constant 2 : index
    %c1_36 = arith.constant 1 : index
    %c0_37 = arith.constant 0 : index
    %c0_38 = arith.constant 0 : index
    %57 = vector.load %arg1[%c2_35, %c1_36, %c0_37, %c0_38] : memref<8x5x5x128xbf16, #tpu.memory_space<vmem>>, vector<2x4x4x128xbf16>
    %58 = arith.extf %57 : vector<2x4x4x128xbf16> to vector<2x4x4x128xf32>
    %c7 = arith.constant 7 : index
    %c0_39 = arith.constant 0 : index
    %59 = vector.load %arg2[%c7, %c0_39] : memref<9x128xbf16, #tpu.memory_space<vmem>>, vector<1x128xbf16>
    %60 = arith.extf %59 : vector<1x128xbf16> to vector<1x128xf32>
    %61 = vector.shape_cast %60 : vector<1x128xf32> to vector<1x1x1x128xf32>
    %62 = vector.broadcast %61 : vector<1x1x1x128xf32> to vector<2x4x4x128xf32>
    %63 = arith.mulf %58, %62 : vector<2x4x4x128xf32>
    %64 = arith.addf %56, %63 : vector<2x4x4x128xf32>
    %c0_40 = arith.constant 0 : index
    %c1_41 = arith.constant 1 : index
    %c1_42 = arith.constant 1 : index
    %c0_43 = arith.constant 0 : index
    %65 = vector.load %arg1[%c0_40, %c1_41, %c1_42, %c0_43] : memref<8x5x5x128xbf16, #tpu.memory_space<vmem>>, vector<2x4x4x128xbf16>
    %66 = arith.extf %65 : vector<2x4x4x128xbf16> to vector<2x4x4x128xf32>
    %c8 = arith.constant 8 : index
    %c0_44 = arith.constant 0 : index
    %67 = vector.load %arg2[%c8, %c0_44] : memref<9x128xbf16, #tpu.memory_space<vmem>>, vector<1x128xbf16>
    %68 = arith.extf %67 : vector<1x128xbf16> to vector<1x128xf32>
    %69 = vector.shape_cast %68 : vector<1x128xf32> to vector<1x1x1x128xf32>
    %70 = vector.broadcast %69 : vector<1x1x1x128xf32> to vector<2x4x4x128xf32>
    %71 = arith.mulf %66, %70 : vector<2x4x4x128xf32>
    %72 = arith.addf %64, %71 : vector<2x4x4x128xf32>
    %cst_45 = arith.constant dense<0.000000e+00> : vector<4x4x128xf32>
    %73 = vector.multi_reduction <add>, %72, %cst_45 [0] : vector<2x4x4x128xf32> to vector<4x4x128xf32>
    %cst_46 = arith.constant dense<0.000000e+00> : vector<4x128xf32>
    %74 = vector.multi_reduction <add>, %73, %cst_46 [0] : vector<4x4x128xf32> to vector<4x128xf32>
    %cst_47 = arith.constant dense<0.000000e+00> : vector<128xf32>
    %75 = vector.multi_reduction <add>, %74, %cst_47 [0] : vector<4x128xf32> to vector<128xf32>
    %76 = vector.shape_cast %75 : vector<128xf32> to vector<1x128xf32>
    %cst_48 = arith.constant 3.200000e+01 : f32
    %77 = vector.broadcast %cst_48 : f32 to vector<1x128xf32>
    %78 = arith.divf %76, %77 : vector<1x128xf32>
    %79 = arith.mulf %72, %72 : vector<2x4x4x128xf32>
    %cst_49 = arith.constant dense<0.000000e+00> : vector<4x4x128xf32>
    %80 = vector.multi_reduction <add>, %79, %cst_49 [0] : vector<2x4x4x128xf32> to vector<4x4x128xf32>
    %cst_50 = arith.constant dense<0.000000e+00> : vector<4x128xf32>
    %81 = vector.multi_reduction <add>, %80, %cst_50 [0] : vector<4x4x128xf32> to vector<4x128xf32>
    %cst_51 = arith.constant dense<0.000000e+00> : vector<128xf32>
    %82 = vector.multi_reduction <add>, %81, %cst_51 [0] : vector<4x128xf32> to vector<128xf32>
    %83 = vector.shape_cast %82 : vector<128xf32> to vector<1x128xf32>
    %cst_52 = arith.constant 3.200000e+01 : f32
    %84 = vector.broadcast %cst_52 : f32 to vector<1x128xf32>
    %85 = arith.divf %83, %84 : vector<1x128xf32>
    %86 = arith.mulf %78, %78 : vector<1x128xf32>
    %87 = arith.subf %85, %86 : vector<1x128xf32>
    %cst_53 = arith.constant 0.000000e+00 : f32
    %88 = vector.broadcast %cst_53 : f32 to vector<1x128xf32>
    %89 = arith.maximumf %87, %88 : vector<1x128xf32>
    %c0_54 = arith.constant 0 : index
    %c0_55 = arith.constant 0 : index
    %90 = vector.load %arg3[%c0_54, %c0_55] : memref<1x128xf32, #tpu.memory_space<vmem>>, vector<1x128xf32>
    %cst_56 = arith.constant 9.99999974E-6 : f32
    %91 = vector.broadcast %cst_56 : f32 to vector<1x128xf32>
    %92 = arith.addf %89, %91 : vector<1x128xf32>
    %93 = math.rsqrt %92 : vector<1x128xf32>
    %94 = arith.mulf %90, %93 : vector<1x128xf32>
    %c0_57 = arith.constant 0 : index
    %c0_58 = arith.constant 0 : index
    %95 = vector.load %arg4[%c0_57, %c0_58] : memref<1x128xf32, #tpu.memory_space<vmem>>, vector<1x128xf32>
    %96 = arith.mulf %78, %94 : vector<1x128xf32>
    %97 = arith.subf %95, %96 : vector<1x128xf32>
    %98 = vector.shape_cast %94 : vector<1x128xf32> to vector<1x1x1x128xf32>
    %99 = vector.broadcast %98 : vector<1x1x1x128xf32> to vector<2x4x4x128xf32>
    %100 = arith.mulf %72, %99 : vector<2x4x4x128xf32>
    %101 = vector.shape_cast %97 : vector<1x128xf32> to vector<1x1x1x128xf32>
    %102 = vector.broadcast %101 : vector<1x1x1x128xf32> to vector<2x4x4x128xf32>
    %103 = arith.addf %100, %102 : vector<2x4x4x128xf32>
    %cst_59 = arith.constant 0.000000e+00 : f32
    %104 = vector.broadcast %cst_59 : f32 to vector<2x4x4x128xf32>
    %105 = arith.maximumf %103, %104 : vector<2x4x4x128xf32>
    %106 = arith.truncf %105 : vector<2x4x4x128xf32> to vector<2x4x4x128xbf16>
    %c0_60 = arith.constant 0 : index
    %c0_61 = arith.constant 0 : index
    %c0_62 = arith.constant 0 : index
    %c0_63 = arith.constant 0 : index
    %107 = vector.load %arg5[%c0_60, %c0_61, %c0_62, %c0_63] : memref<2x4x4x128xbf16, #tpu.memory_space<vmem>>, vector<2x4x4x128xbf16>
    tpu.vector_store %arg5[%c0_60, %c0_61, %c0_62, %c0_63], %106 {strides = array<i32>} : memref<2x4x4x128xbf16, #tpu.memory_space<vmem>>, vector<2x4x4x128xbf16>,
    return
  }
  func.func @transform_0(%arg0: i32) -> (i32, i32, i32, i32) {
    %c0_i32 = arith.constant 0 : i32
    %c0_i32_0 = arith.constant 0 : i32
    %c0_i32_1 = arith.constant 0 : i32
    %c0_i32_2 = arith.constant 0 : i32
    return %c0_i32, %c0_i32_0, %c0_i32_1, %arg0 : i32, i32, i32, i32
  }
  func.func @transform_1(%arg0: i32) -> (i32, i32) {
    %c0_i32 = arith.constant 0 : i32
    %c0_i32_0 = arith.constant 0 : i32
    return %c0_i32, %arg0 : i32, i32
  }
  func.func @transform_2(%arg0: i32) -> (i32, i32) {
    %c0_i32 = arith.constant 0 : i32
    %c0_i32_0 = arith.constant 0 : i32
    return %c0_i32, %arg0 : i32, i32
  }
  func.func @transform_3(%arg0: i32) -> (i32, i32) {
    %c0_i32 = arith.constant 0 : i32
    %c0_i32_0 = arith.constant 0 : i32
    return %c0_i32, %arg0 : i32, i32
  }
  func.func @transform_4(%arg0: i32) -> (i32, i32, i32, i32) {
    %c0_i32 = arith.constant 0 : i32
    %c0_i32_0 = arith.constant 0 : i32
    %c0_i32_1 = arith.constant 0 : i32
    %c0_i32_2 = arith.constant 0 : i32
    return %c0_i32, %c0_i32_0, %c0_i32_1, %arg0 : i32, i32, i32, i32
  }
}

module attributes {stable_mosaic.version = 11 : i64} {
  func.func @kernel(%arg0: i32, %arg1: memref<32x128xbf16, #tpu.memory_space<vmem>>, %arg2: memref<128x128xbf16, #tpu.memory_space<vmem>>, %arg3: memref<1x128xf32, #tpu.memory_space<vmem>>, %arg4: memref<1x128xf32, #tpu.memory_space<vmem>>, %arg5: memref<32x128xbf16, #tpu.memory_space<vmem>>) attributes {dimension_semantics = [#tpu.dimension_semantics<parallel>], iteration_bounds = array<i64: 1>, scalar_prefetch = 0 : i64, scratch_operands = 0 : i64, tpu.core_type = #tpu.core_type<tc>, window_params = [{transform_indices = @transform_0, window_bounds = array<i64: 32, 128>}, {pipeline_mode = #tpu.pipeline_mode<synchronous>, transform_indices = @transform_1, window_bounds = array<i64: 128, 128>}, {pipeline_mode = #tpu.pipeline_mode<synchronous>, transform_indices = @transform_2, window_bounds = array<i64: 1, 128>}, {pipeline_mode = #tpu.pipeline_mode<synchronous>, transform_indices = @transform_3, window_bounds = array<i64: 1, 128>}, {transform_indices = @transform_4, window_bounds = array<i64: 32, 128>}]} {
    %c0 = arith.constant 0 : index
    %c0_0 = arith.constant 0 : index
    %0 = vector.load %arg1[%c0, %c0_0] : memref<32x128xbf16, #tpu.memory_space<vmem>>, vector<32x128xbf16>
    %c0_1 = arith.constant 0 : index
    %c0_2 = arith.constant 0 : index
    %1 = vector.load %arg2[%c0_1, %c0_2] : memref<128x128xbf16, #tpu.memory_space<vmem>>, vector<128x128xbf16>
    %cst = arith.constant dense<0.000000e+00> : vector<32x128xf32>
    %2 = tpu.matmul %0, %1, %cst {dimension_numbers = #tpu.dot_dimension_numbers<[1], [0], [0], [1], [0, 0, 1, 1], [], []>} : vector<32x128xbf16>, vector<128x128xbf16>, vector<32x128xf32> -> vector<32x128xf32>
    %c0_3 = arith.constant 0 : index
    %c0_4 = arith.constant 0 : index
    %3 = vector.load %arg3[%c0_3, %c0_4] : memref<1x128xf32, #tpu.memory_space<vmem>>, vector<1x128xf32>
    %4 = vector.broadcast %3 : vector<1x128xf32> to vector<32x128xf32>
    %5 = arith.mulf %2, %4 : vector<32x128xf32>
    %c0_5 = arith.constant 0 : index
    %c0_6 = arith.constant 0 : index
    %6 = vector.load %arg4[%c0_5, %c0_6] : memref<1x128xf32, #tpu.memory_space<vmem>>, vector<1x128xf32>
    %7 = vector.broadcast %6 : vector<1x128xf32> to vector<32x128xf32>
    %8 = arith.addf %5, %7 : vector<32x128xf32>
    %9 = arith.truncf %8 : vector<32x128xf32> to vector<32x128xbf16>
    %c0_7 = arith.constant 0 : index
    %c0_8 = arith.constant 0 : index
    %10 = vector.load %arg5[%c0_7, %c0_8] : memref<32x128xbf16, #tpu.memory_space<vmem>>, vector<32x128xbf16>
    tpu.vector_store %arg5[%c0_7, %c0_8], %9 {strides = array<i32>} : memref<32x128xbf16, #tpu.memory_space<vmem>>, vector<32x128xbf16>,
    return
  }
  func.func @transform_0(%arg0: i32) -> (i32, i32) {
    %c0_i32 = arith.constant 0 : i32
    %c0_i32_0 = arith.constant 0 : i32
    return %arg0, %c0_i32 : i32, i32
  }
  func.func @transform_1(%arg0: i32) -> (i32, i32) {
    %c0_i32 = arith.constant 0 : i32
    %c0_i32_0 = arith.constant 0 : i32
    %c0_i32_1 = arith.constant 0 : i32
    return %c0_i32, %c0_i32_0 : i32, i32
  }
  func.func @transform_2(%arg0: i32) -> (i32, i32) {
    %c0_i32 = arith.constant 0 : i32
    %c0_i32_0 = arith.constant 0 : i32
    %c0_i32_1 = arith.constant 0 : i32
    return %c0_i32, %c0_i32_0 : i32, i32
  }
  func.func @transform_3(%arg0: i32) -> (i32, i32) {
    %c0_i32 = arith.constant 0 : i32
    %c0_i32_0 = arith.constant 0 : i32
    %c0_i32_1 = arith.constant 0 : i32
    return %c0_i32, %c0_i32_0 : i32, i32
  }
  func.func @transform_4(%arg0: i32) -> (i32, i32) {
    %c0_i32 = arith.constant 0 : i32
    %c0_i32_0 = arith.constant 0 : i32
    return %arg0, %c0_i32 : i32, i32
  }
}

module attributes {stable_mosaic.version = 11 : i64} {
  func.func @kernel(%arg0: i32, %arg1: memref<32x128xbf16, #tpu.memory_space<vmem>>, %arg2: memref<128x128xbf16, #tpu.memory_space<vmem>>, %arg3: memref<1x128xf32, #tpu.memory_space<vmem>>, %arg4: memref<1x128xf32, #tpu.memory_space<vmem>>, %arg5: memref<32x128xbf16, #tpu.memory_space<vmem>>) attributes {dimension_semantics = [#tpu.dimension_semantics<parallel>], iteration_bounds = array<i64: 1>, scalar_prefetch = 0 : i64, scratch_operands = 0 : i64, tpu.core_type = #tpu.core_type<tc>, window_params = [{transform_indices = @transform_0, window_bounds = array<i64: 32, 128>}, {pipeline_mode = #tpu.pipeline_mode<synchronous>, transform_indices = @transform_1, window_bounds = array<i64: 128, 128>}, {pipeline_mode = #tpu.pipeline_mode<synchronous>, transform_indices = @transform_2, window_bounds = array<i64: 1, 128>}, {pipeline_mode = #tpu.pipeline_mode<synchronous>, transform_indices = @transform_3, window_bounds = array<i64: 1, 128>}, {transform_indices = @transform_4, window_bounds = array<i64: 32, 128>}]} {
    %c0 = arith.constant 0 : index
    %c0_0 = arith.constant 0 : index
    %0 = vector.load %arg1[%c0, %c0_0] : memref<32x128xbf16, #tpu.memory_space<vmem>>, vector<32x128xbf16>
    %c0_1 = arith.constant 0 : index
    %c0_2 = arith.constant 0 : index
    %1 = vector.load %arg2[%c0_1, %c0_2] : memref<128x128xbf16, #tpu.memory_space<vmem>>, vector<128x128xbf16>
    %cst = arith.constant dense<0.000000e+00> : vector<32x128xf32>
    %2 = tpu.matmul %0, %1, %cst {dimension_numbers = #tpu.dot_dimension_numbers<[1], [0], [0], [1], [0, 0, 1, 1], [], []>} : vector<32x128xbf16>, vector<128x128xbf16>, vector<32x128xf32> -> vector<32x128xf32>
    %c0_3 = arith.constant 0 : index
    %c0_4 = arith.constant 0 : index
    %3 = vector.load %arg3[%c0_3, %c0_4] : memref<1x128xf32, #tpu.memory_space<vmem>>, vector<1x128xf32>
    %4 = vector.broadcast %3 : vector<1x128xf32> to vector<32x128xf32>
    %5 = arith.mulf %2, %4 : vector<32x128xf32>
    %c0_5 = arith.constant 0 : index
    %c0_6 = arith.constant 0 : index
    %6 = vector.load %arg4[%c0_5, %c0_6] : memref<1x128xf32, #tpu.memory_space<vmem>>, vector<1x128xf32>
    %7 = vector.broadcast %6 : vector<1x128xf32> to vector<32x128xf32>
    %8 = arith.addf %5, %7 : vector<32x128xf32>
    %cst_7 = arith.constant 0.000000e+00 : f32
    %9 = vector.broadcast %cst_7 : f32 to vector<32x128xf32>
    %10 = arith.maximumf %8, %9 : vector<32x128xf32>
    %11 = arith.truncf %10 : vector<32x128xf32> to vector<32x128xbf16>
    %c0_8 = arith.constant 0 : index
    %c0_9 = arith.constant 0 : index
    %12 = vector.load %arg5[%c0_8, %c0_9] : memref<32x128xbf16, #tpu.memory_space<vmem>>, vector<32x128xbf16>
    tpu.vector_store %arg5[%c0_8, %c0_9], %11 {strides = array<i32>} : memref<32x128xbf16, #tpu.memory_space<vmem>>, vector<32x128xbf16>,
    return
  }
  func.func @transform_0(%arg0: i32) -> (i32, i32) {
    %c0_i32 = arith.constant 0 : i32
    %c0_i32_0 = arith.constant 0 : i32
    return %arg0, %c0_i32 : i32, i32
  }
  func.func @transform_1(%arg0: i32) -> (i32, i32) {
    %c0_i32 = arith.constant 0 : i32
    %c0_i32_0 = arith.constant 0 : i32
    %c0_i32_1 = arith.constant 0 : i32
    return %c0_i32, %c0_i32_0 : i32, i32
  }
  func.func @transform_2(%arg0: i32) -> (i32, i32) {
    %c0_i32 = arith.constant 0 : i32
    %c0_i32_0 = arith.constant 0 : i32
    %c0_i32_1 = arith.constant 0 : i32
    return %c0_i32, %c0_i32_0 : i32, i32
  }
  func.func @transform_3(%arg0: i32) -> (i32, i32) {
    %c0_i32 = arith.constant 0 : i32
    %c0_i32_0 = arith.constant 0 : i32
    %c0_i32_1 = arith.constant 0 : i32
    return %c0_i32, %c0_i32_0 : i32, i32
  }
  func.func @transform_4(%arg0: i32) -> (i32, i32) {
    %c0_i32 = arith.constant 0 : i32
    %c0_i32_0 = arith.constant 0 : i32
    return %arg0, %c0_i32 : i32, i32
  }
}

module attributes {stable_mosaic.version = 11 : i64} {
  func.func @kernel(%arg0: i32, %arg1: memref<32x128xbf16, #tpu.memory_space<vmem>>, %arg2: memref<128x128xbf16, #tpu.memory_space<vmem>>, %arg3: memref<1x128xf32, #tpu.memory_space<vmem>>, %arg4: memref<1x128xf32, #tpu.memory_space<vmem>>, %arg5: memref<32x128xbf16, #tpu.memory_space<vmem>>, %arg6: memref<32x128xbf16, #tpu.memory_space<vmem>>) attributes {dimension_semantics = [#tpu.dimension_semantics<parallel>], iteration_bounds = array<i64: 1>, scalar_prefetch = 0 : i64, scratch_operands = 0 : i64, tpu.core_type = #tpu.core_type<tc>, window_params = [{transform_indices = @transform_0, window_bounds = array<i64: 32, 128>}, {pipeline_mode = #tpu.pipeline_mode<synchronous>, transform_indices = @transform_1, window_bounds = array<i64: 128, 128>}, {pipeline_mode = #tpu.pipeline_mode<synchronous>, transform_indices = @transform_2, window_bounds = array<i64: 1, 128>}, {pipeline_mode = #tpu.pipeline_mode<synchronous>, transform_indices = @transform_3, window_bounds = array<i64: 1, 128>}, {transform_indices = @transform_4, window_bounds = array<i64: 32, 128>}, {transform_indices = @transform_5, window_bounds = array<i64: 32, 128>}]} {
    %c0 = arith.constant 0 : index
    %c0_0 = arith.constant 0 : index
    %0 = vector.load %arg1[%c0, %c0_0] : memref<32x128xbf16, #tpu.memory_space<vmem>>, vector<32x128xbf16>
    %c0_1 = arith.constant 0 : index
    %c0_2 = arith.constant 0 : index
    %1 = vector.load %arg2[%c0_1, %c0_2] : memref<128x128xbf16, #tpu.memory_space<vmem>>, vector<128x128xbf16>
    %cst = arith.constant dense<0.000000e+00> : vector<32x128xf32>
    %2 = tpu.matmul %0, %1, %cst {dimension_numbers = #tpu.dot_dimension_numbers<[1], [0], [0], [1], [0, 0, 1, 1], [], []>} : vector<32x128xbf16>, vector<128x128xbf16>, vector<32x128xf32> -> vector<32x128xf32>
    %c0_3 = arith.constant 0 : index
    %c0_4 = arith.constant 0 : index
    %3 = vector.load %arg3[%c0_3, %c0_4] : memref<1x128xf32, #tpu.memory_space<vmem>>, vector<1x128xf32>
    %4 = vector.broadcast %3 : vector<1x128xf32> to vector<32x128xf32>
    %5 = arith.mulf %2, %4 : vector<32x128xf32>
    %c0_5 = arith.constant 0 : index
    %c0_6 = arith.constant 0 : index
    %6 = vector.load %arg4[%c0_5, %c0_6] : memref<1x128xf32, #tpu.memory_space<vmem>>, vector<1x128xf32>
    %7 = vector.broadcast %6 : vector<1x128xf32> to vector<32x128xf32>
    %8 = arith.addf %5, %7 : vector<32x128xf32>
    %c0_7 = arith.constant 0 : index
    %c0_8 = arith.constant 0 : index
    %9 = vector.load %arg5[%c0_7, %c0_8] : memref<32x128xbf16, #tpu.memory_space<vmem>>, vector<32x128xbf16>
    %10 = arith.extf %9 : vector<32x128xbf16> to vector<32x128xf32>
    %11 = arith.addf %8, %10 : vector<32x128xf32>
    %12 = arith.truncf %11 : vector<32x128xf32> to vector<32x128xbf16>
    %c0_9 = arith.constant 0 : index
    %c0_10 = arith.constant 0 : index
    %13 = vector.load %arg6[%c0_9, %c0_10] : memref<32x128xbf16, #tpu.memory_space<vmem>>, vector<32x128xbf16>
    tpu.vector_store %arg6[%c0_9, %c0_10], %12 {strides = array<i32>} : memref<32x128xbf16, #tpu.memory_space<vmem>>, vector<32x128xbf16>,
    return
  }
  func.func @transform_0(%arg0: i32) -> (i32, i32) {
    %c0_i32 = arith.constant 0 : i32
    %c0_i32_0 = arith.constant 0 : i32
    return %arg0, %c0_i32 : i32, i32
  }
  func.func @transform_1(%arg0: i32) -> (i32, i32) {
    %c0_i32 = arith.constant 0 : i32
    %c0_i32_0 = arith.constant 0 : i32
    %c0_i32_1 = arith.constant 0 : i32
    return %c0_i32, %c0_i32_0 : i32, i32
  }
  func.func @transform_2(%arg0: i32) -> (i32, i32) {
    %c0_i32 = arith.constant 0 : i32
    %c0_i32_0 = arith.constant 0 : i32
    %c0_i32_1 = arith.constant 0 : i32
    return %c0_i32, %c0_i32_0 : i32, i32
  }
  func.func @transform_3(%arg0: i32) -> (i32, i32) {
    %c0_i32 = arith.constant 0 : i32
    %c0_i32_0 = arith.constant 0 : i32
    %c0_i32_1 = arith.constant 0 : i32
    return %c0_i32, %c0_i32_0 : i32, i32
  }
  func.func @transform_4(%arg0: i32) -> (i32, i32) {
    %c0_i32 = arith.constant 0 : i32
    %c0_i32_0 = arith.constant 0 : i32
    return %arg0, %c0_i32 : i32, i32
  }
  func.func @transform_5(%arg0: i32) -> (i32, i32) {
    %c0_i32 = arith.constant 0 : i32
    %c0_i32_0 = arith.constant 0 : i32
    return %arg0, %c0_i32 : i32, i32
  }
}

module attributes {stable_mosaic.version = 11 : i64} {
  func.func @kernel(%arg0: i32, %arg1: memref<2x6x6x128xbf16, #tpu.memory_space<vmem>>, %arg2: memref<9x128xbf16, #tpu.memory_space<vmem>>, %arg3: memref<1x128xf32, #tpu.memory_space<vmem>>, %arg4: memref<1x128xf32, #tpu.memory_space<vmem>>, %arg5: memref<2x4x4x128xbf16, #tpu.memory_space<vmem>>) attributes {dimension_semantics = [#tpu.dimension_semantics<parallel>], iteration_bounds = array<i64: 1>, scalar_prefetch = 0 : i64, scratch_operands = 0 : i64, tpu.core_type = #tpu.core_type<tc>, window_params = [{transform_indices = @transform_0, window_bounds = array<i64: 2, 6, 6, 128>}, {transform_indices = @transform_1, window_bounds = array<i64: 9, 128>}, {transform_indices = @transform_2, window_bounds = array<i64: 1, 128>}, {transform_indices = @transform_3, window_bounds = array<i64: 1, 128>}, {transform_indices = @transform_4, window_bounds = array<i64: 2, 4, 4, 128>}]} {
    %cst = arith.constant 0.000000e+00 : f32
    %0 = vector.broadcast %cst : f32 to vector<2x4x4x128xf32>
    %c0 = arith.constant 0 : index
    %c0_0 = arith.constant 0 : index
    %c0_1 = arith.constant 0 : index
    %c0_2 = arith.constant 0 : index
    %1 = vector.load %arg1[%c0, %c0_0, %c0_1, %c0_2] : memref<2x6x6x128xbf16, #tpu.memory_space<vmem>>, vector<2x4x4x128xbf16>
    %2 = arith.extf %1 : vector<2x4x4x128xbf16> to vector<2x4x4x128xf32>
    %c0_3 = arith.constant 0 : index
    %c0_4 = arith.constant 0 : index
    %3 = vector.load %arg2[%c0_3, %c0_4] : memref<9x128xbf16, #tpu.memory_space<vmem>>, vector<1x128xbf16>
    %4 = arith.extf %3 : vector<1x128xbf16> to vector<1x128xf32>
    %5 = vector.shape_cast %4 : vector<1x128xf32> to vector<1x1x1x128xf32>
    %6 = vector.broadcast %5 : vector<1x1x1x128xf32> to vector<2x4x4x128xf32>
    %7 = arith.mulf %2, %6 : vector<2x4x4x128xf32>
    %8 = arith.addf %0, %7 : vector<2x4x4x128xf32>
    %c0_5 = arith.constant 0 : index
    %c0_6 = arith.constant 0 : index
    %c1 = arith.constant 1 : index
    %c0_7 = arith.constant 0 : index
    %9 = vector.load %arg1[%c0_5, %c0_6, %c1, %c0_7] : memref<2x6x6x128xbf16, #tpu.memory_space<vmem>>, vector<2x4x4x128xbf16>
    %10 = arith.extf %9 : vector<2x4x4x128xbf16> to vector<2x4x4x128xf32>
    %c1_8 = arith.constant 1 : index
    %c0_9 = arith.constant 0 : index
    %11 = vector.load %arg2[%c1_8, %c0_9] : memref<9x128xbf16, #tpu.memory_space<vmem>>, vector<1x128xbf16>
    %12 = arith.extf %11 : vector<1x128xbf16> to vector<1x128xf32>
    %13 = vector.shape_cast %12 : vector<1x128xf32> to vector<1x1x1x128xf32>
    %14 = vector.broadcast %13 : vector<1x1x1x128xf32> to vector<2x4x4x128xf32>
    %15 = arith.mulf %10, %14 : vector<2x4x4x128xf32>
    %16 = arith.addf %8, %15 : vector<2x4x4x128xf32>
    %c0_10 = arith.constant 0 : index
    %c0_11 = arith.constant 0 : index
    %c2 = arith.constant 2 : index
    %c0_12 = arith.constant 0 : index
    %17 = vector.load %arg1[%c0_10, %c0_11, %c2, %c0_12] : memref<2x6x6x128xbf16, #tpu.memory_space<vmem>>, vector<2x4x4x128xbf16>
    %18 = arith.extf %17 : vector<2x4x4x128xbf16> to vector<2x4x4x128xf32>
    %c2_13 = arith.constant 2 : index
    %c0_14 = arith.constant 0 : index
    %19 = vector.load %arg2[%c2_13, %c0_14] : memref<9x128xbf16, #tpu.memory_space<vmem>>, vector<1x128xbf16>
    %20 = arith.extf %19 : vector<1x128xbf16> to vector<1x128xf32>
    %21 = vector.shape_cast %20 : vector<1x128xf32> to vector<1x1x1x128xf32>
    %22 = vector.broadcast %21 : vector<1x1x1x128xf32> to vector<2x4x4x128xf32>
    %23 = arith.mulf %18, %22 : vector<2x4x4x128xf32>
    %24 = arith.addf %16, %23 : vector<2x4x4x128xf32>
    %c0_15 = arith.constant 0 : index
    %c1_16 = arith.constant 1 : index
    %c0_17 = arith.constant 0 : index
    %c0_18 = arith.constant 0 : index
    %25 = vector.load %arg1[%c0_15, %c1_16, %c0_17, %c0_18] : memref<2x6x6x128xbf16, #tpu.memory_space<vmem>>, vector<2x4x4x128xbf16>
    %26 = arith.extf %25 : vector<2x4x4x128xbf16> to vector<2x4x4x128xf32>
    %c3 = arith.constant 3 : index
    %c0_19 = arith.constant 0 : index
    %27 = vector.load %arg2[%c3, %c0_19] : memref<9x128xbf16, #tpu.memory_space<vmem>>, vector<1x128xbf16>
    %28 = arith.extf %27 : vector<1x128xbf16> to vector<1x128xf32>
    %29 = vector.shape_cast %28 : vector<1x128xf32> to vector<1x1x1x128xf32>
    %30 = vector.broadcast %29 : vector<1x1x1x128xf32> to vector<2x4x4x128xf32>
    %31 = arith.mulf %26, %30 : vector<2x4x4x128xf32>
    %32 = arith.addf %24, %31 : vector<2x4x4x128xf32>
    %c0_20 = arith.constant 0 : index
    %c1_21 = arith.constant 1 : index
    %c1_22 = arith.constant 1 : index
    %c0_23 = arith.constant 0 : index
    %33 = vector.load %arg1[%c0_20, %c1_21, %c1_22, %c0_23] : memref<2x6x6x128xbf16, #tpu.memory_space<vmem>>, vector<2x4x4x128xbf16>
    %34 = arith.extf %33 : vector<2x4x4x128xbf16> to vector<2x4x4x128xf32>
    %c4 = arith.constant 4 : index
    %c0_24 = arith.constant 0 : index
    %35 = vector.load %arg2[%c4, %c0_24] : memref<9x128xbf16, #tpu.memory_space<vmem>>, vector<1x128xbf16>
    %36 = arith.extf %35 : vector<1x128xbf16> to vector<1x128xf32>
    %37 = vector.shape_cast %36 : vector<1x128xf32> to vector<1x1x1x128xf32>
    %38 = vector.broadcast %37 : vector<1x1x1x128xf32> to vector<2x4x4x128xf32>
    %39 = arith.mulf %34, %38 : vector<2x4x4x128xf32>
    %40 = arith.addf %32, %39 : vector<2x4x4x128xf32>
    %c0_25 = arith.constant 0 : index
    %c1_26 = arith.constant 1 : index
    %c2_27 = arith.constant 2 : index
    %c0_28 = arith.constant 0 : index
    %41 = vector.load %arg1[%c0_25, %c1_26, %c2_27, %c0_28] : memref<2x6x6x128xbf16, #tpu.memory_space<vmem>>, vector<2x4x4x128xbf16>
    %42 = arith.extf %41 : vector<2x4x4x128xbf16> to vector<2x4x4x128xf32>
    %c5 = arith.constant 5 : index
    %c0_29 = arith.constant 0 : index
    %43 = vector.load %arg2[%c5, %c0_29] : memref<9x128xbf16, #tpu.memory_space<vmem>>, vector<1x128xbf16>
    %44 = arith.extf %43 : vector<1x128xbf16> to vector<1x128xf32>
    %45 = vector.shape_cast %44 : vector<1x128xf32> to vector<1x1x1x128xf32>
    %46 = vector.broadcast %45 : vector<1x1x1x128xf32> to vector<2x4x4x128xf32>
    %47 = arith.mulf %42, %46 : vector<2x4x4x128xf32>
    %48 = arith.addf %40, %47 : vector<2x4x4x128xf32>
    %c0_30 = arith.constant 0 : index
    %c2_31 = arith.constant 2 : index
    %c0_32 = arith.constant 0 : index
    %c0_33 = arith.constant 0 : index
    %49 = vector.load %arg1[%c0_30, %c2_31, %c0_32, %c0_33] : memref<2x6x6x128xbf16, #tpu.memory_space<vmem>>, vector<2x4x4x128xbf16>
    %50 = arith.extf %49 : vector<2x4x4x128xbf16> to vector<2x4x4x128xf32>
    %c6 = arith.constant 6 : index
    %c0_34 = arith.constant 0 : index
    %51 = vector.load %arg2[%c6, %c0_34] : memref<9x128xbf16, #tpu.memory_space<vmem>>, vector<1x128xbf16>
    %52 = arith.extf %51 : vector<1x128xbf16> to vector<1x128xf32>
    %53 = vector.shape_cast %52 : vector<1x128xf32> to vector<1x1x1x128xf32>
    %54 = vector.broadcast %53 : vector<1x1x1x128xf32> to vector<2x4x4x128xf32>
    %55 = arith.mulf %50, %54 : vector<2x4x4x128xf32>
    %56 = arith.addf %48, %55 : vector<2x4x4x128xf32>
    %c0_35 = arith.constant 0 : index
    %c2_36 = arith.constant 2 : index
    %c1_37 = arith.constant 1 : index
    %c0_38 = arith.constant 0 : index
    %57 = vector.load %arg1[%c0_35, %c2_36, %c1_37, %c0_38] : memref<2x6x6x128xbf16, #tpu.memory_space<vmem>>, vector<2x4x4x128xbf16>
    %58 = arith.extf %57 : vector<2x4x4x128xbf16> to vector<2x4x4x128xf32>
    %c7 = arith.constant 7 : index
    %c0_39 = arith.constant 0 : index
    %59 = vector.load %arg2[%c7, %c0_39] : memref<9x128xbf16, #tpu.memory_space<vmem>>, vector<1x128xbf16>
    %60 = arith.extf %59 : vector<1x128xbf16> to vector<1x128xf32>
    %61 = vector.shape_cast %60 : vector<1x128xf32> to vector<1x1x1x128xf32>
    %62 = vector.broadcast %61 : vector<1x1x1x128xf32> to vector<2x4x4x128xf32>
    %63 = arith.mulf %58, %62 : vector<2x4x4x128xf32>
    %64 = arith.addf %56, %63 : vector<2x4x4x128xf32>
    %c0_40 = arith.constant 0 : index
    %c2_41 = arith.constant 2 : index
    %c2_42 = arith.constant 2 : index
    %c0_43 = arith.constant 0 : index
    %65 = vector.load %arg1[%c0_40, %c2_41, %c2_42, %c0_43] : memref<2x6x6x128xbf16, #tpu.memory_space<vmem>>, vector<2x4x4x128xbf16>
    %66 = arith.extf %65 : vector<2x4x4x128xbf16> to vector<2x4x4x128xf32>
    %c8 = arith.constant 8 : index
    %c0_44 = arith.constant 0 : index
    %67 = vector.load %arg2[%c8, %c0_44] : memref<9x128xbf16, #tpu.memory_space<vmem>>, vector<1x128xbf16>
    %68 = arith.extf %67 : vector<1x128xbf16> to vector<1x128xf32>
    %69 = vector.shape_cast %68 : vector<1x128xf32> to vector<1x1x1x128xf32>
    %70 = vector.broadcast %69 : vector<1x1x1x128xf32> to vector<2x4x4x128xf32>
    %71 = arith.mulf %66, %70 : vector<2x4x4x128xf32>
    %72 = arith.addf %64, %71 : vector<2x4x4x128xf32>
    %cst_45 = arith.constant dense<0.000000e+00> : vector<4x4x128xf32>
    %73 = vector.multi_reduction <add>, %72, %cst_45 [0] : vector<2x4x4x128xf32> to vector<4x4x128xf32>
    %cst_46 = arith.constant dense<0.000000e+00> : vector<4x128xf32>
    %74 = vector.multi_reduction <add>, %73, %cst_46 [0] : vector<4x4x128xf32> to vector<4x128xf32>
    %cst_47 = arith.constant dense<0.000000e+00> : vector<128xf32>
    %75 = vector.multi_reduction <add>, %74, %cst_47 [0] : vector<4x128xf32> to vector<128xf32>
    %76 = vector.shape_cast %75 : vector<128xf32> to vector<1x128xf32>
    %cst_48 = arith.constant 3.200000e+01 : f32
    %77 = vector.broadcast %cst_48 : f32 to vector<1x128xf32>
    %78 = arith.divf %76, %77 : vector<1x128xf32>
    %79 = arith.mulf %72, %72 : vector<2x4x4x128xf32>
    %cst_49 = arith.constant dense<0.000000e+00> : vector<4x4x128xf32>
    %80 = vector.multi_reduction <add>, %79, %cst_49 [0] : vector<2x4x4x128xf32> to vector<4x4x128xf32>
    %cst_50 = arith.constant dense<0.000000e+00> : vector<4x128xf32>
    %81 = vector.multi_reduction <add>, %80, %cst_50 [0] : vector<4x4x128xf32> to vector<4x128xf32>
    %cst_51 = arith.constant dense<0.000000e+00> : vector<128xf32>
    %82 = vector.multi_reduction <add>, %81, %cst_51 [0] : vector<4x128xf32> to vector<128xf32>
    %83 = vector.shape_cast %82 : vector<128xf32> to vector<1x128xf32>
    %cst_52 = arith.constant 3.200000e+01 : f32
    %84 = vector.broadcast %cst_52 : f32 to vector<1x128xf32>
    %85 = arith.divf %83, %84 : vector<1x128xf32>
    %86 = arith.mulf %78, %78 : vector<1x128xf32>
    %87 = arith.subf %85, %86 : vector<1x128xf32>
    %cst_53 = arith.constant 0.000000e+00 : f32
    %88 = vector.broadcast %cst_53 : f32 to vector<1x128xf32>
    %89 = arith.maximumf %87, %88 : vector<1x128xf32>
    %c0_54 = arith.constant 0 : index
    %c0_55 = arith.constant 0 : index
    %90 = vector.load %arg3[%c0_54, %c0_55] : memref<1x128xf32, #tpu.memory_space<vmem>>, vector<1x128xf32>
    %cst_56 = arith.constant 9.99999974E-6 : f32
    %91 = vector.broadcast %cst_56 : f32 to vector<1x128xf32>
    %92 = arith.addf %89, %91 : vector<1x128xf32>
    %93 = math.rsqrt %92 : vector<1x128xf32>
    %94 = arith.mulf %90, %93 : vector<1x128xf32>
    %c0_57 = arith.constant 0 : index
    %c0_58 = arith.constant 0 : index
    %95 = vector.load %arg4[%c0_57, %c0_58] : memref<1x128xf32, #tpu.memory_space<vmem>>, vector<1x128xf32>
    %96 = arith.mulf %78, %94 : vector<1x128xf32>
    %97 = arith.subf %95, %96 : vector<1x128xf32>
    %98 = vector.shape_cast %94 : vector<1x128xf32> to vector<1x1x1x128xf32>
    %99 = vector.broadcast %98 : vector<1x1x1x128xf32> to vector<2x4x4x128xf32>
    %100 = arith.mulf %72, %99 : vector<2x4x4x128xf32>
    %101 = vector.shape_cast %97 : vector<1x128xf32> to vector<1x1x1x128xf32>
    %102 = vector.broadcast %101 : vector<1x1x1x128xf32> to vector<2x4x4x128xf32>
    %103 = arith.addf %100, %102 : vector<2x4x4x128xf32>
    %cst_59 = arith.constant 0.000000e+00 : f32
    %104 = vector.broadcast %cst_59 : f32 to vector<2x4x4x128xf32>
    %105 = arith.maximumf %103, %104 : vector<2x4x4x128xf32>
    %106 = arith.truncf %105 : vector<2x4x4x128xf32> to vector<2x4x4x128xbf16>
    %c0_60 = arith.constant 0 : index
    %c0_61 = arith.constant 0 : index
    %c0_62 = arith.constant 0 : index
    %c0_63 = arith.constant 0 : index
    %107 = vector.load %arg5[%c0_60, %c0_61, %c0_62, %c0_63] : memref<2x4x4x128xbf16, #tpu.memory_space<vmem>>, vector<2x4x4x128xbf16>
    tpu.vector_store %arg5[%c0_60, %c0_61, %c0_62, %c0_63], %106 {strides = array<i32>} : memref<2x4x4x128xbf16, #tpu.memory_space<vmem>>, vector<2x4x4x128xbf16>,
    return
  }
  func.func @transform_0(%arg0: i32) -> (i32, i32, i32, i32) {
    %c0_i32 = arith.constant 0 : i32
    %c0_i32_0 = arith.constant 0 : i32
    %c0_i32_1 = arith.constant 0 : i32
    %c0_i32_2 = arith.constant 0 : i32
    return %c0_i32, %c0_i32_0, %c0_i32_1, %arg0 : i32, i32, i32, i32
  }
  func.func @transform_1(%arg0: i32) -> (i32, i32) {
    %c0_i32 = arith.constant 0 : i32
    %c0_i32_0 = arith.constant 0 : i32
    return %c0_i32, %arg0 : i32, i32
  }
  func.func @transform_2(%arg0: i32) -> (i32, i32) {
    %c0_i32 = arith.constant 0 : i32
    %c0_i32_0 = arith.constant 0 : i32
    return %c0_i32, %arg0 : i32, i32
  }
  func.func @transform_3(%arg0: i32) -> (i32, i32) {
    %c0_i32 = arith.constant 0 : i32
    %c0_i32_0 = arith.constant 0 : i32
    return %c0_i32, %arg0 : i32, i32
  }
  func.func @transform_4(%arg0: i32) -> (i32, i32, i32, i32) {
    %c0_i32 = arith.constant 0 : i32
    %c0_i32_0 = arith.constant 0 : i32
    %c0_i32_1 = arith.constant 0 : i32
    %c0_i32_2 = arith.constant 0 : i32
    return %c0_i32, %c0_i32_0, %c0_i32_1, %arg0 : i32, i32, i32, i32
  }
}

module attributes {stable_mosaic.version = 11 : i64} {
  func.func @kernel(%arg0: i32, %arg1: memref<2x6x6x128xbf16, #tpu.memory_space<vmem>>, %arg2: memref<9x128xbf16, #tpu.memory_space<vmem>>, %arg3: memref<1x128xf32, #tpu.memory_space<vmem>>, %arg4: memref<1x128xf32, #tpu.memory_space<vmem>>, %arg5: memref<2x4x4x128xbf16, #tpu.memory_space<vmem>>) attributes {dimension_semantics = [#tpu.dimension_semantics<parallel>], iteration_bounds = array<i64: 1>, scalar_prefetch = 0 : i64, scratch_operands = 0 : i64, tpu.core_type = #tpu.core_type<tc>, window_params = [{transform_indices = @transform_0, window_bounds = array<i64: 2, 6, 6, 128>}, {transform_indices = @transform_1, window_bounds = array<i64: 9, 128>}, {transform_indices = @transform_2, window_bounds = array<i64: 1, 128>}, {transform_indices = @transform_3, window_bounds = array<i64: 1, 128>}, {transform_indices = @transform_4, window_bounds = array<i64: 2, 4, 4, 128>}]} {
    %cst = arith.constant 0.000000e+00 : f32
    %0 = vector.broadcast %cst : f32 to vector<2x4x4x128xf32>
    %c0 = arith.constant 0 : index
    %c0_0 = arith.constant 0 : index
    %c0_1 = arith.constant 0 : index
    %c0_2 = arith.constant 0 : index
    %1 = vector.load %arg1[%c0, %c0_0, %c0_1, %c0_2] : memref<2x6x6x128xbf16, #tpu.memory_space<vmem>>, vector<2x4x4x128xbf16>
    %2 = arith.extf %1 : vector<2x4x4x128xbf16> to vector<2x4x4x128xf32>
    %c0_3 = arith.constant 0 : index
    %c0_4 = arith.constant 0 : index
    %3 = vector.load %arg2[%c0_3, %c0_4] : memref<9x128xbf16, #tpu.memory_space<vmem>>, vector<1x128xbf16>
    %4 = arith.extf %3 : vector<1x128xbf16> to vector<1x128xf32>
    %5 = vector.shape_cast %4 : vector<1x128xf32> to vector<1x1x1x128xf32>
    %6 = vector.broadcast %5 : vector<1x1x1x128xf32> to vector<2x4x4x128xf32>
    %7 = arith.mulf %2, %6 : vector<2x4x4x128xf32>
    %8 = arith.addf %0, %7 : vector<2x4x4x128xf32>
    %c0_5 = arith.constant 0 : index
    %c0_6 = arith.constant 0 : index
    %c1 = arith.constant 1 : index
    %c0_7 = arith.constant 0 : index
    %9 = vector.load %arg1[%c0_5, %c0_6, %c1, %c0_7] : memref<2x6x6x128xbf16, #tpu.memory_space<vmem>>, vector<2x4x4x128xbf16>
    %10 = arith.extf %9 : vector<2x4x4x128xbf16> to vector<2x4x4x128xf32>
    %c1_8 = arith.constant 1 : index
    %c0_9 = arith.constant 0 : index
    %11 = vector.load %arg2[%c1_8, %c0_9] : memref<9x128xbf16, #tpu.memory_space<vmem>>, vector<1x128xbf16>
    %12 = arith.extf %11 : vector<1x128xbf16> to vector<1x128xf32>
    %13 = vector.shape_cast %12 : vector<1x128xf32> to vector<1x1x1x128xf32>
    %14 = vector.broadcast %13 : vector<1x1x1x128xf32> to vector<2x4x4x128xf32>
    %15 = arith.mulf %10, %14 : vector<2x4x4x128xf32>
    %16 = arith.addf %8, %15 : vector<2x4x4x128xf32>
    %c0_10 = arith.constant 0 : index
    %c0_11 = arith.constant 0 : index
    %c2 = arith.constant 2 : index
    %c0_12 = arith.constant 0 : index
    %17 = vector.load %arg1[%c0_10, %c0_11, %c2, %c0_12] : memref<2x6x6x128xbf16, #tpu.memory_space<vmem>>, vector<2x4x4x128xbf16>
    %18 = arith.extf %17 : vector<2x4x4x128xbf16> to vector<2x4x4x128xf32>
    %c2_13 = arith.constant 2 : index
    %c0_14 = arith.constant 0 : index
    %19 = vector.load %arg2[%c2_13, %c0_14] : memref<9x128xbf16, #tpu.memory_space<vmem>>, vector<1x128xbf16>
    %20 = arith.extf %19 : vector<1x128xbf16> to vector<1x128xf32>
    %21 = vector.shape_cast %20 : vector<1x128xf32> to vector<1x1x1x128xf32>
    %22 = vector.broadcast %21 : vector<1x1x1x128xf32> to vector<2x4x4x128xf32>
    %23 = arith.mulf %18, %22 : vector<2x4x4x128xf32>
    %24 = arith.addf %16, %23 : vector<2x4x4x128xf32>
    %c0_15 = arith.constant 0 : index
    %c1_16 = arith.constant 1 : index
    %c0_17 = arith.constant 0 : index
    %c0_18 = arith.constant 0 : index
    %25 = vector.load %arg1[%c0_15, %c1_16, %c0_17, %c0_18] : memref<2x6x6x128xbf16, #tpu.memory_space<vmem>>, vector<2x4x4x128xbf16>
    %26 = arith.extf %25 : vector<2x4x4x128xbf16> to vector<2x4x4x128xf32>
    %c3 = arith.constant 3 : index
    %c0_19 = arith.constant 0 : index
    %27 = vector.load %arg2[%c3, %c0_19] : memref<9x128xbf16, #tpu.memory_space<vmem>>, vector<1x128xbf16>
    %28 = arith.extf %27 : vector<1x128xbf16> to vector<1x128xf32>
    %29 = vector.shape_cast %28 : vector<1x128xf32> to vector<1x1x1x128xf32>
    %30 = vector.broadcast %29 : vector<1x1x1x128xf32> to vector<2x4x4x128xf32>
    %31 = arith.mulf %26, %30 : vector<2x4x4x128xf32>
    %32 = arith.addf %24, %31 : vector<2x4x4x128xf32>
    %c0_20 = arith.constant 0 : index
    %c1_21 = arith.constant 1 : index
    %c1_22 = arith.constant 1 : index
    %c0_23 = arith.constant 0 : index
    %33 = vector.load %arg1[%c0_20, %c1_21, %c1_22, %c0_23] : memref<2x6x6x128xbf16, #tpu.memory_space<vmem>>, vector<2x4x4x128xbf16>
    %34 = arith.extf %33 : vector<2x4x4x128xbf16> to vector<2x4x4x128xf32>
    %c4 = arith.constant 4 : index
    %c0_24 = arith.constant 0 : index
    %35 = vector.load %arg2[%c4, %c0_24] : memref<9x128xbf16, #tpu.memory_space<vmem>>, vector<1x128xbf16>
    %36 = arith.extf %35 : vector<1x128xbf16> to vector<1x128xf32>
    %37 = vector.shape_cast %36 : vector<1x128xf32> to vector<1x1x1x128xf32>
    %38 = vector.broadcast %37 : vector<1x1x1x128xf32> to vector<2x4x4x128xf32>
    %39 = arith.mulf %34, %38 : vector<2x4x4x128xf32>
    %40 = arith.addf %32, %39 : vector<2x4x4x128xf32>
    %c0_25 = arith.constant 0 : index
    %c1_26 = arith.constant 1 : index
    %c2_27 = arith.constant 2 : index
    %c0_28 = arith.constant 0 : index
    %41 = vector.load %arg1[%c0_25, %c1_26, %c2_27, %c0_28] : memref<2x6x6x128xbf16, #tpu.memory_space<vmem>>, vector<2x4x4x128xbf16>
    %42 = arith.extf %41 : vector<2x4x4x128xbf16> to vector<2x4x4x128xf32>
    %c5 = arith.constant 5 : index
    %c0_29 = arith.constant 0 : index
    %43 = vector.load %arg2[%c5, %c0_29] : memref<9x128xbf16, #tpu.memory_space<vmem>>, vector<1x128xbf16>
    %44 = arith.extf %43 : vector<1x128xbf16> to vector<1x128xf32>
    %45 = vector.shape_cast %44 : vector<1x128xf32> to vector<1x1x1x128xf32>
    %46 = vector.broadcast %45 : vector<1x1x1x128xf32> to vector<2x4x4x128xf32>
    %47 = arith.mulf %42, %46 : vector<2x4x4x128xf32>
    %48 = arith.addf %40, %47 : vector<2x4x4x128xf32>
    %c0_30 = arith.constant 0 : index
    %c2_31 = arith.constant 2 : index
    %c0_32 = arith.constant 0 : index
    %c0_33 = arith.constant 0 : index
    %49 = vector.load %arg1[%c0_30, %c2_31, %c0_32, %c0_33] : memref<2x6x6x128xbf16, #tpu.memory_space<vmem>>, vector<2x4x4x128xbf16>
    %50 = arith.extf %49 : vector<2x4x4x128xbf16> to vector<2x4x4x128xf32>
    %c6 = arith.constant 6 : index
    %c0_34 = arith.constant 0 : index
    %51 = vector.load %arg2[%c6, %c0_34] : memref<9x128xbf16, #tpu.memory_space<vmem>>, vector<1x128xbf16>
    %52 = arith.extf %51 : vector<1x128xbf16> to vector<1x128xf32>
    %53 = vector.shape_cast %52 : vector<1x128xf32> to vector<1x1x1x128xf32>
    %54 = vector.broadcast %53 : vector<1x1x1x128xf32> to vector<2x4x4x128xf32>
    %55 = arith.mulf %50, %54 : vector<2x4x4x128xf32>
    %56 = arith.addf %48, %55 : vector<2x4x4x128xf32>
    %c0_35 = arith.constant 0 : index
    %c2_36 = arith.constant 2 : index
    %c1_37 = arith.constant 1 : index
    %c0_38 = arith.constant 0 : index
    %57 = vector.load %arg1[%c0_35, %c2_36, %c1_37, %c0_38] : memref<2x6x6x128xbf16, #tpu.memory_space<vmem>>, vector<2x4x4x128xbf16>
    %58 = arith.extf %57 : vector<2x4x4x128xbf16> to vector<2x4x4x128xf32>
    %c7 = arith.constant 7 : index
    %c0_39 = arith.constant 0 : index
    %59 = vector.load %arg2[%c7, %c0_39] : memref<9x128xbf16, #tpu.memory_space<vmem>>, vector<1x128xbf16>
    %60 = arith.extf %59 : vector<1x128xbf16> to vector<1x128xf32>
    %61 = vector.shape_cast %60 : vector<1x128xf32> to vector<1x1x1x128xf32>
    %62 = vector.broadcast %61 : vector<1x1x1x128xf32> to vector<2x4x4x128xf32>
    %63 = arith.mulf %58, %62 : vector<2x4x4x128xf32>
    %64 = arith.addf %56, %63 : vector<2x4x4x128xf32>
    %c0_40 = arith.constant 0 : index
    %c2_41 = arith.constant 2 : index
    %c2_42 = arith.constant 2 : index
    %c0_43 = arith.constant 0 : index
    %65 = vector.load %arg1[%c0_40, %c2_41, %c2_42, %c0_43] : memref<2x6x6x128xbf16, #tpu.memory_space<vmem>>, vector<2x4x4x128xbf16>
    %66 = arith.extf %65 : vector<2x4x4x128xbf16> to vector<2x4x4x128xf32>
    %c8 = arith.constant 8 : index
    %c0_44 = arith.constant 0 : index
    %67 = vector.load %arg2[%c8, %c0_44] : memref<9x128xbf16, #tpu.memory_space<vmem>>, vector<1x128xbf16>
    %68 = arith.extf %67 : vector<1x128xbf16> to vector<1x128xf32>
    %69 = vector.shape_cast %68 : vector<1x128xf32> to vector<1x1x1x128xf32>
    %70 = vector.broadcast %69 : vector<1x1x1x128xf32> to vector<2x4x4x128xf32>
    %71 = arith.mulf %66, %70 : vector<2x4x4x128xf32>
    %72 = arith.addf %64, %71 : vector<2x4x4x128xf32>
    %cst_45 = arith.constant dense<0.000000e+00> : vector<4x4x128xf32>
    %73 = vector.multi_reduction <add>, %72, %cst_45 [0] : vector<2x4x4x128xf32> to vector<4x4x128xf32>
    %cst_46 = arith.constant dense<0.000000e+00> : vector<4x128xf32>
    %74 = vector.multi_reduction <add>, %73, %cst_46 [0] : vector<4x4x128xf32> to vector<4x128xf32>
    %cst_47 = arith.constant dense<0.000000e+00> : vector<128xf32>
    %75 = vector.multi_reduction <add>, %74, %cst_47 [0] : vector<4x128xf32> to vector<128xf32>
    %76 = vector.shape_cast %75 : vector<128xf32> to vector<1x128xf32>
    %cst_48 = arith.constant 3.200000e+01 : f32
    %77 = vector.broadcast %cst_48 : f32 to vector<1x128xf32>
    %78 = arith.divf %76, %77 : vector<1x128xf32>
    %79 = arith.mulf %72, %72 : vector<2x4x4x128xf32>
    %cst_49 = arith.constant dense<0.000000e+00> : vector<4x4x128xf32>
    %80 = vector.multi_reduction <add>, %79, %cst_49 [0] : vector<2x4x4x128xf32> to vector<4x4x128xf32>
    %cst_50 = arith.constant dense<0.000000e+00> : vector<4x128xf32>
    %81 = vector.multi_reduction <add>, %80, %cst_50 [0] : vector<4x4x128xf32> to vector<4x128xf32>
    %cst_51 = arith.constant dense<0.000000e+00> : vector<128xf32>
    %82 = vector.multi_reduction <add>, %81, %cst_51 [0] : vector<4x128xf32> to vector<128xf32>
    %83 = vector.shape_cast %82 : vector<128xf32> to vector<1x128xf32>
    %cst_52 = arith.constant 3.200000e+01 : f32
    %84 = vector.broadcast %cst_52 : f32 to vector<1x128xf32>
    %85 = arith.divf %83, %84 : vector<1x128xf32>
    %86 = arith.mulf %78, %78 : vector<1x128xf32>
    %87 = arith.subf %85, %86 : vector<1x128xf32>
    %cst_53 = arith.constant 0.000000e+00 : f32
    %88 = vector.broadcast %cst_53 : f32 to vector<1x128xf32>
    %89 = arith.maximumf %87, %88 : vector<1x128xf32>
    %c0_54 = arith.constant 0 : index
    %c0_55 = arith.constant 0 : index
    %90 = vector.load %arg3[%c0_54, %c0_55] : memref<1x128xf32, #tpu.memory_space<vmem>>, vector<1x128xf32>
    %cst_56 = arith.constant 9.99999974E-6 : f32
    %91 = vector.broadcast %cst_56 : f32 to vector<1x128xf32>
    %92 = arith.addf %89, %91 : vector<1x128xf32>
    %93 = math.rsqrt %92 : vector<1x128xf32>
    %94 = arith.mulf %90, %93 : vector<1x128xf32>
    %c0_57 = arith.constant 0 : index
    %c0_58 = arith.constant 0 : index
    %95 = vector.load %arg4[%c0_57, %c0_58] : memref<1x128xf32, #tpu.memory_space<vmem>>, vector<1x128xf32>
    %96 = arith.mulf %78, %94 : vector<1x128xf32>
    %97 = arith.subf %95, %96 : vector<1x128xf32>
    %98 = vector.shape_cast %94 : vector<1x128xf32> to vector<1x1x1x128xf32>
    %99 = vector.broadcast %98 : vector<1x1x1x128xf32> to vector<2x4x4x128xf32>
    %100 = arith.mulf %72, %99 : vector<2x4x4x128xf32>
    %101 = vector.shape_cast %97 : vector<1x128xf32> to vector<1x1x1x128xf32>
    %102 = vector.broadcast %101 : vector<1x1x1x128xf32> to vector<2x4x4x128xf32>
    %103 = arith.addf %100, %102 : vector<2x4x4x128xf32>
    %104 = arith.truncf %103 : vector<2x4x4x128xf32> to vector<2x4x4x128xbf16>
    %c0_59 = arith.constant 0 : index
    %c0_60 = arith.constant 0 : index
    %c0_61 = arith.constant 0 : index
    %c0_62 = arith.constant 0 : index
    %105 = vector.load %arg5[%c0_59, %c0_60, %c0_61, %c0_62] : memref<2x4x4x128xbf16, #tpu.memory_space<vmem>>, vector<2x4x4x128xbf16>
    tpu.vector_store %arg5[%c0_59, %c0_60, %c0_61, %c0_62], %104 {strides = array<i32>} : memref<2x4x4x128xbf16, #tpu.memory_space<vmem>>, vector<2x4x4x128xbf16>,
    return
  }
  func.func @transform_0(%arg0: i32) -> (i32, i32, i32, i32) {
    %c0_i32 = arith.constant 0 : i32
    %c0_i32_0 = arith.constant 0 : i32
    %c0_i32_1 = arith.constant 0 : i32
    %c0_i32_2 = arith.constant 0 : i32
    return %c0_i32, %c0_i32_0, %c0_i32_1, %arg0 : i32, i32, i32, i32
  }
  func.func @transform_1(%arg0: i32) -> (i32, i32) {
    %c0_i32 = arith.constant 0 : i32
    %c0_i32_0 = arith.constant 0 : i32
    return %c0_i32, %arg0 : i32, i32
  }
  func.func @transform_2(%arg0: i32) -> (i32, i32) {
    %c0_i32 = arith.constant 0 : i32
    %c0_i32_0 = arith.constant 0 : i32
    return %c0_i32, %arg0 : i32, i32
  }
  func.func @transform_3(%arg0: i32) -> (i32, i32) {
    %c0_i32 = arith.constant 0 : i32
    %c0_i32_0 = arith.constant 0 : i32
    return %c0_i32, %arg0 : i32, i32
  }
  func.func @transform_4(%arg0: i32) -> (i32, i32, i32, i32) {
    %c0_i32 = arith.constant 0 : i32
    %c0_i32_0 = arith.constant 0 : i32
    %c0_i32_1 = arith.constant 0 : i32
    %c0_i32_2 = arith.constant 0 : i32
    return %c0_i32, %c0_i32_0, %c0_i32_1, %arg0 : i32, i32, i32, i32
  }
}

module attributes {stable_mosaic.version = 11 : i64} {
  func.func @_head_kernel(%arg0: memref<2x16x128xbf16, #tpu.memory_space<vmem>>, %arg1: memref<128x1280xbf16, #tpu.memory_space<vmem>>, %arg2: memref<1x1280xf32, #tpu.memory_space<vmem>>, %arg3: memref<1x1280xf32, #tpu.memory_space<vmem>>, %arg4: memref<1280x128xbf16, #tpu.memory_space<vmem>>, %arg5: memref<1x128xf32, #tpu.memory_space<vmem>>, %arg6: memref<2x128xf32, #tpu.memory_space<vmem>>) attributes {dimension_semantics = [], scalar_prefetch = 0 : i64, scratch_operands = 0 : i64, tpu.core_type = #tpu.core_type<tc>} {
    %c0 = arith.constant 0 : index
    %c0_0 = arith.constant 0 : index
    %c0_1 = arith.constant 0 : index
    %0 = vector.load %arg0[%c0, %c0_0, %c0_1] : memref<2x16x128xbf16, #tpu.memory_space<vmem>>, vector<2x16x128xbf16>
    %1 = arith.extf %0 : vector<2x16x128xbf16> to vector<2x16x128xf32>
    %cst = arith.constant dense<0.000000e+00> : vector<2x128xf32>
    %2 = vector.multi_reduction <add>, %1, %cst [1] : vector<2x16x128xf32> to vector<2x128xf32>
    %cst_2 = arith.constant 1.600000e+01 : f32
    %3 = vector.broadcast %cst_2 : f32 to vector<2x128xf32>
    %4 = arith.divf %2, %3 : vector<2x128xf32>
    %5 = arith.truncf %4 : vector<2x128xf32> to vector<2x128xbf16>
    %c0_3 = arith.constant 0 : index
    %c0_4 = arith.constant 0 : index
    %6 = vector.load %arg1[%c0_3, %c0_4] : memref<128x1280xbf16, #tpu.memory_space<vmem>>, vector<128x1280xbf16>
    %cst_5 = arith.constant dense<0.000000e+00> : vector<2x1280xf32>
    %7 = tpu.matmul %5, %6, %cst_5 {dimension_numbers = #tpu.dot_dimension_numbers<[1], [0], [0], [1], [0, 0, 1, 1], [], []>} : vector<2x128xbf16>, vector<128x1280xbf16>, vector<2x1280xf32> -> vector<2x1280xf32>
    %cst_6 = arith.constant dense<0.000000e+00> : vector<1280xf32>
    %8 = vector.multi_reduction <add>, %7, %cst_6 [0] : vector<2x1280xf32> to vector<1280xf32>
    %9 = vector.shape_cast %8 : vector<1280xf32> to vector<1x1280xf32>
    %cst_7 = arith.constant 2.000000e+00 : f32
    %10 = vector.broadcast %cst_7 : f32 to vector<1x1280xf32>
    %11 = arith.divf %9, %10 : vector<1x1280xf32>
    %12 = arith.mulf %7, %7 : vector<2x1280xf32>
    %cst_8 = arith.constant dense<0.000000e+00> : vector<1280xf32>
    %13 = vector.multi_reduction <add>, %12, %cst_8 [0] : vector<2x1280xf32> to vector<1280xf32>
    %14 = vector.shape_cast %13 : vector<1280xf32> to vector<1x1280xf32>
    %cst_9 = arith.constant 2.000000e+00 : f32
    %15 = vector.broadcast %cst_9 : f32 to vector<1x1280xf32>
    %16 = arith.divf %14, %15 : vector<1x1280xf32>
    %17 = arith.mulf %11, %11 : vector<1x1280xf32>
    %18 = arith.subf %16, %17 : vector<1x1280xf32>
    %cst_10 = arith.constant 0.000000e+00 : f32
    %19 = vector.broadcast %cst_10 : f32 to vector<1x1280xf32>
    %20 = arith.maximumf %18, %19 : vector<1x1280xf32>
    %21 = vector.broadcast %11 : vector<1x1280xf32> to vector<2x1280xf32>
    %22 = arith.subf %7, %21 : vector<2x1280xf32>
    %cst_11 = arith.constant 9.99999974E-6 : f32
    %23 = vector.broadcast %cst_11 : f32 to vector<1x1280xf32>
    %24 = arith.addf %20, %23 : vector<1x1280xf32>
    %25 = math.rsqrt %24 : vector<1x1280xf32>
    %26 = vector.broadcast %25 : vector<1x1280xf32> to vector<2x1280xf32>
    %27 = arith.mulf %22, %26 : vector<2x1280xf32>
    %c0_12 = arith.constant 0 : index
    %c0_13 = arith.constant 0 : index
    %28 = vector.load %arg2[%c0_12, %c0_13] : memref<1x1280xf32, #tpu.memory_space<vmem>>, vector<1x1280xf32>
    %29 = vector.broadcast %28 : vector<1x1280xf32> to vector<2x1280xf32>
    %30 = arith.mulf %27, %29 : vector<2x1280xf32>
    %c0_14 = arith.constant 0 : index
    %c0_15 = arith.constant 0 : index
    %31 = vector.load %arg3[%c0_14, %c0_15] : memref<1x1280xf32, #tpu.memory_space<vmem>>, vector<1x1280xf32>
    %32 = vector.broadcast %31 : vector<1x1280xf32> to vector<2x1280xf32>
    %33 = arith.addf %30, %32 : vector<2x1280xf32>
    %cst_16 = arith.constant 0.000000e+00 : f32
    %34 = vector.broadcast %cst_16 : f32 to vector<2x1280xf32>
    %35 = arith.maximumf %33, %34 : vector<2x1280xf32>
    %36 = arith.truncf %35 : vector<2x1280xf32> to vector<2x1280xbf16>
    %c0_17 = arith.constant 0 : index
    %c0_18 = arith.constant 0 : index
    %37 = vector.load %arg4[%c0_17, %c0_18] : memref<1280x128xbf16, #tpu.memory_space<vmem>>, vector<1280x128xbf16>
    %cst_19 = arith.constant dense<0.000000e+00> : vector<2x128xf32>
    %38 = tpu.matmul %36, %37, %cst_19 {dimension_numbers = #tpu.dot_dimension_numbers<[1], [0], [0], [1], [0, 0, 1, 1], [], []>} : vector<2x1280xbf16>, vector<1280x128xbf16>, vector<2x128xf32> -> vector<2x128xf32>
    %c0_20 = arith.constant 0 : index
    %c0_21 = arith.constant 0 : index
    %39 = vector.load %arg5[%c0_20, %c0_21] : memref<1x128xf32, #tpu.memory_space<vmem>>, vector<1x128xf32>
    %40 = vector.broadcast %39 : vector<1x128xf32> to vector<2x128xf32>
    %41 = arith.addf %38, %40 : vector<2x128xf32>
    %c0_22 = arith.constant 0 : index
    %c0_23 = arith.constant 0 : index
    %42 = vector.load %arg6[%c0_22, %c0_23] : memref<2x128xf32, #tpu.memory_space<vmem>>, vector<2x128xf32>
    tpu.vector_store %arg6[%c0_22, %c0_23], %41 {strides = array<i32>} : memref<2x128xf32, #tpu.memory_space<vmem>>, vector<2x128xf32>,
    return
  }
}

</mosaic_0001>

<bundles_post_ra>
// kernel: mobilenetv4_forward.20
= control target key start
LH: loop header
LB: loop body
LE: loop exit
PB: predicated region body
PF: predicated region fallthrough
CT: control target
= control target key end

     0   :  { %s687_s1 = inlined_call_operand.vmem [shape: bf16[128,128], index: 1, kind: input, shape index: {}]   ;;  %s688_s0 = inlined_call_operand.vmem [shape: bf16[128,128], index: 0, kind: input, shape index: {}]   ;;  %s689_s2 = inlined_call_operand.vmem [shape: f32[1,128], index: 2, kind: input, shape index: {}]   ;;  %s690_s3 = inlined_call_operand.vmem [shape: f32[1,128], index: 3, kind: input, shape index: {}]   ;;  %s691_s4 = inlined_call_operand.vmem [shape: bf16[128,128], index: 4, kind: output, shape index: {}]  }
   0x1   :  { %v550_v0 = vld [vmem:[%s687_s1 + $0x38] sm:$0xff]   ;;  %v551_v1 = vld [vmem:[%s687_s1 + $0x30] sm:$0xff]   ;;  %v552_v2 = vld [vmem:[%s687_s1 + $0x28] sm:$0xff]  }
   0x2   :  { %502 = vmatprep.subr.bf16.mxu0 %v550_v0  ;;  %534 = vmatprep.subr.bf16.mxu1 %v550_v0  ;;  %v553_v3 = vld [vmem:[%s687_s1 + $0x20] sm:$0xff]   ;;  %v554_v6 = vld [vmem:[%s687_s1 + $0x18] sm:$0xff]   ;;  %v555_v7 = vld [vmem:[%s687_s1 + $0x10] sm:$0xff]  }
   0x3   :  { %503 = vmatpush3.bf16.msra.mxu0 %v550_v0  ;;  %542 = vmatpush3.bf16.msra.mxu1 %v550_v0  ;;  %v558_v4 = vld [vmem:[%s688_s0] sm:$0xff]   ;;  %v556_v8 = vld [vmem:[%s687_s1 + $0x8] sm:$0xff]   ;;  %v562_v12 = vld [vmem:[%s688_s0 + $0x10] sm:$0xff]  }
   0x4   :  { %504 = vmatprep.subr.bf16.mxu0 %v551_v1  ;;  %535 = vmatprep.subr.bf16.mxu1 %v551_v1  ;;  %v559_v5 = vld [vmem:[%s688_s0 + $0x20] sm:$0xff]   ;;  %v560_v10 = vld [vmem:[%s688_s0 + $0x8] sm:$0xff]   ;;  %v563_v13 = vld [vmem:[%s688_s0 + $0x30] sm:$0xff]  }
   0x5   :  { %518 = vmatprep.mubr.bf16.mxu0 %v558_v4  ;;  %526 = vmatprep.mubr.bf16.mxu1 %v559_v5  ;;  %v557_v9 = vld [vmem:[%s687_s1] sm:$0xff]   ;;  %v561_v11 = vld [vmem:[%s688_s0 + $0x28] sm:$0xff]   ;;  %v564_v14 = vld [vmem:[%s688_s0 + $0x18] sm:$0xff]  }
   0x6   :  { %v565_v15 = vld [vmem:[%s688_s0 + $0x38] sm:$0xff]   ;;  %v642_v16 = vld [vmem:[%s689_s2] ss:$0 sm:$0xff] }
   0x7   :  { %505 = vmatpush3.bf16.msra.mxu0 %v551_v1  ;;  %543 = vmatpush3.bf16.msra.mxu1 %v551_v1  ;;  %v406_v21 = vld [vmem:[%s690_s3] ss:$0 sm:$0xff] }
   0x8   :  { %506 = vmatprep.subr.bf16.mxu0 %v552_v2  ;;  %536 = vmatprep.subr.bf16.mxu1 %v552_v2 }
   0xb   :  { %507 = vmatpush3.bf16.msra.mxu0 %v552_v2  ;;  %544 = vmatpush3.bf16.msra.mxu1 %v552_v2 }
   0xc   :  { %508 = vmatprep.subr.bf16.mxu0 %v553_v3  ;;  %537 = vmatprep.subr.bf16.mxu1 %v553_v3 }
   0xf   :  { %509 = vmatpush3.bf16.msra.mxu0 %v553_v3  ;;  %545 = vmatpush3.bf16.msra.mxu1 %v553_v3 }
  0x10   :  { %510 = vmatprep.subr.bf16.mxu0 %v554_v6  ;;  %538 = vmatprep.subr.bf16.mxu1 %v554_v6 }
  0x13   :  { %511 = vmatpush3.bf16.msra.mxu0 %v554_v6  ;;  %546 = vmatpush3.bf16.msra.mxu1 %v554_v6 }
  0x14   :  { %512 = vmatprep.subr.bf16.mxu0 %v555_v7  ;;  %539 = vmatprep.subr.bf16.mxu1 %v555_v7 }
  0x17   :  { %513 = vmatpush3.bf16.msra.mxu0 %v555_v7  ;;  %547 = vmatpush3.bf16.msra.mxu1 %v555_v7 }
  0x18   :  { %514 = vmatprep.subr.bf16.mxu0 %v556_v8  ;;  %540 = vmatprep.subr.bf16.mxu1 %v556_v8 }
  0x1b   :  { %515 = vmatpush3.bf16.msra.mxu0 %v556_v8  ;;  %548 = vmatpush3.bf16.msra.mxu1 %v556_v8 }
  0x1c   :  { %516 = vmatprep.subr.bf16.mxu0 %v557_v9  ;;  %541 = vmatprep.subr.bf16.mxu1 %v557_v9 }
  0x1f   :  { %517 = vmatpush3.bf16.msra.mxu0 %v557_v9  ;;  %549 = vmatpush3.bf16.msra.mxu1 %v557_v9 }
  0x22   :  { %519 = vmatmul.mubr.bf16.vlgmr.msra.gmra.mxu0 %v560_v10  ;;  %527 = vmatmul.mubr.bf16.vlgmr.msra.gmra.mxu1 %v561_v11 }
  0x23   :  { %522 = vmatprep.mubr.bf16.mxu0 %v562_v12  ;;  %530 = vmatprep.mubr.bf16.mxu1 %v563_v13 }
  0x2a   :  { %523 = vmatmul.mubr.bf16.gmra.mxu0 %v564_v14  ;;  %531 = vmatmul.mubr.bf16.gmra.mxu1 %v565_v15 }
  0xe2   :  { %v520_v17 = vpop.f32.mrf.mxu0  ;;  %v528_v18 = vpop.f32.mrf.mxu1 }
  0xe3   :  { %v252_v19 = vmul.f32 %v520_v17, %v642_v16  ;;  %v260_v20 = vmul.f32 %v528_v18, %v642_v16 }
  0xe4   :  { %v180_v22 = vpop.f32.mrf.mxu0  ;;  %v212_v23 = vpop.f32.mrf.mxu1 }
  0xe5   :  { %v250_v24 = vmul.f32 %v642_v16, %v180_v22  ;;  %v258_v25 = vmul.f32 %v642_v16, %v212_v23  ;;  %v275_v28 = vadd.f32 %v406_v21, %v252_v19  ;;  %v283_v29 = vadd.f32 %v406_v21, %v260_v20 }
  0xe6   :  { %v521_v26 = vpop.f32.mrf.mxu0  ;;  %v529_v27 = vpop.f32.mrf.mxu1 }
  0xe7   :  { %v253_v30 = vmul.f32 %v521_v26, %v642_v16  ;;  %v261_v31 = vmul.f32 %v529_v27, %v642_v16  ;;  %v273_v34 = vadd.f32 %v406_v21, %v250_v24  ;;  %v281_v35 = vadd.f32 %v406_v21, %v258_v25 }
  0xe8   :  { %v183_v32 = vpop.f32.mrf.mxu0  ;;  %v215_v33 = vpop.f32.mrf.mxu1  ;;  %v291_v42 = vmax.f32 %v275_v28, 0.0  ;;  %v299_v43 = vmax.f32 %v283_v29, 0.0 }
  0xe9   :  { %v251_v36 = vmul.f32 %v642_v16, %v183_v32  ;;  %v259_v37 = vmul.f32 %v642_v16, %v215_v33  ;;  %v276_v38 = vadd.f32 %v406_v21, %v253_v30  ;;  %v284_v39 = vadd.f32 %v406_v21, %v261_v31 }
  0xea   :  { %v524_v40 = vpop.f32.mrf.mxu0  ;;  %v532_v41 = vpop.f32.mrf.mxu1  ;;  %v289_v52 = vmax.f32 %v273_v34, 0.0  ;;  %v297_v53 = vmax.f32 %v281_v35, 0.0 }
  0xeb   :  { %v274_v44 = vadd.f32 %v406_v21, %v251_v36  ;;  %v282_v45 = vadd.f32 %v406_v21, %v259_v37  ;;  %v292_v46 = vmax.f32 %v276_v38, 0.0  ;;  %v300_v47 = vmax.f32 %v284_v39, 0.0 }
  0xec   :  { %v256_v48 = vmul.f32 %v524_v40, %v642_v16  ;;  %v264_v49 = vmul.f32 %v532_v41, %v642_v16  ;;  %v196_v50 = vpop.f32.mrf.mxu0  ;;  %v228_v51 = vpop.f32.mrf.mxu1 }
  0xed   :  { %v290_v54 = vmax.f32 %v274_v44, 0.0  ;;  %v298_v55 = vmax.f32 %v282_v45, 0.0  ;;  %v447_v56 = vpack.c.bf16 %v292_v46, %v291_v42  ;;  %v467_v57 = vpack.c.bf16 %v300_v47, %v299_v43 }
  0xee   :  { %v254_v58 = vmul.f32 %v642_v16, %v196_v50  ;;  %v262_v59 = vmul.f32 %v642_v16, %v228_v51  ;;  %v525_v60 = vpop.f32.mrf.mxu0  ;;  %v533_v61 = vpop.f32.mrf.mxu1  ;;  %v279_v0 = vadd.f32 %v406_v21, %v256_v48  ;;  %v287_v1 = vadd.f32 %v406_v21, %v264_v49 }
  0xef   :  { %v442_v62 = vpack.c.bf16 %v290_v54, %v289_v52  ;;  %v462_v63 = vpack.c.bf16 %v298_v55, %v297_v53  ;;  %479 = vst [vmem:[%s691_s4 + $0x8] sm:$0xff] %v447_v56   ;;  %483 = vst [vmem:[%s691_s4 + $0x28] sm:$0xff] %v467_v57   ;;  %v257_v2 = vmul.f32 %v525_v60, %v642_v16 }
  0xf0   :  { %v265_v3 = vmul.f32 %v533_v61, %v642_v16  ;;  %v199_v4 = vpop.f32.mrf.mxu0  ;;  %v231_v5 = vpop.f32.mrf.mxu1  ;;  %v277_v6 = vadd.f32 %v406_v21, %v254_v58  ;;  %v285_v7 = vadd.f32 %v406_v21, %v262_v59  ;;  %v295_v14 = vmax.f32 %v279_v0, 0.0 }
  0xf1   :  { %443 = vst [vmem:[%s691_s4] sm:$0xff] %v442_v62   ;;  %482 = vst [vmem:[%s691_s4 + $0x20] sm:$0xff] %v462_v63   ;;  %v255_v8 = vmul.f32 %v642_v16, %v199_v4  ;;  %v263_v9 = vmul.f32 %v642_v16, %v231_v5  ;;  %v280_v10 = vadd.f32 %v406_v21, %v257_v2  ;;  %v303_v15 = vmax.f32 %v287_v1, 0.0 }
  0xf2   :  { %v288_v11 = vadd.f32 %v406_v21, %v265_v3  ;;  %v293_v19 = vmax.f32 %v277_v6, 0.0  ;;  %v301_v20 = vmax.f32 %v285_v7, 0.0 }
  0xf3   :  { %v278_v12 = vadd.f32 %v406_v21, %v255_v8  ;;  %v286_v13 = vadd.f32 %v406_v21, %v263_v9  ;;  %v296_v17 = vmax.f32 %v280_v10, 0.0 }
  0xf4   :  { %v304_v18 = vmax.f32 %v288_v11, 0.0 }
  0xf5   :  { %v294_v22 = vmax.f32 %v278_v12, 0.0  ;;  %v302_v23 = vmax.f32 %v286_v13, 0.0  ;;  %v457_v24 = vpack.c.bf16 %v296_v17, %v295_v14 }
  0xf6   :  { %v477_v25 = vpack.c.bf16 %v304_v18, %v303_v15 }
  0xf7   :  { %v452_v26 = vpack.c.bf16 %v294_v22, %v293_v19  ;;  %v472_v27 = vpack.c.bf16 %v302_v23, %v301_v20  ;;  %481 = vst [vmem:[%s691_s4 + $0x18] sm:$0xff] %v457_v24  }
  0xf8   :  { %485 = vst [vmem:[%s691_s4 + $0x38] sm:$0xff] %v477_v25  }
  0xf9   :  { %480 = vst [vmem:[%s691_s4 + $0x10] sm:$0xff] %v452_v26   ;;  %484 = vst [vmem:[%s691_s4 + $0x30] sm:$0xff] %v472_v27  }

// kernel: mobilenetv4_forward.19
= control target key start
LH: loop header
LB: loop body
LE: loop exit
PB: predicated region body
PF: predicated region fallthrough
CT: control target
= control target key end

     0   :  { %v414_v16 = vmov 0.0   ;;  %s501_s1 = inlined_call_operand.vmem [shape: bf16[128,128], index: 1, kind: input, shape index: {}]   ;;  %s502_s0 = inlined_call_operand.vmem [shape: bf16[128,128], index: 0, kind: input, shape index: {}]   ;;  %s503_s2 = inlined_call_operand.vmem [shape: f32[1,128], index: 2, kind: output, shape index: {0}]   ;;  %s504_s3 = inlined_call_operand.vmem [shape: f32[1,128], index: 3, kind: output, shape index: {1}]  }
   0x1   :  { %v398_v0 = vld [vmem:[%s501_s1 + $0x38] sm:$0xff]   ;;  %v399_v1 = vld [vmem:[%s501_s1 + $0x30] sm:$0xff]   ;;  %v400_v2 = vld [vmem:[%s501_s1 + $0x28] sm:$0xff]   ;;  %18 = vst [vmem:[%s503_s2] sm:$0x1] %v414_v16 }
   0x2   :  { %349 = vmatprep.subr.bf16.mxu0 %v398_v0  ;;  %381 = vmatprep.subr.bf16.mxu1 %v398_v0  ;;  %v401_v3 = vld [vmem:[%s501_s1 + $0x20] sm:$0xff]   ;;  %v402_v5 = vld [vmem:[%s501_s1 + $0x18] sm:$0xff]   ;;  %v403_v7 = vld [vmem:[%s501_s1 + $0x10] sm:$0xff]   ;;  %19 = vst [vmem:[%s504_s3] sm:$0x1] %v414_v16 }
   0x3   :  { %350 = vmatpush3.bf16.msra.mxu0 %v398_v0  ;;  %389 = vmatpush3.bf16.msra.mxu1 %v398_v0  ;;  %v406_v4 = vld [vmem:[%s502_s0] sm:$0xff]   ;;  %v404_v8 = vld [vmem:[%s501_s1 + $0x8] sm:$0xff]   ;;  %v408_v12 = vld [vmem:[%s502_s0 + $0x10] sm:$0xff]  }
   0x4   :  { %351 = vmatprep.subr.bf16.mxu0 %v399_v1  ;;  %382 = vmatprep.subr.bf16.mxu1 %v399_v1  ;;  %v410_v6 = vld [vmem:[%s502_s0 + $0x20] sm:$0xff]   ;;  %v407_v10 = vld [vmem:[%s502_s0 + $0x8] sm:$0xff]   ;;  %v412_v13 = vld [vmem:[%s502_s0 + $0x30] sm:$0xff]  }
   0x5   :  { %365 = vmatprep.mubr.bf16.mxu0 %v406_v4  ;;  %373 = vmatprep.mubr.bf16.mxu1 %v410_v6  ;;  %v405_v9 = vld [vmem:[%s501_s1] sm:$0xff]   ;;  %v411_v11 = vld [vmem:[%s502_s0 + $0x28] sm:$0xff]   ;;  %v409_v14 = vld [vmem:[%s502_s0 + $0x18] sm:$0xff]  }
   0x6   :  { %v413_v15 = vld [vmem:[%s502_s0 + $0x38] sm:$0xff]  }
   0x7   :  { %352 = vmatpush3.bf16.msra.mxu0 %v399_v1  ;;  %390 = vmatpush3.bf16.msra.mxu1 %v399_v1 }
   0x8   :  { %353 = vmatprep.subr.bf16.mxu0 %v400_v2  ;;  %383 = vmatprep.subr.bf16.mxu1 %v400_v2 }
   0xb   :  { %354 = vmatpush3.bf16.msra.mxu0 %v400_v2  ;;  %391 = vmatpush3.bf16.msra.mxu1 %v400_v2 }
   0xc   :  { %355 = vmatprep.subr.bf16.mxu0 %v401_v3  ;;  %384 = vmatprep.subr.bf16.mxu1 %v401_v3 }
   0xf   :  { %356 = vmatpush3.bf16.msra.mxu0 %v401_v3  ;;  %392 = vmatpush3.bf16.msra.mxu1 %v401_v3 }
  0x10   :  { %357 = vmatprep.subr.bf16.mxu0 %v402_v5  ;;  %385 = vmatprep.subr.bf16.mxu1 %v402_v5 }
  0x13   :  { %358 = vmatpush3.bf16.msra.mxu0 %v402_v5  ;;  %393 = vmatpush3.bf16.msra.mxu1 %v402_v5 }
  0x14   :  { %359 = vmatprep.subr.bf16.mxu0 %v403_v7  ;;  %386 = vmatprep.subr.bf16.mxu1 %v403_v7 }
  0x17   :  { %360 = vmatpush3.bf16.msra.mxu0 %v403_v7  ;;  %394 = vmatpush3.bf16.msra.mxu1 %v403_v7 }
  0x18   :  { %361 = vmatprep.subr.bf16.mxu0 %v404_v8  ;;  %387 = vmatprep.subr.bf16.mxu1 %v404_v8 }
  0x1b   :  { %362 = vmatpush3.bf16.msra.mxu0 %v404_v8  ;;  %395 = vmatpush3.bf16.msra.mxu1 %v404_v8 }
  0x1c   :  { %363 = vmatprep.subr.bf16.mxu0 %v405_v9  ;;  %388 = vmatprep.subr.bf16.mxu1 %v405_v9 }
  0x1f   :  { %364 = vmatpush3.bf16.msra.mxu0 %v405_v9  ;;  %396 = vmatpush3.bf16.msra.mxu1 %v405_v9 }
  0x22   :  { %366 = vmatmul.mubr.bf16.vlgmr.msra.gmra.mxu0 %v407_v10  ;;  %374 = vmatmul.mubr.bf16.vlgmr.msra.gmra.mxu1 %v411_v11 }
  0x23   :  { %369 = vmatprep.mubr.bf16.mxu0 %v408_v12  ;;  %377 = vmatprep.mubr.bf16.mxu1 %v412_v13 }
  0x2a   :  { %370 = vmatmul.mubr.bf16.gmra.mxu0 %v409_v14  ;;  %378 = vmatmul.mubr.bf16.gmra.mxu1 %v413_v15 }
  0xe2   :  { %v367_v17 = vpop.f32.mrf.mxu0  ;;  %v375_v18 = vpop.f32.mrf.mxu1 }
  0xe3   :  { %v272_v28 = vmul.f32 %v367_v17, %v367_v17  ;;  %v280_v59 = vmul.f32 %v375_v18, %v375_v18 }
  0xe4   :  { %v182_v19 = vpop.f32.mrf.mxu0  ;;  %v214_v21 = vpop.f32.mrf.mxu1 }
  0xe5   :  { %v270_v23 = vmul.f32 %v182_v19, %v182_v19  ;;  %v278_v52 = vmul.f32 %v214_v21, %v214_v21 }
  0xe6   :  { %v368_v20 = vpop.f32.mrf.mxu0  ;;  %v376_v27 = vpop.f32.mrf.mxu1 }
  0xe7   :  { %v273_v32 = vmul.f32 %v368_v20, %v368_v20  ;;  %v281_v62 = vmul.f32 %v376_v27, %v376_v27 }
  0xe8   :  { %v185_v22 = vpop.f32.mrf.mxu0  ;;  %v217_v36 = vpop.f32.mrf.mxu1 }
  0xe9   :  { %v246_v24 = vadd.f32 %v185_v22, %v182_v19  ;;  %v271_v25 = vmul.f32 %v185_v22, %v185_v22  ;;  %v279_v56 = vmul.f32 %v217_v36, %v217_v36 }
  0xea   :  { %v371_v26 = vpop.f32.mrf.mxu0  ;;  %v379_v44 = vpop.f32.mrf.mxu1 }
  0xeb   :  { %v247_v29 = vadd.f32 %v367_v17, %v246_v24  ;;  %v286_v30 = vadd.f32 %v271_v25, %v270_v23  ;;  %v276_v45 = vmul.f32 %v371_v26, %v371_v26  ;;  %v284_v8 = vmul.f32 %v379_v44, %v379_v44  ;;  %v245_v24 = vld [vmem:[%s503_s2] sm:$0x1] }
  0xec   :  { %v198_v31 = vpop.f32.mrf.mxu0  ;;  %v230_v51 = vpop.f32.mrf.mxu1 }
  0xed   :  { %v287_v33 = vadd.f32 %v286_v30, %v272_v28  ;;  %v248_v34 = vadd.f32 %v368_v20, %v247_v29  ;;  %v274_v38 = vmul.f32 %v198_v31, %v198_v31  ;;  %v282_v3 = vmul.f32 %v230_v51, %v230_v51 }
  0xee   :  { %v372_v35 = vpop.f32.mrf.mxu0  ;;  %v380_v58 = vpop.f32.mrf.mxu1 }
  0xef   :  { %v249_v37 = vadd.f32 %v248_v34, %v198_v31  ;;  %v288_v39 = vadd.f32 %v287_v33, %v273_v32  ;;  %v277_v48 = vmul.f32 %v372_v35, %v372_v35  ;;  %v285_v11 = vmul.f32 %v380_v58, %v380_v58 }
  0xf0   :  { %v201_v40 = vpop.f32.mrf.mxu0  ;;  %v233_v1 = vpop.f32.mrf.mxu1 }
  0xf1   :  { %v289_v41 = vadd.f32 %v288_v39, %v274_v38  ;;  %v250_v42 = vadd.f32 %v249_v37, %v201_v40  ;;  %v275_v43 = vmul.f32 %v201_v40, %v201_v40  ;;  %v283_v7 = vmul.f32 %v233_v1, %v233_v1 }
  0xf3   :  { %v251_v46 = vadd.f32 %v371_v26, %v250_v42  ;;  %v290_v47 = vadd.f32 %v289_v41, %v275_v43 }
  0xf5   :  { %v252_v49 = vadd.f32 %v372_v35, %v251_v46  ;;  %v291_v50 = vadd.f32 %v290_v47, %v276_v45 }
  0xf7   :  { %v292_v53 = vadd.f32 %v291_v50, %v277_v48  ;;  %v253_v54 = vadd.f32 %v252_v49, %v214_v21 }
  0xf9   :  { %v254_v55 = vadd.f32 %v253_v54, %v217_v36  ;;  %v293_v57 = vadd.f32 %v292_v53, %v278_v52 }
  0xfb   :  { %v255_v60 = vadd.f32 %v375_v18, %v254_v55  ;;  %v294_v61 = vadd.f32 %v293_v57, %v279_v56 }
  0xfd   :  { %v295_v63 = vadd.f32 %v294_v61, %v280_v59  ;;  %v256_v0 = vadd.f32 %v376_v27, %v255_v60  ;;  %v269_v27 = vld [vmem:[%s504_s3] sm:$0x1] }
  0xff   :  { %v257_v2 = vadd.f32 %v256_v0, %v230_v51  ;;  %v296_v4 = vadd.f32 %v295_v63, %v281_v62 }
 0x101   :  { %v297_v5 = vadd.f32 %v296_v4, %v282_v3  ;;  %v258_v6 = vadd.f32 %v257_v2, %v233_v1 }
 0x103   :  { %v259_v9 = vadd.f32 %v379_v44, %v258_v6  ;;  %v298_v10 = vadd.f32 %v297_v5, %v283_v7 }
 0x105   :  { %v260_v12 = vadd.f32 %v380_v58, %v259_v9  ;;  %v299_v13 = vadd.f32 %v298_v10, %v284_v8 }
 0x107   :  { %v261_v14 = vrot.slane %v260_v12, 4  ;;  %v300_v15 = vadd.f32 %v299_v13, %v285_v11 }
 0x109   :  { %v262_v16 = vadd.f32 %v261_v14, %v260_v12  ;;  %v301_v17 = vrot.slane %v300_v15, 4 }
 0x10b   :  { %v263_v18 = vrot.slane %v262_v16, 2  ;;  %v302_v19 = vadd.f32 %v301_v17, %v300_v15 }
 0x10d   :  { %v264_v20 = vadd.f32 %v263_v18, %v262_v16  ;;  %v303_v21 = vrot.slane %v302_v19, 2 }
 0x10f   :  { %v265_v22 = vrot.slane %v264_v20, 1  ;;  %v304_v23 = vadd.f32 %v303_v21, %v302_v19 }
 0x111   :  { %v266_v25 = vadd.f32 %v265_v22, %v264_v20  ;;  %v305_v26 = vrot.slane %v304_v23, 1 }
 0x113   :  { %v267_v28 = vadd.f32 %v266_v25, %v245_v24  ;;  %v306_v29 = vadd.f32 %v305_v26, %v304_v23 }
 0x115   :  { %268 = vst [vmem:[%s503_s2] sm:$0x1] %v267_v28  ;;  %v307_v30 = vadd.f32 %v306_v29, %v269_v27 }
 0x117   :  { %308 = vst [vmem:[%s504_s3] sm:$0x1] %v307_v30 }

// kernel: mobilenetv4_forward.21
= control target key start
LH: loop header
LB: loop body
LE: loop exit
PB: predicated region body
PF: predicated region fallthrough
CT: control target
= control target key end

     0   :  { %v51_v0 = vlaneseq  ;;  %vm187_vm0 = vcmask 1046528   ;;  %vm370_vm1 = vcmask 1045504   ;;  %s3486_s0 = inlined_call_operand.vmem [shape: bf16[2,10,10,128], index: 0, kind: input, shape index: {}]   ;;  %s3487_s1 = inlined_call_operand.vmem [shape: bf16[9,128], index: 1, kind: input, shape index: {}]   ;;  %s3488_s2 = inlined_call_operand.vmem [shape: f32[1,128], index: 2, kind: input, shape index: {}]   ;;  %s3489_s3 = inlined_call_operand.vmem [shape: f32[1,128], index: 3, kind: input, shape index: {}]   ;;  %s3490_s4 = inlined_call_operand.vmem [shape: bf16[2,8,8,128], index: 4, kind: output, shape index: {}]  }
   0x1   :  { %v1639_v1 = vld [vmem:[%s3486_s0] ss:$8 sps:$4 sm:$0xff]   ;;  %v1644_v2 = vld [vmem:[%s3486_s0 + $0x10] ss:$8 sps:$4 sm:$0xff]   ;;  %v1690_v15 = vld [vmem:[%s3486_s0 + $0x4] sm:$0x1] }
   0x2   :  { %v1649_v3 = vld [vmem:[%s3486_s0 + $0x20] ss:$8 sps:$4 sm:$0xff]   ;;  %v1654_v4 = vld [vmem:[%s3486_s0 + $0x30] ss:$8 sps:$4 sm:$0xff]   ;;  %v1676_v9 = vshrl.u32 %v51_v0, 7  ;;  %v33_v10 = vunpack.c.l.bf16 %v1639_v1  ;;  %v3503_v11 = vunpack.c.h.bf16 %v1639_v1  ;;  %v3500_v12 = vunpack.c.l.bf16 %v1644_v2  ;;  %3629 = vst [vmem:[#allocation2_spill] sm:$0xff] %v1690_v15 }
   0x3   :  { %v1659_v5 = vld [vmem:[%s3486_s0 + $0x50] ss:$8 sps:$4 sm:$0xff]   ;;  %v1664_v6 = vld [vmem:[%s3486_s0 + $0x60] ss:$8 sps:$4 sm:$0xff]   ;;  %v3499_v13 = vunpack.c.h.bf16 %v1644_v2  ;;  %v1695_v16 = vld [vmem:[%s3486_s0 + $0xc] sm:$0x1]  ;;  %v3494_v17 = vunpack.c.l.bf16 %v1649_v3  ;;  %v3493_v18 = vunpack.c.h.bf16 %v1649_v3  ;;  %v3491_v19 = vunpack.c.l.bf16 %v1654_v4 }
   0x4   :  { %v1669_v7 = vld [vmem:[%s3486_s0 + $0x70] ss:$8 sps:$4 sm:$0xff]   ;;  %v1674_v8 = vld [vmem:[%s3486_s0 + $0x80] ss:$8 sps:$4 sm:$0xff]   ;;  %3630 = vst [vmem:[#allocation3_spill] sm:$0xff] %v1695_v16  ;;  %v1701_v20 = vsub.s32 0, %v1676_v9  ;;  %v3492_v23 = vunpack.c.h.bf16 %v1654_v4  ;;  %v3495_v24 = vunpack.c.l.bf16 %v1659_v5  ;;  %v3496_v25 = vunpack.c.h.bf16 %v1659_v5 }
   0x5   :  { %v1685_v14 = vld [vmem:[%s3487_s1] sm:$0x1]  ;;  %v1706_v21 = vld [vmem:[%s3486_s0 + $0x14] sm:$0x1]  ;;  %v1711_v22 = vld [vmem:[%s3486_s0 + $0x1c] sm:$0x1]  ;;  %v3497_v26 = vunpack.c.l.bf16 %v1664_v6  ;;  %v3498_v30 = vunpack.c.h.bf16 %v1664_v6  ;;  %v3501_v31 = vunpack.c.l.bf16 %v1669_v7  ;;  %v3502_v32 = vunpack.c.h.bf16 %v1669_v7 }
   0x6   :  { %3631 = vst [vmem:[#allocation4_spill] sm:$0xff] %v1701_v20  ;;  %3632 = vst [vmem:[#allocation5_spill] sm:$0xff] %v1706_v21  ;;  %v1720_v27 = vld [vmem:[%s3486_s0 + $0x24] sm:$0x1]  ;;  %v1725_v28 = vld [vmem:[%s3486_s0 + $0x2c] sm:$0x1]  ;;  %v50_v33 = vunpack.c.l.bf16 %v1685_v14  ;;  %v3504_v37 = vunpack.c.l.bf16 %v1674_v8  ;;  %v3505_v38 = vunpack.c.h.bf16 %v1674_v8  ;;  %v3660_v48 = vunpack.c.h.bf16 %v1639_v1 }
   0x7   :  { %3633 = vst [vmem:[#allocation6_spill] sm:$0xff] %v1711_v22  ;;  %3634 = vst [vmem:[#allocation7_spill] sm:$0xff] %v1720_v27  ;;  %v1730_v29 = vld [vmem:[%s3486_s0 + $0x34] sm:$0x1]  ;;  %v1739_v34 = vld [vmem:[%s3486_s0 + $0x3c] sm:$0x1]  ;;  %v3662_v43 = vunpack.c.l.bf16 %v1644_v2  ;;  %v3665_v42 = vunpack.c.l.bf16 %v1711_v22  ;;  %v3667_v1 = vunpack.c.l.bf16 %v1720_v27 }
   0x8   :  { %3635 = vst [vmem:[#allocation8_spill] sm:$0xff] %v1725_v28  ;;  %3636 = vst [vmem:[#allocation9_spill] sm:$0xff] %v1730_v29  ;;  %v1744_v35 = vld [vmem:[%s3486_s0 + $0x54] sm:$0x1]  ;;  %v1749_v36 = vld [vmem:[%s3486_s0 + $0x5c] sm:$0x1]  ;;  %v54_v44 = vrot.slane %v50_v33, %v1701_v20 }
   0x9   :  { %3637 = vst [vmem:[#allocation10_spill] sm:$0xff] %v1739_v34  ;;  %3638 = vst [vmem:[#allocation11_spill] sm:$0xff] %v1744_v35  ;;  %v1756_v39 = vld [vmem:[%s3486_s0 + $0x64] sm:$0x1]  ;;  %v1761_v40 = vld [vmem:[%s3486_s0 + $0x6c] sm:$0x1] }
   0xa   :  { %3639 = vst [vmem:[#allocation12_spill] sm:$0xff] %v1749_v36  ;;  %3640 = vst [vmem:[#allocation13_spill] sm:$0xff] %v1756_v39  ;;  %v1766_v41 = vld [vmem:[%s3486_s0 + $0x74] sm:$0x1]  ;;  %v1774_v45 = vld [vmem:[%s3486_s0 + $0x7c] sm:$0x1]  ;;  %v1818_v54 = vmul.f32 %v54_v44, %v33_v10  ;;  %v1825_v53 = vmul.f32 %v54_v44, %v3503_v11  ;;  %v1829_v63 = vmul.f32 %v54_v44, %v3500_v12  ;;  %v3661_v12 = vunpack.c.l.bf16 %v1695_v16 }
   0xb   :  { %3641 = vst [vmem:[#allocation14_spill] sm:$0xff] %v1761_v40  ;;  %3642 = vst [vmem:[#allocation15_spill] sm:$0xff] %v1766_v41  ;;  %v1779_v46 = vld [vmem:[%s3486_s0 + $0x84] sm:$0x1]  ;;  %v1784_v47 = vld [vmem:[%s3486_s0 + $0x8c] sm:$0x1]  ;;  %v1833_v14 = vmul.f32 %v54_v44, %v3499_v13  ;;  %v1837_v0 = vmul.f32 %v54_v44, %v3494_v17  ;;  %v1846_v59 = vmul.f32 %v54_v44, %v3493_v18  ;;  %v3664_v11 = vunpack.c.h.bf16 %v1644_v2 }
   0xc   :  { %3643 = vst [vmem:[#allocation16_spill] sm:$0xff] %v1774_v45  ;;  %3644 = vst [vmem:[#allocation17_spill] sm:$0xff] %v1779_v46  ;;  %v1796_v55 = vld [vmem:[%s3486_s0] sm:$0xe]  ;;  %v1801_v56 = vld [vmem:[%s3486_s0 + $0x8] sm:$0xe]  ;;  %v1850_v58 = vmul.f32 %v54_v44, %v3491_v19  ;;  %v1854_v62 = vmul.f32 %v54_v44, %v3492_v23  ;;  %v1873_v23 = vmul.f32 %v54_v44, %v3495_v24  ;;  %v3671_v2 = vunpack.c.l.bf16 %v1730_v29 }
   0xd   :  { %3645 = vst [vmem:[#allocation18_spill] sm:$0xff] %v1784_v47  ;;  %3646 = vst [vmem:[#allocation19_spill] sm:$0xff] %v1796_v55  ;;  %v1806_v57 = vld [vmem:[%s3486_s0 + $0x10] sm:$0xe]  ;;  %v121_v61 = vsub.s32 1, %v1676_v9  ;;  %v1885_v18 = vmul.f32 %v54_v44, %v3498_v30  ;;  %v1908_v30 = vmul.f32 %v54_v44, %v3502_v32  ;;  %v1912_v49 = vmul.f32 %v54_v44, %v3504_v37 }
   0xe   :  { %3647 = vst [vmem:[#allocation20_spill] sm:$0xff] %v1801_v56  ;;  %3648 = vst [vmem:[#allocation21_spill] sm:$0xff] %v1806_v57  ;;  %v1842_v60 = vld [vmem:[%s3486_s0 + $0x18] sm:$0xe]  ;;  %v1859_v51 = vld [vmem:[%s3486_s0 + $0x20] sm:$0xe]  ;;  %v1916_v13 = vmul.f32 %v54_v44, %v3505_v38 }
   0xf   :  { %3649 = vst [vmem:[#allocation22_spill] sm:$0xff] %v1842_v60  ;;  %v122_v52 = vrot.slane %v50_v33, %v121_v61  ;;  %3650 = vst [vmem:[#allocation23_spill] sm:$0xff] %v1859_v51  ;;  %v1864_v50 = vld [vmem:[%s3486_s0 + $0x28] sm:$0xe]  ;;  %v1869_v19 = vld [vmem:[%s3486_s0 + $0x30] sm:$0xe]  ;;  %v1877_v33 = vmul.f32 %v54_v44, %v3496_v25  ;;  %v1881_v61 = vmul.f32 %v54_v44, %v3497_v26 }
  0x10   :  { %3651 = vst [vmem:[#allocation24_spill] sm:$0xff] %v1864_v50  ;;  %3652 = vst [vmem:[#allocation25_spill] sm:$0xff] %v1869_v19  ;;  %v1890_v17 = vld [vmem:[%s3486_s0 + $0x38] sm:$0xe]  ;;  %v1895_v24 = vld [vmem:[%s3486_s0 + $0x50] sm:$0xe]  ;;  %v1904_v26 = vmul.f32 %v54_v44, %v3501_v31  ;;  %v3659_v44 = vunpack.c.l.bf16 %v1690_v15 }
  0x11   :  { %3653 = vst [vmem:[#allocation26_spill] sm:$0xff] %v1890_v17  ;;  %3654 = vst [vmem:[#allocation27_spill] sm:$0xff] %v1895_v24  ;;  %v1900_v25 = vld [vmem:[%s3486_s0 + $0x58] sm:$0xe]  ;;  %v123_v32 = vmul.f32 %v122_v52, %v33_v10  ;;  %v125_v20 = vmul.f32 %v122_v52, %v3660_v48  ;;  %v126_v31 = vmul.f32 %v122_v52, %v3661_v12  ;;  %v3663_v10 = vunpack.c.l.bf16 %v1706_v21 }
  0x12   :  { %3655 = vst [vmem:[#allocation28_spill] sm:$0xff] %v1900_v25  ;;  %3656 = vst [vmem:[#allocation29_spill] sm:$0xff] %v1908_v30  ;;  %v124_v38 = vmul.f32 %v122_v52, %v3659_v44  ;;  %v127_v19 = vmul.f32 %v122_v52, %v3662_v43  ;;  %v129_v37 = vmul.f32 %v122_v52, %v3664_v11  ;;  %v3666_v44 = vunpack.c.l.bf16 %v1649_v3 }
  0x13   :  { %3657 = vst [vmem:[#allocation30_spill] sm:$0xff] %v1912_v49  ;;  %3658 = vst [vmem:[#allocation31_spill] sm:$0xff] %v1916_v13  ;;  %v128_v50 = vmul.f32 %v122_v52, %v3663_v10  ;;  %v130_v25 = vmul.f32 %v122_v52, %v3665_v42  ;;  %v132_v48 = vmul.f32 %v122_v52, %v3667_v1  ;;  %v3668_v12 = vunpack.c.h.bf16 %v1649_v3 }
  0x14   :  { %v131_v24 = vmul.f32 %v122_v52, %v3666_v44  ;;  %v3669_v43 = vunpack.c.l.bf16 %v1725_v28  ;;  %v3670_v10 = vunpack.c.l.bf16 %v1654_v4  ;;  %v136_v11 = vmul.f32 %v122_v52, %v3671_v2 }
  0x15   :  { %v133_v17 = vmul.f32 %v122_v52, %v3668_v12  ;;  %v3672_v42 = vunpack.c.h.bf16 %v1654_v4  ;;  %v3673_v44 = vunpack.c.l.bf16 %v1739_v34  ;;  %v3674_v1 = vunpack.c.l.bf16 %v1659_v5 }
  0x16   :  { %v134_v51 = vmul.f32 %v122_v52, %v3669_v43  ;;  %v135_v60 = vmul.f32 %v122_v52, %v3670_v10  ;;  %v3675_v3 = vunpack.c.l.bf16 %v1744_v35  ;;  %v3676_v43 = vunpack.c.h.bf16 %v1659_v5 }
  0x17   :  { %v137_v22 = vmul.f32 %v122_v52, %v3672_v42  ;;  %v138_v21 = vmul.f32 %v122_v52, %v3673_v44  ;;  %v139_v27 = vmul.f32 %v122_v52, %v3674_v1  ;;  %v3677_v10 = vunpack.c.l.bf16 %v1749_v36 }
  0x18   :  { %v140_v12 = vmul.f32 %v122_v52, %v3675_v3  ;;  %v141_v28 = vmul.f32 %v122_v52, %v3676_v43  ;;  %v3678_v2 = vunpack.c.l.bf16 %v1664_v6  ;;  %v3679_v4 = vunpack.c.l.bf16 %v1756_v39 }
  0x19   :  { %v142_v57 = vmul.f32 %v122_v52, %v3677_v10  ;;  %v3680_v44 = vunpack.c.h.bf16 %v1664_v6  ;;  %v188_v16 = vrot.slane %v123_v32, 1  ;;  %v189_v1 = vrot.slane %v124_v38, 1 }
  0x1a   :  { %v143_v29 = vmul.f32 %v122_v52, %v3678_v2  ;;  %v144_v42 = vmul.f32 %v122_v52, %v3679_v4  ;;  %v191_v56 = vrot.slane %v125_v20, 1  ;;  %v192_v35 = vrot.slane %v126_v31, 1 }
  0x1b   :  { %v145_v34 = vmul.f32 %v122_v52, %v3680_v44  ;;  %v194_v3 = vrot.slane %v127_v19, 1  ;;  %v195_v15 = vrot.slane %v128_v50, 1  ;;  %v3681_v5 = vunpack.c.l.bf16 %v1761_v40 }
  0x1c   :  { %v3682_v10 = vunpack.c.l.bf16 %v1669_v7  ;;  %v3683_v2 = vunpack.c.l.bf16 %v1766_v41  ;;  %v3684_v4 = vunpack.c.h.bf16 %v1669_v7  ;;  %v3685_v6 = vunpack.c.l.bf16 %v1774_v45 }
  0x1d   :  { %v146_v43 = vmul.f32 %v122_v52, %v3681_v5  ;;  %v3686_v20 = vunpack.c.l.bf16 %v1674_v8  ;;  %v3687_v19 = vunpack.c.l.bf16 %v1779_v46  ;;  %v3688_v50 = vunpack.c.h.bf16 %v1674_v8 }
  0x1e   :  { %v147_v36 = vmul.f32 %v122_v52, %v3682_v10  ;;  %v148_v55 = vmul.f32 %v122_v52, %v3683_v2  ;;  %v149_v39 = vmul.f32 %v122_v52, %v3684_v4  ;;  %v150_v32 = vmul.f32 %v122_v52, %v3685_v6 }
  0x1f   :  { %v151_v31 = vmul.f32 %v122_v52, %v3686_v20  ;;  %v152_v38 = vmul.f32 %v122_v52, %v3687_v19  ;;  %v153_v44 = vmul.f32 %v122_v52, %v3688_v50  ;;  %v3689_v5 = vunpack.c.l.bf16 %v1784_v47 }
  0x20   :  { %v190_v2 = vsel %vm187_vm0, %v188_v16, %v189_v1  ;;  %v197_v41 = vrot.slane %v129_v37, 1  ;;  %v198_v7 = vrot.slane %v130_v25, 1  ;;  %v193_v4 = vsel %vm187_vm0, %v191_v56, %v192_v35 }
  0x21   :  { %v154_v10 = vmul.f32 %v122_v52, %v3689_v5  ;;  %v196_v6 = vsel %vm187_vm0, %v194_v3, %v195_v15  ;;  %v200_v45 = vrot.slane %v131_v24, 1  ;;  %v201_v40 = vrot.slane %v132_v48, 1 }
  0x22   :  { %v203_v20 = vrot.slane %v133_v17, 1  ;;  %v204_v13 = vrot.slane %v134_v51, 1  ;;  %v206_v46 = vrot.slane %v135_v60, 1  ;;  %v207_v19 = vrot.slane %v136_v11, 1 }
  0x23   :  { %v209_v49 = vrot.slane %v137_v22, 1  ;;  %v210_v8 = vrot.slane %v138_v21, 1  ;;  %v212_v50 = vrot.slane %v139_v27, 1  ;;  %v213_v30 = vrot.slane %v140_v12, 1 }
  0x24   :  { %v215_v47 = vrot.slane %v141_v28, 1  ;;  %v216_v52 = vrot.slane %v142_v57, 1  ;;  %v218_v5 = vrot.slane %v143_v29, 1  ;;  %v219_v16 = vrot.slane %v144_v42, 1  ;;  %v2042_v42 = vld [vmem:[%s3486_s0 + $0x70] sm:$0xe] }
  0x25   :  { %v221_v37 = vrot.slane %v145_v34, 1  ;;  %v222_v25 = vrot.slane %v146_v43, 1  ;;  %v224_v1 = vrot.slane %v147_v36, 1  ;;  %v225_v35 = vrot.slane %v148_v55, 1  ;;  %v2001_v36 = vld [vmem:[%s3487_s1] sm:$0x2] }
  0x26   :  { %v227_v56 = vrot.slane %v149_v39, 1  ;;  %v228_v15 = vrot.slane %v150_v32, 1  ;;  %v230_v24 = vrot.slane %v151_v31, 1  ;;  %v231_v48 = vrot.slane %v152_v38, 1  ;;  %3690 = vst [vmem:[#allocation32_spill] sm:$0xff] %v2001_v36  ;;  %v3693_v38 = vld [vmem:[#allocation30_spill] sm:$0xff] }
  0x27   :  { %v199_v17 = vsel %vm187_vm0, %v197_v41, %v198_v7  ;;  %v202_v51 = vsel %vm187_vm0, %v200_v45, %v201_v40  ;;  %v205_v21 = vsel %vm187_vm0, %v203_v20, %v204_v13  ;;  %v208_v22 = vsel %vm187_vm0, %v206_v46, %v207_v19  ;;  %v2059_v43 = vld [vmem:[%s3486_s0 + $0x78] sm:$0xe]  ;;  %v2064_v32 = vld [vmem:[%s3486_s0 + $0x80] sm:$0xe]  ;;  %v2101_v20 = vld [vmem:[%s3486_s0 + $0x28] ss:$8 sps:$4 sm:$0xff]  }
  0x28   :  { %v211_v27 = vsel %vm187_vm0, %v209_v49, %v210_v8  ;;  %v214_v28 = vsel %vm187_vm0, %v212_v50, %v213_v30  ;;  %v233_v29 = vrot.slane %v153_v44, 1  ;;  %v234_v34 = vrot.slane %v154_v10, 1  ;;  %v2086_v10 = vld [vmem:[%s3486_s0 + $0x8] ss:$8 sps:$4 sm:$0xff]   ;;  %3699 = vst [vmem:[#allocation35_spill] sm:$0xff] %v2101_v20 }
  0x29   :  { %v217_v39 = vsel %vm187_vm0, %v215_v47, %v216_v52  ;;  %v220_v41 = vsel %vm187_vm0, %v218_v5, %v219_v16  ;;  %v223_v40 = vsel %vm187_vm0, %v221_v37, %v222_v25  ;;  %v226_v13 = vsel %vm187_vm0, %v224_v1, %v225_v35  ;;  %3695 = vst [vmem:[#allocation33_spill] sm:$0xff] %v2086_v10  ;;  %v2106_v19 = vld [vmem:[%s3486_s0 + $0x38] ss:$8 sps:$4 sm:$0xff]   ;;  %v2120_v37 = vld [vmem:[%s3486_s0 + $0x68] ss:$8 sps:$4 sm:$0xff]  }
  0x2a   :  { %v229_v45 = vsel %vm187_vm0, %v227_v56, %v228_v15  ;;  %v232_v46 = vsel %vm187_vm0, %v230_v24, %v231_v48  ;;  %v2010_v30 = vadd.f32 %v190_v2, %v1818_v54  ;;  %v2013_v49 = vadd.f32 %v193_v4, %v1825_v53  ;;  %v2091_v2 = vld [vmem:[%s3486_s0 + $0x18] ss:$8 sps:$4 sm:$0xff]   ;;  %3700 = vst [vmem:[#allocation36_spill] sm:$0xff] %v2106_v19 }
  0x2b   :  { %v2016_v55 = vadd.f32 %v196_v6, %v1829_v63  ;;  %v2019_v47 = vadd.f32 %v199_v17, %v1833_v14  ;;  %v3534_v57 = vunpack.c.l.bf16 %v2001_v36  ;;  %v304_v60 = vsub.s32 2, %v1676_v9  ;;  %v278_v63 = vld [vmem:[%s3486_s0 + $0x60] sm:$0xe]  ;;  %v279_v14 = vld [vmem:[%s3486_s0 + $0x68] sm:$0xe]  ;;  %3696 = vst [vmem:[#allocation34_spill] sm:$0xff] %v2091_v2 }
  0x2c   :  { %v235_v11 = vsel %vm187_vm0, %v233_v29, %v234_v34  ;;  %v2025_v12 = vadd.f32 %v202_v51, %v1837_v0  ;;  %v2028_v54 = vadd.f32 %v205_v21, %v1846_v59  ;;  %v2031_v53 = vadd.f32 %v208_v22, %v1850_v58  ;;  %v2115_v16 = vld [vmem:[%s3486_s0 + $0x58] ss:$8 sps:$4 sm:$0xff]   ;;  %3702 = vst [vmem:[#allocation38_spill] sm:$0xff] %v2120_v37  ;;  %v3703_v51 = vld [vmem:[#allocation19_spill] sm:$0xff] }
  0x2d   :  { %v2045_v0 = vadd.f32 %v211_v27, %v1854_v62  ;;  %v2048_v59 = vadd.f32 %v214_v28, %v1873_v23  ;;  %v2051_v58 = vadd.f32 %v217_v39, %v1877_v33  ;;  %v2054_v3 = vadd.f32 %v220_v41, %v1881_v61  ;;  %v2069_v23 = vld [vmem:[%s3486_s0 + $0x88] sm:$0xe]  ;;  %v3691_v61 = vld [vmem:[#allocation29_spill] sm:$0xff]  ;;  %3701 = vst [vmem:[#allocation37_spill] sm:$0xff] %v2115_v16  ;;  %v3705_v34 = vld [vmem:[#allocation2_spill] sm:$0xff] }
  0x2e   :  { %v2072_v62 = vadd.f32 %v223_v40, %v1885_v18  ;;  %v2075_v33 = vadd.f32 %v226_v13, %v1904_v26  ;;  %v2078_v31 = vadd.f32 %v229_v45, %v3691_v61  ;;  %v2081_v44 = vadd.f32 %v232_v46, %v3693_v38  ;;  %v3697_v18 = vld [vmem:[#allocation31_spill] sm:$0xff]  ;;  %v3707_v40 = vld [vmem:[#allocation20_spill] sm:$0xff]  ;;  %v3715_v61 = vld [vmem:[#allocation22_spill] sm:$0xff] }
  0x2f   :  { %v2094_v7 = vadd.f32 %v235_v11, %v3697_v18  ;;  %v294_v26 = vunpack.c.l.bf16 %v278_v63  ;;  %v295_v4 = vunpack.c.l.bf16 %v279_v14  ;;  %v305_v6 = vrot.slane %v3534_v57, %v304_v60  ;;  %v3709_v46 = vld [vmem:[#allocation3_spill] sm:$0xff]  ;;  %v3711_v63 = vld [vmem:[#allocation21_spill] sm:$0xff]  ;;  %v3745_v10 = vld [vmem:[#allocation14_spill] sm:$0xff] }
  0x30   :  { %3692 = vst [vmem:[#allocation29_spill] sm:$0xff] %v2078_v31  ;;  %3694 = vst [vmem:[#allocation30_spill] sm:$0xff] %v2081_v44  ;;  %v296_v8 = vunpack.c.l.bf16 %v2042_v42  ;;  %v297_v50 = vunpack.c.l.bf16 %v2059_v43  ;;  %v298_v52 = vunpack.c.l.bf16 %v2064_v32  ;;  %v299_v5 = vunpack.c.l.bf16 %v2069_v23  ;;  %v3713_v43 = vld [vmem:[#allocation5_spill] sm:$0xff] }
  0x31   :  { %3698 = vst [vmem:[#allocation31_spill] sm:$0xff] %v2094_v7  ;;  %v3704_v21 = vunpack.c.l.bf16 %v3703_v51  ;;  %v3706_v39 = vunpack.c.l.bf16 %v3705_v34  ;;  %v3708_v13 = vunpack.c.l.bf16 %v3707_v40  ;;  %v3710_v60 = vunpack.c.l.bf16 %v3709_v46  ;;  %v3717_v51 = vld [vmem:[#allocation6_spill] sm:$0xff]  ;;  %v3719_v34 = vld [vmem:[#allocation23_spill] sm:$0xff]  ;;  %v3723_v46 = vld [vmem:[#allocation24_spill] sm:$0xff] }
  0x32   :  { %v3712_v14 = vunpack.c.l.bf16 %v3711_v63  ;;  %v3714_v32 = vunpack.c.l.bf16 %v3713_v43  ;;  %v3716_v38 = vunpack.c.l.bf16 %v3715_v61  ;;  %v3721_v40 = vld [vmem:[#allocation7_spill] sm:$0xff]  ;;  %v3725_v63 = vld [vmem:[#allocation8_spill] sm:$0xff]  ;;  %v3727_v43 = vld [vmem:[#allocation25_spill] sm:$0xff]  ;;  %v330_v36 = vmul.f32 %v305_v6, %v296_v8 }
  0x33   :  { %v306_v22 = vmul.f32 %v305_v6, %v3704_v21  ;;  %v307_v41 = vmul.f32 %v305_v6, %v3706_v39  ;;  %v308_v45 = vmul.f32 %v305_v6, %v3708_v13  ;;  %v309_v11 = vmul.f32 %v305_v6, %v3710_v60  ;;  %v3729_v61 = vld [vmem:[#allocation9_spill] sm:$0xff] }
  0x34   :  { %v310_v42 = vmul.f32 %v305_v6, %v3712_v14  ;;  %v311_v23 = vmul.f32 %v305_v6, %v3714_v32  ;;  %v312_v18 = vmul.f32 %v305_v6, %v3716_v38  ;;  %v3718_v21 = vunpack.c.l.bf16 %v3717_v51  ;;  %v3731_v51 = vld [vmem:[#allocation26_spill] sm:$0xff] }
  0x35   :  { %v3720_v39 = vunpack.c.l.bf16 %v3719_v34  ;;  %v3722_v13 = vunpack.c.l.bf16 %v3721_v40  ;;  %v3724_v60 = vunpack.c.l.bf16 %v3723_v46  ;;  %v3726_v14 = vunpack.c.l.bf16 %v3725_v63  ;;  %v3733_v34 = vld [vmem:[#allocation10_spill] sm:$0xff]  ;;  %v3735_v40 = vld [vmem:[#allocation27_spill] sm:$0xff]  ;;  %v3739_v63 = vld [vmem:[#allocation28_spill] sm:$0xff] }
  0x36   :  { %v313_v29 = vmul.f32 %v305_v6, %v3718_v21  ;;  %v3728_v32 = vunpack.c.l.bf16 %v3727_v43  ;;  %v3730_v38 = vunpack.c.l.bf16 %v3729_v61  ;;  %v3732_v21 = vunpack.c.l.bf16 %v3731_v51  ;;  %v3737_v46 = vld [vmem:[#allocation11_spill] sm:$0xff]  ;;  %v3741_v43 = vld [vmem:[#allocation12_spill] sm:$0xff] }
  0x37   :  { %v314_v28 = vmul.f32 %v305_v6, %v3720_v39  ;;  %v315_v27 = vmul.f32 %v305_v6, %v3722_v13  ;;  %v316_v17 = vmul.f32 %v305_v6, %v3724_v60  ;;  %v317_v48 = vmul.f32 %v305_v6, %v3726_v14 }
  0x38   :  { %v318_v24 = vmul.f32 %v305_v6, %v3728_v32  ;;  %v319_v15 = vmul.f32 %v305_v6, %v3730_v38  ;;  %v320_v56 = vmul.f32 %v305_v6, %v3732_v21  ;;  %v3734_v39 = vunpack.c.l.bf16 %v3733_v34  ;;  %v3743_v38 = vld [vmem:[#allocation13_spill] sm:$0xff] }
  0x39   :  { %v3736_v13 = vunpack.c.l.bf16 %v3735_v40  ;;  %v3738_v60 = vunpack.c.l.bf16 %v3737_v46  ;;  %v3740_v14 = vunpack.c.l.bf16 %v3739_v63  ;;  %v3742_v32 = vunpack.c.l.bf16 %v3741_v43  ;;  %v3747_v63 = vld [vmem:[#allocation15_spill] sm:$0xff] }
  0x3a   :  { %v321_v35 = vmul.f32 %v305_v6, %v3734_v39  ;;  %v326_v61 = vmul.f32 %v305_v6, %v294_v26  ;;  %v3744_v19 = vunpack.c.l.bf16 %v3743_v38  ;;  %v328_v21 = vmul.f32 %v305_v6, %v295_v4 }
  0x3b   :  { %v322_v1 = vmul.f32 %v305_v6, %v3736_v13  ;;  %v323_v25 = vmul.f32 %v305_v6, %v3738_v60  ;;  %v324_v57 = vmul.f32 %v305_v6, %v3740_v14  ;;  %v325_v16 = vmul.f32 %v305_v6, %v3742_v32  ;;  %v3749_v32 = vld [vmem:[#allocation16_spill] sm:$0xff] }
  0x3c   :  { %v327_v51 = vmul.f32 %v305_v6, %v3744_v19  ;;  %v371_v20 = vrot.slane %v306_v22, 2  ;;  %v372_v34 = vrot.slane %v307_v41, 2  ;;  %v374_v39 = vrot.slane %v308_v45, 2  ;;  %v3751_v19 = vld [vmem:[#allocation17_spill] sm:$0xff]  ;;  %v3753_v45 = vld [vmem:[#allocation18_spill] sm:$0xff] }
  0x3d   :  { %v375_v2 = vrot.slane %v309_v11, 2  ;;  %v377_v40 = vrot.slane %v310_v42, 2  ;;  %v378_v13 = vrot.slane %v311_v23, 2  ;;  %v3746_v46 = vunpack.c.l.bf16 %v3745_v10 }
  0x3e   :  { %v3748_v14 = vunpack.c.l.bf16 %v3747_v63  ;;  %v332_v43 = vmul.f32 %v305_v6, %v297_v50  ;;  %v3750_v26 = vunpack.c.l.bf16 %v3749_v32  ;;  %v334_v38 = vmul.f32 %v305_v6, %v298_v52 }
  0x3f   :  { %v329_v60 = vmul.f32 %v305_v6, %v3746_v46  ;;  %v3752_v4 = vunpack.c.l.bf16 %v3751_v19  ;;  %v336_v41 = vmul.f32 %v305_v6, %v299_v5  ;;  %v3754_v11 = vunpack.c.l.bf16 %v3753_v45 }
  0x40   :  { %v331_v37 = vmul.f32 %v305_v6, %v3748_v14  ;;  %v333_v7 = vmul.f32 %v305_v6, %v3750_v26  ;;  %v373_v23 = vsel %vm370_vm1, %v371_v20, %v372_v34  ;;  %v380_v10 = vrot.slane %v312_v18, 2 }
  0x41   :  { %v335_v22 = vmul.f32 %v305_v6, %v3752_v4  ;;  %v337_v42 = vmul.f32 %v305_v6, %v3754_v11  ;;  %v381_v46 = vrot.slane %v313_v29, 2  ;;  %v376_v8 = vsel %vm370_vm1, %v374_v39, %v375_v2 }
  0x42   :  { %v379_v63 = vsel %vm370_vm1, %v377_v40, %v378_v13  ;;  %v383_v50 = vrot.slane %v314_v28, 2  ;;  %v384_v14 = vrot.slane %v315_v27, 2  ;;  %v386_v32 = vrot.slane %v316_v17, 2 }
  0x43   :  { %v387_v26 = vrot.slane %v317_v48, 2  ;;  %v389_v52 = vrot.slane %v318_v24, 2  ;;  %v390_v44 = vrot.slane %v319_v15, 2  ;;  %v392_v19 = vrot.slane %v320_v56, 2 }
  0x44   :  { %v393_v4 = vrot.slane %v321_v35, 2  ;;  %v395_v5 = vrot.slane %v322_v1, 2  ;;  %v396_v31 = vrot.slane %v323_v25, 2  ;;  %v398_v45 = vrot.slane %v324_v57, 2 }
  0x45   :  { %v399_v6 = vrot.slane %v325_v16, 2  ;;  %v401_v11 = vrot.slane %v326_v61, 2  ;;  %v402_v20 = vrot.slane %v327_v51, 2  ;;  %v404_v18 = vrot.slane %v328_v21, 2 }
  0x46   :  { %v405_v29 = vrot.slane %v329_v60, 2  ;;  %v407_v34 = vrot.slane %v330_v36, 2  ;;  %v408_v2 = vrot.slane %v331_v37, 2  ;;  %v410_v39 = vrot.slane %v332_v43, 2 }
  0x47   :  { %v411_v40 = vrot.slane %v333_v7, 2  ;;  %v413_v28 = vrot.slane %v334_v38, 2  ;;  %v414_v27 = vrot.slane %v335_v22, 2  ;;  %v382_v48 = vsel %vm370_vm1, %v380_v10, %v381_v46  ;;  %v3761_v46 = vld [vmem:[#allocation31_spill] sm:$0xff] }
  0x48   :  { %v385_v15 = vsel %vm370_vm1, %v383_v50, %v384_v14  ;;  %v416_v56 = vrot.slane %v336_v41, 2  ;;  %v417_v35 = vrot.slane %v337_v42, 2  ;;  %v388_v25 = vsel %vm370_vm1, %v386_v32, %v387_v26  ;;  %v2256_v41 = vld [vmem:[%s3486_s0 + $0x14] sm:$0x1]  ;;  %v2261_v42 = vld [vmem:[%s3486_s0 + $0x1c] sm:$0x1] }
  0x49   :  { %v391_v57 = vsel %vm370_vm1, %v389_v52, %v390_v44  ;;  %v394_v16 = vsel %vm370_vm1, %v392_v19, %v393_v4  ;;  %v397_v1 = vsel %vm370_vm1, %v395_v5, %v396_v31  ;;  %v400_v36 = vsel %vm370_vm1, %v398_v45, %v399_v6  ;;  %3756 = vst [vmem:[#allocation2_spill] sm:$0xff] %v2256_v41  ;;  %v2288_v50 = vld [vmem:[%s3486_s0 + $0x34] sm:$0x1]  ;;  %v3765_v14 = vld [vmem:[#allocation38_spill] sm:$0xff]  ;;  %v2308_v6 = vld [vmem:[%s3486_s0 + $0x5c] sm:$0x1] }
  0x4a   :  { %v403_v7 = vsel %vm370_vm1, %v401_v11, %v402_v20  ;;  %v406_v37 = vsel %vm370_vm1, %v404_v18, %v405_v29  ;;  %v409_v24 = vsel %vm370_vm1, %v407_v34, %v408_v2  ;;  %v412_v17 = vsel %vm370_vm1, %v410_v39, %v411_v40  ;;  %3757 = vst [vmem:[#allocation20_spill] sm:$0xff] %v2261_v42  ;;  %v3766_v19 = vld [vmem:[#allocation32_spill] sm:$0xff]  ;;  %v2303_v45 = vld [vmem:[%s3486_s0 + $0x44] sm:$0x1]  ;;  %v2320_v29 = vld [vmem:[%s3486_s0 + $0x6c] sm:$0x1] }
  0x4b   :  { %v415_v61 = vsel %vm370_vm1, %v413_v28, %v414_v27  ;;  %v2201_v51 = vadd.f32 %v373_v23, %v2010_v30  ;;  %v2204_v44 = vadd.f32 %v376_v8, %v2013_v49  ;;  %v418_v31 = vsel %vm370_vm1, %v416_v56, %v417_v35  ;;  %v3760_v23 = vld [vmem:[#allocation30_spill] sm:$0xff]  ;;  %3763 = vst [vmem:[#allocation5_spill] sm:$0xff] %v2288_v50  ;;  %v2325_v34 = vld [vmem:[%s3486_s0 + $0x74] sm:$0x1]  ;;  %v2330_v2 = vld [vmem:[%s3486_s0 + $0x7c] sm:$0x1] }
  0x4c   :  { %v2208_v21 = vadd.f32 %v379_v63, %v2016_v55  ;;  %v2211_v13 = vadd.f32 %v382_v48, %v2019_v47  ;;  %v486_v60 = vsub.s32 3, %v1676_v9  ;;  %v2215_v43 = vadd.f32 %v385_v15, %v2025_v12  ;;  %v2229_v55 = vld [vmem:[%s3486_s0 + $0x78] ss:$8 sps:$4 sm:$0xff]   ;;  %v2234_v47 = vld [vmem:[%s3486_s0 + $0x88] ss:$8 sps:$4 sm:$0xff]   ;;  %3768 = vst [vmem:[#allocation6_spill] sm:$0xff] %v2303_v45 }
  0x4d   :  { %v2218_v38 = vadd.f32 %v388_v25, %v2028_v54  ;;  %v2221_v30 = vadd.f32 %v391_v57, %v2031_v53  ;;  %v2224_v49 = vadd.f32 %v394_v16, %v2045_v0  ;;  %v2239_v12 = vld [vmem:[%s3486_s0 + $0xc] sm:$0x1]  ;;  %v2242_v54 = vadd.f32 %v397_v1, %v2048_v59  ;;  %v2266_v59 = vld [vmem:[%s3486_s0 + $0x24] sm:$0x1]  ;;  %3769 = vst [vmem:[#allocation23_spill] sm:$0xff] %v2308_v6  ;;  %v3774_v16 = vld [vmem:[#allocation33_spill] sm:$0xff] }
  0x4e   :  { %3755 = vst [vmem:[#allocation19_spill] sm:$0xff] %v2239_v12  ;;  %v2245_v53 = vadd.f32 %v400_v36, %v2051_v58  ;;  %v2248_v0 = vadd.f32 %v403_v7, %v2054_v3  ;;  %v2251_v22 = vadd.f32 %v406_v37, %v2072_v62  ;;  %3758 = vst [vmem:[#allocation3_spill] sm:$0xff] %v2266_v59  ;;  %v3759_v3 = vld [vmem:[#allocation29_spill] sm:$0xff]  ;;  %v2283_v63 = vld [vmem:[%s3486_s0 + $0x2c] sm:$0x1]  ;;  %v3548_v32 = vunpack.c.h.bf16 %v3765_v14 }
  0x4f   :  { %v2269_v58 = vadd.f32 %v409_v24, %v2075_v33  ;;  %v2272_v62 = vadd.f32 %v412_v17, %v3759_v3  ;;  %v2275_v10 = vadd.f32 %v415_v61, %v3760_v23  ;;  %v2278_v8 = vadd.f32 %v418_v31, %v3761_v46  ;;  %3762 = vst [vmem:[#allocation21_spill] sm:$0xff] %v2283_v63  ;;  %v2293_v33 = vld [vmem:[%s3486_s0 + $0x3c] sm:$0x1]  ;;  %v2313_v11 = vld [vmem:[%s3486_s0 + $0x64] sm:$0x1]  ;;  %v3783_v7 = vld [vmem:[#allocation36_spill] sm:$0xff] }
  0x50   :  { %3764 = vst [vmem:[#allocation22_spill] sm:$0xff] %v2293_v33  ;;  %v3549_v26 = vunpack.c.l.bf16 %v2229_v55  ;;  %v3553_v52 = vunpack.c.h.bf16 %v2229_v55  ;;  %v3767_v4 = vunpack.c.l.bf16 %v3766_v19  ;;  %3770 = vst [vmem:[#allocation7_spill] sm:$0xff] %v2313_v11  ;;  %v3550_v20 = vunpack.c.l.bf16 %v2234_v47  ;;  %v3777_v31 = vld [vmem:[#allocation34_spill] sm:$0xff]  ;;  %v3780_v19 = vld [vmem:[#allocation35_spill] sm:$0xff] }
  0x51   :  { %v3551_v18 = vunpack.c.h.bf16 %v2234_v47  ;;  %3771 = vst [vmem:[#allocation24_spill] sm:$0xff] %v2320_v29  ;;  %3772 = vst [vmem:[#allocation8_spill] sm:$0xff] %v2325_v34  ;;  %v3775_v1 = vunpack.c.l.bf16 %v3774_v16  ;;  %v3776_v17 = vunpack.c.h.bf16 %v3774_v16  ;;  %v3779_v23 = vunpack.c.h.bf16 %v3777_v31  ;;  %v3786_v15 = vld [vmem:[#allocation37_spill] sm:$0xff] }
  0x52   :  { %v487_v5 = vrot.slane %v3767_v4, %v486_v60  ;;  %3773 = vst [vmem:[#allocation25_spill] sm:$0xff] %v2330_v2  ;;  %v3778_v60 = vunpack.c.l.bf16 %v3777_v31  ;;  %v3781_v4 = vunpack.c.l.bf16 %v3780_v19  ;;  %v3784_v35 = vunpack.c.l.bf16 %v3783_v7 }
  0x53   :  { %v3785_v24 = vunpack.c.h.bf16 %v3783_v7  ;;  %v3790_v27 = vunpack.c.l.bf16 %v3765_v14 }
  0x54   :  { %v488_v36 = vmul.f32 %v487_v5, %v3775_v1  ;;  %v489_v61 = vmul.f32 %v487_v5, %v3776_v17  ;;  %v490_v3 = vmul.f32 %v487_v5, %v3778_v60  ;;  %v491_v46 = vmul.f32 %v487_v5, %v3779_v23  ;;  %v2366_v60 = vld [vmem:[%s3487_s1] sm:$0x4] }
  0x55   :  { %v492_v57 = vmul.f32 %v487_v5, %v3781_v4  ;;  %v3782_v1 = vunpack.c.h.bf16 %v3780_v19  ;;  %v494_v37 = vmul.f32 %v487_v5, %v3784_v35  ;;  %v495_v56 = vmul.f32 %v487_v5, %v3785_v24  ;;  %3788 = vst [vmem:[#allocation9_spill] sm:$0xff] %v2366_v60 }
  0x56   :  { %v3787_v17 = vunpack.c.l.bf16 %v3786_v15  ;;  %v3789_v23 = vunpack.c.h.bf16 %v3786_v15  ;;  %v499_v35 = vmul.f32 %v487_v5, %v3548_v32  ;;  %v500_v24 = vmul.f32 %v487_v5, %v3549_v26  ;;  %v2394_v26 = vld [vmem:[%s3486_s0 + $0x84] sm:$0x1] }
  0x57   :  { %v493_v25 = vmul.f32 %v487_v5, %v3782_v1  ;;  %v498_v1 = vmul.f32 %v487_v5, %v3790_v27  ;;  %v502_v28 = vmul.f32 %v487_v5, %v3550_v20  ;;  %v503_v40 = vmul.f32 %v487_v5, %v3551_v18  ;;  %3791 = vst [vmem:[#allocation26_spill] sm:$0xff] %v2394_v26  ;;  %v2399_v20 = vld [vmem:[%s3486_s0 + $0x8c] sm:$0x1]  ;;  %v2423_v18 = vld [vmem:[%s3486_s0 + $0x8] sm:$0xe] }
  0x58   :  { %v496_v48 = vmul.f32 %v487_v5, %v3787_v17  ;;  %v497_v4 = vmul.f32 %v487_v5, %v3789_v23  ;;  %v501_v17 = vmul.f32 %v487_v5, %v3553_v52  ;;  %v2383_v23 = vadd.f32 %v488_v36, %v2201_v51  ;;  %3792 = vst [vmem:[#allocation10_spill] sm:$0xff] %v2399_v20 }
  0x59   :  { %v2386_v27 = vadd.f32 %v489_v61, %v2204_v44  ;;  %v2389_v32 = vadd.f32 %v490_v3, %v2208_v21  ;;  %v3552_v5 = vunpack.c.l.bf16 %v2366_v60  ;;  %v556_v51 = vsub.s32 4, %v1676_v9  ;;  %v2418_v3 = vld [vmem:[%s3486_s0 + $0x94] sm:$0x1]  ;;  %3794 = vst [vmem:[#allocation11_spill] sm:$0xff] %v2423_v18 }
  0x5a   :  { %v2404_v44 = vadd.f32 %v491_v46, %v2211_v13  ;;  %v2407_v21 = vadd.f32 %v492_v57, %v2215_v43  ;;  %v2410_v36 = vadd.f32 %v493_v25, %v2218_v38  ;;  %v2413_v61 = vadd.f32 %v494_v37, %v2221_v30  ;;  %3793 = vst [vmem:[#allocation27_spill] sm:$0xff] %v2418_v3  ;;  %v2428_v13 = vld [vmem:[%s3486_s0 + $0x10] sm:$0xe]  ;;  %v2445_v57 = vld [vmem:[%s3486_s0 + $0x18] sm:$0xe] }
  0x5b   :  { %3795 = vst [vmem:[#allocation28_spill] sm:$0xff] %v2428_v13  ;;  %v2431_v43 = vadd.f32 %v495_v56, %v2224_v49  ;;  %v2434_v38 = vadd.f32 %v496_v48, %v2242_v54  ;;  %v2437_v30 = vadd.f32 %v497_v4, %v2245_v53  ;;  %v2440_v25 = vadd.f32 %v498_v1, %v2248_v0  ;;  %v2450_v37 = vld [vmem:[%s3486_s0 + $0x20] sm:$0xe]  ;;  %v2455_v49 = vld [vmem:[%s3486_s0 + $0x28] sm:$0xe] }
  0x5c   :  { %3796 = vst [vmem:[#allocation12_spill] sm:$0xff] %v2445_v57  ;;  %3797 = vst [vmem:[#allocation13_spill] sm:$0xff] %v2450_v37  ;;  %v2458_v54 = vadd.f32 %v499_v35, %v2251_v22  ;;  %v2461_v53 = vadd.f32 %v500_v24, %v2269_v58  ;;  %v2464_v0 = vadd.f32 %v501_v17, %v2272_v62  ;;  %v2472_v56 = vld [vmem:[%s3486_s0 + $0x30] sm:$0xe]  ;;  %v2477_v46 = vld [vmem:[%s3486_s0 + $0x38] sm:$0xe]  ;;  %v3812_v52 = vunpack.c.l.bf16 %v2239_v12 }
  0x5d   :  { %3798 = vst [vmem:[#allocation14_spill] sm:$0xff] %v2455_v49  ;;  %v2467_v48 = vadd.f32 %v502_v28, %v2275_v10  ;;  %3801 = vst [vmem:[#allocation17_spill] sm:$0xff] %v2472_v56  ;;  %v2482_v22 = vld [vmem:[%s3486_s0 + $0x40] sm:$0xe]  ;;  %v2485_v58 = vadd.f32 %v503_v40, %v2278_v8  ;;  %v557_v28 = vrot.slane %v3552_v5, %v556_v51  ;;  %v2494_v4 = vld [vmem:[%s3486_s0 + $0x58] sm:$0xe]  ;;  %v3811_v5 = vunpack.c.l.bf16 %v3774_v16 }
  0x5e   :  { %3799 = vst [vmem:[#allocation15_spill] sm:$0xff] %v2464_v0  ;;  %3802 = vst [vmem:[#allocation18_spill] sm:$0xff] %v2477_v46  ;;  %v2499_v1 = vld [vmem:[%s3486_s0 + $0x60] sm:$0xe]  ;;  %v2504_v8 = vld [vmem:[%s3486_s0 + $0x68] sm:$0xe]  ;;  %v3814_v60 = vunpack.c.l.bf16 %v2256_v41  ;;  %v3815_v51 = vunpack.c.l.bf16 %v3777_v31  ;;  %v3817_v40 = vunpack.c.h.bf16 %v3777_v31  ;;  %v3818_v62 = vunpack.c.l.bf16 %v2266_v59 }
  0x5f   :  { %3800 = vst [vmem:[#allocation16_spill] sm:$0xff] %v2467_v48  ;;  %3803 = vst [vmem:[#allocation29_spill] sm:$0xff] %v2482_v22  ;;  %v2510_v35 = vld [vmem:[%s3486_s0 + $0x70] sm:$0xe]  ;;  %v2515_v24 = vld [vmem:[%s3486_s0 + $0x78] sm:$0xe]  ;;  %v558_v13 = vmul.f32 %v557_v28, %v3811_v5  ;;  %v559_v39 = vmul.f32 %v557_v28, %v3812_v52  ;;  %v3816_v5 = vunpack.c.l.bf16 %v2261_v42  ;;  %v3819_v52 = vunpack.c.l.bf16 %v3780_v19 }
  0x60   :  { %3804 = vst [vmem:[#allocation30_spill] sm:$0xff] %v2485_v58  ;;  %3805 = vst [vmem:[#allocation31_spill] sm:$0xff] %v2494_v4  ;;  %v2520_v17 = vld [vmem:[%s3486_s0 + $0x80] sm:$0xe]  ;;  %v3813_v58 = vunpack.c.h.bf16 %v3774_v16  ;;  %v561_v48 = vmul.f32 %v557_v28, %v3814_v60  ;;  %v564_v10 = vmul.f32 %v557_v28, %v3817_v40  ;;  %v3820_v16 = vunpack.c.l.bf16 %v2283_v63 }
  0x61   :  { %3806 = vst [vmem:[#allocation38_spill] sm:$0xff] %v2499_v1  ;;  %3807 = vst [vmem:[#allocation32_spill] sm:$0xff] %v2504_v8  ;;  %v562_v8 = vmul.f32 %v557_v28, %v3815_v51  ;;  %v563_v1 = vmul.f32 %v557_v28, %v3816_v5  ;;  %v3821_v60 = vunpack.c.h.bf16 %v3780_v19  ;;  %v3822_v51 = vunpack.c.l.bf16 %v2288_v50 }
  0x62   :  { %3808 = vst [vmem:[#allocation33_spill] sm:$0xff] %v2510_v35  ;;  %3809 = vst [vmem:[#allocation34_spill] sm:$0xff] %v2515_v24  ;;  %v560_v22 = vmul.f32 %v557_v28, %v3813_v58  ;;  %v566_v24 = vmul.f32 %v557_v28, %v3819_v52  ;;  %v567_v58 = vmul.f32 %v557_v28, %v3820_v16  ;;  %v3823_v5 = vunpack.c.l.bf16 %v3783_v7 }
  0x63   :  { %3810 = vst [vmem:[#allocation35_spill] sm:$0xff] %v2520_v17  ;;  %v565_v17 = vmul.f32 %v557_v28, %v3818_v62  ;;  %v568_v35 = vmul.f32 %v557_v28, %v3821_v60  ;;  %v569_v4 = vmul.f32 %v557_v28, %v3822_v51  ;;  %v3824_v31 = vunpack.c.l.bf16 %v2293_v33 }
  0x64   :  { %v570_v46 = vmul.f32 %v557_v28, %v3823_v5  ;;  %v3825_v62 = vunpack.c.h.bf16 %v3783_v7  ;;  %v3826_v52 = vunpack.c.l.bf16 %v2303_v45  ;;  %v3827_v16 = vunpack.c.l.bf16 %v3786_v15 }
  0x65   :  { %v571_v40 = vmul.f32 %v557_v28, %v3824_v31  ;;  %v3828_v19 = vunpack.c.l.bf16 %v2308_v6  ;;  %v3829_v51 = vunpack.c.h.bf16 %v3786_v15  ;;  %v3830_v5 = vunpack.c.l.bf16 %v2313_v11 }
  0x66   :  { %v572_v56 = vmul.f32 %v557_v28, %v3825_v62  ;;  %v573_v49 = vmul.f32 %v557_v28, %v3826_v52  ;;  %v574_v63 = vmul.f32 %v557_v28, %v3827_v16  ;;  %v3831_v31 = vunpack.c.l.bf16 %v3765_v14 }
  0x67   :  { %v575_v60 = vmul.f32 %v557_v28, %v3828_v19  ;;  %v576_v50 = vmul.f32 %v557_v28, %v3829_v51  ;;  %v577_v59 = vmul.f32 %v557_v28, %v3830_v5  ;;  %v3832_v7 = vunpack.c.l.bf16 %v2320_v29 }
  0x68   :  { %v578_v33 = vmul.f32 %v557_v28, %v3831_v31  ;;  %v3833_v52 = vunpack.c.h.bf16 %v3765_v14  ;;  %v622_v37 = vrot.slane %v558_v13, 1  ;;  %v623_v16 = vrot.slane %v559_v39, 1 }
  0x69   :  { %v579_v62 = vmul.f32 %v557_v28, %v3832_v7  ;;  %v625_v42 = vrot.slane %v560_v22, 1  ;;  %v626_v6 = vrot.slane %v561_v48, 1  ;;  %v628_v19 = vrot.slane %v562_v8, 1 }
  0x6a   :  { %v580_v45 = vmul.f32 %v557_v28, %v3833_v52  ;;  %v629_v57 = vrot.slane %v563_v1, 1  ;;  %v3834_v15 = vunpack.c.l.bf16 %v2325_v34  ;;  %v3835_v5 = vunpack.c.l.bf16 %v2229_v55 }
  0x6b   :  { %v3836_v31 = vunpack.c.l.bf16 %v2330_v2  ;;  %v3837_v7 = vunpack.c.h.bf16 %v2229_v55  ;;  %v3838_v14 = vunpack.c.l.bf16 %v2394_v26  ;;  %v3839_v39 = vunpack.c.l.bf16 %v2234_v47 }
  0x6c   :  { %v581_v51 = vmul.f32 %v557_v28, %v3834_v15  ;;  %v582_v11 = vmul.f32 %v557_v28, %v3835_v5  ;;  %v3840_v22 = vunpack.c.l.bf16 %v2399_v20  ;;  %v3841_v8 = vunpack.c.h.bf16 %v2234_v47 }
  0x6d   :  { %v583_v41 = vmul.f32 %v557_v28, %v3836_v31  ;;  %v584_v29 = vmul.f32 %v557_v28, %v3837_v7  ;;  %v585_v13 = vmul.f32 %v557_v28, %v3838_v14  ;;  %v586_v48 = vmul.f32 %v557_v28, %v3839_v39 }
  0x6e   :  { %v587_v1 = vmul.f32 %v557_v28, %v3840_v22  ;;  %v588_v52 = vmul.f32 %v557_v28, %v3841_v8  ;;  %v3842_v15 = vunpack.c.l.bf16 %v2418_v3  ;;  %v624_v31 = vsel %vm187_vm0, %v622_v37, %v623_v16 }
  0x6f   :  { %v631_v2 = vrot.slane %v564_v10, 1  ;;  %v632_v55 = vrot.slane %v565_v17, 1  ;;  %v627_v7 = vsel %vm187_vm0, %v625_v42, %v626_v6  ;;  %v630_v14 = vsel %vm187_vm0, %v628_v19, %v629_v57  ;;  %v2676_v19 = vld [vmem:[%s3486_s0 + $0x30] ss:$8 sps:$4 sm:$0xff]  }
  0x70   :  { %v589_v5 = vmul.f32 %v557_v28, %v3842_v15  ;;  %v634_v26 = vrot.slane %v566_v24, 1  ;;  %v635_v34 = vrot.slane %v567_v58, 1  ;;  %v637_v39 = vrot.slane %v568_v35, 1  ;;  %3845 = vst [vmem:[#allocation39_spill] sm:$0xff] %v2676_v19 }
  0x71   :  { %v638_v12 = vrot.slane %v569_v4, 1  ;;  %v640_v20 = vrot.slane %v570_v46, 1  ;;  %v641_v22 = vrot.slane %v571_v40, 1  ;;  %v643_v18 = vrot.slane %v572_v56, 1 }
  0x72   :  { %v644_v47 = vrot.slane %v573_v49, 1  ;;  %v646_v8 = vrot.slane %v574_v63, 1  ;;  %v647_v0 = vrot.slane %v575_v60, 1  ;;  %v649_v3 = vrot.slane %v576_v50, 1 }
  0x73   :  { %v650_v28 = vrot.slane %v577_v59, 1  ;;  %v652_v15 = vrot.slane %v578_v33, 1  ;;  %v653_v37 = vrot.slane %v579_v62, 1  ;;  %v655_v10 = vrot.slane %v580_v45, 1  ;;  %v2671_v62 = vld [vmem:[%s3486_s0 + $0x20] ss:$8 sps:$4 sm:$0xff]  }
  0x74   :  { %v656_v17 = vrot.slane %v581_v51, 1  ;;  %v658_v16 = vrot.slane %v582_v11, 1  ;;  %v659_v42 = vrot.slane %v583_v41, 1  ;;  %v633_v6 = vsel %vm187_vm0, %v631_v2, %v632_v55  ;;  %3844 = vst [vmem:[#allocation37_spill] sm:$0xff] %v2671_v62 }
  0x75   :  { %v636_v57 = vsel %vm187_vm0, %v634_v26, %v635_v34  ;;  %v661_v35 = vrot.slane %v584_v29, 1  ;;  %v662_v4 = vrot.slane %v585_v13, 1  ;;  %v639_v46 = vsel %vm187_vm0, %v637_v39, %v638_v12 }
  0x76   :  { %v642_v49 = vsel %vm187_vm0, %v640_v20, %v641_v22  ;;  %v664_v63 = vrot.slane %v586_v48, 1  ;;  %v665_v56 = vrot.slane %v587_v1, 1  ;;  %v645_v59 = vsel %vm187_vm0, %v643_v18, %v644_v47 }
  0x77   :  { %v648_v50 = vsel %vm187_vm0, %v646_v8, %v647_v0  ;;  %v667_v33 = vrot.slane %v588_v52, 1  ;;  %v668_v45 = vrot.slane %v589_v5, 1  ;;  %v651_v41 = vsel %vm187_vm0, %v649_v3, %v650_v28  ;;  %v2692_v52 = vld [vmem:[%s3486_s0 + $0x40] ss:$8 sps:$4 sm:$0xff]  }
  0x78   :  { %v654_v11 = vsel %vm187_vm0, %v652_v15, %v653_v37  ;;  %v657_v26 = vsel %vm187_vm0, %v655_v10, %v656_v17  ;;  %v660_v29 = vsel %vm187_vm0, %v658_v16, %v659_v42  ;;  %v663_v12 = vsel %vm187_vm0, %v661_v35, %v662_v4  ;;  %v2697_v5 = vld [vmem:[%s3486_s0 + $0x60] ss:$8 sps:$4 sm:$0xff]  }
  0x79   :  { %v2615_v20 = vadd.f32 %v624_v31, %v2383_v23  ;;  %v2618_v34 = vadd.f32 %v627_v7, %v2386_v27  ;;  %v736_v18 = vsub.s32 5, %v1676_v9  ;;  %v666_v2 = vsel %vm187_vm0, %v664_v63, %v665_v56  ;;  %3853 = vst [vmem:[#allocation40_spill] sm:$0xff] %v2697_v5  ;;  %v3857_v16 = vld [vmem:[#allocation11_spill] sm:$0xff]  ;;  %v3861_v56 = vld [vmem:[#allocation28_spill] sm:$0xff] }
  0x7a   :  { %v2623_v3 = vadd.f32 %v630_v14, %v2389_v32  ;;  %v2626_v0 = vadd.f32 %v633_v6, %v2404_v44  ;;  %v2629_v24 = vadd.f32 %v636_v57, %v2407_v21  ;;  %v669_v58 = vsel %vm187_vm0, %v667_v33, %v668_v45  ;;  %v2644_v32 = vld [vmem:[%s3486_s0 + $0x88] sm:$0xe]  ;;  %v2649_v44 = vld [vmem:[%s3486_s0 + $0x90] sm:$0xe]  ;;  %v3863_v33 = vld [vmem:[#allocation2_spill] sm:$0xff] }
  0x7b   :  { %v2633_v23 = vadd.f32 %v639_v46, %v2410_v36  ;;  %v2636_v27 = vadd.f32 %v642_v49, %v2413_v61  ;;  %v2639_v40 = vadd.f32 %v645_v59, %v2431_v43  ;;  %v2654_v21 = vld [vmem:[%s3486_s0 + $0x10] ss:$8 sps:$4 sm:$0xff]   ;;  %v2657_v36 = vadd.f32 %v648_v50, %v2434_v38  ;;  %v3859_v46 = vld [vmem:[#allocation19_spill] sm:$0xff] }
  0x7c   :  { %3843 = vst [vmem:[#allocation36_spill] sm:$0xff] %v2654_v21  ;;  %v2660_v61 = vadd.f32 %v651_v41, %v2437_v30  ;;  %v2663_v43 = vadd.f32 %v654_v11, %v2440_v25  ;;  %v2666_v60 = vadd.f32 %v657_v26, %v2458_v54  ;;  %v2679_v38 = vadd.f32 %v660_v29, %v2461_v53  ;;  %v3846_v30 = vld [vmem:[#allocation15_spill] sm:$0xff]  ;;  %v3848_v25 = vld [vmem:[#allocation16_spill] sm:$0xff]  ;;  %v3850_v54 = vld [vmem:[#allocation9_spill] sm:$0xff] }
  0x7d   :  { %v2682_v51 = vadd.f32 %v663_v12, %v3846_v30  ;;  %v2685_v13 = vadd.f32 %v666_v2, %v3848_v25  ;;  %v3851_v48 = vunpack.c.l.bf16 %v3850_v54  ;;  %3852 = vst [vmem:[#allocation9_spill] sm:$0xff] %v2692_v52  ;;  %v3854_v53 = vld [vmem:[#allocation30_spill] sm:$0xff]  ;;  %v732_v55 = vunpack.c.l.bf16 %v2644_v32  ;;  %v2707_v14 = vld [vmem:[%s3486_s0 + $0x70] ss:$8 sps:$4 sm:$0xff]   ;;  %v3871_v30 = vld [vmem:[#allocation3_spill] sm:$0xff] }
  0x7e   :  { %v2700_v31 = vadd.f32 %v669_v58, %v3854_v53  ;;  %v733_v7 = vunpack.c.l.bf16 %v2649_v44  ;;  %3856 = vst [vmem:[#allocation41_spill] sm:$0xff] %v2707_v14  ;;  %v3858_v42 = vunpack.c.l.bf16 %v3857_v16  ;;  %v3860_v49 = vunpack.c.l.bf16 %v3859_v46  ;;  %v3865_v11 = vld [vmem:[#allocation12_spill] sm:$0xff]  ;;  %v3869_v58 = vld [vmem:[#allocation13_spill] sm:$0xff]  ;;  %v3915_v21 = vld [vmem:[#allocation27_spill] sm:$0xff] }
  0x7f   :  { %3847 = vst [vmem:[#allocation15_spill] sm:$0xff] %v2682_v51  ;;  %3849 = vst [vmem:[#allocation16_spill] sm:$0xff] %v2685_v13  ;;  %v737_v1 = vrot.slane %v3851_v48, %v736_v18  ;;  %v3862_v59 = vunpack.c.l.bf16 %v3861_v56  ;;  %v3864_v45 = vunpack.c.l.bf16 %v3863_v33  ;;  %v3866_v26 = vunpack.c.l.bf16 %v3865_v11  ;;  %v3867_v12 = vld [vmem:[#allocation20_spill] sm:$0xff]  ;;  %v3873_v48 = vld [vmem:[#allocation14_spill] sm:$0xff] }
  0x80   :  { %3855 = vst [vmem:[#allocation30_spill] sm:$0xff] %v2700_v31  ;;  %v3868_v18 = vunpack.c.l.bf16 %v3867_v12  ;;  %v3870_v32 = vunpack.c.l.bf16 %v3869_v58  ;;  %v3872_v25 = vunpack.c.l.bf16 %v3871_v30  ;;  %v3874_v53 = vunpack.c.l.bf16 %v3873_v48  ;;  %v3877_v56 = vld [vmem:[#allocation17_spill] sm:$0xff]  ;;  %v3881_v12 = vld [vmem:[#allocation18_spill] sm:$0xff] }
  0x81   :  { %v738_v6 = vmul.f32 %v737_v1, %v3858_v42  ;;  %v739_v63 = vmul.f32 %v737_v1, %v3860_v49  ;;  %v740_v50 = vmul.f32 %v737_v1, %v3862_v59  ;;  %v741_v41 = vmul.f32 %v737_v1, %v3864_v45  ;;  %v3875_v42 = vld [vmem:[#allocation21_spill] sm:$0xff]  ;;  %v3883_v58 = vld [vmem:[#allocation22_spill] sm:$0xff] }
  0x82   :  { %v742_v29 = vmul.f32 %v737_v1, %v3866_v26  ;;  %v743_v2 = vmul.f32 %v737_v1, %v3868_v18  ;;  %v744_v44 = vmul.f32 %v737_v1, %v3870_v32  ;;  %v745_v54 = vmul.f32 %v737_v1, %v3872_v25  ;;  %v3879_v45 = vld [vmem:[#allocation5_spill] sm:$0xff]  ;;  %v3887_v48 = vld [vmem:[#allocation6_spill] sm:$0xff] }
  0x83   :  { %v746_v16 = vmul.f32 %v737_v1, %v3874_v53  ;;  %v3876_v46 = vunpack.c.l.bf16 %v3875_v42  ;;  %v3878_v59 = vunpack.c.l.bf16 %v3877_v56  ;;  %v3880_v11 = vunpack.c.l.bf16 %v3879_v45  ;;  %v3885_v30 = vld [vmem:[#allocation29_spill] sm:$0xff]  ;;  %v3889_v42 = vld [vmem:[#allocation31_spill] sm:$0xff]  ;;  %v3893_v45 = vld [vmem:[#allocation38_spill] sm:$0xff] }
  0x84   :  { %v3882_v18 = vunpack.c.l.bf16 %v3881_v12  ;;  %v3884_v32 = vunpack.c.l.bf16 %v3883_v58  ;;  %v3886_v25 = vunpack.c.l.bf16 %v3885_v30  ;;  %v3888_v53 = vunpack.c.l.bf16 %v3887_v48  ;;  %v3891_v56 = vld [vmem:[#allocation23_spill] sm:$0xff]  ;;  %v3897_v58 = vld [vmem:[#allocation32_spill] sm:$0xff]  ;;  %v3901_v48 = vld [vmem:[#allocation33_spill] sm:$0xff] }
  0x85   :  { %v747_v49 = vmul.f32 %v737_v1, %v3876_v46  ;;  %v748_v33 = vmul.f32 %v737_v1, %v3878_v59  ;;  %v749_v26 = vmul.f32 %v737_v1, %v3880_v11  ;;  %v3890_v46 = vunpack.c.l.bf16 %v3889_v42  ;;  %v3895_v12 = vld [vmem:[#allocation7_spill] sm:$0xff]  ;;  %v3899_v30 = vld [vmem:[#allocation24_spill] sm:$0xff] }
  0x86   :  { %v750_v4 = vmul.f32 %v737_v1, %v3882_v18  ;;  %v751_v35 = vmul.f32 %v737_v1, %v3884_v32  ;;  %v752_v57 = vmul.f32 %v737_v1, %v3886_v25  ;;  %v753_v17 = vmul.f32 %v737_v1, %v3888_v53 }
  0x87   :  { %v754_v10 = vmul.f32 %v737_v1, %v3890_v46  ;;  %v3892_v59 = vunpack.c.l.bf16 %v3891_v56  ;;  %v3894_v11 = vunpack.c.l.bf16 %v3893_v45  ;;  %v3896_v18 = vunpack.c.l.bf16 %v3895_v12  ;;  %v3903_v45 = vld [vmem:[#allocation8_spill] sm:$0xff]  ;;  %v3905_v12 = vld [vmem:[#allocation34_spill] sm:$0xff] }
  0x88   :  { %v3898_v32 = vunpack.c.l.bf16 %v3897_v58  ;;  %v3900_v25 = vunpack.c.l.bf16 %v3899_v30  ;;  %v3902_v53 = vunpack.c.l.bf16 %v3901_v48  ;;  %v802_v42 = vrot.slane %v738_v6, 2  ;;  %v3907_v58 = vld [vmem:[#allocation25_spill] sm:$0xff]  ;;  %v3909_v30 = vld [vmem:[#allocation35_spill] sm:$0xff]  ;;  %v3911_v48 = vld [vmem:[#allocation26_spill] sm:$0xff] }
  0x89   :  { %v755_v37 = vmul.f32 %v737_v1, %v3892_v59  ;;  %v756_v15 = vmul.f32 %v737_v1, %v3894_v11  ;;  %v757_v28 = vmul.f32 %v737_v1, %v3896_v18  ;;  %v803_v46 = vrot.slane %v739_v63, 2 }
  0x8a   :  { %v758_v8 = vmul.f32 %v737_v1, %v3898_v32  ;;  %v759_v47 = vmul.f32 %v737_v1, %v3900_v25  ;;  %v760_v22 = vmul.f32 %v737_v1, %v3902_v53  ;;  %v805_v39 = vrot.slane %v740_v50, 2  ;;  %v3913_v50 = vld [vmem:[#allocation10_spill] sm:$0xff] }
  0x8b   :  { %v806_v56 = vrot.slane %v741_v41, 2  ;;  %v808_v59 = vrot.slane %v742_v29, 2  ;;  %v809_v14 = vrot.slane %v743_v2, 2  ;;  %v3904_v11 = vunpack.c.l.bf16 %v3903_v45 }
  0x8c   :  { %v3906_v18 = vunpack.c.l.bf16 %v3905_v12  ;;  %v3908_v32 = vunpack.c.l.bf16 %v3907_v58  ;;  %v3910_v25 = vunpack.c.l.bf16 %v3909_v30  ;;  %v3912_v53 = vunpack.c.l.bf16 %v3911_v48 }
  0x8d   :  { %v761_v5 = vmul.f32 %v737_v1, %v3904_v11  ;;  %v766_v63 = vmul.f32 %v737_v1, %v732_v55  ;;  %v3914_v41 = vunpack.c.l.bf16 %v3913_v50  ;;  %v768_v2 = vmul.f32 %v737_v1, %v733_v7 }
  0x8e   :  { %v762_v52 = vmul.f32 %v737_v1, %v3906_v18  ;;  %v763_v19 = vmul.f32 %v737_v1, %v3908_v32  ;;  %v764_v62 = vmul.f32 %v737_v1, %v3910_v25  ;;  %v765_v6 = vmul.f32 %v737_v1, %v3912_v53 }
  0x8f   :  { %v767_v29 = vmul.f32 %v737_v1, %v3914_v41  ;;  %v3916_v45 = vunpack.c.l.bf16 %v3915_v21  ;;  %v804_v12 = vsel %vm370_vm1, %v802_v42, %v803_v46  ;;  %v811_v18 = vrot.slane %v744_v44, 2 }
  0x90   :  { %v812_v31 = vrot.slane %v745_v54, 2  ;;  %v807_v58 = vsel %vm370_vm1, %v805_v39, %v806_v56  ;;  %v810_v32 = vsel %vm370_vm1, %v808_v59, %v809_v14  ;;  %v814_v30 = vrot.slane %v746_v16, 2 }
  0x91   :  { %v769_v11 = vmul.f32 %v737_v1, %v3916_v45  ;;  %v815_v25 = vrot.slane %v747_v49, 2  ;;  %v817_v48 = vrot.slane %v748_v33, 2  ;;  %v818_v53 = vrot.slane %v749_v26, 2 }
  0x92   :  { %v820_v55 = vrot.slane %v750_v4, 2  ;;  %v821_v13 = vrot.slane %v751_v35, 2  ;;  %v823_v50 = vrot.slane %v752_v57, 2  ;;  %v824_v41 = vrot.slane %v753_v17, 2 }
  0x93   :  { %v826_v7 = vrot.slane %v754_v10, 2  ;;  %v827_v51 = vrot.slane %v755_v37, 2  ;;  %v829_v21 = vrot.slane %v756_v15, 2  ;;  %v830_v1 = vrot.slane %v757_v28, 2 }
  0x94   :  { %v832_v45 = vrot.slane %v758_v8, 2  ;;  %v833_v42 = vrot.slane %v759_v47, 2  ;;  %v835_v44 = vrot.slane %v760_v22, 2  ;;  %v836_v54 = vrot.slane %v761_v5, 2 }
  0x95   :  { %v838_v46 = vrot.slane %v762_v52, 2  ;;  %v839_v39 = vrot.slane %v763_v19, 2  ;;  %v841_v56 = vrot.slane %v764_v62, 2  ;;  %v842_v14 = vrot.slane %v765_v6, 2  ;;  %v2793_v62 = vld [vmem:[%s3487_s1] sm:$0x8] }
  0x96   :  { %v844_v16 = vrot.slane %v766_v63, 2  ;;  %v845_v49 = vrot.slane %v767_v29, 2  ;;  %v813_v33 = vsel %vm370_vm1, %v811_v18, %v812_v31  ;;  %v816_v35 = vsel %vm370_vm1, %v814_v30, %v815_v25  ;;  %v2882_v30 = vld [vmem:[%s3486_s0 + $0x34] sm:$0x1]  ;;  %v2887_v25 = vld [vmem:[%s3486_s0 + $0x3c] sm:$0x1] }
  0x97   :  { %v819_v17 = vsel %vm370_vm1, %v817_v48, %v818_v53  ;;  %v822_v37 = vsel %vm370_vm1, %v820_v55, %v821_v13  ;;  %v825_v28 = vsel %vm370_vm1, %v823_v50, %v824_v41  ;;  %v828_v47 = vsel %vm370_vm1, %v826_v7, %v827_v51  ;;  %3923 = vst [vmem:[#allocation12_spill] sm:$0xff] %v2882_v30  ;;  %v2904_v41 = vld [vmem:[%s3486_s0 + $0x4c] sm:$0x1]  ;;  %v2909_v7 = vld [vmem:[%s3486_s0 + $0x64] sm:$0x1] }
  0x98   :  { %v847_v22 = vrot.slane %v768_v2, 2  ;;  %v848_v5 = vrot.slane %v769_v11, 2  ;;  %v831_v19 = vsel %vm370_vm1, %v829_v21, %v830_v1  ;;  %v834_v52 = vsel %vm370_vm1, %v832_v45, %v833_v42  ;;  %v2855_v11 = vld [vmem:[%s3486_s0 + $0x1c] sm:$0x1]  ;;  %3924 = vst [vmem:[#allocation20_spill] sm:$0xff] %v2887_v25  ;;  %3927 = vst [vmem:[#allocation3_spill] sm:$0xff] %v2904_v41 }
  0x99   :  { %v837_v31 = vsel %vm370_vm1, %v835_v44, %v836_v54  ;;  %v840_v8 = vsel %vm370_vm1, %v838_v46, %v839_v39  ;;  %v843_v13 = vsel %vm370_vm1, %v841_v56, %v842_v14  ;;  %v846_v15 = vsel %vm370_vm1, %v844_v16, %v845_v49  ;;  %3918 = vst [vmem:[#allocation19_spill] sm:$0xff] %v2855_v11  ;;  %v2914_v21 = vld [vmem:[%s3486_s0 + $0x6c] sm:$0x1]  ;;  %v2921_v42 = vld [vmem:[%s3486_s0 + $0x74] sm:$0x1]  ;;  %v3948_v56 = vld [vmem:[#allocation41_spill] sm:$0xff] }
  0x9a   :  { %v2802_v51 = vadd.f32 %v804_v12, %v2615_v20  ;;  %v2805_v10 = vadd.f32 %v807_v58, %v2618_v34  ;;  %v2808_v57 = vadd.f32 %v810_v32, %v2623_v3  ;;  %v2811_v4 = vadd.f32 %v813_v33, %v2626_v0  ;;  %v2828_v3 = vld [vmem:[%s3486_s0 + $0x80] ss:$8 sps:$4 sm:$0xff]   ;;  %v2833_v0 = vld [vmem:[%s3486_s0 + $0x90] ss:$8 sps:$4 sm:$0xff]   ;;  %v2860_v12 = vld [vmem:[%s3486_s0 + $0x24] sm:$0x1] }
  0x9b   :  { %v3597_v26 = vunpack.c.l.bf16 %v2793_v62  ;;  %v919_v59 = vsub.s32 6, %v1676_v9  ;;  %v849_v6 = vsel %vm370_vm1, %v847_v22, %v848_v5  ;;  %v2817_v63 = vadd.f32 %v816_v35, %v2629_v24  ;;  %v2838_v24 = vld [vmem:[%s3486_s0 + $0x14] sm:$0x1]  ;;  %3919 = vst [vmem:[#allocation28_spill] sm:$0xff] %v2860_v12  ;;  %3928 = vst [vmem:[#allocation14_spill] sm:$0xff] %v2909_v7  ;;  %v3942_v5 = vld [vmem:[#allocation9_spill] sm:$0xff] }
  0x9c   :  { %v2820_v20 = vadd.f32 %v819_v17, %v2633_v23  ;;  %v2823_v34 = vadd.f32 %v822_v37, %v2636_v27  ;;  %3917 = vst [vmem:[#allocation11_spill] sm:$0xff] %v2838_v24  ;;  %v2841_v23 = vadd.f32 %v825_v28, %v2639_v40  ;;  %v2844_v27 = vadd.f32 %v828_v47, %v2657_v36  ;;  %v2865_v40 = vld [vmem:[%s3486_s0 + $0x2c] sm:$0x1]  ;;  %v3922_v58 = vld [vmem:[#allocation16_spill] sm:$0xff]  ;;  %v2926_v44 = vld [vmem:[%s3486_s0 + $0x7c] sm:$0x1] }
  0x9d   :  { %v2847_v29 = vadd.f32 %v831_v19, %v2660_v61  ;;  %v2850_v2 = vadd.f32 %v834_v52, %v2663_v43  ;;  %3920 = vst [vmem:[#allocation2_spill] sm:$0xff] %v2865_v40  ;;  %v2868_v36 = vadd.f32 %v837_v31, %v2666_v60  ;;  %v2871_v61 = vadd.f32 %v840_v8, %v2679_v38  ;;  %v3921_v43 = vld [vmem:[#allocation15_spill] sm:$0xff]  ;;  %v2892_v60 = vld [vmem:[%s3486_s0 + $0x44] sm:$0x1]  ;;  %v3933_v28 = vld [vmem:[#allocation36_spill] sm:$0xff] }
  0x9e   :  { %v2874_v18 = vadd.f32 %v843_v13, %v3921_v43  ;;  %v2877_v32 = vadd.f32 %v846_v15, %v3922_v58  ;;  %3925 = vst [vmem:[#allocation13_spill] sm:$0xff] %v2892_v60  ;;  %v3926_v38 = vld [vmem:[#allocation30_spill] sm:$0xff]  ;;  %v3598_v53 = vunpack.c.l.bf16 %v2828_v3  ;;  %v3601_v55 = vunpack.c.h.bf16 %v2828_v3  ;;  %3929 = vst [vmem:[#allocation21_spill] sm:$0xff] %v2914_v21  ;;  %v3936_v13 = vld [vmem:[#allocation37_spill] sm:$0xff] }
  0x9f   :  { %v2895_v48 = vadd.f32 %v849_v6, %v3926_v38  ;;  %v920_v50 = vrot.slane %v3597_v26, %v919_v59  ;;  %v3599_v1 = vunpack.c.l.bf16 %v2833_v0  ;;  %v3600_v45 = vunpack.c.h.bf16 %v2833_v0  ;;  %3930 = vst [vmem:[#allocation17_spill] sm:$0xff] %v2921_v42  ;;  %3931 = vst [vmem:[#allocation5_spill] sm:$0xff] %v2926_v44  ;;  %v2931_v54 = vld [vmem:[%s3486_s0 + $0x84] sm:$0x1]  ;;  %v3939_v58 = vld [vmem:[#allocation39_spill] sm:$0xff] }
  0xa0   :  { %3932 = vst [vmem:[#allocation18_spill] sm:$0xff] %v2931_v54  ;;  %v3934_v47 = vunpack.c.l.bf16 %v3933_v28  ;;  %v3935_v31 = vunpack.c.h.bf16 %v3933_v28  ;;  %v3937_v15 = vunpack.c.l.bf16 %v3936_v13  ;;  %v3938_v6 = vunpack.c.h.bf16 %v3936_v13  ;;  %v3945_v49 = vld [vmem:[#allocation40_spill] sm:$0xff] }
  0xa1   :  { %v3940_v38 = vunpack.c.l.bf16 %v3939_v58  ;;  %v3943_v35 = vunpack.c.l.bf16 %v3942_v5  ;;  %v3944_v52 = vunpack.c.h.bf16 %v3942_v5 }
  0xa2   :  { %v921_v22 = vmul.f32 %v920_v50, %v3934_v47  ;;  %v922_v8 = vmul.f32 %v920_v50, %v3935_v31  ;;  %v923_v59 = vmul.f32 %v920_v50, %v3937_v15  ;;  %v924_v43 = vmul.f32 %v920_v50, %v3938_v6 }
  0xa3   :  { %v925_v37 = vmul.f32 %v920_v50, %v3940_v38  ;;  %v3941_v47 = vunpack.c.h.bf16 %v3939_v58  ;;  %v927_v19 = vmul.f32 %v920_v50, %v3943_v35  ;;  %v928_v33 = vmul.f32 %v920_v50, %v3944_v52 }
  0xa4   :  { %v3946_v31 = vunpack.c.l.bf16 %v3945_v49  ;;  %v3947_v15 = vunpack.c.h.bf16 %v3945_v49  ;;  %v3949_v6 = vunpack.c.l.bf16 %v3948_v56  ;;  %v3950_v38 = vunpack.c.h.bf16 %v3948_v56 }
  0xa5   :  { %v926_v17 = vmul.f32 %v920_v50, %v3941_v47  ;;  %v933_v47 = vmul.f32 %v920_v50, %v3598_v53  ;;  %v934_v35 = vmul.f32 %v920_v50, %v3601_v55  ;;  %v935_v52 = vmul.f32 %v920_v50, %v3599_v1  ;;  %v2994_v1 = vld [vmem:[%s3486_s0 + $0x8c] sm:$0x1] }
  0xa6   :  { %v929_v16 = vmul.f32 %v920_v50, %v3946_v31  ;;  %v930_v14 = vmul.f32 %v920_v50, %v3947_v15  ;;  %v931_v39 = vmul.f32 %v920_v50, %v3949_v6  ;;  %v932_v46 = vmul.f32 %v920_v50, %v3950_v38  ;;  %3951 = vst [vmem:[#allocation22_spill] sm:$0xff] %v2994_v1 }
  0xa7   :  { %v936_v31 = vmul.f32 %v920_v50, %v3600_v45  ;;  %v987_v15 = vsub.s32 7, %v1676_v9  ;;  %v2980_v26 = vadd.f32 %v921_v22, %v2802_v51  ;;  %v2983_v6 = vadd.f32 %v922_v8, %v2805_v10  ;;  %v2999_v9 = vld [vmem:[%s3486_s0 + $0x94] sm:$0x1]  ;;  %v3016_v50 = vld [vmem:[%s3486_s0 + $0x9c] sm:$0x1] }
  0xa8   :  { %v2986_v38 = vadd.f32 %v923_v59, %v2808_v57  ;;  %v2989_v53 = vadd.f32 %v924_v43, %v2811_v4  ;;  %3952 = vst [vmem:[#allocation29_spill] sm:$0xff] %v2999_v9  ;;  %v3002_v51 = vadd.f32 %v925_v37, %v2817_v63  ;;  %v3005_v10 = vadd.f32 %v926_v17, %v2820_v20  ;;  %v3021_v22 = vld [vmem:[%s3486_s0 + $0x10] sm:$0xe]  ;;  %v3026_v63 = vld [vmem:[%s3486_s0 + $0x18] sm:$0xe] }
  0xa9   :  { %v3008_v57 = vadd.f32 %v927_v19, %v2823_v34  ;;  %v3011_v4 = vadd.f32 %v928_v33, %v2841_v23  ;;  %3953 = vst [vmem:[#allocation6_spill] sm:$0xff] %v3016_v50  ;;  %3954 = vst [vmem:[#allocation31_spill] sm:$0xff] %v3021_v22  ;;  %v3029_v20 = vadd.f32 %v929_v16, %v2844_v27  ;;  %v3043_v17 = vld [vmem:[%s3486_s0 + $0x20] sm:$0xe]  ;;  %v3048_v37 = vld [vmem:[%s3486_s0 + $0x28] sm:$0xe]  ;;  %v3968_v45 = vunpack.c.l.bf16 %v3933_v28 }
  0xaa   :  { %3955 = vst [vmem:[#allocation23_spill] sm:$0xff] %v3026_v63  ;;  %v3032_v34 = vadd.f32 %v930_v14, %v2847_v29  ;;  %v3035_v23 = vadd.f32 %v931_v39, %v2850_v2  ;;  %v3038_v33 = vadd.f32 %v932_v46, %v2868_v36  ;;  %3956 = vst [vmem:[#allocation38_spill] sm:$0xff] %v3043_v17  ;;  %v3053_v27 = vld [vmem:[%s3486_s0 + $0x30] sm:$0xe]  ;;  %v3960_v46 = vunpack.c.l.bf16 %v2793_v62  ;;  %v3069_v14 = vld [vmem:[%s3486_s0 + $0x38] sm:$0xe] }
  0xab   :  { %3957 = vst [vmem:[#allocation7_spill] sm:$0xff] %v3048_v37  ;;  %3958 = vst [vmem:[#allocation32_spill] sm:$0xff] %v3053_v27  ;;  %v3056_v29 = vadd.f32 %v933_v47, %v2871_v61  ;;  %v3059_v2 = vadd.f32 %v934_v35, %v2874_v18  ;;  %v3062_v36 = vadd.f32 %v935_v52, %v2877_v32  ;;  %v3074_v16 = vld [vmem:[%s3486_s0 + $0x40] sm:$0xe]  ;;  %v3079_v61 = vld [vmem:[%s3486_s0 + $0x48] sm:$0xe]  ;;  %v3969_v35 = vunpack.c.l.bf16 %v2838_v24 }
  0xac   :  { %v988_v39 = vrot.slane %v3960_v46, %v987_v15  ;;  %3961 = vst [vmem:[#allocation33_spill] sm:$0xff] %v3069_v14  ;;  %3962 = vst [vmem:[#allocation8_spill] sm:$0xff] %v3074_v16  ;;  %v3082_v18 = vadd.f32 %v936_v31, %v2895_v48  ;;  %v3090_v8 = vld [vmem:[%s3486_s0 + $0x60] sm:$0xe]  ;;  %v3095_v59 = vld [vmem:[%s3486_s0 + $0x68] sm:$0xe]  ;;  %v3970_v31 = vunpack.c.h.bf16 %v3933_v28  ;;  %v3971_v15 = vunpack.c.l.bf16 %v2855_v11 }
  0xad   :  { %3959 = vst [vmem:[#allocation24_spill] sm:$0xff] %v3062_v36  ;;  %3963 = vst [vmem:[#allocation34_spill] sm:$0xff] %v3079_v61  ;;  %v3100_v48 = vld [vmem:[%s3486_s0 + $0x70] sm:$0xe]  ;;  %v3972_v19 = vunpack.c.l.bf16 %v3936_v13  ;;  %v3974_v62 = vunpack.c.h.bf16 %v3936_v13  ;;  %v3975_v47 = vunpack.c.l.bf16 %v2865_v40  ;;  %v3977_v28 = vunpack.c.l.bf16 %v2882_v30 }
  0xae   :  { %3964 = vst [vmem:[#allocation25_spill] sm:$0xff] %v3082_v18  ;;  %3965 = vst [vmem:[#allocation35_spill] sm:$0xff] %v3090_v8  ;;  %v989_v32 = vmul.f32 %v988_v39, %v3968_v45  ;;  %v990_v52 = vmul.f32 %v988_v39, %v3969_v35  ;;  %v991_v55 = vmul.f32 %v988_v39, %v3970_v31  ;;  %v3973_v45 = vunpack.c.l.bf16 %v2860_v12 }
  0xaf   :  { %3966 = vst [vmem:[#allocation26_spill] sm:$0xff] %v3095_v59  ;;  %3967 = vst [vmem:[#allocation10_spill] sm:$0xff] %v3100_v48  ;;  %v992_v46 = vmul.f32 %v988_v39, %v3971_v15  ;;  %v993_v18 = vmul.f32 %v988_v39, %v3972_v19  ;;  %v995_v43 = vmul.f32 %v988_v39, %v3974_v62  ;;  %v3976_v35 = vunpack.c.l.bf16 %v3939_v58 }
  0xb0   :  { %v994_v61 = vmul.f32 %v988_v39, %v3973_v45  ;;  %v996_v48 = vmul.f32 %v988_v39, %v3975_v47  ;;  %v998_v31 = vmul.f32 %v988_v39, %v3977_v28  ;;  %v3978_v15 = vunpack.c.h.bf16 %v3939_v58 }
  0xb1   :  { %v997_v59 = vmul.f32 %v988_v39, %v3976_v35  ;;  %v3979_v19 = vunpack.c.l.bf16 %v2887_v25  ;;  %v3980_v45 = vunpack.c.l.bf16 %v3942_v5  ;;  %v3981_v13 = vunpack.c.l.bf16 %v2892_v60 }
  0xb2   :  { %v999_v8 = vmul.f32 %v988_v39, %v3978_v15  ;;  %v3982_v47 = vunpack.c.h.bf16 %v3942_v5  ;;  %v3983_v35 = vunpack.c.l.bf16 %v2904_v41  ;;  %v3984_v28 = vunpack.c.l.bf16 %v3945_v49 }
  0xb3   :  { %v1000_v16 = vmul.f32 %v988_v39, %v3979_v19  ;;  %v1001_v14 = vmul.f32 %v988_v39, %v3980_v45  ;;  %v1002_v62 = vmul.f32 %v988_v39, %v3981_v13  ;;  %v3985_v58 = vunpack.c.l.bf16 %v2909_v7 }
  0xb4   :  { %v1003_v27 = vmul.f32 %v988_v39, %v3982_v47  ;;  %v1004_v40 = vmul.f32 %v988_v39, %v3983_v35  ;;  %v1005_v30 = vmul.f32 %v988_v39, %v3984_v28  ;;  %v3986_v19 = vunpack.c.h.bf16 %v3945_v49 }
  0xb5   :  { %v1006_v15 = vmul.f32 %v988_v39, %v3985_v58  ;;  %v3987_v45 = vunpack.c.l.bf16 %v2914_v21  ;;  %v3988_v13 = vunpack.c.l.bf16 %v3948_v56  ;;  %v3989_v5 = vunpack.c.l.bf16 %v2921_v42 }
  0xb6   :  { %v1007_v25 = vmul.f32 %v988_v39, %v3986_v19  ;;  %v3990_v35 = vunpack.c.h.bf16 %v3948_v56  ;;  %v1053_v12 = vrot.slane %v989_v32, 1  ;;  %v1054_v28 = vrot.slane %v990_v52, 1 }
  0xb7   :  { %v1008_v37 = vmul.f32 %v988_v39, %v3987_v45  ;;  %v1009_v60 = vmul.f32 %v988_v39, %v3988_v13  ;;  %v1010_v47 = vmul.f32 %v988_v39, %v3989_v5  ;;  %v1056_v17 = vrot.slane %v991_v55, 1 }
  0xb8   :  { %v1011_v41 = vmul.f32 %v988_v39, %v3990_v35  ;;  %v1057_v7 = vrot.slane %v992_v46, 1  ;;  %v1059_v58 = vrot.slane %v993_v18, 1  ;;  %v1060_v11 = vrot.slane %v994_v61, 1 }
  0xb9   :  { %v3991_v49 = vunpack.c.l.bf16 %v2926_v44  ;;  %v3992_v45 = vunpack.c.l.bf16 %v2828_v3  ;;  %v3993_v13 = vunpack.c.l.bf16 %v2931_v54  ;;  %v3994_v5 = vunpack.c.h.bf16 %v2828_v3 }
  0xba   :  { %v3995_v56 = vunpack.c.l.bf16 %v2994_v1  ;;  %v3996_v55 = vunpack.c.l.bf16 %v2833_v0  ;;  %v3997_v61 = vunpack.c.l.bf16 %v2999_v9  ;;  %v3998_v46 = vunpack.c.h.bf16 %v2833_v0 }
  0xbb   :  { %v1012_v19 = vmul.f32 %v988_v39, %v3991_v49  ;;  %v1013_v21 = vmul.f32 %v988_v39, %v3992_v45  ;;  %v1014_v63 = vmul.f32 %v988_v39, %v3993_v13  ;;  %v1015_v42 = vmul.f32 %v988_v39, %v3994_v5 }
  0xbc   :  { %v1016_v32 = vmul.f32 %v988_v39, %v3995_v56  ;;  %v1017_v52 = vmul.f32 %v988_v39, %v3996_v55  ;;  %v1018_v18 = vmul.f32 %v988_v39, %v3997_v61  ;;  %v1019_v35 = vmul.f32 %v988_v39, %v3998_v46 }
  0xbd   :  { %v3999_v49 = vunpack.c.l.bf16 %v3016_v50  ;;  %v1055_v13 = vsel %vm187_vm0, %v1053_v12, %v1054_v28  ;;  %v1062_v54 = vrot.slane %v995_v43, 1  ;;  %v1063_v3 = vrot.slane %v996_v48, 1 }
  0xbe   :  { %v1058_v5 = vsel %vm187_vm0, %v1056_v17, %v1057_v7  ;;  %v1061_v56 = vsel %vm187_vm0, %v1059_v58, %v1060_v11  ;;  %v1065_v1 = vrot.slane %v997_v59, 1  ;;  %v1066_v44 = vrot.slane %v998_v31, 1 }
  0xbf   :  { %v1020_v45 = vmul.f32 %v988_v39, %v3999_v49  ;;  %v1068_v55 = vrot.slane %v999_v8, 1  ;;  %v1069_v24 = vrot.slane %v1000_v16, 1  ;;  %v1071_v9 = vrot.slane %v1001_v14, 1 }
  0xc0   :  { %v1072_v61 = vrot.slane %v1002_v62, 1  ;;  %v1074_v22 = vrot.slane %v1003_v27, 1  ;;  %v1075_v0 = vrot.slane %v1004_v40, 1  ;;  %v1077_v46 = vrot.slane %v1005_v30, 1 }
  0xc1   :  { %v1078_v36 = vrot.slane %v1006_v15, 1  ;;  %v1080_v50 = vrot.slane %v1007_v25, 1  ;;  %v1081_v39 = vrot.slane %v1008_v37, 1  ;;  %v1083_v49 = vrot.slane %v1009_v60, 1  ;;  %v1165_v25 = vld [vmem:[%s3487_s1 + $0x4] sm:$0x1] }
  0xc2   :  { %v1084_v12 = vrot.slane %v1010_v47, 1  ;;  %v1086_v43 = vrot.slane %v1011_v41, 1  ;;  %v1087_v48 = vrot.slane %v1012_v19, 1  ;;  %v1089_v28 = vrot.slane %v1013_v21, 1  ;;  %v4000_v47 = vld [vmem:[#allocation4_spill] sm:$0xff] }
  0xc3   :  { %v1090_v7 = vrot.slane %v1014_v63, 1  ;;  %v1064_v11 = vsel %vm187_vm0, %v1062_v54, %v1063_v3  ;;  %v1067_v17 = vsel %vm187_vm0, %v1065_v1, %v1066_v44  ;;  %v1092_v8 = vrot.slane %v1015_v42, 1 }
  0xc4   :  { %v1093_v16 = vrot.slane %v1016_v32, 1  ;;  %v1070_v14 = vsel %vm187_vm0, %v1068_v55, %v1069_v24  ;;  %v1073_v40 = vsel %vm187_vm0, %v1071_v9, %v1072_v61  ;;  %v1095_v30 = vrot.slane %v1017_v52, 1  ;;  %v1561_v52 = vld [vmem:[%s3486_s0 + $0x98] sm:$0xe] }
  0xc5   :  { %v1096_v27 = vrot.slane %v1018_v18, 1  ;;  %v1076_v60 = vsel %vm187_vm0, %v1074_v22, %v1075_v0  ;;  %v1079_v41 = vsel %vm187_vm0, %v1077_v46, %v1078_v36  ;;  %v1098_v21 = vrot.slane %v1019_v35, 1  ;;  %v4006_v0 = vld [vmem:[#allocation11_spill] sm:$0xff] }
  0xc6   :  { %v1099_v54 = vrot.slane %v1020_v45, 1  ;;  %v1082_v1 = vsel %vm187_vm0, %v1080_v50, %v1081_v39  ;;  %v1085_v42 = vsel %vm187_vm0, %v1083_v49, %v1084_v12  ;;  %v1088_v24 = vsel %vm187_vm0, %v1086_v43, %v1087_v48  ;;  %v4008_v39 = vld [vmem:[#allocation23_spill] sm:$0xff]  ;;  %v4012_v48 = vld [vmem:[#allocation38_spill] sm:$0xff] }
  0xc7   :  { %v1091_v44 = vsel %vm187_vm0, %v1089_v28, %v1090_v7  ;;  %v1094_v9 = vsel %vm187_vm0, %v1092_v8, %v1093_v16  ;;  %v3195_v63 = vadd.f32 %v1055_v13, %v2980_v26  ;;  %v3198_v37 = vadd.f32 %v1058_v5, %v2983_v6  ;;  %v1557_v26 = vld [vmem:[%s3486_s0 + $0x78] sm:$0xe]  ;;  %v4010_v12 = vld [vmem:[#allocation19_spill] sm:$0xff] }
  0xc8   :  { %v1166_v22 = vunpack.c.l.bf16 %v1165_v25  ;;  %v1097_v36 = vsel %vm187_vm0, %v1095_v30, %v1096_v27  ;;  %v3202_v59 = vadd.f32 %v1061_v56, %v2986_v38  ;;  %v3205_v50 = vadd.f32 %v1064_v11, %v2989_v53  ;;  %v1558_v53 = vld [vmem:[%s3486_s0 + $0x80] sm:$0xe]  ;;  %v1559_v38 = vld [vmem:[%s3486_s0 + $0x88] sm:$0xe]  ;;  %v4014_v11 = vld [vmem:[#allocation28_spill] sm:$0xff] }
  0xc9   :  { %v3208_v31 = vadd.f32 %v1067_v17, %v3002_v51  ;;  %v3214_v62 = vsel %vm187_vm0, %v1098_v21, %v1099_v54  ;;  %v3217_v6 = vadd.f32 %v1070_v14, %v3005_v10  ;;  %v3220_v15 = vadd.f32 %v1073_v40, %v3008_v57  ;;  %v1560_v51 = vld [vmem:[%s3486_s0 + $0x90] sm:$0xe]  ;;  %v4004_v56 = vld [vmem:[#allocation31_spill] sm:$0xff]  ;;  %v4018_v30 = vld [vmem:[#allocation2_spill] sm:$0xff] }
  0xca   :  { %v1170_v58 = vrot.slane %v1166_v22, %v4000_v47  ;;  %v3233_v10 = vadd.f32 %v1076_v60, %v3011_v4  ;;  %v3236_v57 = vadd.f32 %v1079_v41, %v3029_v20  ;;  %v3239_v19 = vadd.f32 %v1082_v1, %v3032_v34  ;;  %v4002_v20 = vld [vmem:[#allocation24_spill] sm:$0xff]  ;;  %v4016_v16 = vld [vmem:[#allocation7_spill] sm:$0xff]  ;;  %v4054_v47 = vld [vmem:[#allocation29_spill] sm:$0xff] }
  0xcb   :  { %v3242_v32 = vadd.f32 %v1085_v42, %v3035_v23  ;;  %v3248_v18 = vadd.f32 %v1088_v24, %v3038_v33  ;;  %v3251_v35 = vadd.f32 %v1091_v44, %v3056_v29  ;;  %v3254_v4 = vadd.f32 %v1094_v9, %v3059_v2  ;;  %v4020_v60 = vld [vmem:[#allocation32_spill] sm:$0xff]  ;;  %v4024_v24 = vld [vmem:[#allocation33_spill] sm:$0xff] }
  0xcc   :  { %4001 = vst [vmem:[#allocation27_spill] sm:$0xff] %v3233_v10  ;;  %v3257_v45 = vadd.f32 %v1097_v36, %v4002_v20  ;;  %v1160_v34 = vunpack.c.l.bf16 %v1557_v26  ;;  %v1161_v13 = vunpack.c.l.bf16 %v1558_v53  ;;  %v1162_v23 = vunpack.c.l.bf16 %v1559_v38  ;;  %v4022_v54 = vld [vmem:[#allocation12_spill] sm:$0xff] }
  0xcd   :  { %v1163_v3 = vunpack.c.l.bf16 %v1560_v51  ;;  %v1164_v5 = vunpack.c.l.bf16 %v1561_v52  ;;  %v4005_v55 = vunpack.c.l.bf16 %v4004_v56  ;;  %v4007_v33 = vunpack.c.l.bf16 %v4006_v0  ;;  %v4026_v22 = vld [vmem:[#allocation20_spill] sm:$0xff]  ;;  %v4030_v52 = vld [vmem:[#allocation13_spill] sm:$0xff] }
  0xce   :  { %4003 = vst [vmem:[#allocation15_spill] sm:$0xff] %v3257_v45  ;;  %v4009_v29 = vunpack.c.l.bf16 %v4008_v39  ;;  %v4011_v2 = vunpack.c.l.bf16 %v4010_v12  ;;  %v4013_v28 = vunpack.c.l.bf16 %v4012_v48  ;;  %v4015_v17 = vunpack.c.l.bf16 %v4014_v11  ;;  %v4028_v53 = vld [vmem:[#allocation8_spill] sm:$0xff]  ;;  %v4034_v39 = vld [vmem:[#allocation3_spill] sm:$0xff]  ;;  %v4038_v11 = vld [vmem:[#allocation14_spill] sm:$0xff] }
  0xcf   :  { %v1171_v61 = vmul.f32 %v1170_v58, %v4005_v55  ;;  %v1172_v46 = vmul.f32 %v1170_v58, %v4007_v33  ;;  %v4017_v14 = vunpack.c.l.bf16 %v4016_v16  ;;  %v4019_v27 = vunpack.c.l.bf16 %v4018_v30  ;;  %v4032_v55 = vld [vmem:[#allocation34_spill] sm:$0xff] }
  0xd0   :  { %v1173_v49 = vmul.f32 %v1170_v58, %v4009_v29  ;;  %v1174_v43 = vmul.f32 %v1170_v58, %v4011_v2  ;;  %v1175_v7 = vmul.f32 %v1170_v58, %v4013_v28  ;;  %v1176_v8 = vmul.f32 %v1170_v58, %v4015_v17  ;;  %v4036_v2 = vld [vmem:[#allocation35_spill] sm:$0xff] }
  0xd1   :  { %v1177_v40 = vmul.f32 %v1170_v58, %v4017_v14  ;;  %v1178_v25 = vmul.f32 %v1170_v58, %v4019_v27  ;;  %v4021_v41 = vunpack.c.l.bf16 %v4020_v60  ;;  %v4023_v1 = vunpack.c.l.bf16 %v4022_v54  ;;  %v4040_v14 = vld [vmem:[#allocation26_spill] sm:$0xff]  ;;  %v4042_v60 = vld [vmem:[#allocation21_spill] sm:$0xff] }
  0xd2   :  { %v4025_v44 = vunpack.c.l.bf16 %v4024_v24  ;;  %v4027_v36 = vunpack.c.l.bf16 %v4026_v22  ;;  %v4029_v38 = vunpack.c.l.bf16 %v4028_v53  ;;  %v4031_v20 = vunpack.c.l.bf16 %v4030_v52  ;;  %v4046_v22 = vld [vmem:[#allocation17_spill] sm:$0xff] }
  0xd3   :  { %v1179_v21 = vmul.f32 %v1170_v58, %v4021_v41  ;;  %v1180_v42 = vmul.f32 %v1170_v58, %v4023_v1  ;;  %v4033_v0 = vunpack.c.l.bf16 %v4032_v55  ;;  %v4035_v29 = vunpack.c.l.bf16 %v4034_v39  ;;  %v4044_v1 = vld [vmem:[#allocation10_spill] sm:$0xff]  ;;  %v4048_v52 = vld [vmem:[#allocation5_spill] sm:$0xff] }
  0xd4   :  { %v1181_v9 = vmul.f32 %v1170_v58, %v4025_v44  ;;  %v1182_v26 = vmul.f32 %v1170_v58, %v4027_v36  ;;  %v3285_v51 = vmul.f32 %v1170_v58, %v4029_v38  ;;  %v3289_v56 = vmul.f32 %v1170_v58, %v4031_v20 }
  0xd5   :  { %v3293_v33 = vmul.f32 %v1170_v58, %v4033_v0  ;;  %v3297_v12 = vmul.f32 %v1170_v58, %v4035_v29  ;;  %v4037_v48 = vunpack.c.l.bf16 %v4036_v2  ;;  %v4039_v17 = vunpack.c.l.bf16 %v4038_v11  ;;  %v4050_v2 = vld [vmem:[#allocation18_spill] sm:$0xff] }
  0xd6   :  { %v4041_v30 = vunpack.c.l.bf16 %v4040_v14  ;;  %v4043_v41 = vunpack.c.l.bf16 %v4042_v60  ;;  %v4045_v24 = vunpack.c.l.bf16 %v4044_v1  ;;  %v4047_v36 = vunpack.c.l.bf16 %v4046_v22  ;;  %v4052_v60 = vld [vmem:[#allocation22_spill] sm:$0xff] }
  0xd7   :  { %v1187_v28 = vmul.f32 %v1170_v58, %v4037_v48  ;;  %v1188_v16 = vmul.f32 %v1170_v58, %v4039_v17  ;;  %v1193_v38 = vmul.f32 %v1170_v58, %v1160_v34  ;;  %v4049_v20 = vunpack.c.l.bf16 %v4048_v52 }
  0xd8   :  { %v1189_v27 = vmul.f32 %v1170_v58, %v4041_v30  ;;  %v1190_v54 = vmul.f32 %v1170_v58, %v4043_v41  ;;  %v1191_v44 = vmul.f32 %v1170_v58, %v4045_v24  ;;  %v1192_v53 = vmul.f32 %v1170_v58, %v4047_v36 }
  0xd9   :  { %v1194_v55 = vmul.f32 %v1170_v58, %v4049_v20  ;;  %v1195_v0 = vmul.f32 %v1170_v58, %v1161_v13  ;;  %v1235_v39 = vrot.slane %v1171_v61, 2  ;;  %v1236_v29 = vrot.slane %v1172_v46, 2  ;;  %v4056_v61 = vld [vmem:[#allocation6_spill] sm:$0xff] }
  0xda   :  { %v4051_v48 = vunpack.c.l.bf16 %v4050_v2  ;;  %v1197_v17 = vmul.f32 %v1170_v58, %v1162_v23  ;;  %v1238_v14 = vrot.slane %v1173_v49, 2  ;;  %v1239_v30 = vrot.slane %v1174_v43, 2 }
  0xdb   :  { %v4053_v41 = vunpack.c.l.bf16 %v4052_v60  ;;  %v1199_v24 = vmul.f32 %v1170_v58, %v1163_v3  ;;  %v4055_v22 = vunpack.c.l.bf16 %v4054_v47  ;;  %v1201_v34 = vmul.f32 %v1170_v58, %v1164_v5 }
  0xdc   :  { %v1196_v11 = vmul.f32 %v1170_v58, %v4051_v48  ;;  %v1241_v10 = vrot.slane %v1175_v7, 2  ;;  %v1242_v52 = vrot.slane %v1176_v8, 2  ;;  %v1244_v20 = vrot.slane %v1177_v40, 2 }
  0xdd   :  { %v1198_v1 = vmul.f32 %v1170_v58, %v4053_v41  ;;  %v1200_v36 = vmul.f32 %v1170_v58, %v4055_v22  ;;  %v1245_v13 = vrot.slane %v1178_v25, 2  ;;  %v4057_v46 = vunpack.c.l.bf16 %v4056_v61 }
  0xde   :  { %v1237_v2 = vsel %vm370_vm1, %v1235_v39, %v1236_v29  ;;  %v1247_v23 = vrot.slane %v1179_v21, 2  ;;  %v1248_v49 = vrot.slane %v1180_v42, 2  ;;  %v1240_v43 = vsel %vm370_vm1, %v1238_v14, %v1239_v30 }
  0xdf   :  { %v1202_v45 = vmul.f32 %v1170_v58, %v4057_v46  ;;  %v1250_v48 = vrot.slane %v1181_v9, 2  ;;  %v1251_v60 = vrot.slane %v1182_v26, 2  ;;  %v1259_v3 = vrot.slane %v1187_v28, 2 }
  0xe0   :  { %v1260_v41 = vrot.slane %v1188_v16, 2  ;;  %v1262_v47 = vrot.slane %v1189_v27, 2  ;;  %v1263_v22 = vrot.slane %v1190_v54, 2  ;;  %v1265_v5 = vrot.slane %v1191_v44, 2 }
  0xe1   :  { %v1243_v7 = vsel %vm370_vm1, %v1241_v10, %v1242_v52  ;;  %v1246_v8 = vsel %vm370_vm1, %v1244_v20, %v1245_v13  ;;  %v1266_v40 = vrot.slane %v1192_v53, 2  ;;  %v1268_v25 = vrot.slane %v1193_v38, 2 }
  0xe2   :  { %v1249_v58 = vsel %vm370_vm1, %v1247_v23, %v1248_v49  ;;  %v1253_v21 = vrot.slane %v3285_v51, 2  ;;  %v1254_v42 = vrot.slane %v3289_v56, 2  ;;  %v1269_v39 = vrot.slane %v1194_v55, 2 }
  0xe3   :  { %v1252_v9 = vsel %vm370_vm1, %v1250_v48, %v1251_v60  ;;  %v1256_v26 = vrot.slane %v3293_v33, 2  ;;  %v1271_v28 = vrot.slane %v1195_v0, 2  ;;  %v1272_v16 = vrot.slane %v1196_v11, 2  ;;  %v4060_v60 = vld [vmem:[#allocation27_spill] sm:$0xff] }
  0xe4   :  { %v1261_v27 = vsel %vm370_vm1, %v1259_v3, %v1260_v41  ;;  %v1264_v10 = vsel %vm370_vm1, %v1262_v47, %v1263_v22  ;;  %v1267_v54 = vsel %vm370_vm1, %v1265_v5, %v1266_v40  ;;  %v1274_v44 = vrot.slane %v1197_v17, 2 }
  0xe5   :  { %v1270_v53 = vsel %vm370_vm1, %v1268_v25, %v1269_v39  ;;  %v1275_v38 = vrot.slane %v1198_v1, 2  ;;  %v1277_v51 = vrot.slane %v1199_v24, 2  ;;  %v1278_v29 = vrot.slane %v1200_v36, 2  ;;  %v4058_v36 = vld [vmem:[#allocation25_spill] sm:$0xff] }
  0xe6   :  { %v1257_v56 = vrot.slane %v3297_v12, 2  ;;  %v3336_v55 = vadd.f32 %v1237_v2, %v3195_v63  ;;  %v3339_v33 = vadd.f32 %v1240_v43, %v3198_v37  ;;  %v3342_v0 = vadd.f32 %v1243_v7, %v3202_v59 }
  0xe7   :  { %v1273_v11 = vsel %vm370_vm1, %v1271_v28, %v1272_v16  ;;  %v1280_v14 = vrot.slane %v1201_v34, 2  ;;  %v1281_v17 = vrot.slane %v1202_v45, 2  ;;  %v3346_v30 = vadd.f32 %v1246_v8, %v3205_v50 }
  0xe8   :  { %v3349_v1 = vadd.f32 %v1261_v27, %v3236_v57  ;;  %v3352_v12 = vadd.f32 %v1264_v10, %v3239_v19  ;;  %v3355_v63 = vadd.f32 %v1267_v54, %v3242_v32  ;;  %v3358_v37 = vadd.f32 %v1270_v53, %v3248_v18 }
  0xe9   :  { %v1255_v59 = vsel %vm370_vm1, %v1253_v21, %v1254_v42  ;;  %v1276_v24 = vsel %vm370_vm1, %v1274_v44, %v1275_v38  ;;  %v1279_v45 = vsel %vm370_vm1, %v1277_v51, %v1278_v29  ;;  %v3364_v50 = vadd.f32 %v1249_v58, %v3208_v31 }
  0xea   :  { %v3367_v57 = vadd.f32 %v1273_v11, %v3251_v35  ;;  %v1315_v19 = vadd.f32 %v3349_v1, %v3336_v55  ;;  %v1316_v32 = vadd.f32 %v3352_v12, %v3339_v33  ;;  %v1317_v18 = vadd.f32 %v3355_v63, %v3342_v0 }
  0xeb   :  { %v1132_v34 = vadd.f32 %v3214_v62, %v4058_v36  ;;  %v1258_v52 = vsel %vm370_vm1, %v1256_v26, %v1257_v56  ;;  %v1282_v31 = vsel %vm370_vm1, %v1280_v14, %v1281_v17  ;;  %v3380_v20 = vadd.f32 %v1252_v9, %v3217_v6  ;;  %v4059_v62 = vld [vmem:[#allocation15_spill] sm:$0xff] }
  0xec   :  { %v3383_v35 = vadd.f32 %v1276_v24, %v3254_v4  ;;  %v1318_v13 = vadd.f32 %v3358_v37, %v3346_v30  ;;  %v1323_v61 = vadd.f32 %v1316_v32, %v1315_v19  ;;  %v1338_v46 = vmul.f32 %v3336_v55, %v3336_v55 }
  0xed   :  { %v3390_v2 = vadd.f32 %v1255_v59, %v3220_v15  ;;  %v3393_v23 = vadd.f32 %v1279_v45, %v4059_v62  ;;  %v1339_v6 = vmul.f32 %v3339_v33, %v3339_v33  ;;  %v1340_v4 = vmul.f32 %v3342_v0, %v3342_v0 }
  0xee   :  { %v1319_v49 = vadd.f32 %v3367_v57, %v3364_v50  ;;  %v1324_v43 = vadd.f32 %v1323_v61, %v1317_v18  ;;  %v1346_v48 = vmul.f32 %v3349_v1, %v3349_v1  ;;  %v1347_v15 = vmul.f32 %v3352_v12, %v3352_v12 }
  0xef   :  { %v3406_v3 = vadd.f32 %v1258_v52, %v4060_v60  ;;  %v1341_v41 = vmul.f32 %v3346_v30, %v3346_v30  ;;  %v1348_v47 = vmul.f32 %v3355_v63, %v3355_v63  ;;  %v1349_v22 = vmul.f32 %v3358_v37, %v3358_v37 }
  0xf0   :  { %v3414_v5 = vadd.f32 %v1282_v31, %v1132_v34  ;;  %v1320_v7 = vadd.f32 %v3383_v35, %v3380_v20  ;;  %v1325_v8 = vadd.f32 %v1324_v43, %v1318_v13  ;;  %v1354_v40 = vadd.f32 %v1346_v48, %v1338_v46 }
  0xf1   :  { %v1342_v25 = vmul.f32 %v3364_v50, %v3364_v50  ;;  %v1350_v58 = vmul.f32 %v3367_v57, %v3367_v57  ;;  %v1355_v21 = vadd.f32 %v1347_v15, %v1339_v6  ;;  %v1356_v42 = vadd.f32 %v1348_v47, %v1340_v4 }
  0xf2   :  { %v1321_v39 = vadd.f32 %v3393_v23, %v3390_v2  ;;  %v1326_v9 = vadd.f32 %v1325_v8, %v1319_v49  ;;  %v1343_v26 = vmul.f32 %v3380_v20, %v3380_v20  ;;  %v1351_v28 = vmul.f32 %v3383_v35, %v3383_v35  ;;  %v1379_v8 = vld [vmem:[%s3488_s2] sm:$0x1] }
  0xf3   :  { %v1357_v16 = vadd.f32 %v1349_v22, %v1341_v41  ;;  %v1362_v27 = vadd.f32 %v1355_v21, %v1354_v40  ;;  %v1322_v10 = vadd.f32 %v3414_v5, %v3406_v3  ;;  %v1344_v44 = vmul.f32 %v3390_v2, %v3390_v2 }
  0xf4   :  { %v1327_v54 = vadd.f32 %v1326_v9, %v1320_v7  ;;  %v1352_v53 = vmul.f32 %v3393_v23, %v3393_v23  ;;  %v1358_v38 = vadd.f32 %v1350_v58, %v1342_v25  ;;  %v1345_v56 = vmul.f32 %v3406_v3, %v3406_v3  ;;  %v1383_v58 = vld [vmem:[%s3489_s3] sm:$0x1] }
  0xf5   :  { %v1363_v51 = vadd.f32 %v1362_v27, %v1356_v42  ;;  %v1353_v11 = vmul.f32 %v3414_v5, %v3414_v5  ;;  %v1359_v14 = vadd.f32 %v1351_v28, %v1343_v26  ;;  %v4061_v42 = vld [vmem:[#allocation4_spill] sm:$0xff] }
  0xf6   :  { %v1328_v29 = vadd.f32 %v1327_v54, %v1321_v39  ;;  %v1360_v24 = vadd.f32 %v1352_v53, %v1344_v44 }
  0xf7   :  { %v1364_v17 = vadd.f32 %v1363_v51, %v1357_v16  ;;  %v1361_v32 = vadd.f32 %v1353_v11, %v1345_v56 }
  0xf8   :  { %v1329_v59 = vadd.f32 %v1328_v29, %v1322_v10 }
  0xf9   :  { %v1365_v45 = vadd.f32 %v1364_v17, %v1358_v38 }
  0xfa   :  { %v1330_v19 = vrot.slane %v1329_v59, 4 }
  0xfb   :  { %v1366_v18 = vadd.f32 %v1365_v45, %v1359_v14 }
  0xfc   :  { %v1331_v36 = vadd.f32 %v1330_v19, %v1329_v59 }
  0xfd   :  { %v1367_v34 = vadd.f32 %v1366_v18, %v1360_v24 }
  0xfe   :  { %v1332_v52 = vrot.slane %v1331_v36, 2 }
  0xff   :  { %v1368_v31 = vadd.f32 %v1367_v34, %v1361_v32 }
 0x100   :  { %v1333_v13 = vadd.f32 %v1332_v52, %v1331_v36 }
 0x101   :  { %v1369_v61 = vrot.slane %v1368_v31, 4 }
 0x102   :  { %v1334_v46 = vrot.slane %v1333_v13, 1 }
 0x103   :  { %v1370_v62 = vadd.f32 %v1369_v61, %v1368_v31 }
 0x104   :  { %v1335_v6 = vadd.f32 %v1334_v46, %v1333_v13 }
 0x105   :  { %v1371_v4 = vrot.slane %v1370_v62, 2 }
 0x106   :  { %v1337_v49 = vmul.f32 0.0078125, %v1335_v6 }
 0x107   :  { %v1372_v43 = vadd.f32 %v1371_v4, %v1370_v62 }
 0x108   :  { %v1376_v60 = vmul.f32 %v1337_v49, %v1337_v49 }
 0x109   :  { %v1373_v48 = vrot.slane %v1372_v43, 1 }
 0x10b   :  { %v1374_v15 = vadd.f32 %v1373_v48, %v1372_v43 }
 0x10d   :  { %v1375_v41 = vmul.f32 0.0078125, %v1374_v15 }
 0x10f   :  { %v1377_v47 = vsub.f32 %v1375_v41, %v1376_v60 }
 0x111   :  { %v1378_v22 = vmax.f32 %v1377_v47, 0.0 }
 0x113   :  { %v1380_v7 = vadd.f32 1e-05, %v1378_v22 }
 0x115   :  { %1609 = vrsqrt.f32 %v1380_v7 }
 0x122   :  { %v1610_v40 = vpop.eup %1609 }
 0x123   :  { %v1382_v25 = vmul.f32 %v1610_v40, %v1379_v8 }
 0x125   :  { %v1384_v21 = vmul.f32 %v1382_v25, %v1337_v49  ;;  %v1390_v39 = vrot.slane %v1382_v25, %v4061_v42 }
 0x127   :  { %v1385_v9 = vsub.f32 %v1383_v58, %v1384_v21  ;;  %v1392_v26 = vmul.f32 %v1390_v39, %v3336_v55  ;;  %v1393_v28 = vmul.f32 %v1390_v39, %v3339_v33  ;;  %v1394_v16 = vmul.f32 %v1390_v39, %v3342_v0 }
 0x128   :  { %v1395_v27 = vmul.f32 %v1390_v39, %v3346_v30  ;;  %v1396_v10 = vmul.f32 %v1390_v39, %v3364_v50  ;;  %v1397_v54 = vmul.f32 %v1390_v39, %v3380_v20  ;;  %v1398_v44 = vmul.f32 %v1390_v39, %v3390_v2 }
 0x129   :  { %v1399_v53 = vmul.f32 %v1390_v39, %v3406_v3  ;;  %v1400_v38 = vmul.f32 %v1390_v39, %v3349_v1  ;;  %v1401_v51 = vmul.f32 %v1390_v39, %v3352_v12  ;;  %v1402_v55 = vmul.f32 %v1390_v39, %v3355_v63 }
 0x12a   :  { %v1403_v33 = vmul.f32 %v1390_v39, %v3358_v37  ;;  %v1412_v0 = vrot.slane %v1385_v9, %v4061_v42  ;;  %v1404_v30 = vmul.f32 %v1390_v39, %v3367_v57  ;;  %v1405_v50 = vmul.f32 %v1390_v39, %v3383_v35 }
 0x12b   :  { %v1406_v20 = vmul.f32 %v1390_v39, %v3393_v23  ;;  %v1407_v2 = vmul.f32 %v1390_v39, %v3414_v5 }
 0x12c   :  { %v1414_v29 = vadd.f32 %v1412_v0, %v1392_v26  ;;  %v1415_v3 = vadd.f32 %v1412_v0, %v1393_v28  ;;  %v1416_v56 = vadd.f32 %v1412_v0, %v1394_v16  ;;  %v1417_v1 = vadd.f32 %v1412_v0, %v1395_v27 }
 0x12d   :  { %v1418_v11 = vadd.f32 %v1412_v0, %v1396_v10  ;;  %v1419_v12 = vadd.f32 %v1412_v0, %v1397_v54  ;;  %v1420_v14 = vadd.f32 %v1412_v0, %v1398_v44  ;;  %v1421_v63 = vadd.f32 %v1412_v0, %v1399_v53 }
 0x12e   :  { %v1422_v17 = vadd.f32 %v1412_v0, %v1400_v38  ;;  %v1423_v37 = vadd.f32 %v1412_v0, %v1401_v51  ;;  %v1424_v59 = vadd.f32 %v1412_v0, %v1402_v55  ;;  %v1425_v24 = vadd.f32 %v1412_v0, %v1403_v33 }
 0x12f   :  { %v1426_v45 = vadd.f32 %v1412_v0, %v1404_v30  ;;  %v1427_v57 = vadd.f32 %v1412_v0, %v1405_v50  ;;  %v1428_v19 = vadd.f32 %v1412_v0, %v1406_v20  ;;  %v1429_v35 = vadd.f32 %v1412_v0, %v1407_v2 }
 0x130   :  { %v1565_v32 = vpack.c.bf16 %v1415_v3, %v1414_v29  ;;  %v1570_v23 = vpack.c.bf16 %v1417_v1, %v1416_v56  ;;  %v1575_v18 = vpack.c.bf16 %v1419_v12, %v1418_v11  ;;  %v1580_v5 = vpack.c.bf16 %v1421_v63, %v1420_v14 }
 0x131   :  { %v1585_v36 = vpack.c.bf16 %v1423_v37, %v1422_v17  ;;  %v1590_v34 = vpack.c.bf16 %v1425_v24, %v1424_v59  ;;  %v1595_v52 = vpack.c.bf16 %v1427_v57, %v1426_v45  ;;  %v1600_v31 = vpack.c.bf16 %v1429_v35, %v1428_v19 }
 0x132   :  { %1566 = vst [vmem:[%s3490_s4] sm:$0xff] %v1565_v32   ;;  %1602 = vst [vmem:[%s3490_s4 + $0x8] sm:$0xff] %v1570_v23  }
 0x133   :  { %1603 = vst [vmem:[%s3490_s4 + $0x10] sm:$0xff] %v1575_v18   ;;  %1604 = vst [vmem:[%s3490_s4 + $0x18] sm:$0xff] %v1580_v5  }
 0x134   :  { %1605 = vst [vmem:[%s3490_s4 + $0x20] sm:$0xff] %v1585_v36   ;;  %1606 = vst [vmem:[%s3490_s4 + $0x28] sm:$0xff] %v1590_v34  }
 0x135   :  { %1607 = vst [vmem:[%s3490_s4 + $0x30] sm:$0xff] %v1595_v52   ;;  %1608 = vst [vmem:[%s3490_s4 + $0x38] sm:$0xff] %v1600_v31  }

// kernel: mobilenetv4_forward.25
= control target key start
LH: loop header
LB: loop body
LE: loop exit
PB: predicated region body
PF: predicated region fallthrough
CT: control target
= control target key end

     0   :  { %v236_v10 = vmov 0.0   ;;  %s305_s1 = inlined_call_operand.vmem [shape: bf16[128,128], index: 1, kind: input, shape index: {}]   ;;  %s306_s0 = inlined_call_operand.vmem [shape: bf16[32,128], index: 0, kind: input, shape index: {}]   ;;  %s307_s2 = inlined_call_operand.vmem [shape: f32[1,128], index: 2, kind: output, shape index: {0}]   ;;  %s308_s3 = inlined_call_operand.vmem [shape: f32[1,128], index: 3, kind: output, shape index: {1}]  }
   0x1   :  { %v226_v0 = vld [vmem:[%s305_s1 + $0x38] sm:$0xff]   ;;  %v227_v1 = vld [vmem:[%s305_s1 + $0x30] sm:$0xff]   ;;  %v228_v2 = vld [vmem:[%s305_s1 + $0x28] sm:$0xff]   ;;  %18 = vst [vmem:[%s307_s2] sm:$0x1] %v236_v10 }
   0x2   :  { %205 = vmatprep.subr.bf16.mxu0 %v226_v0  ;;  %v229_v3 = vld [vmem:[%s305_s1 + $0x20] sm:$0xff]   ;;  %v230_v5 = vld [vmem:[%s305_s1 + $0x18] sm:$0xff]   ;;  %v231_v6 = vld [vmem:[%s305_s1 + $0x10] sm:$0xff]   ;;  %19 = vst [vmem:[%s308_s3] sm:$0x1] %v236_v10 }
   0x3   :  { %206 = vmatpush3.bf16.msra.mxu0 %v226_v0  ;;  %v234_v4 = vld [vmem:[%s306_s0] sm:$0xff]   ;;  %v232_v7 = vld [vmem:[%s305_s1 + $0x8] sm:$0xff]  }
   0x4   :  { %207 = vmatprep.subr.bf16.mxu0 %v227_v1  ;;  %221 = vmatprep.mubr.bf16.mxu0 %v234_v4  ;;  %v233_v8 = vld [vmem:[%s305_s1] sm:$0xff]   ;;  %v235_v9 = vld [vmem:[%s306_s0 + $0x8] sm:$0xff]  }
   0x7   :  { %208 = vmatpush3.bf16.msra.mxu0 %v227_v1 }
   0x8   :  { %209 = vmatprep.subr.bf16.mxu0 %v228_v2  ;;  %v149_v34 = vld [vmem:[%s307_s2] sm:$0x1] }
   0x9   :  { %v161_v37 = vld [vmem:[%s308_s3] sm:$0x1] }
   0xb   :  { %210 = vmatpush3.bf16.msra.mxu0 %v228_v2 }
   0xc   :  { %211 = vmatprep.subr.bf16.mxu0 %v229_v3 }
   0xf   :  { %212 = vmatpush3.bf16.msra.mxu0 %v229_v3 }
  0x10   :  { %213 = vmatprep.subr.bf16.mxu0 %v230_v5 }
  0x13   :  { %214 = vmatpush3.bf16.msra.mxu0 %v230_v5 }
  0x14   :  { %215 = vmatprep.subr.bf16.mxu0 %v231_v6 }
  0x17   :  { %216 = vmatpush3.bf16.msra.mxu0 %v231_v6 }
  0x18   :  { %217 = vmatprep.subr.bf16.mxu0 %v232_v7 }
  0x1b   :  { %218 = vmatpush3.bf16.msra.mxu0 %v232_v7 }
  0x1c   :  { %219 = vmatprep.subr.bf16.mxu0 %v233_v8 }
  0x1f   :  { %220 = vmatpush3.bf16.msra.mxu0 %v233_v8 }
  0x22   :  { %222 = vmatmul.mubr.bf16.vlgmr.msra.gmra.mxu0 %v235_v9 }
  0xe2   :  { %v223_v11 = vpop.f32.mrf.mxu0 }
  0xe3   :  { %v164_v18 = vmul.f32 %v223_v11, %v223_v11 }
  0xe4   :  { %v134_v12 = vpop.f32.mrf.mxu0 }
  0xe5   :  { %v162_v15 = vmul.f32 %v134_v12, %v134_v12 }
  0xe6   :  { %v224_v13 = vpop.f32.mrf.mxu0 }
  0xe7   :  { %v165_v21 = vmul.f32 %v224_v13, %v224_v13 }
  0xe8   :  { %v137_v14 = vpop.f32.mrf.mxu0 }
  0xe9   :  { %v150_v16 = vadd.f32 %v137_v14, %v134_v12  ;;  %v163_v17 = vmul.f32 %v137_v14, %v137_v14 }
  0xeb   :  { %v151_v19 = vadd.f32 %v223_v11, %v150_v16  ;;  %v166_v20 = vadd.f32 %v163_v17, %v162_v15 }
  0xed   :  { %v152_v22 = vadd.f32 %v224_v13, %v151_v19  ;;  %v167_v23 = vadd.f32 %v166_v20, %v164_v18 }
  0xef   :  { %v153_v24 = vrot.slane %v152_v22, 4  ;;  %v168_v25 = vadd.f32 %v167_v23, %v165_v21 }
  0xf1   :  { %v154_v26 = vadd.f32 %v153_v24, %v152_v22  ;;  %v169_v27 = vrot.slane %v168_v25, 4 }
  0xf3   :  { %v155_v28 = vrot.slane %v154_v26, 2  ;;  %v170_v29 = vadd.f32 %v169_v27, %v168_v25 }
  0xf5   :  { %v156_v30 = vadd.f32 %v155_v28, %v154_v26  ;;  %v171_v31 = vrot.slane %v170_v29, 2 }
  0xf7   :  { %v157_v32 = vrot.slane %v156_v30, 1  ;;  %v172_v33 = vadd.f32 %v171_v31, %v170_v29 }
  0xf9   :  { %v158_v35 = vadd.f32 %v157_v32, %v156_v30  ;;  %v173_v36 = vrot.slane %v172_v33, 1 }
  0xfb   :  { %v159_v38 = vadd.f32 %v158_v35, %v149_v34  ;;  %v174_v39 = vadd.f32 %v173_v36, %v172_v33 }
  0xfd   :  { %160 = vst [vmem:[%s307_s2] sm:$0x1] %v159_v38  ;;  %v175_v40 = vadd.f32 %v174_v39, %v161_v37 }
  0xff   :  { %176 = vst [vmem:[%s308_s3] sm:$0x1] %v175_v40 }

// kernel: mobilenetv4_forward.26
= control target key start
LH: loop header
LB: loop body
LE: loop exit
PB: predicated region body
PF: predicated region fallthrough
CT: control target
= control target key end

     0   :  { %s331_s1 = inlined_call_operand.vmem [shape: bf16[128,128], index: 1, kind: input, shape index: {}]   ;;  %s332_s0 = inlined_call_operand.vmem [shape: bf16[32,128], index: 0, kind: input, shape index: {}]   ;;  %s333_s2 = inlined_call_operand.vmem [shape: f32[1,128], index: 2, kind: input, shape index: {}]   ;;  %s334_s3 = inlined_call_operand.vmem [shape: f32[1,128], index: 3, kind: input, shape index: {}]   ;;  %s335_s4 = inlined_call_operand.vmem [shape: bf16[32,128], index: 4, kind: output, shape index: {}]  }
   0x1   :  { %v254_v0 = vld [vmem:[%s331_s1 + $0x38] sm:$0xff]   ;;  %v255_v1 = vld [vmem:[%s331_s1 + $0x30] sm:$0xff]   ;;  %v256_v2 = vld [vmem:[%s331_s1 + $0x28] sm:$0xff]  }
   0x2   :  { %234 = vmatprep.subr.bf16.mxu0 %v254_v0  ;;  %v257_v3 = vld [vmem:[%s331_s1 + $0x20] sm:$0xff]   ;;  %v258_v5 = vld [vmem:[%s331_s1 + $0x18] sm:$0xff]   ;;  %v259_v6 = vld [vmem:[%s331_s1 + $0x10] sm:$0xff]  }
   0x3   :  { %235 = vmatpush3.bf16.msra.mxu0 %v254_v0  ;;  %v262_v4 = vld [vmem:[%s332_s0] sm:$0xff]   ;;  %v260_v7 = vld [vmem:[%s331_s1 + $0x8] sm:$0xff]  }
   0x4   :  { %236 = vmatprep.subr.bf16.mxu0 %v255_v1  ;;  %250 = vmatprep.mubr.bf16.mxu0 %v262_v4  ;;  %v261_v8 = vld [vmem:[%s331_s1] sm:$0xff]   ;;  %v263_v9 = vld [vmem:[%s332_s0 + $0x8] sm:$0xff]  }
   0x5   :  { %v203_v11 = vld [vmem:[%s333_s2] ss:$0 sm:$0xff] }
   0x6   :  { %v204_v14 = vld [vmem:[%s334_s3] ss:$0 sm:$0xff] }
   0x7   :  { %237 = vmatpush3.bf16.msra.mxu0 %v255_v1 }
   0x8   :  { %238 = vmatprep.subr.bf16.mxu0 %v256_v2 }
   0xb   :  { %239 = vmatpush3.bf16.msra.mxu0 %v256_v2 }
   0xc   :  { %240 = vmatprep.subr.bf16.mxu0 %v257_v3 }
   0xf   :  { %241 = vmatpush3.bf16.msra.mxu0 %v257_v3 }
  0x10   :  { %242 = vmatprep.subr.bf16.mxu0 %v258_v5 }
  0x13   :  { %243 = vmatpush3.bf16.msra.mxu0 %v258_v5 }
  0x14   :  { %244 = vmatprep.subr.bf16.mxu0 %v259_v6 }
  0x17   :  { %245 = vmatpush3.bf16.msra.mxu0 %v259_v6 }
  0x18   :  { %246 = vmatprep.subr.bf16.mxu0 %v260_v7 }
  0x1b   :  { %247 = vmatpush3.bf16.msra.mxu0 %v260_v7 }
  0x1c   :  { %248 = vmatprep.subr.bf16.mxu0 %v261_v8 }
  0x1f   :  { %249 = vmatpush3.bf16.msra.mxu0 %v261_v8 }
  0x22   :  { %251 = vmatmul.mubr.bf16.vlgmr.msra.gmra.mxu0 %v263_v9 }
  0xe2   :  { %v252_v10 = vpop.f32.mrf.mxu0 }
  0xe3   :  { %v156_v13 = vmul.f32 %v252_v10, %v203_v11 }
  0xe4   :  { %v132_v12 = vpop.f32.mrf.mxu0 }
  0xe5   :  { %v154_v16 = vmul.f32 %v203_v11, %v132_v12  ;;  %v167_v19 = vadd.f32 %v204_v14, %v156_v13 }
  0xe6   :  { %v253_v15 = vpop.f32.mrf.mxu0 }
  0xe7   :  { %v157_v17 = vmul.f32 %v253_v15, %v203_v11  ;;  %v165_v22 = vadd.f32 %v204_v14, %v154_v16 }
  0xe8   :  { %v135_v18 = vpop.f32.mrf.mxu0 }
  0xe9   :  { %v168_v20 = vadd.f32 %v204_v14, %v157_v17  ;;  %v155_v21 = vmul.f32 %v203_v11, %v135_v18 }
  0xeb   :  { %v221_v23 = vpack.c.bf16 %v168_v20, %v167_v19  ;;  %v166_v24 = vadd.f32 %v204_v14, %v155_v21 }
  0xed   :  { %223 = vst [vmem:[%s335_s4 + $0x8] sm:$0xff] %v221_v23   ;;  %v216_v25 = vpack.c.bf16 %v166_v24, %v165_v22 }
  0xef   :  { %217 = vst [vmem:[%s335_s4] sm:$0xff] %v216_v25  }

// kernel: mobilenetv4_forward.24
= control target key start
LH: loop header
LB: loop body
LE: loop exit
PB: predicated region body
PF: predicated region fallthrough
CT: control target
= control target key end

     0   :  { %v35_v0 = vlaneseq  ;;  %vm428_vm0 = vcmask 1043456   ;;  %s1022_s0 = inlined_call_operand.vmem [shape: bf16[8,5,5,128], index: 0, kind: input, shape index: {}]   ;;  %s1023_s1 = inlined_call_operand.vmem [shape: bf16[9,128], index: 1, kind: input, shape index: {}]   ;;  %s1024_s2 = inlined_call_operand.vmem [shape: f32[1,128], index: 2, kind: input, shape index: {}]   ;;  %s1025_s3 = inlined_call_operand.vmem [shape: f32[1,128], index: 3, kind: input, shape index: {}]   ;;  %s1026_s4 = inlined_call_operand.vmem [shape: bf16[2,4,4,128], index: 4, kind: output, shape index: {}]  }
   0x1   :  { %v17_v1 = vld [vmem:[%s1022_s0] sm:$0x3]  ;;  %v18_v2 = vld [vmem:[%s1022_s0 + $0x4] sm:$0x3]  ;;  %v19_v3 = vld [vmem:[%s1022_s0 + $0x8] sm:$0x3] }
   0x2   :  { %v20_v4 = vld [vmem:[%s1022_s0 + $0xc] sm:$0x3]  ;;  %v21_v5 = vld [vmem:[%s1022_s0 + $0x14] sm:$0x3]  ;;  %v22_v6 = vld [vmem:[%s1022_s0 + $0x18] sm:$0x3]  ;;  %v25_v13 = vunpack.c.l.bf16 %v17_v1  ;;  %v26_v14 = vunpack.c.l.bf16 %v18_v2  ;;  %v27_v18 = vunpack.c.l.bf16 %v19_v3 }
   0x3   :  { %v23_v7 = vld [vmem:[%s1022_s0 + $0x1c] sm:$0x3]  ;;  %v33_v8 = vld [vmem:[%s1023_s1] sm:$0x1]  ;;  %v665_v10 = vshrl.u32 %v35_v0, 7  ;;  %v28_v19 = vunpack.c.l.bf16 %v20_v4  ;;  %v29_v20 = vunpack.c.l.bf16 %v21_v5  ;;  %v30_v25 = vunpack.c.l.bf16 %v22_v6 }
   0x4   :  { %v34_v9 = vunpack.c.l.bf16 %v33_v8  ;;  %v558_v11 = vld [vmem:[%s1022_s0 + $0x28] sm:$0x3]  ;;  %v559_v12 = vld [vmem:[%s1022_s0 + $0x2c] sm:$0x3]  ;;  %v560_v15 = vld [vmem:[%s1022_s0 + $0x30] sm:$0x3]  ;;  %v31_v26 = vunpack.c.l.bf16 %v23_v7 }
   0x5   :  { %v561_v16 = vld [vmem:[%s1022_s0 + $0x34] sm:$0x3]  ;;  %v562_v17 = vld [vmem:[%s1022_s0 + $0x3c] sm:$0x3]  ;;  %v683_v21 = vsub.s32 0, %v665_v10  ;;  %v64_v28 = vunpack.c.l.bf16 %v558_v11  ;;  %v74_v29 = vsub.s32 1, %v665_v10  ;;  %v65_v31 = vunpack.c.l.bf16 %v559_v12 }
   0x6   :  { %v563_v22 = vld [vmem:[%s1022_s0 + $0x40] sm:$0x3]  ;;  %v564_v23 = vld [vmem:[%s1022_s0 + $0x44] sm:$0x3]  ;;  %v565_v27 = vld [vmem:[%s1022_s0 + $0x48] sm:$0x3]  ;;  %v66_v32 = vunpack.c.l.bf16 %v560_v15  ;;  %v67_v33 = vunpack.c.l.bf16 %v561_v16  ;;  %v68_v34 = vunpack.c.l.bf16 %v562_v17 }
   0x7   :  { %v24_v24 = vld [vmem:[%s1022_s0 + $0x20] sm:$0x3]  ;;  %v38_v30 = vrot.slane %v34_v9, %v683_v21  ;;  %v69_v35 = vunpack.c.l.bf16 %v563_v22  ;;  %v70_v36 = vunpack.c.l.bf16 %v564_v23  ;;  %v75_v37 = vrot.slane %v34_v9, %v74_v29  ;;  %v93_v47 = vld [vmem:[%s1022_s0 + $0x4] sm:$0x7]  ;;  %v94_v52 = vld [vmem:[%s1022_s0 + $0x8] sm:$0x7] }
   0x8   :  { %v32_v38 = vunpack.c.l.bf16 %v24_v24  ;;  %v71_v41 = vunpack.c.l.bf16 %v565_v27  ;;  %v92_v46 = vld [vmem:[%s1022_s0] sm:$0x7]  ;;  %v95_v53 = vld [vmem:[%s1022_s0 + $0xc] sm:$0x7]  ;;  %v96_v58 = vld [vmem:[%s1022_s0 + $0x14] sm:$0x7]  ;;  %v101_v60 = vunpack.c.l.bf16 %v93_v47  ;;  %v102_v4 = vunpack.c.l.bf16 %v94_v52 }
   0x9   :  { %v39_v39 = vmul.f32 %v38_v30, %v25_v13  ;;  %v40_v40 = vmul.f32 %v38_v30, %v26_v14  ;;  %v41_v42 = vmul.f32 %v38_v30, %v27_v18  ;;  %v42_v43 = vmul.f32 %v38_v30, %v28_v19  ;;  %v717_v61 = vld [vmem:[%s1023_s1] sm:$0x2]  ;;  %v97_v1 = vld [vmem:[%s1022_s0 + $0x18] sm:$0x7]  ;;  %v98_v2 = vld [vmem:[%s1022_s0 + $0x1c] sm:$0x7] }
   0xa   :  { %v43_v44 = vmul.f32 %v38_v30, %v29_v20  ;;  %v44_v45 = vmul.f32 %v38_v30, %v30_v25  ;;  %v76_v48 = vmul.f32 %v75_v37, %v64_v28  ;;  %v77_v49 = vmul.f32 %v75_v37, %v65_v31  ;;  %v99_v3 = vld [vmem:[%s1022_s0 + $0x20] sm:$0x7]  ;;  %v732_v11 = vld [vmem:[%s1022_s0 + $0x50] sm:$0x3]  ;;  %v737_v12 = vld [vmem:[%s1022_s0 + $0x54] sm:$0x3] }
   0xb   :  { %v78_v50 = vmul.f32 %v75_v37, %v66_v32  ;;  %v79_v51 = vmul.f32 %v75_v37, %v67_v33  ;;  %v45_v54 = vmul.f32 %v38_v30, %v31_v26  ;;  %v80_v55 = vmul.f32 %v75_v37, %v68_v34  ;;  %v568_v17 = vld [vmem:[%s1022_s0 + $0x58] sm:$0x3]  ;;  %v746_v18 = vld [vmem:[%s1022_s0 + $0x5c] sm:$0x3]  ;;  %v751_v19 = vld [vmem:[%s1022_s0 + $0x64] sm:$0x3] }
   0xc   :  { %v81_v56 = vmul.f32 %v75_v37, %v69_v35  ;;  %v82_v57 = vmul.f32 %v75_v37, %v70_v36  ;;  %v100_v59 = vunpack.c.l.bf16 %v92_v46  ;;  %v112_v62 = vsub.s32 2, %v665_v10  ;;  %v780_v46 = vld [vmem:[%s1022_s0 + $0x80] sm:$0x3] }
   0xd   :  { %v46_v63 = vmul.f32 %v38_v30, %v32_v38  ;;  %v83_v0 = vmul.f32 %v75_v37, %v71_v41  ;;  %v103_v5 = vunpack.c.l.bf16 %v95_v53  ;;  %v84_v6 = vadd.f32 %v76_v48, %v39_v39  ;;  %v571_v37 = vld [vmem:[%s1022_s0 + $0x68] sm:$0x3]  ;;  %v572_v38 = vld [vmem:[%s1022_s0 + $0x6c] sm:$0x3]  ;;  %v573_v39 = vld [vmem:[%s1022_s0 + $0x70] sm:$0x3] }
   0xe   :  { %v85_v7 = vadd.f32 %v77_v49, %v40_v40  ;;  %v86_v8 = vadd.f32 %v78_v50, %v41_v42  ;;  %v87_v9 = vadd.f32 %v79_v51, %v42_v43  ;;  %v88_v13 = vadd.f32 %v80_v55, %v43_v44  ;;  %v770_v44 = vld [vmem:[%s1022_s0 + $0x78] sm:$0x3]  ;;  %v785_v51 = vld [vmem:[%s1022_s0 + $0x84] sm:$0x3] }
   0xf   :  { %v89_v14 = vadd.f32 %v81_v56, %v44_v45  ;;  %v90_v15 = vadd.f32 %v82_v57, %v45_v54  ;;  %v109_v16 = vunpack.c.l.bf16 %v717_v61  ;;  %v104_v20 = vunpack.c.l.bf16 %v96_v58  ;;  %v775_v45 = vld [vmem:[%s1022_s0 + $0x7c] sm:$0x3] }
  0x10   :  { %v105_v22 = vunpack.c.l.bf16 %v97_v1  ;;  %v106_v23 = vunpack.c.l.bf16 %v98_v2  ;;  %v107_v24 = vunpack.c.l.bf16 %v99_v3  ;;  %v91_v25 = vadd.f32 %v83_v0, %v46_v63 }
  0x11   :  { %v113_v26 = vrot.slane %v109_v16, %v112_v62  ;;  %v163_v27 = vunpack.c.l.bf16 %v732_v11  ;;  %v164_v28 = vunpack.c.l.bf16 %v737_v12  ;;  %v165_v29 = vunpack.c.l.bf16 %v568_v17 }
  0x12   :  { %v166_v30 = vunpack.c.l.bf16 %v746_v18  ;;  %v167_v31 = vunpack.c.l.bf16 %v751_v19  ;;  %v173_v32 = vsub.s32 3, %v665_v10  ;;  %v168_v55 = vunpack.c.l.bf16 %v571_v37  ;;  %v579_v18 = vld [vmem:[%s1022_s0 + $0x90] sm:$0x3] }
  0x13   :  { %v114_v33 = vmul.f32 %v113_v26, %v100_v59  ;;  %v115_v34 = vmul.f32 %v113_v26, %v101_v60  ;;  %v116_v35 = vmul.f32 %v113_v26, %v102_v4  ;;  %v117_v36 = vmul.f32 %v113_v26, %v103_v5  ;;  %v792_v60 = vld [vmem:[%s1023_s1] sm:$0x4]  ;;  %v578_v5 = vld [vmem:[%s1022_s0 + $0x8c] sm:$0x3] }
  0x14   :  { %v118_v40 = vmul.f32 %v113_v26, %v104_v20  ;;  %v119_v41 = vmul.f32 %v113_v26, %v105_v22  ;;  %v120_v42 = vmul.f32 %v113_v26, %v106_v23  ;;  %v121_v43 = vmul.f32 %v113_v26, %v107_v24 }
  0x15   :  { %v130_v47 = vrot.slane %v114_v33, 1  ;;  %v131_v48 = vrot.slane %v115_v34, 1  ;;  %v132_v49 = vrot.slane %v116_v35, 1  ;;  %v133_v50 = vrot.slane %v117_v36, 1 }
  0x16   :  { %v134_v52 = vrot.slane %v118_v40, 1  ;;  %v135_v53 = vrot.slane %v119_v41, 1  ;;  %v136_v54 = vrot.slane %v120_v42, 1  ;;  %v169_v56 = vunpack.c.l.bf16 %v572_v38  ;;  %v584_v40 = vld [vmem:[%s1022_s0 + $0x58] sm:$0x7] }
  0x17   :  { %v170_v57 = vunpack.c.l.bf16 %v573_v39  ;;  %v200_v58 = vunpack.c.l.bf16 %v770_v44  ;;  %v201_v59 = vunpack.c.l.bf16 %v775_v45  ;;  %v137_v61 = vrot.slane %v121_v43, 1  ;;  %v586_v43 = vld [vmem:[%s1022_s0 + $0x64] sm:$0x7]  ;;  %v587_v44 = vld [vmem:[%s1022_s0 + $0x68] sm:$0x7] }
  0x18   :  { %v146_v62 = vadd.f32 %v130_v47, %v84_v6  ;;  %v202_v63 = vunpack.c.l.bf16 %v780_v46  ;;  %v203_v0 = vunpack.c.l.bf16 %v785_v51  ;;  %v147_v1 = vadd.f32 %v131_v48, %v85_v7  ;;  %v580_v6 = vld [vmem:[%s1022_s0 + $0x94] sm:$0x3]  ;;  %v581_v7 = vld [vmem:[%s1022_s0 + $0x98] sm:$0x3]  ;;  %v588_v48 = vld [vmem:[%s1022_s0 + $0x6c] sm:$0x7] }
  0x19   :  { %v148_v2 = vadd.f32 %v132_v49, %v86_v8  ;;  %v149_v3 = vadd.f32 %v133_v50, %v87_v9  ;;  %v174_v4 = vrot.slane %v109_v16, %v173_v32  ;;  %v150_v11 = vadd.f32 %v134_v52, %v88_v13  ;;  %v589_v49 = vld [vmem:[%s1022_s0 + $0x70] sm:$0x7] }
  0x1a   :  { %v151_v12 = vadd.f32 %v135_v53, %v89_v14  ;;  %v152_v17 = vadd.f32 %v136_v54, %v90_v15  ;;  %v209_v8 = vunpack.c.l.bf16 %v792_v60  ;;  %v212_v13 = vsub.s32 4, %v665_v10  ;;  %v582_v14 = vld [vmem:[%s1022_s0 + $0x50] sm:$0x7]  ;;  %v583_v15 = vld [vmem:[%s1022_s0 + $0x54] sm:$0x7] }
  0x1b   :  { %v175_v9 = vmul.f32 %v174_v4, %v163_v27  ;;  %v176_v16 = vmul.f32 %v174_v4, %v164_v28  ;;  %v177_v19 = vmul.f32 %v174_v4, %v165_v29  ;;  %v178_v20 = vmul.f32 %v174_v4, %v166_v30 }
  0x1c   :  { %v179_v22 = vmul.f32 %v174_v4, %v167_v31  ;;  %v180_v23 = vmul.f32 %v174_v4, %v168_v55  ;;  %v181_v24 = vmul.f32 %v174_v4, %v169_v56  ;;  %v153_v26 = vadd.f32 %v137_v61, %v91_v25  ;;  %v585_v25 = vld [vmem:[%s1022_s0 + $0x5c] sm:$0x7] }
  0x1d   :  { %v204_v32 = vunpack.c.l.bf16 %v578_v5  ;;  %v205_v33 = vunpack.c.l.bf16 %v579_v18  ;;  %v206_v27 = vunpack.c.l.bf16 %v580_v6  ;;  %v182_v28 = vmul.f32 %v174_v4, %v170_v57 }
  0x1e   :  { %v207_v29 = vunpack.c.l.bf16 %v581_v7  ;;  %v238_v34 = vunpack.c.l.bf16 %v582_v14  ;;  %v239_v35 = vunpack.c.l.bf16 %v583_v15  ;;  %v183_v36 = vadd.f32 %v175_v9, %v146_v62  ;;  %v591_v9 = vld [vmem:[%s1022_s0 + $0x8] sm:$0x3]  ;;  %v592_v14 = vld [vmem:[%s1022_s0 + $0xc] sm:$0x3]  ;;  %v593_v15 = vld [vmem:[%s1022_s0 + $0x10] sm:$0x3] }
  0x1f   :  { %v184_v37 = vadd.f32 %v176_v16, %v147_v1  ;;  %v185_v38 = vadd.f32 %v177_v19, %v148_v2  ;;  %v213_v39 = vrot.slane %v209_v8, %v212_v13  ;;  %v186_v30 = vadd.f32 %v178_v20, %v149_v3  ;;  %v594_v20 = vld [vmem:[%s1022_s0 + $0x18] sm:$0x3] }
  0x20   :  { %v187_v31 = vadd.f32 %v179_v22, %v150_v11  ;;  %v188_v41 = vadd.f32 %v180_v23, %v151_v12  ;;  %v189_v42 = vadd.f32 %v181_v24, %v152_v17  ;;  %v248_v50 = vsub.s32 5, %v665_v10 }
  0x21   :  { %v214_v45 = vmul.f32 %v213_v39, %v200_v58  ;;  %v215_v46 = vmul.f32 %v213_v39, %v201_v59  ;;  %v216_v47 = vmul.f32 %v213_v39, %v202_v63  ;;  %v217_v51 = vmul.f32 %v213_v39, %v203_v0  ;;  %v590_v0 = vld [vmem:[%s1022_s0 + $0x4] sm:$0x3] }
  0x22   :  { %v218_v52 = vmul.f32 %v213_v39, %v204_v32  ;;  %v219_v53 = vmul.f32 %v213_v39, %v205_v33  ;;  %v220_v54 = vmul.f32 %v213_v39, %v206_v27  ;;  %v190_v55 = vadd.f32 %v182_v28, %v153_v26  ;;  %v595_v26 = vld [vmem:[%s1022_s0 + $0x1c] sm:$0x3]  ;;  %v596_v32 = vld [vmem:[%s1022_s0 + $0x20] sm:$0x3] }
  0x23   :  { %v240_v56 = vunpack.c.l.bf16 %v584_v40  ;;  %v241_v57 = vunpack.c.l.bf16 %v585_v25  ;;  %v242_v58 = vunpack.c.l.bf16 %v586_v43  ;;  %v221_v59 = vmul.f32 %v213_v39, %v207_v29  ;;  %v597_v39 = vld [vmem:[%s1022_s0 + $0x24] sm:$0x3]  ;;  %v598_v25 = vld [vmem:[%s1022_s0 + $0x2c] sm:$0x3] }
  0x24   :  { %v243_v60 = vunpack.c.l.bf16 %v587_v44  ;;  %v244_v61 = vunpack.c.l.bf16 %v588_v48  ;;  %v245_v62 = vunpack.c.l.bf16 %v589_v49  ;;  %v222_v63 = vadd.f32 %v214_v45, %v183_v36  ;;  %v600_v48 = vld [vmem:[%s1022_s0 + $0x34] sm:$0x3] }
  0x25   :  { %v223_v1 = vadd.f32 %v215_v46, %v184_v37  ;;  %v224_v2 = vadd.f32 %v216_v47, %v185_v38  ;;  %v249_v3 = vrot.slane %v209_v8, %v248_v50  ;;  %v225_v4 = vadd.f32 %v217_v51, %v186_v30  ;;  %v599_v47 = vld [vmem:[%s1022_s0 + $0x30] sm:$0x3] }
  0x26   :  { %v226_v5 = vadd.f32 %v218_v52, %v187_v31  ;;  %v227_v11 = vadd.f32 %v219_v53, %v188_v41  ;;  %v228_v12 = vadd.f32 %v220_v54, %v189_v42  ;;  %v229_v22 = vadd.f32 %v221_v59, %v190_v55  ;;  %v603_v59 = vld [vmem:[%s1022_s0 + $0x44] sm:$0x3] }
  0x27   :  { %v250_v17 = vmul.f32 %v249_v3, %v238_v34  ;;  %v251_v18 = vmul.f32 %v249_v3, %v239_v35  ;;  %v252_v6 = vmul.f32 %v249_v3, %v240_v56  ;;  %v253_v7 = vmul.f32 %v249_v3, %v241_v57  ;;  %v307_v35 = vld [vmem:[%s1023_s1] sm:$0x8]  ;;  %v601_v57 = vld [vmem:[%s1022_s0 + $0x38] sm:$0x3] }
  0x28   :  { %v254_v16 = vmul.f32 %v249_v3, %v242_v58  ;;  %v255_v19 = vmul.f32 %v249_v3, %v243_v60  ;;  %v256_v13 = vmul.f32 %v249_v3, %v244_v61  ;;  %v257_v8 = vmul.f32 %v249_v3, %v245_v62  ;;  %v602_v58 = vld [vmem:[%s1022_s0 + $0x40] sm:$0x3]  ;;  %v604_v60 = vld [vmem:[%s1022_s0 + $0x48] sm:$0x3] }
  0x29   :  { %v266_v23 = vrot.slane %v250_v17, 1  ;;  %v267_v24 = vrot.slane %v251_v18, 1  ;;  %v299_v33 = vunpack.c.l.bf16 %v590_v0  ;;  %v268_v27 = vrot.slane %v252_v6, 1 }
  0x2a   :  { %v269_v28 = vrot.slane %v253_v7, 1  ;;  %v270_v29 = vrot.slane %v254_v16, 1  ;;  %v300_v34 = vunpack.c.l.bf16 %v591_v9  ;;  %v271_v36 = vrot.slane %v255_v19, 1  ;;  %v382_v19 = vld [vmem:[%s1023_s1 + $0x4] sm:$0x1] }
  0x2b   :  { %v272_v37 = vrot.slane %v256_v13, 1  ;;  %v273_v38 = vrot.slane %v257_v8, 1  ;;  %v301_v40 = vunpack.c.l.bf16 %v592_v14  ;;  %v302_v30 = vunpack.c.l.bf16 %v593_v15 }
  0x2c   :  { %v303_v31 = vunpack.c.l.bf16 %v594_v20  ;;  %v304_v41 = vunpack.c.l.bf16 %v595_v26  ;;  %v305_v42 = vunpack.c.l.bf16 %v596_v32  ;;  %v282_v43 = vadd.f32 %v266_v23, %v222_v63  ;;  %v607_v26 = vld [vmem:[%s1022_s0 + $0x8] sm:$0x7] }
  0x2d   :  { %v283_v44 = vadd.f32 %v267_v24, %v223_v1  ;;  %v308_v45 = vunpack.c.l.bf16 %v307_v35  ;;  %v311_v46 = vsub.s32 6, %v665_v10  ;;  %v284_v49 = vadd.f32 %v268_v27, %v224_v2 }
  0x2e   :  { %v285_v50 = vadd.f32 %v269_v28, %v225_v4  ;;  %v286_v51 = vadd.f32 %v270_v29, %v226_v5  ;;  %v306_v52 = vunpack.c.l.bf16 %v597_v39  ;;  %v287_v53 = vadd.f32 %v271_v36, %v227_v11  ;;  %v605_v11 = vld [vmem:[%s1022_s0 + $0x4c] sm:$0x3]  ;;  %v609_v29 = vld [vmem:[%s1022_s0 + $0x10] sm:$0x7] }
  0x2f   :  { %v288_v54 = vadd.f32 %v272_v37, %v228_v12  ;;  %v289_v55 = vadd.f32 %v273_v38, %v229_v22  ;;  %v312_v56 = vrot.slane %v308_v45, %v311_v46  ;;  %v338_v61 = vunpack.c.l.bf16 %v598_v25  ;;  %v606_v12 = vld [vmem:[%s1022_s0 + $0x4] sm:$0x7]  ;;  %v608_v28 = vld [vmem:[%s1022_s0 + $0xc] sm:$0x7] }
  0x30   :  { %v339_v62 = vunpack.c.l.bf16 %v599_v47  ;;  %v340_v63 = vunpack.c.l.bf16 %v600_v48  ;;  %v348_v1 = vsub.s32 7, %v665_v10  ;;  %v341_v7 = vunpack.c.l.bf16 %v601_v57 }
  0x31   :  { %v313_v2 = vmul.f32 %v312_v56, %v299_v33  ;;  %v314_v3 = vmul.f32 %v312_v56, %v300_v34  ;;  %v315_v4 = vmul.f32 %v312_v56, %v301_v40  ;;  %v316_v5 = vmul.f32 %v312_v56, %v302_v30  ;;  %v610_v34 = vld [vmem:[%s1022_s0 + $0x18] sm:$0x7]  ;;  %v611_v40 = vld [vmem:[%s1022_s0 + $0x1c] sm:$0x7]  ;;  %v612_v30 = vld [vmem:[%s1022_s0 + $0x20] sm:$0x7] }
  0x32   :  { %v317_v0 = vmul.f32 %v312_v56, %v303_v31  ;;  %v318_v17 = vmul.f32 %v312_v56, %v304_v41  ;;  %v319_v18 = vmul.f32 %v312_v56, %v305_v42  ;;  %v320_v6 = vmul.f32 %v312_v56, %v306_v52  ;;  %v613_v31 = vld [vmem:[%s1022_s0 + $0x24] sm:$0x7] }
  0x33   :  { %v342_v9 = vunpack.c.l.bf16 %v602_v58  ;;  %v343_v16 = vunpack.c.l.bf16 %v603_v59  ;;  %v344_v10 = vunpack.c.l.bf16 %v604_v60  ;;  %v321_v13 = vadd.f32 %v313_v2, %v282_v43 }
  0x34   :  { %v322_v8 = vadd.f32 %v314_v3, %v283_v44  ;;  %v345_v14 = vunpack.c.l.bf16 %v605_v11  ;;  %v374_v15 = vunpack.c.l.bf16 %v606_v12  ;;  %v323_v20 = vadd.f32 %v315_v4, %v284_v49 }
  0x35   :  { %v324_v22 = vadd.f32 %v316_v5, %v285_v50  ;;  %v325_v23 = vadd.f32 %v317_v0, %v286_v51  ;;  %v349_v24 = vrot.slane %v308_v45, %v348_v1  ;;  %v326_v32 = vadd.f32 %v318_v17, %v287_v53 }
  0x36   :  { %v327_v33 = vadd.f32 %v319_v18, %v288_v54  ;;  %v328_v27 = vadd.f32 %v320_v6, %v289_v55  ;;  %v383_v35 = vunpack.c.l.bf16 %v382_v19  ;;  %v375_v44 = vunpack.c.l.bf16 %v607_v26 }
  0x37   :  { %v350_v36 = vmul.f32 %v349_v24, %v338_v61  ;;  %v351_v37 = vmul.f32 %v349_v24, %v339_v62  ;;  %v352_v38 = vmul.f32 %v349_v24, %v340_v63  ;;  %v353_v39 = vmul.f32 %v349_v24, %v341_v7 }
  0x38   :  { %v354_v41 = vmul.f32 %v349_v24, %v342_v9  ;;  %v355_v42 = vmul.f32 %v349_v24, %v343_v16  ;;  %v356_v25 = vmul.f32 %v349_v24, %v344_v10  ;;  %v357_v43 = vmul.f32 %v349_v24, %v345_v14 }
  0x39   :  { %v376_v45 = vunpack.c.l.bf16 %v608_v28  ;;  %v377_v46 = vunpack.c.l.bf16 %v609_v29  ;;  %v378_v47 = vunpack.c.l.bf16 %v610_v34  ;;  %v358_v48 = vadd.f32 %v350_v36, %v321_v13 }
  0x3a   :  { %v379_v49 = vunpack.c.l.bf16 %v611_v40  ;;  %v380_v50 = vunpack.c.l.bf16 %v612_v30  ;;  %v381_v51 = vunpack.c.l.bf16 %v613_v31  ;;  %v359_v52 = vadd.f32 %v351_v37, %v322_v8 }
  0x3b   :  { %v360_v53 = vadd.f32 %v352_v38, %v323_v20  ;;  %v361_v54 = vadd.f32 %v353_v39, %v324_v22  ;;  %v387_v55 = vrot.slane %v383_v35, %v683_v21  ;;  %v362_v56 = vadd.f32 %v354_v41, %v325_v23 }
  0x3c   :  { %v363_v57 = vadd.f32 %v355_v42, %v326_v32  ;;  %v364_v58 = vadd.f32 %v356_v25, %v327_v33  ;;  %v365_v59 = vadd.f32 %v357_v43, %v328_v27 }
  0x3d   :  { %v388_v60 = vmul.f32 %v387_v55, %v374_v15  ;;  %v389_v61 = vmul.f32 %v387_v55, %v375_v44  ;;  %v390_v62 = vmul.f32 %v387_v55, %v376_v45  ;;  %v391_v63 = vmul.f32 %v387_v55, %v377_v46 }
  0x3e   :  { %v392_v1 = vmul.f32 %v387_v55, %v378_v47  ;;  %v393_v2 = vmul.f32 %v387_v55, %v379_v49  ;;  %v394_v3 = vmul.f32 %v387_v55, %v380_v50  ;;  %v395_v4 = vmul.f32 %v387_v55, %v381_v51 }
  0x3f   :  { %v404_v5 = vrot.slane %v388_v60, 1  ;;  %v405_v11 = vrot.slane %v389_v61, 1  ;;  %v406_v12 = vrot.slane %v390_v62, 1  ;;  %v407_v0 = vrot.slane %v391_v63, 1 }
  0x40   :  { %v408_v17 = vrot.slane %v392_v1, 1  ;;  %v409_v18 = vrot.slane %v393_v2, 1  ;;  %v410_v6 = vrot.slane %v394_v3, 1  ;;  %v411_v7 = vrot.slane %v395_v4, 1 }
  0x41   :  { %v916_v9 = vadd.f32 %v404_v5, %v358_v48  ;;  %v918_v16 = vadd.f32 %v405_v11, %v359_v52  ;;  %v920_v10 = vadd.f32 %v406_v12, %v360_v53  ;;  %v922_v19 = vadd.f32 %v407_v0, %v361_v54 }
  0x42   :  { %v924_v13 = vadd.f32 %v408_v17, %v362_v56  ;;  %v926_v8 = vadd.f32 %v409_v18, %v363_v57  ;;  %v928_v14 = vadd.f32 %v410_v6, %v364_v58  ;;  %v930_v15 = vadd.f32 %v411_v7, %v365_v59 }
  0x43   :  { %v429_v20 = vsel %vm428_vm0, %v916_v9, 0.0  ;;  %v432_v22 = vsel %vm428_vm0, %v918_v16, 0.0  ;;  %v435_v23 = vsel %vm428_vm0, %v920_v10, 0.0  ;;  %v438_v24 = vsel %vm428_vm0, %v922_v19, 0.0 }
  0x44   :  { %v430_v26 = vsel %vm428_vm0, %v924_v13, 0.0  ;;  %v433_v32 = vsel %vm428_vm0, %v926_v8, 0.0  ;;  %v436_v33 = vsel %vm428_vm0, %v928_v14, 0.0  ;;  %v439_v27 = vsel %vm428_vm0, %v930_v15, 0.0 }
  0x45   :  { %v431_v28 = vadd.f32 %v430_v26, %v429_v20  ;;  %v434_v29 = vadd.f32 %v433_v32, %v432_v22  ;;  %v437_v34 = vadd.f32 %v436_v33, %v435_v23  ;;  %v440_v35 = vadd.f32 %v439_v27, %v438_v24 }
  0x46   :  { %v457_v36 = vmul.f32 %v916_v9, %v916_v9  ;;  %v458_v37 = vmul.f32 %v918_v16, %v918_v16  ;;  %v459_v38 = vmul.f32 %v920_v10, %v920_v10  ;;  %v460_v39 = vmul.f32 %v922_v19, %v922_v19 }
  0x47   :  { %v441_v40 = vsel %vm428_vm0, %v431_v28, 0.0  ;;  %v442_v30 = vsel %vm428_vm0, %v434_v29, 0.0  ;;  %v444_v31 = vsel %vm428_vm0, %v437_v34, 0.0  ;;  %v446_v41 = vsel %vm428_vm0, %v440_v35, 0.0  ;;  %v495_v35 = vld [vmem:[%s1024_s2] sm:$0x1] }
  0x48   :  { %v443_v42 = vadd.f32 %v442_v30, %v441_v40  ;;  %v461_v25 = vmul.f32 %v924_v13, %v924_v13  ;;  %v462_v43 = vmul.f32 %v926_v8, %v926_v8  ;;  %v463_v44 = vmul.f32 %v928_v14, %v928_v14 }
  0x49   :  { %v464_v45 = vmul.f32 %v930_v15, %v930_v15  ;;  %v465_v46 = vsel %vm428_vm0, %v457_v36, 0.0  ;;  %v468_v47 = vsel %vm428_vm0, %v458_v37, 0.0  ;;  %v471_v48 = vsel %vm428_vm0, %v459_v38, 0.0  ;;  %v499_v38 = vld [vmem:[%s1025_s3] sm:$0x1] }
  0x4a   :  { %v445_v49 = vadd.f32 %v444_v31, %v443_v42  ;;  %v466_v50 = vsel %vm428_vm0, %v461_v25, 0.0  ;;  %v469_v51 = vsel %vm428_vm0, %v462_v43, 0.0  ;;  %v472_v52 = vsel %vm428_vm0, %v463_v44, 0.0 }
  0x4b   :  { %v467_v53 = vadd.f32 %v466_v50, %v465_v46  ;;  %v470_v54 = vadd.f32 %v469_v51, %v468_v47  ;;  %v473_v55 = vadd.f32 %v472_v52, %v471_v48  ;;  %v474_v56 = vsel %vm428_vm0, %v460_v39, 0.0 }
  0x4c   :  { %v447_v57 = vadd.f32 %v446_v41, %v445_v49  ;;  %v475_v58 = vsel %vm428_vm0, %v464_v45, 0.0 }
  0x4d   :  { %v476_v59 = vadd.f32 %v475_v58, %v474_v56  ;;  %v477_v60 = vsel %vm428_vm0, %v467_v53, 0.0  ;;  %v478_v61 = vsel %vm428_vm0, %v470_v54, 0.0  ;;  %v480_v62 = vsel %vm428_vm0, %v473_v55, 0.0 }
  0x4e   :  { %v448_v63 = vsel %vm428_vm0, %v447_v57, 0.0  ;;  %v479_v1 = vadd.f32 %v478_v61, %v477_v60 }
  0x4f   :  { %v449_v2 = vrot.slane %v448_v63, 4  ;;  %v482_v3 = vsel %vm428_vm0, %v476_v59, 0.0 }
  0x50   :  { %v481_v4 = vadd.f32 %v480_v62, %v479_v1 }
  0x51   :  { %v450_v5 = vadd.f32 %v449_v2, %v448_v63 }
  0x52   :  { %v483_v11 = vadd.f32 %v482_v3, %v481_v4 }
  0x53   :  { %v451_v12 = vrot.slane %v450_v5, 2 }
  0x54   :  { %v484_v0 = vsel %vm428_vm0, %v483_v11, 0.0 }
  0x55   :  { %v452_v17 = vadd.f32 %v451_v12, %v450_v5  ;;  %v485_v18 = vrot.slane %v484_v0, 4 }
  0x57   :  { %v453_v6 = vrot.slane %v452_v17, 1  ;;  %v486_v7 = vadd.f32 %v485_v18, %v484_v0 }
  0x59   :  { %v454_v20 = vadd.f32 %v453_v6, %v452_v17  ;;  %v487_v22 = vrot.slane %v486_v7, 2 }
  0x5b   :  { %v456_v23 = vmul.f32 0.03125, %v454_v20  ;;  %v488_v24 = vadd.f32 %v487_v22, %v486_v7 }
  0x5d   :  { %v489_v26 = vrot.slane %v488_v24, 1  ;;  %v492_v33 = vmul.f32 %v456_v23, %v456_v23 }
  0x5f   :  { %v490_v32 = vadd.f32 %v489_v26, %v488_v24 }
  0x61   :  { %v491_v27 = vmul.f32 0.03125, %v490_v32 }
  0x63   :  { %v493_v28 = vsub.f32 %v491_v27, %v492_v33 }
  0x65   :  { %v494_v29 = vmax.f32 %v493_v28, 0.0 }
  0x67   :  { %v496_v34 = vadd.f32 1e-05, %v494_v29 }
  0x69   :  { %614 = vrsqrt.f32 %v496_v34 }
  0x76   :  { %v615_v36 = vpop.eup %614 }
  0x77   :  { %v498_v37 = vmul.f32 %v615_v36, %v495_v35 }
  0x79   :  { %v500_v39 = vmul.f32 %v498_v37, %v456_v23  ;;  %v506_v40 = vrot.slane %v498_v37, %v683_v21 }
  0x7b   :  { %v501_v30 = vsub.f32 %v499_v38, %v500_v39  ;;  %v508_v31 = vmul.f32 %v506_v40, %v916_v9  ;;  %v509_v41 = vmul.f32 %v506_v40, %v918_v16  ;;  %v510_v42 = vmul.f32 %v506_v40, %v920_v10 }
  0x7c   :  { %v511_v25 = vmul.f32 %v506_v40, %v922_v19  ;;  %v512_v43 = vmul.f32 %v506_v40, %v924_v13  ;;  %v513_v44 = vmul.f32 %v506_v40, %v926_v8  ;;  %v514_v45 = vmul.f32 %v506_v40, %v928_v14 }
  0x7d   :  { %v520_v46 = vrot.slane %v501_v30, %v683_v21  ;;  %v515_v47 = vmul.f32 %v506_v40, %v930_v15 }
  0x7f   :  { %v522_v48 = vadd.f32 %v520_v46, %v508_v31  ;;  %v523_v49 = vadd.f32 %v520_v46, %v509_v41  ;;  %v524_v50 = vadd.f32 %v520_v46, %v510_v42  ;;  %v525_v9 = vadd.f32 %v520_v46, %v511_v25 }
  0x80   :  { %v526_v51 = vadd.f32 %v520_v46, %v512_v43  ;;  %v527_v16 = vadd.f32 %v520_v46, %v513_v44  ;;  %v528_v52 = vadd.f32 %v520_v46, %v514_v45  ;;  %v529_v10 = vadd.f32 %v520_v46, %v515_v47 }
  0x81   :  { %v530_v53 = vmax.f32 %v522_v48, 0.0  ;;  %v531_v19 = vmax.f32 %v523_v49, 0.0  ;;  %v532_v54 = vmax.f32 %v524_v50, 0.0  ;;  %v533_v13 = vmax.f32 %v525_v9, 0.0 }
  0x82   :  { %v534_v55 = vmax.f32 %v526_v51, 0.0  ;;  %v535_v8 = vmax.f32 %v527_v16, 0.0  ;;  %v536_v56 = vmax.f32 %v528_v52, 0.0  ;;  %v537_v14 = vmax.f32 %v529_v10, 0.0 }
  0x83   :  { %v538_v57 = vpack.c.bf16 %v530_v53, %v530_v53  ;;  %v539_v21 = vpack.c.bf16 %v531_v19, %v531_v19  ;;  %v540_v58 = vpack.c.bf16 %v532_v54, %v532_v54  ;;  %v541_v15 = vpack.c.bf16 %v533_v13, %v533_v13 }
  0x84   :  { %v542_v59 = vpack.c.bf16 %v534_v55, %v534_v55  ;;  %v543_v60 = vpack.c.bf16 %v535_v8, %v535_v8  ;;  %v544_v61 = vpack.c.bf16 %v536_v56, %v536_v56  ;;  %v545_v62 = vpack.c.bf16 %v537_v14, %v537_v14 }
  0x85   :  { %546 = vst [vmem:[%s1026_s4] sm:$0x3] %v538_v57  ;;  %547 = vst [vmem:[%s1026_s4 + $0x2] sm:$0x3] %v539_v21 }
  0x86   :  { %548 = vst [vmem:[%s1026_s4 + $0x4] sm:$0x3] %v540_v58  ;;  %549 = vst [vmem:[%s1026_s4 + $0x6] sm:$0x3] %v541_v15 }
  0x87   :  { %550 = vst [vmem:[%s1026_s4 + $0x8] sm:$0x3] %v542_v59  ;;  %551 = vst [vmem:[%s1026_s4 + $0xa] sm:$0x3] %v543_v60 }
  0x88   :  { %552 = vst [vmem:[%s1026_s4 + $0xc] sm:$0x3] %v544_v61  ;;  %553 = vst [vmem:[%s1026_s4 + $0xe] sm:$0x3] %v545_v62 }

// kernel: mobilenetv4_forward.28
= control target key start
LH: loop header
LB: loop body
LE: loop exit
PB: predicated region body
PF: predicated region fallthrough
CT: control target
= control target key end

     0   :  { %s335_s1 = inlined_call_operand.vmem [shape: bf16[128,128], index: 1, kind: input, shape index: {}]   ;;  %s336_s0 = inlined_call_operand.vmem [shape: bf16[32,128], index: 0, kind: input, shape index: {}]   ;;  %s337_s2 = inlined_call_operand.vmem [shape: f32[1,128], index: 2, kind: input, shape index: {}]   ;;  %s338_s3 = inlined_call_operand.vmem [shape: f32[1,128], index: 3, kind: input, shape index: {}]   ;;  %s339_s4 = inlined_call_operand.vmem [shape: bf16[32,128], index: 4, kind: output, shape index: {}]  }
   0x1   :  { %v258_v0 = vld [vmem:[%s335_s1 + $0x38] sm:$0xff]   ;;  %v259_v1 = vld [vmem:[%s335_s1 + $0x30] sm:$0xff]   ;;  %v260_v2 = vld [vmem:[%s335_s1 + $0x28] sm:$0xff]  }
   0x2   :  { %238 = vmatprep.subr.bf16.mxu0 %v258_v0  ;;  %v261_v3 = vld [vmem:[%s335_s1 + $0x20] sm:$0xff]   ;;  %v262_v5 = vld [vmem:[%s335_s1 + $0x18] sm:$0xff]   ;;  %v263_v6 = vld [vmem:[%s335_s1 + $0x10] sm:$0xff]  }
   0x3   :  { %239 = vmatpush3.bf16.msra.mxu0 %v258_v0  ;;  %v266_v4 = vld [vmem:[%s336_s0] sm:$0xff]   ;;  %v264_v7 = vld [vmem:[%s335_s1 + $0x8] sm:$0xff]  }
   0x4   :  { %240 = vmatprep.subr.bf16.mxu0 %v259_v1  ;;  %254 = vmatprep.mubr.bf16.mxu0 %v266_v4  ;;  %v265_v8 = vld [vmem:[%s335_s1] sm:$0xff]   ;;  %v267_v9 = vld [vmem:[%s336_s0 + $0x8] sm:$0xff]  }
   0x5   :  { %v207_v10 = vld [vmem:[%s337_s2] ss:$0 sm:$0xff] }
   0x6   :  { %v208_v13 = vld [vmem:[%s338_s3] ss:$0 sm:$0xff] }
   0x7   :  { %241 = vmatpush3.bf16.msra.mxu0 %v259_v1 }
   0x8   :  { %242 = vmatprep.subr.bf16.mxu0 %v260_v2 }
   0xb   :  { %243 = vmatpush3.bf16.msra.mxu0 %v260_v2 }
   0xc   :  { %244 = vmatprep.subr.bf16.mxu0 %v261_v3 }
   0xf   :  { %245 = vmatpush3.bf16.msra.mxu0 %v261_v3 }
  0x10   :  { %246 = vmatprep.subr.bf16.mxu0 %v262_v5 }
  0x13   :  { %247 = vmatpush3.bf16.msra.mxu0 %v262_v5 }
  0x14   :  { %248 = vmatprep.subr.bf16.mxu0 %v263_v6 }
  0x17   :  { %249 = vmatpush3.bf16.msra.mxu0 %v263_v6 }
  0x18   :  { %250 = vmatprep.subr.bf16.mxu0 %v264_v7 }
  0x1b   :  { %251 = vmatpush3.bf16.msra.mxu0 %v264_v7 }
  0x1c   :  { %252 = vmatprep.subr.bf16.mxu0 %v265_v8 }
  0x1f   :  { %253 = vmatpush3.bf16.msra.mxu0 %v265_v8 }
  0x22   :  { %255 = vmatmul.mubr.bf16.vlgmr.msra.gmra.mxu0 %v267_v9 }
  0xe2   :  { %v256_v11 = vpop.f32.mrf.mxu0 }
  0xe3   :  { %v156_v12 = vmul.f32 %v256_v11, %v207_v10 }
  0xe4   :  { %v132_v14 = vpop.f32.mrf.mxu0 }
  0xe5   :  { %v154_v15 = vmul.f32 %v207_v10, %v132_v14  ;;  %v167_v17 = vadd.f32 %v208_v13, %v156_v12 }
  0xe6   :  { %v257_v16 = vpop.f32.mrf.mxu0 }
  0xe7   :  { %v157_v18 = vmul.f32 %v257_v16, %v207_v10  ;;  %v165_v20 = vadd.f32 %v208_v13, %v154_v15  ;;  %v171_v23 = vmax.f32 %v167_v17, 0.0 }
  0xe8   :  { %v135_v19 = vpop.f32.mrf.mxu0 }
  0xe9   :  { %v168_v21 = vadd.f32 %v208_v13, %v157_v18  ;;  %v155_v22 = vmul.f32 %v207_v10, %v135_v19  ;;  %v169_v26 = vmax.f32 %v165_v20, 0.0 }
  0xeb   :  { %v172_v24 = vmax.f32 %v168_v21, 0.0  ;;  %v166_v25 = vadd.f32 %v208_v13, %v155_v22 }
  0xed   :  { %v225_v27 = vpack.c.bf16 %v172_v24, %v171_v23  ;;  %v170_v28 = vmax.f32 %v166_v25, 0.0 }
  0xef   :  { %227 = vst [vmem:[%s339_s4 + $0x8] sm:$0xff] %v225_v27   ;;  %v220_v29 = vpack.c.bf16 %v170_v28, %v169_v26 }
  0xf1   :  { %221 = vst [vmem:[%s339_s4] sm:$0xff] %v220_v29  }

// kernel: mobilenetv4_forward.31
= control target key start
LH: loop header
LB: loop body
LE: loop exit
PB: predicated region body
PF: predicated region fallthrough
CT: control target
= control target key end

     0   :  { %s366_s1 = inlined_call_operand.vmem [shape: bf16[128,128], index: 1, kind: input, shape index: {}]   ;;  %s367_s0 = inlined_call_operand.vmem [shape: bf16[32,128], index: 0, kind: input, shape index: {}]   ;;  %s368_s2 = inlined_call_operand.vmem [shape: f32[1,128], index: 2, kind: input, shape index: {}]   ;;  %s369_s3 = inlined_call_operand.vmem [shape: f32[1,128], index: 3, kind: input, shape index: {}]   ;;  %s370_s4 = inlined_call_operand.vmem [shape: bf16[32,128], index: 4, kind: input, shape index: {}]   ;;  %s371_s5 = inlined_call_operand.vmem [shape: bf16[32,128], index: 5, kind: output, shape index: {}]  }
   0x1   :  { %v278_v0 = vld [vmem:[%s366_s1 + $0x38] sm:$0xff]   ;;  %v279_v1 = vld [vmem:[%s366_s1 + $0x30] sm:$0xff]   ;;  %v280_v2 = vld [vmem:[%s366_s1 + $0x28] sm:$0xff]  }
   0x2   :  { %258 = vmatprep.subr.bf16.mxu0 %v278_v0  ;;  %v281_v3 = vld [vmem:[%s366_s1 + $0x20] sm:$0xff]   ;;  %v282_v5 = vld [vmem:[%s366_s1 + $0x18] sm:$0xff]   ;;  %v283_v6 = vld [vmem:[%s366_s1 + $0x10] sm:$0xff]  }
   0x3   :  { %259 = vmatpush3.bf16.msra.mxu0 %v278_v0  ;;  %v286_v4 = vld [vmem:[%s367_s0] sm:$0xff]   ;;  %v284_v7 = vld [vmem:[%s366_s1 + $0x8] sm:$0xff]  }
   0x4   :  { %260 = vmatprep.subr.bf16.mxu0 %v279_v1  ;;  %274 = vmatprep.mubr.bf16.mxu0 %v286_v4  ;;  %v285_v8 = vld [vmem:[%s366_s1] sm:$0xff]   ;;  %v287_v9 = vld [vmem:[%s367_s0 + $0x8] sm:$0xff]  }
   0x5   :  { %v218_v10 = vld [vmem:[%s368_s2] ss:$0 sm:$0xff]  ;;  %v246_v14 = vld [vmem:[%s370_s4 + $0x8] sm:$0xff]  }
   0x6   :  { %v219_v13 = vld [vmem:[%s369_s3] ss:$0 sm:$0xff]  ;;  %v234_v20 = vunpack.c.l.bf16 %v246_v14  ;;  %v235_v22 = vunpack.c.h.bf16 %v246_v14 }
   0x7   :  { %261 = vmatpush3.bf16.msra.mxu0 %v279_v1  ;;  %v229_v17 = vld [vmem:[%s370_s4] sm:$0xff]  }
   0x8   :  { %262 = vmatprep.subr.bf16.mxu0 %v280_v2  ;;  %v230_v23 = vunpack.c.l.bf16 %v229_v17  ;;  %v231_v28 = vunpack.c.h.bf16 %v229_v17 }
   0xb   :  { %263 = vmatpush3.bf16.msra.mxu0 %v280_v2 }
   0xc   :  { %264 = vmatprep.subr.bf16.mxu0 %v281_v3 }
   0xf   :  { %265 = vmatpush3.bf16.msra.mxu0 %v281_v3 }
  0x10   :  { %266 = vmatprep.subr.bf16.mxu0 %v282_v5 }
  0x13   :  { %267 = vmatpush3.bf16.msra.mxu0 %v282_v5 }
  0x14   :  { %268 = vmatprep.subr.bf16.mxu0 %v283_v6 }
  0x17   :  { %269 = vmatpush3.bf16.msra.mxu0 %v283_v6 }
  0x18   :  { %270 = vmatprep.subr.bf16.mxu0 %v284_v7 }
  0x1b   :  { %271 = vmatpush3.bf16.msra.mxu0 %v284_v7 }
  0x1c   :  { %272 = vmatprep.subr.bf16.mxu0 %v285_v8 }
  0x1f   :  { %273 = vmatpush3.bf16.msra.mxu0 %v285_v8 }
  0x22   :  { %275 = vmatmul.mubr.bf16.vlgmr.msra.gmra.mxu0 %v287_v9 }
  0xe2   :  { %v276_v11 = vpop.f32.mrf.mxu0 }
  0xe3   :  { %v159_v12 = vmul.f32 %v276_v11, %v218_v10 }
  0xe4   :  { %v135_v15 = vpop.f32.mrf.mxu0 }
  0xe5   :  { %v157_v16 = vmul.f32 %v218_v10, %v135_v15  ;;  %v170_v19 = vadd.f32 %v219_v13, %v159_v12 }
  0xe6   :  { %v277_v18 = vpop.f32.mrf.mxu0 }
  0xe7   :  { %v160_v21 = vmul.f32 %v277_v18, %v218_v10  ;;  %v168_v25 = vadd.f32 %v219_v13, %v157_v16  ;;  %v182_v29 = vadd.f32 %v234_v20, %v170_v19 }
  0xe8   :  { %v138_v24 = vpop.f32.mrf.mxu0 }
  0xe9   :  { %v171_v26 = vadd.f32 %v219_v13, %v160_v21  ;;  %v158_v27 = vmul.f32 %v218_v10, %v138_v24  ;;  %v180_v32 = vadd.f32 %v230_v23, %v168_v25 }
  0xeb   :  { %v183_v30 = vadd.f32 %v235_v22, %v171_v26  ;;  %v169_v31 = vadd.f32 %v219_v13, %v158_v27 }
  0xed   :  { %v244_v33 = vpack.c.bf16 %v183_v30, %v182_v29  ;;  %v181_v34 = vadd.f32 %v231_v28, %v169_v31 }
  0xef   :  { %247 = vst [vmem:[%s371_s5 + $0x8] sm:$0xff] %v244_v33   ;;  %v239_v35 = vpack.c.bf16 %v181_v34, %v180_v32 }
  0xf1   :  { %240 = vst [vmem:[%s371_s5] sm:$0xff] %v239_v35  }

// kernel: mobilenetv4_forward.29
= control target key start
LH: loop header
LB: loop body
LE: loop exit
PB: predicated region body
PF: predicated region fallthrough
CT: control target
= control target key end

     0   :  { %v35_v0 = vlaneseq  ;;  %vm497_vm0 = vcmask 1043456   ;;  %s1074_s0 = inlined_call_operand.vmem [shape: bf16[2,6,6,128], index: 0, kind: input, shape index: {}]   ;;  %s1075_s1 = inlined_call_operand.vmem [shape: bf16[9,128], index: 1, kind: input, shape index: {}]   ;;  %s1076_s2 = inlined_call_operand.vmem [shape: f32[1,128], index: 2, kind: input, shape index: {}]   ;;  %s1077_s3 = inlined_call_operand.vmem [shape: f32[1,128], index: 3, kind: input, shape index: {}]   ;;  %s1078_s4 = inlined_call_operand.vmem [shape: bf16[2,4,4,128], index: 4, kind: output, shape index: {}]  }
   0x1   :  { %v17_v1 = vld [vmem:[%s1074_s0] sm:$0x3]  ;;  %v18_v2 = vld [vmem:[%s1074_s0 + $0x4] sm:$0x3]  ;;  %v19_v3 = vld [vmem:[%s1074_s0 + $0x8] sm:$0x3] }
   0x2   :  { %v20_v4 = vld [vmem:[%s1074_s0 + $0xc] sm:$0x3]  ;;  %v21_v5 = vld [vmem:[%s1074_s0 + $0x18] sm:$0x3]  ;;  %v22_v6 = vld [vmem:[%s1074_s0 + $0x1c] sm:$0x3]  ;;  %v25_v12 = vunpack.c.l.bf16 %v17_v1  ;;  %v26_v13 = vunpack.c.l.bf16 %v18_v2  ;;  %v27_v14 = vunpack.c.l.bf16 %v19_v3 }
   0x3   :  { %v23_v7 = vld [vmem:[%s1074_s0 + $0x20] sm:$0x3]  ;;  %v726_v9 = vshrl.u32 %v35_v0, 7  ;;  %v56_v11 = vld [vmem:[%s1074_s0 + $0x4] sm:$0x7]  ;;  %v28_v19 = vunpack.c.l.bf16 %v20_v4  ;;  %v29_v20 = vunpack.c.l.bf16 %v21_v5  ;;  %v30_v21 = vunpack.c.l.bf16 %v22_v6 }
   0x4   :  { %v33_v8 = vld [vmem:[%s1075_s1] sm:$0x1]  ;;  %v57_v16 = vld [vmem:[%s1074_s0 + $0x8] sm:$0x7]  ;;  %v58_v17 = vld [vmem:[%s1074_s0 + $0xc] sm:$0x7]  ;;  %v31_v26 = vunpack.c.l.bf16 %v23_v7  ;;  %v64_v29 = vunpack.c.l.bf16 %v56_v11 }
   0x5   :  { %v55_v10 = vld [vmem:[%s1074_s0] sm:$0x7]  ;;  %v34_v15 = vunpack.c.l.bf16 %v33_v8  ;;  %v59_v18 = vld [vmem:[%s1074_s0 + $0x18] sm:$0x7]  ;;  %v744_v22 = vsub.s32 0, %v726_v9  ;;  %v73_v30 = vsub.s32 1, %v726_v9  ;;  %v65_v32 = vunpack.c.l.bf16 %v57_v16 }
   0x6   :  { %v60_v23 = vld [vmem:[%s1074_s0 + $0x1c] sm:$0x7]  ;;  %v61_v24 = vld [vmem:[%s1074_s0 + $0x20] sm:$0x7]  ;;  %v24_v25 = vld [vmem:[%s1074_s0 + $0x24] sm:$0x3]  ;;  %v63_v28 = vunpack.c.l.bf16 %v55_v10  ;;  %v66_v33 = vunpack.c.l.bf16 %v58_v17  ;;  %v67_v34 = vunpack.c.l.bf16 %v59_v18 }
   0x7   :  { %v62_v27 = vld [vmem:[%s1074_s0 + $0x24] sm:$0x7]  ;;  %v38_v31 = vrot.slane %v34_v15, %v744_v22  ;;  %v68_v35 = vunpack.c.l.bf16 %v60_v23  ;;  %v69_v36 = vunpack.c.l.bf16 %v61_v24  ;;  %v74_v38 = vrot.slane %v34_v15, %v73_v30  ;;  %v115_v55 = vld [vmem:[%s1074_s0] sm:$0x6]  ;;  %v117_v57 = vld [vmem:[%s1074_s0 + $0x8] sm:$0x6] }
   0x8   :  { %v70_v37 = vunpack.c.l.bf16 %v62_v27  ;;  %v32_v39 = vunpack.c.l.bf16 %v24_v25  ;;  %v135_v42 = vsub.s32 2, %v726_v9  ;;  %v116_v56 = vld [vmem:[%s1074_s0 + $0x4] sm:$0x6]  ;;  %v118_v62 = vld [vmem:[%s1074_s0 + $0xc] sm:$0x6]  ;;  %v123_v5 = vunpack.c.l.bf16 %v115_v55 }
   0x9   :  { %v39_v40 = vmul.f32 %v38_v31, %v25_v12  ;;  %v40_v41 = vmul.f32 %v38_v31, %v26_v13  ;;  %v41_v43 = vmul.f32 %v38_v31, %v27_v14  ;;  %v42_v44 = vmul.f32 %v38_v31, %v28_v19  ;;  %v119_v3 = vld [vmem:[%s1074_s0 + $0x18] sm:$0x6]  ;;  %v120_v4 = vld [vmem:[%s1074_s0 + $0x1c] sm:$0x6]  ;;  %v782_v7 = vld [vmem:[%s1075_s1] sm:$0x2] }
   0xa   :  { %v43_v45 = vmul.f32 %v38_v31, %v29_v20  ;;  %v44_v46 = vmul.f32 %v38_v31, %v30_v21  ;;  %v75_v47 = vmul.f32 %v74_v38, %v63_v28  ;;  %v76_v48 = vmul.f32 %v74_v38, %v64_v29  ;;  %v121_v11 = vld [vmem:[%s1074_s0 + $0x20] sm:$0x6]  ;;  %v122_v12 = vld [vmem:[%s1074_s0 + $0x24] sm:$0x6]  ;;  %v798_v20 = vld [vmem:[%s1074_s0 + $0x8] sm:$0x3] }
   0xb   :  { %v77_v49 = vmul.f32 %v74_v38, %v65_v32  ;;  %v78_v50 = vmul.f32 %v74_v38, %v66_v33  ;;  %v79_v51 = vmul.f32 %v74_v38, %v67_v34  ;;  %v80_v52 = vmul.f32 %v74_v38, %v68_v35  ;;  %v793_v19 = vld [vmem:[%s1074_s0 + $0x4] sm:$0x3]  ;;  %v807_v27 = vld [vmem:[%s1074_s0 + $0x10] sm:$0x3]  ;;  %v812_v28 = vld [vmem:[%s1074_s0 + $0x1c] sm:$0x3] }
   0xc   :  { %v81_v53 = vmul.f32 %v74_v38, %v69_v36  ;;  %v82_v54 = vmul.f32 %v74_v38, %v70_v37  ;;  %v91_v58 = vrot.slane %v75_v47, 1  ;;  %v92_v59 = vrot.slane %v76_v48, 1  ;;  %v634_v47 = vld [vmem:[%s1074_s0 + $0x28] sm:$0x3] }
   0xd   :  { %v93_v60 = vrot.slane %v77_v49, 1  ;;  %v94_v61 = vrot.slane %v78_v50, 1  ;;  %v45_v63 = vmul.f32 %v38_v31, %v31_v26  ;;  %v95_v0 = vrot.slane %v79_v51, 1  ;;  %v629_v26 = vld [vmem:[%s1074_s0 + $0xc] sm:$0x3] }
   0xe   :  { %v96_v1 = vrot.slane %v80_v52, 1  ;;  %v97_v2 = vrot.slane %v81_v53, 1  ;;  %v124_v6 = vunpack.c.l.bf16 %v116_v56  ;;  %v46_v8 = vmul.f32 %v38_v31, %v32_v39  ;;  %v635_v52 = vld [vmem:[%s1074_s0 + $0x4] sm:$0x7]  ;;  %v636_v53 = vld [vmem:[%s1074_s0 + $0x8] sm:$0x7] }
   0xf   :  { %v98_v10 = vrot.slane %v82_v54, 1  ;;  %v125_v13 = vunpack.c.l.bf16 %v117_v57  ;;  %v126_v14 = vunpack.c.l.bf16 %v118_v62  ;;  %v107_v15 = vadd.f32 %v91_v58, %v39_v40  ;;  %v637_v54 = vld [vmem:[%s1074_s0 + $0xc] sm:$0x7] }
  0x10   :  { %v108_v16 = vadd.f32 %v92_v59, %v40_v41  ;;  %v109_v17 = vadd.f32 %v93_v60, %v41_v43  ;;  %v110_v18 = vadd.f32 %v94_v61, %v42_v44  ;;  %v111_v21 = vadd.f32 %v95_v0, %v43_v45  ;;  %v638_v59 = vld [vmem:[%s1074_s0 + $0x10] sm:$0x7] }
  0x11   :  { %v112_v23 = vadd.f32 %v96_v1, %v44_v46  ;;  %v113_v24 = vadd.f32 %v97_v2, %v45_v63  ;;  %v132_v25 = vunpack.c.l.bf16 %v782_v7  ;;  %v127_v29 = vunpack.c.l.bf16 %v119_v3  ;;  %v632_v46 = vld [vmem:[%s1074_s0 + $0x20] sm:$0x3] }
  0x12   :  { %v128_v30 = vunpack.c.l.bf16 %v120_v4  ;;  %v129_v31 = vunpack.c.l.bf16 %v121_v11  ;;  %v130_v32 = vunpack.c.l.bf16 %v122_v12  ;;  %v114_v33 = vadd.f32 %v98_v10, %v46_v8  ;;  %v843_v4 = vld [vmem:[%s1075_s1] sm:$0x4] }
  0x13   :  { %v136_v34 = vrot.slane %v132_v25, %v135_v42  ;;  %v186_v35 = vunpack.c.l.bf16 %v793_v19  ;;  %v187_v36 = vunpack.c.l.bf16 %v798_v20  ;;  %v188_v37 = vunpack.c.l.bf16 %v629_v26  ;;  %v633_v42 = vld [vmem:[%s1074_s0 + $0x24] sm:$0x3] }
  0x14   :  { %v189_v38 = vunpack.c.l.bf16 %v807_v27  ;;  %v190_v39 = vunpack.c.l.bf16 %v812_v28  ;;  %v196_v40 = vsub.s32 3, %v726_v9  ;;  %v191_v63 = vunpack.c.l.bf16 %v632_v46  ;;  %v640_v27 = vld [vmem:[%s1074_s0 + $0x20] sm:$0x7] }
  0x15   :  { %v137_v41 = vmul.f32 %v136_v34, %v123_v5  ;;  %v138_v43 = vmul.f32 %v136_v34, %v124_v6  ;;  %v139_v44 = vmul.f32 %v136_v34, %v125_v13  ;;  %v140_v45 = vmul.f32 %v136_v34, %v126_v14  ;;  %v639_v14 = vld [vmem:[%s1074_s0 + $0x1c] sm:$0x7] }
  0x16   :  { %v141_v48 = vmul.f32 %v136_v34, %v127_v29  ;;  %v142_v49 = vmul.f32 %v136_v34, %v128_v30  ;;  %v143_v50 = vmul.f32 %v136_v34, %v129_v31  ;;  %v144_v51 = vmul.f32 %v136_v34, %v130_v32 }
  0x17   :  { %v153_v55 = vrot.slane %v137_v41, 2  ;;  %v154_v56 = vrot.slane %v138_v43, 2  ;;  %v155_v57 = vrot.slane %v139_v44, 2  ;;  %v156_v58 = vrot.slane %v140_v45, 2 }
  0x18   :  { %v157_v60 = vrot.slane %v141_v48, 2  ;;  %v158_v61 = vrot.slane %v142_v49, 2  ;;  %v159_v62 = vrot.slane %v143_v50, 2  ;;  %v192_v0 = vunpack.c.l.bf16 %v633_v42 }
  0x19   :  { %v193_v1 = vunpack.c.l.bf16 %v634_v47  ;;  %v222_v2 = vunpack.c.l.bf16 %v635_v52  ;;  %v223_v3 = vunpack.c.l.bf16 %v636_v53  ;;  %v160_v5 = vrot.slane %v144_v51, 2 }
  0x1a   :  { %v169_v6 = vadd.f32 %v153_v55, %v107_v15  ;;  %v224_v7 = vunpack.c.l.bf16 %v637_v54  ;;  %v225_v8 = vunpack.c.l.bf16 %v638_v59  ;;  %v170_v10 = vadd.f32 %v154_v56, %v108_v16  ;;  %v641_v15 = vld [vmem:[%s1074_s0 + $0x24] sm:$0x7]  ;;  %v642_v16 = vld [vmem:[%s1074_s0 + $0x28] sm:$0x7]  ;;  %v646_v54 = vld [vmem:[%s1074_s0 + $0x10] sm:$0x6] }
  0x1b   :  { %v171_v11 = vadd.f32 %v155_v57, %v109_v17  ;;  %v172_v12 = vadd.f32 %v156_v58, %v110_v18  ;;  %v197_v13 = vrot.slane %v132_v25, %v196_v40  ;;  %v173_v19 = vadd.f32 %v157_v60, %v111_v21  ;;  %v647_v59 = vld [vmem:[%s1074_s0 + $0x1c] sm:$0x6]  ;;  %v648_v60 = vld [vmem:[%s1074_s0 + $0x20] sm:$0x6] }
  0x1c   :  { %v174_v20 = vadd.f32 %v158_v61, %v112_v23  ;;  %v175_v26 = vadd.f32 %v159_v62, %v113_v24  ;;  %v231_v17 = vunpack.c.l.bf16 %v843_v4  ;;  %v234_v21 = vsub.s32 4, %v726_v9  ;;  %v643_v23 = vld [vmem:[%s1074_s0 + $0x4] sm:$0x6]  ;;  %v644_v24 = vld [vmem:[%s1074_s0 + $0x8] sm:$0x6] }
  0x1d   :  { %v198_v18 = vmul.f32 %v197_v13, %v186_v35  ;;  %v199_v25 = vmul.f32 %v197_v13, %v187_v36  ;;  %v200_v28 = vmul.f32 %v197_v13, %v188_v37  ;;  %v201_v29 = vmul.f32 %v197_v13, %v189_v38  ;;  %v649_v61 = vld [vmem:[%s1074_s0 + $0x24] sm:$0x6] }
  0x1e   :  { %v202_v30 = vmul.f32 %v197_v13, %v190_v39  ;;  %v203_v31 = vmul.f32 %v197_v13, %v191_v63  ;;  %v204_v32 = vmul.f32 %v197_v13, %v192_v0  ;;  %v176_v34 = vadd.f32 %v160_v5, %v114_v33  ;;  %v645_v33 = vld [vmem:[%s1074_s0 + $0xc] sm:$0x6] }
  0x1f   :  { %v226_v40 = vunpack.c.l.bf16 %v639_v14  ;;  %v227_v41 = vunpack.c.l.bf16 %v640_v27  ;;  %v228_v35 = vunpack.c.l.bf16 %v641_v15  ;;  %v205_v36 = vmul.f32 %v197_v13, %v193_v1  ;;  %v650_v1 = vld [vmem:[%s1074_s0 + $0x28] sm:$0x6] }
  0x20   :  { %v229_v37 = vunpack.c.l.bf16 %v642_v16  ;;  %v284_v43 = vunpack.c.l.bf16 %v643_v23  ;;  %v285_v44 = vunpack.c.l.bf16 %v644_v24  ;;  %v206_v45 = vadd.f32 %v198_v18, %v169_v6 }
  0x21   :  { %v207_v46 = vadd.f32 %v199_v25, %v170_v10  ;;  %v208_v42 = vadd.f32 %v200_v28, %v171_v11  ;;  %v235_v47 = vrot.slane %v231_v17, %v234_v21  ;;  %v209_v48 = vadd.f32 %v201_v29, %v172_v12  ;;  %v651_v21 = vld [vmem:[%s1074_s0 + $0x8] sm:$0x3] }
  0x22   :  { %v210_v49 = vadd.f32 %v202_v30, %v173_v19  ;;  %v211_v50 = vadd.f32 %v203_v31, %v174_v20  ;;  %v212_v51 = vadd.f32 %v204_v32, %v175_v26  ;;  %v287_v10 = vunpack.c.l.bf16 %v646_v54  ;;  %v652_v31 = vld [vmem:[%s1074_s0 + $0xc] sm:$0x3] }
  0x23   :  { %v236_v38 = vmul.f32 %v235_v47, %v222_v2  ;;  %v237_v39 = vmul.f32 %v235_v47, %v223_v3  ;;  %v238_v52 = vmul.f32 %v235_v47, %v224_v7  ;;  %v239_v53 = vmul.f32 %v235_v47, %v225_v8 }
  0x24   :  { %v240_v55 = vmul.f32 %v235_v47, %v226_v40  ;;  %v241_v56 = vmul.f32 %v235_v47, %v227_v41  ;;  %v242_v57 = vmul.f32 %v235_v47, %v228_v35  ;;  %v243_v58 = vmul.f32 %v235_v47, %v229_v37  ;;  %v653_v41 = vld [vmem:[%s1074_s0 + $0x10] sm:$0x3]  ;;  %v654_v35 = vld [vmem:[%s1074_s0 + $0x14] sm:$0x3] }
  0x25   :  { %v252_v62 = vrot.slane %v236_v38, 1  ;;  %v253_v63 = vrot.slane %v237_v39, 1  ;;  %v254_v0 = vrot.slane %v238_v52, 1  ;;  %v294_v2 = vsub.s32 5, %v726_v9 }
  0x26   :  { %v255_v3 = vrot.slane %v239_v53, 1  ;;  %v256_v4 = vrot.slane %v240_v55, 1  ;;  %v257_v5 = vrot.slane %v241_v56, 1  ;;  %v258_v6 = vrot.slane %v242_v57, 1  ;;  %v658_v53 = vld [vmem:[%s1074_s0 + $0x2c] sm:$0x3] }
  0x27   :  { %v213_v7 = vadd.f32 %v205_v36, %v176_v34  ;;  %v286_v8 = vunpack.c.l.bf16 %v645_v33  ;;  %v288_v11 = vunpack.c.l.bf16 %v647_v59  ;;  %v259_v12 = vrot.slane %v243_v58, 1  ;;  %v655_v36 = vld [vmem:[%s1074_s0 + $0x20] sm:$0x3]  ;;  %v659_v58 = vld [vmem:[%s1074_s0 + $0x8] sm:$0x7] }
  0x28   :  { %v289_v13 = vunpack.c.l.bf16 %v648_v60  ;;  %v290_v14 = vunpack.c.l.bf16 %v649_v61  ;;  %v291_v19 = vunpack.c.l.bf16 %v650_v1  ;;  %v268_v20 = vadd.f32 %v252_v62, %v206_v45  ;;  %v656_v45 = vld [vmem:[%s1074_s0 + $0x24] sm:$0x3] }
  0x29   :  { %v269_v26 = vadd.f32 %v253_v63, %v207_v46  ;;  %v270_v27 = vadd.f32 %v254_v0, %v208_v42  ;;  %v295_v15 = vrot.slane %v231_v17, %v294_v2  ;;  %v271_v16 = vadd.f32 %v255_v3, %v209_v48  ;;  %v657_v46 = vld [vmem:[%s1074_s0 + $0x28] sm:$0x3]  ;;  %v660_v63 = vld [vmem:[%s1074_s0 + $0xc] sm:$0x7]  ;;  %v661_v0 = vld [vmem:[%s1074_s0 + $0x10] sm:$0x7] }
  0x2a   :  { %v272_v18 = vadd.f32 %v256_v4, %v210_v49  ;;  %v273_v25 = vadd.f32 %v257_v5, %v211_v50  ;;  %v274_v28 = vadd.f32 %v258_v6, %v212_v51  ;;  %v275_v37 = vadd.f32 %v259_v12, %v213_v7  ;;  %v353_v51 = vld [vmem:[%s1075_s1] sm:$0x8]  ;;  %v664_v12 = vld [vmem:[%s1074_s0 + $0x24] sm:$0x7] }
  0x2b   :  { %v296_v23 = vmul.f32 %v295_v15, %v284_v43  ;;  %v297_v24 = vmul.f32 %v295_v15, %v285_v44  ;;  %v298_v29 = vmul.f32 %v295_v15, %v286_v8  ;;  %v299_v30 = vmul.f32 %v295_v15, %v287_v10  ;;  %v662_v10 = vld [vmem:[%s1074_s0 + $0x14] sm:$0x7] }
  0x2c   :  { %v300_v32 = vmul.f32 %v295_v15, %v288_v11  ;;  %v301_v34 = vmul.f32 %v295_v15, %v289_v13  ;;  %v302_v40 = vmul.f32 %v295_v15, %v290_v14  ;;  %v303_v17 = vmul.f32 %v295_v15, %v291_v19  ;;  %v663_v11 = vld [vmem:[%s1074_s0 + $0x20] sm:$0x7]  ;;  %v665_v13 = vld [vmem:[%s1074_s0 + $0x28] sm:$0x7] }
  0x2d   :  { %v312_v43 = vrot.slane %v296_v23, 2  ;;  %v313_v44 = vrot.slane %v297_v24, 2  ;;  %v345_v42 = vunpack.c.l.bf16 %v651_v21  ;;  %v314_v47 = vrot.slane %v298_v29, 2 }
  0x2e   :  { %v315_v48 = vrot.slane %v299_v30, 2  ;;  %v316_v49 = vrot.slane %v300_v32, 2  ;;  %v346_v50 = vunpack.c.l.bf16 %v652_v31  ;;  %v317_v38 = vrot.slane %v301_v34, 2  ;;  %v451_v34 = vld [vmem:[%s1075_s1 + $0x4] sm:$0x1] }
  0x2f   :  { %v318_v39 = vrot.slane %v302_v40, 2  ;;  %v319_v52 = vrot.slane %v303_v17, 2  ;;  %v347_v33 = vunpack.c.l.bf16 %v653_v41  ;;  %v348_v54 = vunpack.c.l.bf16 %v654_v35 }
  0x30   :  { %v349_v55 = vunpack.c.l.bf16 %v655_v36  ;;  %v350_v56 = vunpack.c.l.bf16 %v656_v45  ;;  %v351_v57 = vunpack.c.l.bf16 %v657_v46  ;;  %v328_v59 = vadd.f32 %v312_v43, %v268_v20 }
  0x31   :  { %v329_v60 = vadd.f32 %v313_v44, %v269_v26  ;;  %v354_v61 = vunpack.c.l.bf16 %v353_v51  ;;  %v357_v62 = vsub.s32 6, %v726_v9  ;;  %v330_v1 = vadd.f32 %v314_v47, %v270_v27 }
  0x32   :  { %v331_v2 = vadd.f32 %v315_v48, %v271_v16  ;;  %v332_v3 = vadd.f32 %v316_v49, %v272_v18  ;;  %v352_v4 = vunpack.c.l.bf16 %v658_v53  ;;  %v333_v5 = vadd.f32 %v317_v38, %v273_v25  ;;  %v666_v25 = vld [vmem:[%s1074_s0 + $0x2c] sm:$0x7] }
  0x33   :  { %v334_v6 = vadd.f32 %v318_v39, %v274_v28  ;;  %v335_v7 = vadd.f32 %v319_v52, %v275_v37  ;;  %v358_v8 = vrot.slane %v354_v61, %v357_v62  ;;  %v383_v14 = vunpack.c.l.bf16 %v659_v58  ;;  %v940_v28 = vld [vmem:[%s1074_s0 + $0x8] sm:$0x6]  ;;  %v668_v38 = vld [vmem:[%s1074_s0 + $0xc] sm:$0x6]  ;;  %v669_v39 = vld [vmem:[%s1074_s0 + $0x10] sm:$0x6] }
  0x34   :  { %v384_v19 = vunpack.c.l.bf16 %v660_v63  ;;  %v385_v20 = vunpack.c.l.bf16 %v661_v0  ;;  %v393_v26 = vsub.s32 7, %v726_v9  ;;  %v386_v30 = vunpack.c.l.bf16 %v662_v10  ;;  %v670_v52 = vld [vmem:[%s1074_s0 + $0x14] sm:$0x6]  ;;  %v673_v58 = vld [vmem:[%s1074_s0 + $0x28] sm:$0x6] }
  0x35   :  { %v359_v27 = vmul.f32 %v358_v8, %v345_v42  ;;  %v360_v15 = vmul.f32 %v358_v8, %v346_v50  ;;  %v361_v16 = vmul.f32 %v358_v8, %v347_v33  ;;  %v362_v18 = vmul.f32 %v358_v8, %v348_v54  ;;  %v674_v63 = vld [vmem:[%s1074_s0 + $0x2c] sm:$0x6] }
  0x36   :  { %v363_v21 = vmul.f32 %v358_v8, %v349_v55  ;;  %v364_v23 = vmul.f32 %v358_v8, %v350_v56  ;;  %v365_v24 = vmul.f32 %v358_v8, %v351_v57  ;;  %v366_v29 = vmul.f32 %v358_v8, %v352_v4  ;;  %v671_v56 = vld [vmem:[%s1074_s0 + $0x20] sm:$0x6]  ;;  %v672_v57 = vld [vmem:[%s1074_s0 + $0x24] sm:$0x6] }
  0x37   :  { %v387_v31 = vunpack.c.l.bf16 %v663_v11  ;;  %v388_v9 = vunpack.c.l.bf16 %v664_v12  ;;  %v389_v32 = vunpack.c.l.bf16 %v665_v13  ;;  %v367_v40 = vadd.f32 %v359_v27, %v328_v59 }
  0x38   :  { %v368_v17 = vadd.f32 %v360_v15, %v329_v60  ;;  %v390_v41 = vunpack.c.l.bf16 %v666_v25  ;;  %v443_v35 = vunpack.c.l.bf16 %v940_v28  ;;  %v369_v36 = vadd.f32 %v361_v16, %v330_v1 }
  0x39   :  { %v370_v37 = vadd.f32 %v362_v18, %v331_v2  ;;  %v371_v43 = vadd.f32 %v363_v21, %v332_v3  ;;  %v394_v44 = vrot.slane %v354_v61, %v393_v26  ;;  %v372_v45 = vadd.f32 %v364_v23, %v333_v5 }
  0x3a   :  { %v373_v46 = vadd.f32 %v365_v24, %v334_v6  ;;  %v374_v42 = vadd.f32 %v366_v29, %v335_v7  ;;  %v452_v47 = vunpack.c.l.bf16 %v451_v34  ;;  %v444_v4 = vunpack.c.l.bf16 %v668_v38 }
  0x3b   :  { %v395_v48 = vmul.f32 %v394_v44, %v383_v14  ;;  %v396_v49 = vmul.f32 %v394_v44, %v384_v19  ;;  %v397_v50 = vmul.f32 %v394_v44, %v385_v20  ;;  %v398_v51 = vmul.f32 %v394_v44, %v386_v30 }
  0x3c   :  { %v399_v53 = vmul.f32 %v394_v44, %v387_v31  ;;  %v400_v33 = vmul.f32 %v394_v44, %v388_v9  ;;  %v401_v54 = vmul.f32 %v394_v44, %v389_v32  ;;  %v402_v55 = vmul.f32 %v394_v44, %v390_v41 }
  0x3d   :  { %v411_v59 = vrot.slane %v395_v48, 1  ;;  %v412_v60 = vrot.slane %v396_v49, 1  ;;  %v413_v61 = vrot.slane %v397_v50, 1  ;;  %v414_v62 = vrot.slane %v398_v51, 1 }
  0x3e   :  { %v415_v0 = vrot.slane %v399_v53, 1  ;;  %v416_v1 = vrot.slane %v400_v33, 1  ;;  %v417_v2 = vrot.slane %v401_v54, 1  ;;  %v418_v3 = vrot.slane %v402_v55, 1 }
  0x3f   :  { %v445_v5 = vunpack.c.l.bf16 %v669_v39  ;;  %v446_v6 = vunpack.c.l.bf16 %v670_v52  ;;  %v447_v7 = vunpack.c.l.bf16 %v671_v56  ;;  %v427_v8 = vadd.f32 %v411_v59, %v367_v40 }
  0x40   :  { %v448_v10 = vunpack.c.l.bf16 %v672_v57  ;;  %v449_v11 = vunpack.c.l.bf16 %v673_v58  ;;  %v450_v12 = vunpack.c.l.bf16 %v674_v63  ;;  %v428_v13 = vadd.f32 %v412_v60, %v368_v17 }
  0x41   :  { %v429_v14 = vadd.f32 %v413_v61, %v369_v36  ;;  %v430_v19 = vadd.f32 %v414_v62, %v370_v37  ;;  %v456_v20 = vrot.slane %v452_v47, %v744_v22  ;;  %v431_v26 = vadd.f32 %v415_v0, %v371_v43 }
  0x42   :  { %v432_v27 = vadd.f32 %v416_v1, %v372_v45  ;;  %v433_v15 = vadd.f32 %v417_v2, %v373_v46  ;;  %v434_v16 = vadd.f32 %v418_v3, %v374_v42 }
  0x43   :  { %v457_v18 = vmul.f32 %v456_v20, %v443_v35  ;;  %v458_v25 = vmul.f32 %v456_v20, %v444_v4  ;;  %v459_v28 = vmul.f32 %v456_v20, %v445_v5  ;;  %v460_v21 = vmul.f32 %v456_v20, %v446_v6 }
  0x44   :  { %v461_v23 = vmul.f32 %v456_v20, %v447_v7  ;;  %v462_v24 = vmul.f32 %v456_v20, %v448_v10  ;;  %v463_v29 = vmul.f32 %v456_v20, %v449_v11  ;;  %v464_v30 = vmul.f32 %v456_v20, %v450_v12 }
  0x45   :  { %v473_v31 = vrot.slane %v457_v18, 2  ;;  %v474_v9 = vrot.slane %v458_v25, 2  ;;  %v475_v32 = vrot.slane %v459_v28, 2  ;;  %v476_v34 = vrot.slane %v460_v21, 2 }
  0x46   :  { %v477_v40 = vrot.slane %v461_v23, 2  ;;  %v478_v17 = vrot.slane %v462_v24, 2  ;;  %v479_v41 = vrot.slane %v463_v29, 2  ;;  %v480_v36 = vrot.slane %v464_v30, 2 }
  0x47   :  { %v968_v37 = vadd.f32 %v473_v31, %v427_v8  ;;  %v970_v43 = vadd.f32 %v474_v9, %v428_v13  ;;  %v972_v35 = vadd.f32 %v475_v32, %v429_v14  ;;  %v974_v44 = vadd.f32 %v476_v34, %v430_v19 }
  0x48   :  { %v976_v45 = vadd.f32 %v477_v40, %v431_v26  ;;  %v978_v46 = vadd.f32 %v478_v17, %v432_v27  ;;  %v980_v42 = vadd.f32 %v479_v41, %v433_v15  ;;  %v982_v47 = vadd.f32 %v480_v36, %v434_v16 }
  0x49   :  { %v498_v48 = vsel %vm497_vm0, %v968_v37, 0.0  ;;  %v501_v49 = vsel %vm497_vm0, %v970_v43, 0.0  ;;  %v504_v50 = vsel %vm497_vm0, %v972_v35, 0.0  ;;  %v507_v51 = vsel %vm497_vm0, %v974_v44, 0.0 }
  0x4a   :  { %v499_v38 = vsel %vm497_vm0, %v976_v45, 0.0  ;;  %v502_v39 = vsel %vm497_vm0, %v978_v46, 0.0  ;;  %v505_v52 = vsel %vm497_vm0, %v980_v42, 0.0  ;;  %v508_v53 = vsel %vm497_vm0, %v982_v47, 0.0 }
  0x4b   :  { %v500_v33 = vadd.f32 %v499_v38, %v498_v48  ;;  %v503_v54 = vadd.f32 %v502_v39, %v501_v49  ;;  %v506_v55 = vadd.f32 %v505_v52, %v504_v50  ;;  %v509_v56 = vadd.f32 %v508_v53, %v507_v51 }
  0x4c   :  { %v526_v57 = vmul.f32 %v968_v37, %v968_v37  ;;  %v527_v58 = vmul.f32 %v970_v43, %v970_v43  ;;  %v528_v59 = vmul.f32 %v972_v35, %v972_v35  ;;  %v529_v60 = vmul.f32 %v974_v44, %v974_v44 }
  0x4d   :  { %v510_v61 = vsel %vm497_vm0, %v500_v33, 0.0  ;;  %v511_v62 = vsel %vm497_vm0, %v503_v54, 0.0  ;;  %v513_v63 = vsel %vm497_vm0, %v506_v55, 0.0  ;;  %v515_v0 = vsel %vm497_vm0, %v509_v56, 0.0  ;;  %v564_v56 = vld [vmem:[%s1076_s2] sm:$0x1] }
  0x4e   :  { %v512_v1 = vadd.f32 %v511_v62, %v510_v61  ;;  %v530_v2 = vmul.f32 %v976_v45, %v976_v45  ;;  %v531_v3 = vmul.f32 %v978_v46, %v978_v46  ;;  %v532_v4 = vmul.f32 %v980_v42, %v980_v42 }
  0x4f   :  { %v533_v5 = vmul.f32 %v982_v47, %v982_v47  ;;  %v534_v6 = vsel %vm497_vm0, %v526_v57, 0.0  ;;  %v537_v7 = vsel %vm497_vm0, %v527_v58, 0.0  ;;  %v540_v8 = vsel %vm497_vm0, %v528_v59, 0.0  ;;  %v568_v59 = vld [vmem:[%s1077_s3] sm:$0x1] }
  0x50   :  { %v514_v10 = vadd.f32 %v513_v63, %v512_v1  ;;  %v535_v11 = vsel %vm497_vm0, %v530_v2, 0.0  ;;  %v538_v12 = vsel %vm497_vm0, %v531_v3, 0.0  ;;  %v541_v13 = vsel %vm497_vm0, %v532_v4, 0.0 }
  0x51   :  { %v536_v14 = vadd.f32 %v535_v11, %v534_v6  ;;  %v539_v19 = vadd.f32 %v538_v12, %v537_v7  ;;  %v542_v20 = vadd.f32 %v541_v13, %v540_v8  ;;  %v543_v26 = vsel %vm497_vm0, %v529_v60, 0.0 }
  0x52   :  { %v516_v27 = vadd.f32 %v515_v0, %v514_v10  ;;  %v544_v15 = vsel %vm497_vm0, %v533_v5, 0.0 }
  0x53   :  { %v545_v16 = vadd.f32 %v544_v15, %v543_v26  ;;  %v546_v18 = vsel %vm497_vm0, %v536_v14, 0.0  ;;  %v547_v25 = vsel %vm497_vm0, %v539_v19, 0.0  ;;  %v549_v28 = vsel %vm497_vm0, %v542_v20, 0.0 }
  0x54   :  { %v517_v21 = vsel %vm497_vm0, %v516_v27, 0.0  ;;  %v548_v23 = vadd.f32 %v547_v25, %v546_v18 }
  0x55   :  { %v518_v24 = vrot.slane %v517_v21, 4  ;;  %v551_v29 = vsel %vm497_vm0, %v545_v16, 0.0 }
  0x56   :  { %v550_v30 = vadd.f32 %v549_v28, %v548_v23 }
  0x57   :  { %v519_v31 = vadd.f32 %v518_v24, %v517_v21 }
  0x58   :  { %v552_v9 = vadd.f32 %v551_v29, %v550_v30 }
  0x59   :  { %v520_v32 = vrot.slane %v519_v31, 2 }
  0x5a   :  { %v553_v34 = vsel %vm497_vm0, %v552_v9, 0.0 }
  0x5b   :  { %v521_v40 = vadd.f32 %v520_v32, %v519_v31  ;;  %v554_v17 = vrot.slane %v553_v34, 4 }
  0x5d   :  { %v522_v41 = vrot.slane %v521_v40, 1  ;;  %v555_v36 = vadd.f32 %v554_v17, %v553_v34 }
  0x5f   :  { %v523_v48 = vadd.f32 %v522_v41, %v521_v40  ;;  %v556_v49 = vrot.slane %v555_v36, 2 }
  0x61   :  { %v525_v50 = vmul.f32 0.03125, %v523_v48  ;;  %v557_v51 = vadd.f32 %v556_v49, %v555_v36 }
  0x63   :  { %v558_v38 = vrot.slane %v557_v51, 1  ;;  %v561_v52 = vmul.f32 %v525_v50, %v525_v50 }
  0x65   :  { %v559_v39 = vadd.f32 %v558_v38, %v557_v51 }
  0x67   :  { %v560_v53 = vmul.f32 0.03125, %v559_v39 }
  0x69   :  { %v562_v33 = vsub.f32 %v560_v53, %v561_v52 }
  0x6b   :  { %v563_v54 = vmax.f32 %v562_v33, 0.0 }
  0x6d   :  { %v565_v55 = vadd.f32 1e-05, %v563_v54 }
  0x6f   :  { %675 = vrsqrt.f32 %v565_v55 }
  0x7c   :  { %v676_v57 = vpop.eup %675 }
  0x7d   :  { %v567_v58 = vmul.f32 %v676_v57, %v564_v56 }
  0x7f   :  { %v569_v60 = vmul.f32 %v567_v58, %v525_v50  ;;  %v575_v61 = vrot.slane %v567_v58, %v744_v22 }
  0x81   :  { %v570_v62 = vsub.f32 %v568_v59, %v569_v60  ;;  %v577_v63 = vmul.f32 %v575_v61, %v968_v37  ;;  %v578_v0 = vmul.f32 %v575_v61, %v970_v43  ;;  %v579_v1 = vmul.f32 %v575_v61, %v972_v35 }
  0x82   :  { %v580_v2 = vmul.f32 %v575_v61, %v974_v44  ;;  %v581_v3 = vmul.f32 %v575_v61, %v976_v45  ;;  %v582_v4 = vmul.f32 %v575_v61, %v978_v46  ;;  %v583_v5 = vmul.f32 %v575_v61, %v980_v42 }
  0x83   :  { %v589_v6 = vrot.slane %v570_v62, %v744_v22  ;;  %v584_v7 = vmul.f32 %v575_v61, %v982_v47 }
  0x85   :  { %v591_v8 = vadd.f32 %v589_v6, %v577_v63  ;;  %v592_v10 = vadd.f32 %v589_v6, %v578_v0  ;;  %v593_v11 = vadd.f32 %v589_v6, %v579_v1  ;;  %v594_v37 = vadd.f32 %v589_v6, %v580_v2 }
  0x86   :  { %v595_v12 = vadd.f32 %v589_v6, %v581_v3  ;;  %v596_v43 = vadd.f32 %v589_v6, %v582_v4  ;;  %v597_v13 = vadd.f32 %v589_v6, %v583_v5  ;;  %v598_v35 = vadd.f32 %v589_v6, %v584_v7 }
  0x87   :  { %v599_v14 = vmax.f32 %v591_v8, 0.0  ;;  %v600_v44 = vmax.f32 %v592_v10, 0.0  ;;  %v601_v19 = vmax.f32 %v593_v11, 0.0  ;;  %v602_v45 = vmax.f32 %v594_v37, 0.0 }
  0x88   :  { %v603_v20 = vmax.f32 %v595_v12, 0.0  ;;  %v604_v46 = vmax.f32 %v596_v43, 0.0  ;;  %v605_v26 = vmax.f32 %v597_v13, 0.0  ;;  %v606_v42 = vmax.f32 %v598_v35, 0.0 }
  0x89   :  { %v607_v27 = vpack.c.bf16 %v599_v14, %v599_v14  ;;  %v608_v22 = vpack.c.bf16 %v600_v44, %v600_v44  ;;  %v609_v15 = vpack.c.bf16 %v601_v19, %v601_v19  ;;  %v610_v47 = vpack.c.bf16 %v602_v45, %v602_v45 }
  0x8a   :  { %v611_v16 = vpack.c.bf16 %v603_v20, %v603_v20  ;;  %v612_v18 = vpack.c.bf16 %v604_v46, %v604_v46  ;;  %v613_v25 = vpack.c.bf16 %v605_v26, %v605_v26  ;;  %v614_v28 = vpack.c.bf16 %v606_v42, %v606_v42 }
  0x8b   :  { %615 = vst [vmem:[%s1078_s4] sm:$0x3] %v607_v27  ;;  %616 = vst [vmem:[%s1078_s4 + $0x2] sm:$0x3] %v608_v22 }
  0x8c   :  { %617 = vst [vmem:[%s1078_s4 + $0x4] sm:$0x3] %v609_v15  ;;  %618 = vst [vmem:[%s1078_s4 + $0x6] sm:$0x3] %v610_v47 }
  0x8d   :  { %619 = vst [vmem:[%s1078_s4 + $0x8] sm:$0x3] %v611_v16  ;;  %620 = vst [vmem:[%s1078_s4 + $0xa] sm:$0x3] %v612_v18 }
  0x8e   :  { %621 = vst [vmem:[%s1078_s4 + $0xc] sm:$0x3] %v613_v25  ;;  %622 = vst [vmem:[%s1078_s4 + $0xe] sm:$0x3] %v614_v28 }

// kernel: mobilenetv4_forward.32
= control target key start
LH: loop header
LB: loop body
LE: loop exit
PB: predicated region body
PF: predicated region fallthrough
CT: control target
= control target key end

     0   :  { %v35_v0 = vlaneseq  ;;  %vm497_vm0 = vcmask 1043456   ;;  %s1066_s0 = inlined_call_operand.vmem [shape: bf16[2,6,6,128], index: 0, kind: input, shape index: {}]   ;;  %s1067_s1 = inlined_call_operand.vmem [shape: bf16[9,128], index: 1, kind: input, shape index: {}]   ;;  %s1068_s2 = inlined_call_operand.vmem [shape: f32[1,128], index: 2, kind: input, shape index: {}]   ;;  %s1069_s3 = inlined_call_operand.vmem [shape: f32[1,128], index: 3, kind: input, shape index: {}]   ;;  %s1070_s4 = inlined_call_operand.vmem [shape: bf16[2,4,4,128], index: 4, kind: output, shape index: {}]  }
   0x1   :  { %v17_v1 = vld [vmem:[%s1066_s0] sm:$0x3]  ;;  %v18_v2 = vld [vmem:[%s1066_s0 + $0x4] sm:$0x3]  ;;  %v19_v3 = vld [vmem:[%s1066_s0 + $0x8] sm:$0x3] }
   0x2   :  { %v20_v4 = vld [vmem:[%s1066_s0 + $0xc] sm:$0x3]  ;;  %v21_v5 = vld [vmem:[%s1066_s0 + $0x18] sm:$0x3]  ;;  %v22_v6 = vld [vmem:[%s1066_s0 + $0x1c] sm:$0x3]  ;;  %v25_v12 = vunpack.c.l.bf16 %v17_v1  ;;  %v26_v13 = vunpack.c.l.bf16 %v18_v2  ;;  %v27_v14 = vunpack.c.l.bf16 %v19_v3 }
   0x3   :  { %v23_v7 = vld [vmem:[%s1066_s0 + $0x20] sm:$0x3]  ;;  %v718_v9 = vshrl.u32 %v35_v0, 7  ;;  %v56_v11 = vld [vmem:[%s1066_s0 + $0x4] sm:$0x7]  ;;  %v28_v19 = vunpack.c.l.bf16 %v20_v4  ;;  %v29_v20 = vunpack.c.l.bf16 %v21_v5  ;;  %v30_v21 = vunpack.c.l.bf16 %v22_v6 }
   0x4   :  { %v33_v8 = vld [vmem:[%s1067_s1] sm:$0x1]  ;;  %v57_v16 = vld [vmem:[%s1066_s0 + $0x8] sm:$0x7]  ;;  %v58_v17 = vld [vmem:[%s1066_s0 + $0xc] sm:$0x7]  ;;  %v31_v26 = vunpack.c.l.bf16 %v23_v7  ;;  %v64_v29 = vunpack.c.l.bf16 %v56_v11 }
   0x5   :  { %v55_v10 = vld [vmem:[%s1066_s0] sm:$0x7]  ;;  %v34_v15 = vunpack.c.l.bf16 %v33_v8  ;;  %v59_v18 = vld [vmem:[%s1066_s0 + $0x18] sm:$0x7]  ;;  %v736_v22 = vsub.s32 0, %v718_v9  ;;  %v73_v30 = vsub.s32 1, %v718_v9  ;;  %v65_v32 = vunpack.c.l.bf16 %v57_v16 }
   0x6   :  { %v60_v23 = vld [vmem:[%s1066_s0 + $0x1c] sm:$0x7]  ;;  %v61_v24 = vld [vmem:[%s1066_s0 + $0x20] sm:$0x7]  ;;  %v24_v25 = vld [vmem:[%s1066_s0 + $0x24] sm:$0x3]  ;;  %v63_v28 = vunpack.c.l.bf16 %v55_v10  ;;  %v66_v33 = vunpack.c.l.bf16 %v58_v17  ;;  %v67_v34 = vunpack.c.l.bf16 %v59_v18 }
   0x7   :  { %v62_v27 = vld [vmem:[%s1066_s0 + $0x24] sm:$0x7]  ;;  %v38_v31 = vrot.slane %v34_v15, %v736_v22  ;;  %v68_v35 = vunpack.c.l.bf16 %v60_v23  ;;  %v69_v36 = vunpack.c.l.bf16 %v61_v24  ;;  %v74_v38 = vrot.slane %v34_v15, %v73_v30  ;;  %v115_v55 = vld [vmem:[%s1066_s0] sm:$0x6]  ;;  %v117_v57 = vld [vmem:[%s1066_s0 + $0x8] sm:$0x6] }
   0x8   :  { %v70_v37 = vunpack.c.l.bf16 %v62_v27  ;;  %v32_v39 = vunpack.c.l.bf16 %v24_v25  ;;  %v135_v42 = vsub.s32 2, %v718_v9  ;;  %v116_v56 = vld [vmem:[%s1066_s0 + $0x4] sm:$0x6]  ;;  %v118_v62 = vld [vmem:[%s1066_s0 + $0xc] sm:$0x6]  ;;  %v123_v5 = vunpack.c.l.bf16 %v115_v55 }
   0x9   :  { %v39_v40 = vmul.f32 %v38_v31, %v25_v12  ;;  %v40_v41 = vmul.f32 %v38_v31, %v26_v13  ;;  %v41_v43 = vmul.f32 %v38_v31, %v27_v14  ;;  %v42_v44 = vmul.f32 %v38_v31, %v28_v19  ;;  %v119_v3 = vld [vmem:[%s1066_s0 + $0x18] sm:$0x6]  ;;  %v120_v4 = vld [vmem:[%s1066_s0 + $0x1c] sm:$0x6]  ;;  %v774_v7 = vld [vmem:[%s1067_s1] sm:$0x2] }
   0xa   :  { %v43_v45 = vmul.f32 %v38_v31, %v29_v20  ;;  %v44_v46 = vmul.f32 %v38_v31, %v30_v21  ;;  %v75_v47 = vmul.f32 %v74_v38, %v63_v28  ;;  %v76_v48 = vmul.f32 %v74_v38, %v64_v29  ;;  %v121_v11 = vld [vmem:[%s1066_s0 + $0x20] sm:$0x6]  ;;  %v122_v12 = vld [vmem:[%s1066_s0 + $0x24] sm:$0x6]  ;;  %v790_v20 = vld [vmem:[%s1066_s0 + $0x8] sm:$0x3] }
   0xb   :  { %v77_v49 = vmul.f32 %v74_v38, %v65_v32  ;;  %v78_v50 = vmul.f32 %v74_v38, %v66_v33  ;;  %v79_v51 = vmul.f32 %v74_v38, %v67_v34  ;;  %v80_v52 = vmul.f32 %v74_v38, %v68_v35  ;;  %v785_v19 = vld [vmem:[%s1066_s0 + $0x4] sm:$0x3]  ;;  %v799_v27 = vld [vmem:[%s1066_s0 + $0x10] sm:$0x3]  ;;  %v804_v28 = vld [vmem:[%s1066_s0 + $0x1c] sm:$0x3] }
   0xc   :  { %v81_v53 = vmul.f32 %v74_v38, %v69_v36  ;;  %v82_v54 = vmul.f32 %v74_v38, %v70_v37  ;;  %v91_v58 = vrot.slane %v75_v47, 1  ;;  %v92_v59 = vrot.slane %v76_v48, 1  ;;  %v626_v47 = vld [vmem:[%s1066_s0 + $0x28] sm:$0x3] }
   0xd   :  { %v93_v60 = vrot.slane %v77_v49, 1  ;;  %v94_v61 = vrot.slane %v78_v50, 1  ;;  %v45_v63 = vmul.f32 %v38_v31, %v31_v26  ;;  %v95_v0 = vrot.slane %v79_v51, 1  ;;  %v621_v26 = vld [vmem:[%s1066_s0 + $0xc] sm:$0x3] }
   0xe   :  { %v96_v1 = vrot.slane %v80_v52, 1  ;;  %v97_v2 = vrot.slane %v81_v53, 1  ;;  %v124_v6 = vunpack.c.l.bf16 %v116_v56  ;;  %v46_v8 = vmul.f32 %v38_v31, %v32_v39  ;;  %v627_v52 = vld [vmem:[%s1066_s0 + $0x4] sm:$0x7]  ;;  %v628_v53 = vld [vmem:[%s1066_s0 + $0x8] sm:$0x7] }
   0xf   :  { %v98_v10 = vrot.slane %v82_v54, 1  ;;  %v125_v13 = vunpack.c.l.bf16 %v117_v57  ;;  %v126_v14 = vunpack.c.l.bf16 %v118_v62  ;;  %v107_v15 = vadd.f32 %v91_v58, %v39_v40  ;;  %v629_v54 = vld [vmem:[%s1066_s0 + $0xc] sm:$0x7] }
  0x10   :  { %v108_v16 = vadd.f32 %v92_v59, %v40_v41  ;;  %v109_v17 = vadd.f32 %v93_v60, %v41_v43  ;;  %v110_v18 = vadd.f32 %v94_v61, %v42_v44  ;;  %v111_v21 = vadd.f32 %v95_v0, %v43_v45  ;;  %v630_v59 = vld [vmem:[%s1066_s0 + $0x10] sm:$0x7] }
  0x11   :  { %v112_v23 = vadd.f32 %v96_v1, %v44_v46  ;;  %v113_v24 = vadd.f32 %v97_v2, %v45_v63  ;;  %v132_v25 = vunpack.c.l.bf16 %v774_v7  ;;  %v127_v29 = vunpack.c.l.bf16 %v119_v3  ;;  %v624_v46 = vld [vmem:[%s1066_s0 + $0x20] sm:$0x3] }
  0x12   :  { %v128_v30 = vunpack.c.l.bf16 %v120_v4  ;;  %v129_v31 = vunpack.c.l.bf16 %v121_v11  ;;  %v130_v32 = vunpack.c.l.bf16 %v122_v12  ;;  %v114_v33 = vadd.f32 %v98_v10, %v46_v8  ;;  %v835_v4 = vld [vmem:[%s1067_s1] sm:$0x4] }
  0x13   :  { %v136_v34 = vrot.slane %v132_v25, %v135_v42  ;;  %v186_v35 = vunpack.c.l.bf16 %v785_v19  ;;  %v187_v36 = vunpack.c.l.bf16 %v790_v20  ;;  %v188_v37 = vunpack.c.l.bf16 %v621_v26  ;;  %v625_v42 = vld [vmem:[%s1066_s0 + $0x24] sm:$0x3] }
  0x14   :  { %v189_v38 = vunpack.c.l.bf16 %v799_v27  ;;  %v190_v39 = vunpack.c.l.bf16 %v804_v28  ;;  %v196_v40 = vsub.s32 3, %v718_v9  ;;  %v191_v63 = vunpack.c.l.bf16 %v624_v46  ;;  %v632_v27 = vld [vmem:[%s1066_s0 + $0x20] sm:$0x7] }
  0x15   :  { %v137_v41 = vmul.f32 %v136_v34, %v123_v5  ;;  %v138_v43 = vmul.f32 %v136_v34, %v124_v6  ;;  %v139_v44 = vmul.f32 %v136_v34, %v125_v13  ;;  %v140_v45 = vmul.f32 %v136_v34, %v126_v14  ;;  %v631_v14 = vld [vmem:[%s1066_s0 + $0x1c] sm:$0x7] }
  0x16   :  { %v141_v48 = vmul.f32 %v136_v34, %v127_v29  ;;  %v142_v49 = vmul.f32 %v136_v34, %v128_v30  ;;  %v143_v50 = vmul.f32 %v136_v34, %v129_v31  ;;  %v144_v51 = vmul.f32 %v136_v34, %v130_v32 }
  0x17   :  { %v153_v55 = vrot.slane %v137_v41, 2  ;;  %v154_v56 = vrot.slane %v138_v43, 2  ;;  %v155_v57 = vrot.slane %v139_v44, 2  ;;  %v156_v58 = vrot.slane %v140_v45, 2 }
  0x18   :  { %v157_v60 = vrot.slane %v141_v48, 2  ;;  %v158_v61 = vrot.slane %v142_v49, 2  ;;  %v159_v62 = vrot.slane %v143_v50, 2  ;;  %v192_v0 = vunpack.c.l.bf16 %v625_v42 }
  0x19   :  { %v193_v1 = vunpack.c.l.bf16 %v626_v47  ;;  %v222_v2 = vunpack.c.l.bf16 %v627_v52  ;;  %v223_v3 = vunpack.c.l.bf16 %v628_v53  ;;  %v160_v5 = vrot.slane %v144_v51, 2 }
  0x1a   :  { %v169_v6 = vadd.f32 %v153_v55, %v107_v15  ;;  %v224_v7 = vunpack.c.l.bf16 %v629_v54  ;;  %v225_v8 = vunpack.c.l.bf16 %v630_v59  ;;  %v170_v10 = vadd.f32 %v154_v56, %v108_v16  ;;  %v633_v15 = vld [vmem:[%s1066_s0 + $0x24] sm:$0x7]  ;;  %v634_v16 = vld [vmem:[%s1066_s0 + $0x28] sm:$0x7]  ;;  %v638_v54 = vld [vmem:[%s1066_s0 + $0x10] sm:$0x6] }
  0x1b   :  { %v171_v11 = vadd.f32 %v155_v57, %v109_v17  ;;  %v172_v12 = vadd.f32 %v156_v58, %v110_v18  ;;  %v197_v13 = vrot.slane %v132_v25, %v196_v40  ;;  %v173_v19 = vadd.f32 %v157_v60, %v111_v21  ;;  %v639_v59 = vld [vmem:[%s1066_s0 + $0x1c] sm:$0x6]  ;;  %v640_v60 = vld [vmem:[%s1066_s0 + $0x20] sm:$0x6] }
  0x1c   :  { %v174_v20 = vadd.f32 %v158_v61, %v112_v23  ;;  %v175_v26 = vadd.f32 %v159_v62, %v113_v24  ;;  %v231_v17 = vunpack.c.l.bf16 %v835_v4  ;;  %v234_v21 = vsub.s32 4, %v718_v9  ;;  %v635_v23 = vld [vmem:[%s1066_s0 + $0x4] sm:$0x6]  ;;  %v636_v24 = vld [vmem:[%s1066_s0 + $0x8] sm:$0x6] }
  0x1d   :  { %v198_v18 = vmul.f32 %v197_v13, %v186_v35  ;;  %v199_v25 = vmul.f32 %v197_v13, %v187_v36  ;;  %v200_v28 = vmul.f32 %v197_v13, %v188_v37  ;;  %v201_v29 = vmul.f32 %v197_v13, %v189_v38  ;;  %v641_v61 = vld [vmem:[%s1066_s0 + $0x24] sm:$0x6] }
  0x1e   :  { %v202_v30 = vmul.f32 %v197_v13, %v190_v39  ;;  %v203_v31 = vmul.f32 %v197_v13, %v191_v63  ;;  %v204_v32 = vmul.f32 %v197_v13, %v192_v0  ;;  %v176_v34 = vadd.f32 %v160_v5, %v114_v33  ;;  %v637_v33 = vld [vmem:[%s1066_s0 + $0xc] sm:$0x6] }
  0x1f   :  { %v226_v40 = vunpack.c.l.bf16 %v631_v14  ;;  %v227_v41 = vunpack.c.l.bf16 %v632_v27  ;;  %v228_v35 = vunpack.c.l.bf16 %v633_v15  ;;  %v205_v36 = vmul.f32 %v197_v13, %v193_v1  ;;  %v642_v1 = vld [vmem:[%s1066_s0 + $0x28] sm:$0x6] }
  0x20   :  { %v229_v37 = vunpack.c.l.bf16 %v634_v16  ;;  %v284_v43 = vunpack.c.l.bf16 %v635_v23  ;;  %v285_v44 = vunpack.c.l.bf16 %v636_v24  ;;  %v206_v45 = vadd.f32 %v198_v18, %v169_v6 }
  0x21   :  { %v207_v46 = vadd.f32 %v199_v25, %v170_v10  ;;  %v208_v42 = vadd.f32 %v200_v28, %v171_v11  ;;  %v235_v47 = vrot.slane %v231_v17, %v234_v21  ;;  %v209_v48 = vadd.f32 %v201_v29, %v172_v12  ;;  %v643_v21 = vld [vmem:[%s1066_s0 + $0x8] sm:$0x3] }
  0x22   :  { %v210_v49 = vadd.f32 %v202_v30, %v173_v19  ;;  %v211_v50 = vadd.f32 %v203_v31, %v174_v20  ;;  %v212_v51 = vadd.f32 %v204_v32, %v175_v26  ;;  %v287_v10 = vunpack.c.l.bf16 %v638_v54  ;;  %v644_v31 = vld [vmem:[%s1066_s0 + $0xc] sm:$0x3] }
  0x23   :  { %v236_v38 = vmul.f32 %v235_v47, %v222_v2  ;;  %v237_v39 = vmul.f32 %v235_v47, %v223_v3  ;;  %v238_v52 = vmul.f32 %v235_v47, %v224_v7  ;;  %v239_v53 = vmul.f32 %v235_v47, %v225_v8 }
  0x24   :  { %v240_v55 = vmul.f32 %v235_v47, %v226_v40  ;;  %v241_v56 = vmul.f32 %v235_v47, %v227_v41  ;;  %v242_v57 = vmul.f32 %v235_v47, %v228_v35  ;;  %v243_v58 = vmul.f32 %v235_v47, %v229_v37  ;;  %v645_v41 = vld [vmem:[%s1066_s0 + $0x10] sm:$0x3]  ;;  %v646_v35 = vld [vmem:[%s1066_s0 + $0x14] sm:$0x3] }
  0x25   :  { %v252_v62 = vrot.slane %v236_v38, 1  ;;  %v253_v63 = vrot.slane %v237_v39, 1  ;;  %v254_v0 = vrot.slane %v238_v52, 1  ;;  %v294_v2 = vsub.s32 5, %v718_v9 }
  0x26   :  { %v255_v3 = vrot.slane %v239_v53, 1  ;;  %v256_v4 = vrot.slane %v240_v55, 1  ;;  %v257_v5 = vrot.slane %v241_v56, 1  ;;  %v258_v6 = vrot.slane %v242_v57, 1  ;;  %v650_v53 = vld [vmem:[%s1066_s0 + $0x2c] sm:$0x3] }
  0x27   :  { %v213_v7 = vadd.f32 %v205_v36, %v176_v34  ;;  %v286_v8 = vunpack.c.l.bf16 %v637_v33  ;;  %v288_v11 = vunpack.c.l.bf16 %v639_v59  ;;  %v259_v12 = vrot.slane %v243_v58, 1  ;;  %v647_v36 = vld [vmem:[%s1066_s0 + $0x20] sm:$0x3]  ;;  %v651_v58 = vld [vmem:[%s1066_s0 + $0x8] sm:$0x7] }
  0x28   :  { %v289_v13 = vunpack.c.l.bf16 %v640_v60  ;;  %v290_v14 = vunpack.c.l.bf16 %v641_v61  ;;  %v291_v19 = vunpack.c.l.bf16 %v642_v1  ;;  %v268_v20 = vadd.f32 %v252_v62, %v206_v45  ;;  %v648_v45 = vld [vmem:[%s1066_s0 + $0x24] sm:$0x3] }
  0x29   :  { %v269_v26 = vadd.f32 %v253_v63, %v207_v46  ;;  %v270_v27 = vadd.f32 %v254_v0, %v208_v42  ;;  %v295_v15 = vrot.slane %v231_v17, %v294_v2  ;;  %v271_v16 = vadd.f32 %v255_v3, %v209_v48  ;;  %v649_v46 = vld [vmem:[%s1066_s0 + $0x28] sm:$0x3]  ;;  %v652_v63 = vld [vmem:[%s1066_s0 + $0xc] sm:$0x7]  ;;  %v653_v0 = vld [vmem:[%s1066_s0 + $0x10] sm:$0x7] }
  0x2a   :  { %v272_v18 = vadd.f32 %v256_v4, %v210_v49  ;;  %v273_v25 = vadd.f32 %v257_v5, %v211_v50  ;;  %v274_v28 = vadd.f32 %v258_v6, %v212_v51  ;;  %v275_v37 = vadd.f32 %v259_v12, %v213_v7  ;;  %v353_v51 = vld [vmem:[%s1067_s1] sm:$0x8]  ;;  %v656_v12 = vld [vmem:[%s1066_s0 + $0x24] sm:$0x7] }
  0x2b   :  { %v296_v23 = vmul.f32 %v295_v15, %v284_v43  ;;  %v297_v24 = vmul.f32 %v295_v15, %v285_v44  ;;  %v298_v29 = vmul.f32 %v295_v15, %v286_v8  ;;  %v299_v30 = vmul.f32 %v295_v15, %v287_v10  ;;  %v654_v10 = vld [vmem:[%s1066_s0 + $0x14] sm:$0x7] }
  0x2c   :  { %v300_v32 = vmul.f32 %v295_v15, %v288_v11  ;;  %v301_v34 = vmul.f32 %v295_v15, %v289_v13  ;;  %v302_v40 = vmul.f32 %v295_v15, %v290_v14  ;;  %v303_v17 = vmul.f32 %v295_v15, %v291_v19  ;;  %v655_v11 = vld [vmem:[%s1066_s0 + $0x20] sm:$0x7]  ;;  %v657_v13 = vld [vmem:[%s1066_s0 + $0x28] sm:$0x7] }
  0x2d   :  { %v312_v43 = vrot.slane %v296_v23, 2  ;;  %v313_v44 = vrot.slane %v297_v24, 2  ;;  %v345_v42 = vunpack.c.l.bf16 %v643_v21  ;;  %v314_v47 = vrot.slane %v298_v29, 2 }
  0x2e   :  { %v315_v48 = vrot.slane %v299_v30, 2  ;;  %v316_v49 = vrot.slane %v300_v32, 2  ;;  %v346_v50 = vunpack.c.l.bf16 %v644_v31  ;;  %v317_v38 = vrot.slane %v301_v34, 2  ;;  %v451_v34 = vld [vmem:[%s1067_s1 + $0x4] sm:$0x1] }
  0x2f   :  { %v318_v39 = vrot.slane %v302_v40, 2  ;;  %v319_v52 = vrot.slane %v303_v17, 2  ;;  %v347_v33 = vunpack.c.l.bf16 %v645_v41  ;;  %v348_v54 = vunpack.c.l.bf16 %v646_v35 }
  0x30   :  { %v349_v55 = vunpack.c.l.bf16 %v647_v36  ;;  %v350_v56 = vunpack.c.l.bf16 %v648_v45  ;;  %v351_v57 = vunpack.c.l.bf16 %v649_v46  ;;  %v328_v59 = vadd.f32 %v312_v43, %v268_v20 }
  0x31   :  { %v329_v60 = vadd.f32 %v313_v44, %v269_v26  ;;  %v354_v61 = vunpack.c.l.bf16 %v353_v51  ;;  %v357_v62 = vsub.s32 6, %v718_v9  ;;  %v330_v1 = vadd.f32 %v314_v47, %v270_v27 }
  0x32   :  { %v331_v2 = vadd.f32 %v315_v48, %v271_v16  ;;  %v332_v3 = vadd.f32 %v316_v49, %v272_v18  ;;  %v352_v4 = vunpack.c.l.bf16 %v650_v53  ;;  %v333_v5 = vadd.f32 %v317_v38, %v273_v25  ;;  %v658_v25 = vld [vmem:[%s1066_s0 + $0x2c] sm:$0x7] }
  0x33   :  { %v334_v6 = vadd.f32 %v318_v39, %v274_v28  ;;  %v335_v7 = vadd.f32 %v319_v52, %v275_v37  ;;  %v358_v8 = vrot.slane %v354_v61, %v357_v62  ;;  %v383_v14 = vunpack.c.l.bf16 %v651_v58  ;;  %v932_v28 = vld [vmem:[%s1066_s0 + $0x8] sm:$0x6]  ;;  %v660_v38 = vld [vmem:[%s1066_s0 + $0xc] sm:$0x6]  ;;  %v661_v39 = vld [vmem:[%s1066_s0 + $0x10] sm:$0x6] }
  0x34   :  { %v384_v19 = vunpack.c.l.bf16 %v652_v63  ;;  %v385_v20 = vunpack.c.l.bf16 %v653_v0  ;;  %v393_v26 = vsub.s32 7, %v718_v9  ;;  %v386_v30 = vunpack.c.l.bf16 %v654_v10  ;;  %v662_v52 = vld [vmem:[%s1066_s0 + $0x14] sm:$0x6]  ;;  %v665_v58 = vld [vmem:[%s1066_s0 + $0x28] sm:$0x6] }
  0x35   :  { %v359_v27 = vmul.f32 %v358_v8, %v345_v42  ;;  %v360_v15 = vmul.f32 %v358_v8, %v346_v50  ;;  %v361_v16 = vmul.f32 %v358_v8, %v347_v33  ;;  %v362_v18 = vmul.f32 %v358_v8, %v348_v54  ;;  %v666_v63 = vld [vmem:[%s1066_s0 + $0x2c] sm:$0x6] }
  0x36   :  { %v363_v21 = vmul.f32 %v358_v8, %v349_v55  ;;  %v364_v23 = vmul.f32 %v358_v8, %v350_v56  ;;  %v365_v24 = vmul.f32 %v358_v8, %v351_v57  ;;  %v366_v29 = vmul.f32 %v358_v8, %v352_v4  ;;  %v663_v56 = vld [vmem:[%s1066_s0 + $0x20] sm:$0x6]  ;;  %v664_v57 = vld [vmem:[%s1066_s0 + $0x24] sm:$0x6] }
  0x37   :  { %v387_v31 = vunpack.c.l.bf16 %v655_v11  ;;  %v388_v9 = vunpack.c.l.bf16 %v656_v12  ;;  %v389_v32 = vunpack.c.l.bf16 %v657_v13  ;;  %v367_v40 = vadd.f32 %v359_v27, %v328_v59 }
  0x38   :  { %v368_v17 = vadd.f32 %v360_v15, %v329_v60  ;;  %v390_v41 = vunpack.c.l.bf16 %v658_v25  ;;  %v443_v35 = vunpack.c.l.bf16 %v932_v28  ;;  %v369_v36 = vadd.f32 %v361_v16, %v330_v1 }
  0x39   :  { %v370_v37 = vadd.f32 %v362_v18, %v331_v2  ;;  %v371_v43 = vadd.f32 %v363_v21, %v332_v3  ;;  %v394_v44 = vrot.slane %v354_v61, %v393_v26  ;;  %v372_v45 = vadd.f32 %v364_v23, %v333_v5 }
  0x3a   :  { %v373_v46 = vadd.f32 %v365_v24, %v334_v6  ;;  %v374_v42 = vadd.f32 %v366_v29, %v335_v7  ;;  %v452_v47 = vunpack.c.l.bf16 %v451_v34  ;;  %v444_v4 = vunpack.c.l.bf16 %v660_v38 }
  0x3b   :  { %v395_v48 = vmul.f32 %v394_v44, %v383_v14  ;;  %v396_v49 = vmul.f32 %v394_v44, %v384_v19  ;;  %v397_v50 = vmul.f32 %v394_v44, %v385_v20  ;;  %v398_v51 = vmul.f32 %v394_v44, %v386_v30 }
  0x3c   :  { %v399_v53 = vmul.f32 %v394_v44, %v387_v31  ;;  %v400_v33 = vmul.f32 %v394_v44, %v388_v9  ;;  %v401_v54 = vmul.f32 %v394_v44, %v389_v32  ;;  %v402_v55 = vmul.f32 %v394_v44, %v390_v41 }
  0x3d   :  { %v411_v59 = vrot.slane %v395_v48, 1  ;;  %v412_v60 = vrot.slane %v396_v49, 1  ;;  %v413_v61 = vrot.slane %v397_v50, 1  ;;  %v414_v62 = vrot.slane %v398_v51, 1 }
  0x3e   :  { %v415_v0 = vrot.slane %v399_v53, 1  ;;  %v416_v1 = vrot.slane %v400_v33, 1  ;;  %v417_v2 = vrot.slane %v401_v54, 1  ;;  %v418_v3 = vrot.slane %v402_v55, 1 }
  0x3f   :  { %v445_v5 = vunpack.c.l.bf16 %v661_v39  ;;  %v446_v6 = vunpack.c.l.bf16 %v662_v52  ;;  %v447_v7 = vunpack.c.l.bf16 %v663_v56  ;;  %v427_v8 = vadd.f32 %v411_v59, %v367_v40 }
  0x40   :  { %v448_v10 = vunpack.c.l.bf16 %v664_v57  ;;  %v449_v11 = vunpack.c.l.bf16 %v665_v58  ;;  %v450_v12 = vunpack.c.l.bf16 %v666_v63  ;;  %v428_v13 = vadd.f32 %v412_v60, %v368_v17 }
  0x41   :  { %v429_v14 = vadd.f32 %v413_v61, %v369_v36  ;;  %v430_v19 = vadd.f32 %v414_v62, %v370_v37  ;;  %v456_v20 = vrot.slane %v452_v47, %v736_v22  ;;  %v431_v26 = vadd.f32 %v415_v0, %v371_v43 }
  0x42   :  { %v432_v27 = vadd.f32 %v416_v1, %v372_v45  ;;  %v433_v15 = vadd.f32 %v417_v2, %v373_v46  ;;  %v434_v16 = vadd.f32 %v418_v3, %v374_v42 }
  0x43   :  { %v457_v18 = vmul.f32 %v456_v20, %v443_v35  ;;  %v458_v25 = vmul.f32 %v456_v20, %v444_v4  ;;  %v459_v28 = vmul.f32 %v456_v20, %v445_v5  ;;  %v460_v21 = vmul.f32 %v456_v20, %v446_v6 }
  0x44   :  { %v461_v23 = vmul.f32 %v456_v20, %v447_v7  ;;  %v462_v24 = vmul.f32 %v456_v20, %v448_v10  ;;  %v463_v29 = vmul.f32 %v456_v20, %v449_v11  ;;  %v464_v30 = vmul.f32 %v456_v20, %v450_v12 }
  0x45   :  { %v473_v31 = vrot.slane %v457_v18, 2  ;;  %v474_v9 = vrot.slane %v458_v25, 2  ;;  %v475_v32 = vrot.slane %v459_v28, 2  ;;  %v476_v34 = vrot.slane %v460_v21, 2 }
  0x46   :  { %v477_v40 = vrot.slane %v461_v23, 2  ;;  %v478_v17 = vrot.slane %v462_v24, 2  ;;  %v479_v41 = vrot.slane %v463_v29, 2  ;;  %v480_v36 = vrot.slane %v464_v30, 2 }
  0x47   :  { %v960_v37 = vadd.f32 %v473_v31, %v427_v8  ;;  %v962_v43 = vadd.f32 %v474_v9, %v428_v13  ;;  %v964_v35 = vadd.f32 %v475_v32, %v429_v14  ;;  %v966_v44 = vadd.f32 %v476_v34, %v430_v19 }
  0x48   :  { %v968_v45 = vadd.f32 %v477_v40, %v431_v26  ;;  %v970_v46 = vadd.f32 %v478_v17, %v432_v27  ;;  %v972_v42 = vadd.f32 %v479_v41, %v433_v15  ;;  %v974_v47 = vadd.f32 %v480_v36, %v434_v16 }
  0x49   :  { %v498_v48 = vsel %vm497_vm0, %v960_v37, 0.0  ;;  %v501_v49 = vsel %vm497_vm0, %v962_v43, 0.0  ;;  %v504_v50 = vsel %vm497_vm0, %v964_v35, 0.0  ;;  %v507_v51 = vsel %vm497_vm0, %v966_v44, 0.0 }
  0x4a   :  { %v499_v38 = vsel %vm497_vm0, %v968_v45, 0.0  ;;  %v502_v39 = vsel %vm497_vm0, %v970_v46, 0.0  ;;  %v505_v52 = vsel %vm497_vm0, %v972_v42, 0.0  ;;  %v508_v53 = vsel %vm497_vm0, %v974_v47, 0.0 }
  0x4b   :  { %v500_v33 = vadd.f32 %v499_v38, %v498_v48  ;;  %v503_v54 = vadd.f32 %v502_v39, %v501_v49  ;;  %v506_v55 = vadd.f32 %v505_v52, %v504_v50  ;;  %v509_v56 = vadd.f32 %v508_v53, %v507_v51 }
  0x4c   :  { %v526_v57 = vmul.f32 %v960_v37, %v960_v37  ;;  %v527_v58 = vmul.f32 %v962_v43, %v962_v43  ;;  %v528_v59 = vmul.f32 %v964_v35, %v964_v35  ;;  %v529_v60 = vmul.f32 %v966_v44, %v966_v44 }
  0x4d   :  { %v510_v61 = vsel %vm497_vm0, %v500_v33, 0.0  ;;  %v511_v62 = vsel %vm497_vm0, %v503_v54, 0.0  ;;  %v513_v63 = vsel %vm497_vm0, %v506_v55, 0.0  ;;  %v515_v0 = vsel %vm497_vm0, %v509_v56, 0.0  ;;  %v564_v56 = vld [vmem:[%s1068_s2] sm:$0x1] }
  0x4e   :  { %v512_v1 = vadd.f32 %v511_v62, %v510_v61  ;;  %v530_v2 = vmul.f32 %v968_v45, %v968_v45  ;;  %v531_v3 = vmul.f32 %v970_v46, %v970_v46  ;;  %v532_v4 = vmul.f32 %v972_v42, %v972_v42 }
  0x4f   :  { %v533_v5 = vmul.f32 %v974_v47, %v974_v47  ;;  %v534_v6 = vsel %vm497_vm0, %v526_v57, 0.0  ;;  %v537_v7 = vsel %vm497_vm0, %v527_v58, 0.0  ;;  %v540_v8 = vsel %vm497_vm0, %v528_v59, 0.0  ;;  %v568_v59 = vld [vmem:[%s1069_s3] sm:$0x1] }
  0x50   :  { %v514_v10 = vadd.f32 %v513_v63, %v512_v1  ;;  %v535_v11 = vsel %vm497_vm0, %v530_v2, 0.0  ;;  %v538_v12 = vsel %vm497_vm0, %v531_v3, 0.0  ;;  %v541_v13 = vsel %vm497_vm0, %v532_v4, 0.0 }
  0x51   :  { %v536_v14 = vadd.f32 %v535_v11, %v534_v6  ;;  %v539_v19 = vadd.f32 %v538_v12, %v537_v7  ;;  %v542_v20 = vadd.f32 %v541_v13, %v540_v8  ;;  %v543_v26 = vsel %vm497_vm0, %v529_v60, 0.0 }
  0x52   :  { %v516_v27 = vadd.f32 %v515_v0, %v514_v10  ;;  %v544_v15 = vsel %vm497_vm0, %v533_v5, 0.0 }
  0x53   :  { %v545_v16 = vadd.f32 %v544_v15, %v543_v26  ;;  %v546_v18 = vsel %vm497_vm0, %v536_v14, 0.0  ;;  %v547_v25 = vsel %vm497_vm0, %v539_v19, 0.0  ;;  %v549_v28 = vsel %vm497_vm0, %v542_v20, 0.0 }
  0x54   :  { %v517_v21 = vsel %vm497_vm0, %v516_v27, 0.0  ;;  %v548_v23 = vadd.f32 %v547_v25, %v546_v18 }
  0x55   :  { %v518_v24 = vrot.slane %v517_v21, 4  ;;  %v551_v29 = vsel %vm497_vm0, %v545_v16, 0.0 }
  0x56   :  { %v550_v30 = vadd.f32 %v549_v28, %v548_v23 }
  0x57   :  { %v519_v31 = vadd.f32 %v518_v24, %v517_v21 }
  0x58   :  { %v552_v9 = vadd.f32 %v551_v29, %v550_v30 }
  0x59   :  { %v520_v32 = vrot.slane %v519_v31, 2 }
  0x5a   :  { %v553_v34 = vsel %vm497_vm0, %v552_v9, 0.0 }
  0x5b   :  { %v521_v40 = vadd.f32 %v520_v32, %v519_v31  ;;  %v554_v17 = vrot.slane %v553_v34, 4 }
  0x5d   :  { %v522_v41 = vrot.slane %v521_v40, 1  ;;  %v555_v36 = vadd.f32 %v554_v17, %v553_v34 }
  0x5f   :  { %v523_v48 = vadd.f32 %v522_v41, %v521_v40  ;;  %v556_v49 = vrot.slane %v555_v36, 2 }
  0x61   :  { %v525_v50 = vmul.f32 0.03125, %v523_v48  ;;  %v557_v51 = vadd.f32 %v556_v49, %v555_v36 }
  0x63   :  { %v558_v38 = vrot.slane %v557_v51, 1  ;;  %v561_v52 = vmul.f32 %v525_v50, %v525_v50 }
  0x65   :  { %v559_v39 = vadd.f32 %v558_v38, %v557_v51 }
  0x67   :  { %v560_v53 = vmul.f32 0.03125, %v559_v39 }
  0x69   :  { %v562_v33 = vsub.f32 %v560_v53, %v561_v52 }
  0x6b   :  { %v563_v54 = vmax.f32 %v562_v33, 0.0 }
  0x6d   :  { %v565_v55 = vadd.f32 1e-05, %v563_v54 }
  0x6f   :  { %667 = vrsqrt.f32 %v565_v55 }
  0x7c   :  { %v668_v57 = vpop.eup %667 }
  0x7d   :  { %v567_v58 = vmul.f32 %v668_v57, %v564_v56 }
  0x7f   :  { %v569_v60 = vmul.f32 %v567_v58, %v525_v50  ;;  %v575_v61 = vrot.slane %v567_v58, %v736_v22 }
  0x81   :  { %v570_v62 = vsub.f32 %v568_v59, %v569_v60  ;;  %v577_v63 = vmul.f32 %v575_v61, %v960_v37  ;;  %v578_v0 = vmul.f32 %v575_v61, %v962_v43  ;;  %v579_v1 = vmul.f32 %v575_v61, %v964_v35 }
  0x82   :  { %v580_v2 = vmul.f32 %v575_v61, %v966_v44  ;;  %v581_v3 = vmul.f32 %v575_v61, %v968_v45  ;;  %v582_v4 = vmul.f32 %v575_v61, %v970_v46  ;;  %v583_v5 = vmul.f32 %v575_v61, %v972_v42 }
  0x83   :  { %v589_v6 = vrot.slane %v570_v62, %v736_v22  ;;  %v584_v7 = vmul.f32 %v575_v61, %v974_v47 }
  0x85   :  { %v591_v8 = vadd.f32 %v589_v6, %v577_v63  ;;  %v592_v10 = vadd.f32 %v589_v6, %v578_v0  ;;  %v593_v11 = vadd.f32 %v589_v6, %v579_v1  ;;  %v594_v37 = vadd.f32 %v589_v6, %v580_v2 }
  0x86   :  { %v595_v12 = vadd.f32 %v589_v6, %v581_v3  ;;  %v596_v43 = vadd.f32 %v589_v6, %v582_v4  ;;  %v597_v13 = vadd.f32 %v589_v6, %v583_v5  ;;  %v598_v35 = vadd.f32 %v589_v6, %v584_v7 }
  0x87   :  { %v599_v14 = vpack.c.bf16 %v591_v8, %v591_v8  ;;  %v600_v44 = vpack.c.bf16 %v592_v10, %v592_v10  ;;  %v601_v19 = vpack.c.bf16 %v593_v11, %v593_v11  ;;  %v602_v45 = vpack.c.bf16 %v594_v37, %v594_v37 }
  0x88   :  { %v603_v20 = vpack.c.bf16 %v595_v12, %v595_v12  ;;  %v604_v46 = vpack.c.bf16 %v596_v43, %v596_v43  ;;  %v605_v26 = vpack.c.bf16 %v597_v13, %v597_v13  ;;  %v606_v42 = vpack.c.bf16 %v598_v35, %v598_v35 }
  0x89   :  { %607 = vst [vmem:[%s1070_s4] sm:$0x3] %v599_v14  ;;  %608 = vst [vmem:[%s1070_s4 + $0x2] sm:$0x3] %v600_v44 }
  0x8a   :  { %609 = vst [vmem:[%s1070_s4 + $0x4] sm:$0x3] %v601_v19  ;;  %610 = vst [vmem:[%s1070_s4 + $0x6] sm:$0x3] %v602_v45 }
  0x8b   :  { %611 = vst [vmem:[%s1070_s4 + $0x8] sm:$0x3] %v603_v20  ;;  %612 = vst [vmem:[%s1070_s4 + $0xa] sm:$0x3] %v604_v46 }
  0x8c   :  { %613 = vst [vmem:[%s1070_s4 + $0xc] sm:$0x3] %v605_v26  ;;  %614 = vst [vmem:[%s1070_s4 + $0xe] sm:$0x3] %v606_v42 }

// kernel: mobilenetv4_forward.37
= control target key start
LH: loop header
LB: loop body
LE: loop exit
PB: predicated region body
PF: predicated region fallthrough
CT: control target
= control target key end

     0   :  { %v2521_v2 = vmov 0   ;;  %vm136_vm0 = vcmask 1041409   ;;  %s3277_s0 = inlined_call_operand.vmem [shape: bf16[2,16,128], index: 0, kind: input, shape index: {}]   ;;  %s3278_s1 = inlined_call_operand.vmem [shape: bf16[128,1280], index: 1, kind: input, shape index: {}]   ;;  %s3279_s2 = inlined_call_operand.vmem [shape: f32[1,1280], index: 2, kind: input, shape index: {}]   ;;  %s3280_s3 = inlined_call_operand.vmem [shape: f32[1,1280], index: 3, kind: input, shape index: {}]   ;;  %s3281_s4 = inlined_call_operand.vmem [shape: bf16[1280,128], index: 4, kind: input, shape index: {}]   ;;  %s3282_s5 = inlined_call_operand.vmem [shape: f32[1,128], index: 5, kind: input, shape index: {}]   ;;  %s3283_s6 = inlined_call_operand.hbm [shape: f32[2,128], index: 6, kind: output, shape index: {}]  }
   0x1   :  { %v2279_v0 = vld [vmem:[%s3278_s1 + $0x234] ss:$40 sps:$4 sm:$0xff]   ;;  %572 = vmatprep.mubr.bf16.mxu0 %v2521_v2  ;;  %613 = vmatprep.mubr.bf16.mxu1 %v2521_v2  ;;  %v2283_v3 = vld [vmem:[%s3278_s1 + $0x230] ss:$40 sps:$4 sm:$0xff]   ;;  %v2285_v5 = vld [vmem:[%s3278_s1 + $0x1e4] ss:$40 sps:$4 sm:$0xff]  }
   0x2   :  { %v2281_v1 = vld [vmem:[%s3278_s1 + $0x23c] ss:$40 sps:$4 sm:$0xff]   ;;  %540 = vmatprep.subr.bf16.mxu0 %v2279_v0  ;;  %v2284_v4 = vld [vmem:[%s3278_s1 + $0x238] ss:$40 sps:$4 sm:$0xff]   ;;  %v2287_v6 = vld [vmem:[%s3278_s1 + $0x1ec] ss:$40 sps:$4 sm:$0xff]  }
   0x3   :  { %581 = vmatprep.subr.bf16.mxu1 %v2281_v1  ;;  %541 = vmatpush1.bf16.msra.mxu0 %v2283_v3  ;;  %v2289_v7 = vld [vmem:[%s3278_s1 + $0x1e0] ss:$40 sps:$4 sm:$0xff]   ;;  %v2291_v9 = vld [vmem:[%s3278_s1 + $0x194] ss:$40 sps:$4 sm:$0xff]   ;;  %v2295_v11 = vld [vmem:[%s3278_s1 + $0x190] ss:$40 sps:$4 sm:$0xff]  }
   0x4   :  { %582 = vmatpush1.bf16.msra.mxu1 %v2284_v4  ;;  %542 = vmatprep.subr.bf16.mxu0 %v2285_v5  ;;  %v2290_v8 = vld [vmem:[%s3278_s1 + $0x1e8] ss:$40 sps:$4 sm:$0xff]   ;;  %v2293_v10 = vld [vmem:[%s3278_s1 + $0x19c] ss:$40 sps:$4 sm:$0xff]   ;;  %v2296_v12 = vld [vmem:[%s3278_s1 + $0x198] ss:$40 sps:$4 sm:$0xff]  }
   0x5   :  { %583 = vmatprep.subr.bf16.mxu1 %v2287_v6  ;;  %v2297_v13 = vld [vmem:[%s3278_s1 + $0x144] ss:$40 sps:$4 sm:$0xff]   ;;  %v2301_v15 = vld [vmem:[%s3278_s1 + $0x140] ss:$40 sps:$4 sm:$0xff]   ;;  %v2303_v17 = vld [vmem:[%s3278_s1 + $0xf4] ss:$40 sps:$4 sm:$0xff]  }
   0x6   :  { %v2299_v14 = vld [vmem:[%s3278_s1 + $0x14c] ss:$40 sps:$4 sm:$0xff]   ;;  %v2302_v16 = vld [vmem:[%s3278_s1 + $0x148] ss:$40 sps:$4 sm:$0xff]   ;;  %v2305_v18 = vld [vmem:[%s3278_s1 + $0xfc] ss:$40 sps:$4 sm:$0xff]  }
   0x7   :  { %543 = vmatpush1.bf16.msra.mxu0 %v2289_v7  ;;  %v2307_v19 = vld [vmem:[%s3278_s1 + $0xf0] ss:$40 sps:$4 sm:$0xff]   ;;  %v2309_v21 = vld [vmem:[%s3278_s1 + $0xa4] ss:$40 sps:$4 sm:$0xff]   ;;  %v2313_v23 = vld [vmem:[%s3278_s1 + $0xa0] ss:$40 sps:$4 sm:$0xff]  }
   0x8   :  { %584 = vmatpush1.bf16.msra.mxu1 %v2290_v8  ;;  %544 = vmatprep.subr.bf16.mxu0 %v2291_v9  ;;  %v2308_v20 = vld [vmem:[%s3278_s1 + $0xf8] ss:$40 sps:$4 sm:$0xff]   ;;  %v2311_v22 = vld [vmem:[%s3278_s1 + $0xac] ss:$40 sps:$4 sm:$0xff]   ;;  %v2314_v24 = vld [vmem:[%s3278_s1 + $0xa8] ss:$40 sps:$4 sm:$0xff]  }
   0x9   :  { %585 = vmatprep.subr.bf16.mxu1 %v2293_v10  ;;  %v2315_v25 = vld [vmem:[%s3278_s1 + $0x54] ss:$40 sps:$4 sm:$0xff]   ;;  %v2159_v27 = vld [vmem:[%s3277_s0] sm:$0xff]   ;;  %v2166_v28 = vld [vmem:[%s3277_s0 + $0x8] sm:$0xff]  }
   0xa   :  { %v2317_v26 = vld [vmem:[%s3278_s1 + $0x5c] ss:$40 sps:$4 sm:$0xff]   ;;  %v2160_v29 = vunpack.c.l.bf16 %v2159_v27  ;;  %v2161_v30 = vunpack.c.h.bf16 %v2159_v27  ;;  %v2164_v31 = vunpack.c.l.bf16 %v2166_v28  ;;  %v2165_v32 = vunpack.c.h.bf16 %v2166_v28  ;;  %v2319_v33 = vld [vmem:[%s3278_s1 + $0x50] ss:$40 sps:$4 sm:$0xff]   ;;  %v2323_v38 = vld [vmem:[%s3278_s1 + $0xc] ss:$40 sps:$4 sm:$0xff]  }
   0xb   :  { %545 = vmatpush1.bf16.msra.mxu0 %v2295_v11  ;;  %v2320_v34 = vld [vmem:[%s3278_s1 + $0x58] ss:$40 sps:$4 sm:$0xff]   ;;  %v2321_v37 = vld [vmem:[%s3278_s1 + $0x4] ss:$40 sps:$4 sm:$0xff]   ;;  %v2326_v42 = vld [vmem:[%s3278_s1 + $0x8] ss:$40 sps:$4 sm:$0xff]  }
   0xc   :  { %586 = vmatpush1.bf16.msra.mxu1 %v2296_v12  ;;  %546 = vmatprep.subr.bf16.mxu0 %v2297_v13  ;;  %v33_v35 = vadd.f32 %v2161_v30, %v2160_v29  ;;  %v40_v36 = vadd.f32 %v2165_v32, %v2164_v31  ;;  %v2325_v41 = vld [vmem:[%s3278_s1] ss:$40 sps:$4 sm:$0xff]   ;;  %v2329_v45 = vld [vmem:[%s3278_s1 + $0x244] ss:$40 sps:$4 sm:$0xff]   ;;  %v2335_v1 = vld [vmem:[%s3278_s1 + $0x1f4] ss:$40 sps:$4 sm:$0xff]  }
   0xd   :  { %587 = vmatprep.subr.bf16.mxu1 %v2299_v14  ;;  %v2332_v46 = vld [vmem:[%s3278_s1 + $0x24c] ss:$40 sps:$4 sm:$0xff]   ;;  %v2327_v62 = vld [vmem:[%s3278_s1 + $0x240] ss:$40 sps:$4 sm:$0xff]   ;;  %v2338_v3 = vld [vmem:[%s3278_s1 + $0x1fc] ss:$40 sps:$4 sm:$0xff]  }
   0xe   :  { %v34_v39 = vrot.slane %v33_v35, 4  ;;  %v41_v40 = vrot.slane %v40_v36, 4  ;;  %v2330_v63 = vld [vmem:[%s3278_s1 + $0x248] ss:$40 sps:$4 sm:$0xff]   ;;  %v2336_v5 = vld [vmem:[%s3278_s1 + $0x1f8] ss:$40 sps:$4 sm:$0xff]  }
   0xf   :  { %547 = vmatpush1.bf16.msra.mxu0 %v2301_v15  ;;  %v2333_v4 = vld [vmem:[%s3278_s1 + $0x1f0] ss:$40 sps:$4 sm:$0xff]   ;;  %v2341_v6 = vld [vmem:[%s3278_s1 + $0x1a4] ss:$40 sps:$4 sm:$0xff]   ;;  %v2339_v8 = vld [vmem:[%s3278_s1 + $0x1a0] ss:$40 sps:$4 sm:$0xff]  }
  0x10   :  { %588 = vmatpush1.bf16.msra.mxu1 %v2302_v16  ;;  %548 = vmatprep.subr.bf16.mxu0 %v2303_v17  ;;  %v35_v43 = vadd.f32 %v34_v39, %v33_v35  ;;  %v42_v44 = vadd.f32 %v41_v40, %v40_v36  ;;  %v2344_v7 = vld [vmem:[%s3278_s1 + $0x1ac] ss:$40 sps:$4 sm:$0xff]   ;;  %v2342_v9 = vld [vmem:[%s3278_s1 + $0x1a8] ss:$40 sps:$4 sm:$0xff]   ;;  %v2350_v11 = vld [vmem:[%s3278_s1 + $0x15c] ss:$40 sps:$4 sm:$0xff]  }
  0x11   :  { %589 = vmatprep.subr.bf16.mxu1 %v2305_v18  ;;  %v2347_v10 = vld [vmem:[%s3278_s1 + $0x154] ss:$40 sps:$4 sm:$0xff]   ;;  %v2345_v12 = vld [vmem:[%s3278_s1 + $0x150] ss:$40 sps:$4 sm:$0xff]   ;;  %v2353_v14 = vld [vmem:[%s3278_s1 + $0x104] ss:$40 sps:$4 sm:$0xff]  }
  0x12   :  { %v36_v47 = vrot.slane %v35_v43, 2  ;;  %v43_v48 = vrot.slane %v42_v44, 2  ;;  %v2348_v13 = vld [vmem:[%s3278_s1 + $0x158] ss:$40 sps:$4 sm:$0xff]   ;;  %v2356_v15 = vld [vmem:[%s3278_s1 + $0x10c] ss:$40 sps:$4 sm:$0xff]  }
  0x13   :  { %549 = vmatpush1.bf16.msra.mxu0 %v2307_v19  ;;  %v2351_v16 = vld [vmem:[%s3278_s1 + $0x100] ss:$40 sps:$4 sm:$0xff]   ;;  %v2359_v18 = vld [vmem:[%s3278_s1 + $0xb4] ss:$40 sps:$4 sm:$0xff]   ;;  %v2369_v28 = vld [vmem:[%s3278_s1 + $0x10] ss:$40 sps:$4 sm:$0xff]  }
  0x14   :  { %590 = vmatpush1.bf16.msra.mxu1 %v2308_v20  ;;  %550 = vmatprep.subr.bf16.mxu0 %v2309_v21  ;;  %v37_v49 = vadd.f32 %v36_v47, %v35_v43  ;;  %v44_v50 = vadd.f32 %v43_v48, %v42_v44  ;;  %v2354_v17 = vld [vmem:[%s3278_s1 + $0x108] ss:$40 sps:$4 sm:$0xff]   ;;  %v2362_v19 = vld [vmem:[%s3278_s1 + $0xbc] ss:$40 sps:$4 sm:$0xff]   ;;  %v2360_v21 = vld [vmem:[%s3278_s1 + $0xb8] ss:$40 sps:$4 sm:$0xff]  }
  0x15   :  { %591 = vmatprep.subr.bf16.mxu1 %v2311_v22  ;;  %v2357_v20 = vld [vmem:[%s3278_s1 + $0xb0] ss:$40 sps:$4 sm:$0xff]   ;;  %v2365_v22 = vld [vmem:[%s3278_s1 + $0x64] ss:$40 sps:$4 sm:$0xff]   ;;  %v2377_v30 = vld [vmem:[%s3278_s1 + $0x254] ss:$40 sps:$4 sm:$0xff]  }
  0x16   :  { %v38_v51 = vrot.slane %v37_v49, 1  ;;  %v45_v52 = vrot.slane %v44_v50, 1  ;;  %v2374_v27 = vld [vmem:[%s3278_s1 + $0x1c] ss:$40 sps:$4 sm:$0xff]   ;;  %v2372_v29 = vld [vmem:[%s3278_s1 + $0x18] ss:$40 sps:$4 sm:$0xff]  }
  0x17   :  { %551 = vmatpush1.bf16.msra.mxu0 %v2313_v23  ;;  %v2368_v23 = vld [vmem:[%s3278_s1 + $0x6c] ss:$40 sps:$4 sm:$0xff]   ;;  %v2375_v31 = vld [vmem:[%s3278_s1 + $0x250] ss:$40 sps:$4 sm:$0xff]   ;;  %v2390_v40 = vld [vmem:[%s3278_s1 + $0xc0] ss:$40 sps:$4 sm:$0xff]  }
  0x18   :  { %592 = vmatpush1.bf16.msra.mxu1 %v2314_v24  ;;  %552 = vmatprep.subr.bf16.mxu0 %v2315_v25  ;;  %v39_v53 = vadd.f32 %v38_v51, %v37_v49  ;;  %v46_v54 = vadd.f32 %v45_v52, %v44_v50  ;;  %v2363_v24 = vld [vmem:[%s3278_s1 + $0x60] ss:$40 sps:$4 sm:$0xff]   ;;  %v2380_v32 = vld [vmem:[%s3278_s1 + $0x204] ss:$40 sps:$4 sm:$0xff]   ;;  %v2381_v35 = vld [vmem:[%s3278_s1 + $0x1b0] ss:$40 sps:$4 sm:$0xff]  }
  0x19   :  { %593 = vmatprep.subr.bf16.mxu1 %v2317_v26  ;;  %v2366_v25 = vld [vmem:[%s3278_s1 + $0x68] ss:$40 sps:$4 sm:$0xff]   ;;  %v2371_v26 = vld [vmem:[%s3278_s1 + $0x14] ss:$40 sps:$4 sm:$0xff]   ;;  %v2386_v36 = vld [vmem:[%s3278_s1 + $0x164] ss:$40 sps:$4 sm:$0xff]  }
  0x1a   :  { %v48_v55 = vmul.f32 0.0625, %v39_v53  ;;  %v49_v56 = vmul.f32 0.0625, %v46_v54  ;;  %v2392_v39 = vld [vmem:[%s3278_s1 + $0xc4] ss:$40 sps:$4 sm:$0xff]   ;;  %v2396_v44 = vld [vmem:[%s3278_s1 + $0x20] ss:$40 sps:$4 sm:$0xff]  }
  0x1b   :  { %553 = vmatpush1.bf16.msra.mxu0 %v2319_v33  ;;  %v2378_v33 = vld [vmem:[%s3278_s1 + $0x200] ss:$40 sps:$4 sm:$0xff]   ;;  %v2398_v43 = vld [vmem:[%s3278_s1 + $0x24] ss:$40 sps:$4 sm:$0xff]  }
  0x1c   :  { %594 = vmatpush1.bf16.msra.mxu1 %v2320_v34  ;;  %554 = vmatprep.subr.bf16.mxu0 %v2321_v37  ;;  %v50_v57 = vpack.c.bf16 %v48_v55, %v48_v55  ;;  %v51_v58 = vpack.c.bf16 %v49_v56, %v49_v56  ;;  %v2383_v34 = vld [vmem:[%s3278_s1 + $0x1b4] ss:$40 sps:$4 sm:$0xff]   ;;  %v2384_v37 = vld [vmem:[%s3278_s1 + $0x160] ss:$40 sps:$4 sm:$0xff]  }
  0x1d   :  { %595 = vmatprep.subr.bf16.mxu1 %v2323_v38  ;;  %v2389_v38 = vld [vmem:[%s3278_s1 + $0x114] ss:$40 sps:$4 sm:$0xff]  }
  0x1e   :  { %v134_v59 = vunpack.c.l.b16 %v50_v57  ;;  %v135_v60 = vunpack.c.l.b16 %v51_v58 }
  0x1f   :  { %555 = vmatpush1.bf16.msra.mxu0 %v2325_v41  ;;  %v2395_v41 = vld [vmem:[%s3278_s1 + $0x74] ss:$40 sps:$4 sm:$0xff]  }
  0x20   :  { %596 = vmatpush1.bf16.msra.mxu1 %v2326_v42  ;;  %622 = vmatprep.subr.bf16.mxu0 %v2329_v45  ;;  %v137_v61 = vsel %vm136_vm0, %v135_v60, %v134_v59  ;;  %v2393_v42 = vld [vmem:[%s3278_s1 + $0x70] ss:$40 sps:$4 sm:$0xff]  }
  0x21   :  { %663 = vmatprep.subr.bf16.mxu1 %v2332_v46  ;;  %v2674_v0 = vpack.c.b16 %v137_v61, %v137_v61 }
  0x23   :  { %573 = vmatmul.mubr.bf16.vlgmr.msra.gmra.mxu0 %v2674_v0  ;;  %614 = vmatmul.mubr.bf16.vlgmr.msra.gmra.mxu1 %v2674_v0 }
  0x24   :  { %623 = vmatpush1.bf16.msra.mxu0 %v2327_v62  ;;  %664 = vmatpush1.bf16.msra.mxu1 %v2330_v63 }
  0x25   :  { %624 = vmatprep.subr.bf16.mxu0 %v2335_v1  ;;  %665 = vmatprep.subr.bf16.mxu1 %v2338_v3 }
  0x26   :  { %654 = vmatprep.mubr.bf16.mxu0 %v2521_v2  ;;  %695 = vmatprep.mubr.bf16.mxu1 %v2521_v2 }
  0x28   :  { %625 = vmatpush1.bf16.msra.mxu0 %v2333_v4  ;;  %666 = vmatpush1.bf16.msra.mxu1 %v2336_v5 }
  0x29   :  { %626 = vmatprep.subr.bf16.mxu0 %v2341_v6  ;;  %667 = vmatprep.subr.bf16.mxu1 %v2344_v7 }
  0x2c   :  { %627 = vmatpush1.bf16.msra.mxu0 %v2339_v8  ;;  %668 = vmatpush1.bf16.msra.mxu1 %v2342_v9 }
  0x2d   :  { %628 = vmatprep.subr.bf16.mxu0 %v2347_v10  ;;  %669 = vmatprep.subr.bf16.mxu1 %v2350_v11 }
  0x30   :  { %629 = vmatpush1.bf16.msra.mxu0 %v2345_v12  ;;  %670 = vmatpush1.bf16.msra.mxu1 %v2348_v13 }
  0x31   :  { %630 = vmatprep.subr.bf16.mxu0 %v2353_v14  ;;  %671 = vmatprep.subr.bf16.mxu1 %v2356_v15 }
  0x34   :  { %631 = vmatpush1.bf16.msra.mxu0 %v2351_v16  ;;  %672 = vmatpush1.bf16.msra.mxu1 %v2354_v17 }
  0x35   :  { %632 = vmatprep.subr.bf16.mxu0 %v2359_v18  ;;  %673 = vmatprep.subr.bf16.mxu1 %v2362_v19 }
  0x38   :  { %633 = vmatpush1.bf16.msra.mxu0 %v2357_v20  ;;  %674 = vmatpush1.bf16.msra.mxu1 %v2360_v21 }
  0x39   :  { %634 = vmatprep.subr.bf16.mxu0 %v2365_v22  ;;  %675 = vmatprep.subr.bf16.mxu1 %v2368_v23 }
  0x3c   :  { %635 = vmatpush1.bf16.msra.mxu0 %v2363_v24  ;;  %676 = vmatpush1.bf16.msra.mxu1 %v2366_v25 }
  0x3d   :  { %636 = vmatprep.subr.bf16.mxu0 %v2371_v26  ;;  %677 = vmatprep.subr.bf16.mxu1 %v2374_v27 }
  0x40   :  { %637 = vmatpush1.bf16.msra.mxu0 %v2369_v28  ;;  %678 = vmatpush1.bf16.msra.mxu1 %v2372_v29 }
  0x41   :  { %704 = vmatprep.subr.bf16.mxu0 %v2377_v30 }
  0x43   :  { %655 = vmatmul.mubr.bf16.vlgmr.msra.gmra.mxu0 %v2674_v0  ;;  %696 = vmatmul.mubr.bf16.vlgmr.msra.gmra.mxu1 %v2674_v0 }
  0x44   :  { %705 = vmatpush1.bf16.msra.mxu0 %v2375_v31  ;;  %736 = vmatprep.mubr.bf16.mxu0 %v2521_v2  ;;  %v2387_v2 = vld [vmem:[%s3278_s1 + $0x110] ss:$40 sps:$4 sm:$0xff]  }
  0x45   :  { %706 = vmatprep.subr.bf16.mxu0 %v2380_v32 }
  0x48   :  { %707 = vmatpush1.bf16.msra.mxu0 %v2378_v33 }
  0x49   :  { %708 = vmatprep.subr.bf16.mxu0 %v2383_v34 }
  0x4c   :  { %709 = vmatpush1.bf16.msra.mxu0 %v2381_v35 }
  0x4d   :  { %710 = vmatprep.subr.bf16.mxu0 %v2386_v36 }
  0x50   :  { %711 = vmatpush1.bf16.msra.mxu0 %v2384_v37 }
  0x51   :  { %712 = vmatprep.subr.bf16.mxu0 %v2389_v38 }
  0x54   :  { %713 = vmatpush1.bf16.msra.mxu0 %v2387_v2 }
  0x55   :  { %714 = vmatprep.subr.bf16.mxu0 %v2392_v39 }
  0x58   :  { %715 = vmatpush1.bf16.msra.mxu0 %v2390_v40 }
  0x59   :  { %716 = vmatprep.subr.bf16.mxu0 %v2395_v41 }
  0x5c   :  { %717 = vmatpush1.bf16.msra.mxu0 %v2393_v42 }
  0x5d   :  { %718 = vmatprep.subr.bf16.mxu0 %v2398_v43 }
  0x5e   :  { %11 = vsyncpa [#allocation3], 0  ;;  %v2399_v45 = vld [vmem:[%s3281_s4 + $0x78] sm:$0xff]   ;;  %v2403_v49 = vld [vmem:[%s3281_s4 + $0x70] sm:$0xff]   ;;  %vm745_vm1 = vcmask 1041408   ;;  %s2522_s22 = smov [#allocation2]  }
  0x5f   :  { %v2400_v46 = vld [vmem:[%s3281_s4 + $0xf8] sm:$0xff]   ;;  %2167 = vmatprep.subr.bf16.mxu1 %v2399_v45  ;;  %v2404_v50 = vld [vmem:[%s3281_s4 + $0xf0] sm:$0xff]   ;;  %v2407_v53 = vld [vmem:[%s3281_s4 + $0x68] sm:$0xff]   ;;  %s1989_s23 = sshll.u32 %s2522_s22, 4  ;;  %s1990_s23 = int_to_ptr.vmem [resolvable:$true] %s1989_s23 }
  0x60   :  { %719 = vmatpush1.bf16.msra.mxu0 %v2396_v44  ;;  %v2401_v47 = vld [vmem:[%s3281_s4 + $0x38] sm:$0xff]   ;;  %v2405_v51 = vld [vmem:[%s3281_s4 + $0x30] sm:$0xff]   ;;  %v2408_v54 = vld [vmem:[%s3281_s4 + $0xe8] sm:$0xff]   ;;  %s2499_s24 = scalar_lea.vmem %s1990_s23, 32  ;;  %p2504_p1 = scmp.lt.s32.totalorder %s1990_s23, %s1990_s23 }
  0x61   :  { %v2402_v48 = vld [vmem:[%s3281_s4 + $0xb8] sm:$0xff]   ;;  %2189 = vmatprep.subr.bf16.mxu0 %v2400_v46  ;;  %2168 = vmatpush3.bf16.msra.mxu1 %v2401_v47  ;;  %v2406_v52 = vld [vmem:[%s3281_s4 + $0xb0] sm:$0xff]   ;;  %v2409_v55 = vld [vmem:[%s3281_s4 + $0x28] sm:$0xff]   ;;  %p2500_p0 = scmp.ne.s32.totalorder %s1990_s23, %s2499_s24  ;;  %p2505_p2 = scmp.lt.s32.totalorder %s2499_s24, %s2499_s24 }
  0x62   :  { %2169 = vmatprep.subr.bf16.mxu1 %v2403_v49  ;;  %v2410_v56 = vld [vmem:[%s3281_s4 + $0xa8] sm:$0xff]   ;;  %v2411_v57 = vld [vmem:[%s3281_s4 + $0x60] sm:$0xff]   ;;  %v2415_v61 = vld [vmem:[%s3281_s4 + $0x58] sm:$0xff]  }
  0x63   :  { %737 = vmatmul.mubr.bf16.vlgmr.msra.gmra.mxu0 %v2674_v0  ;;  %v2412_v58 = vld [vmem:[%s3281_s4 + $0xe0] sm:$0xff]   ;;  %v2416_v62 = vld [vmem:[%s3281_s4 + $0xd8] sm:$0xff]   ;;  %v2419_v1 = vld [vmem:[%s3281_s4 + $0x50] sm:$0xff]   ;;  %p2506_p3 = por %p2505_p2, %p2504_p1 }
  0x64   :  { %2190 = vmatpush3.bf16.msra.mxu0 %v2402_v48  ;;  %v2413_v59 = vld [vmem:[%s3281_s4 + $0x20] sm:$0xff]   ;;  %v2417_v63 = vld [vmem:[%s3281_s4 + $0x18] sm:$0xff]   ;;  %v2420_v3 = vld [vmem:[%s3281_s4 + $0xd0] sm:$0xff]  }
  0x65   :  { %2191 = vmatprep.subr.bf16.mxu0 %v2404_v50  ;;  %2170 = vmatpush3.bf16.msra.mxu1 %v2405_v51  ;;  %v2414_v60 = vld [vmem:[%s3281_s4 + $0xa0] sm:$0xff]   ;;  %v2418_v0 = vld [vmem:[%s3281_s4 + $0x98] sm:$0xff]   ;;  %v2421_v4 = vld [vmem:[%s3281_s4 + $0x10] sm:$0xff]   ;;  %p2507_p4 = pnand %p2506_p3, %p2500_p0 }
  0x66   :  { %2171 = vmatprep.subr.bf16.mxu1 %v2407_v53  ;;  %v2422_v5 = vld [vmem:[%s3281_s4 + $0x90] sm:$0xff]   ;;  %v2423_v6 = vld [vmem:[%s3281_s4 + $0x48] sm:$0xff]   ;;  %v2427_v10 = vld [vmem:[%s3281_s4 + $0x40] sm:$0xff]  }
  0x67   :  { %v2424_v7 = vld [vmem:[%s3281_s4 + $0xc8] sm:$0xff]   ;;  %v2428_v11 = vld [vmem:[%s3281_s4 + $0xc0] sm:$0xff]   ;;  %v2431_v14 = vld [vmem:[%s3281_s4 + $0x178] sm:$0xff]  }
  0x68   :  { %2192 = vmatpush3.bf16.msra.mxu0 %v2406_v52  ;;  %v2425_v8 = vld [vmem:[%s3281_s4 + $0x8] sm:$0xff]   ;;  %v2429_v12 = vld [vmem:[%s3281_s4] sm:$0xff]   ;;  %v2432_v15 = vld [vmem:[%s3281_s4 + $0x1f8] sm:$0xff]  }
  0x69   :  { %2193 = vmatprep.subr.bf16.mxu0 %v2408_v54  ;;  %2172 = vmatpush3.bf16.msra.mxu1 %v2409_v55  ;;  %v2426_v9 = vld [vmem:[%s3281_s4 + $0x88] sm:$0xff]   ;;  %v2430_v13 = vld [vmem:[%s3281_s4 + $0x80] sm:$0xff]  }
  0x6a   :  { %2173 = vmatprep.subr.bf16.mxu1 %v2411_v57 }
  0x6c   :  { %2194 = vmatpush3.bf16.msra.mxu0 %v2410_v56 }
  0x6d   :  { %2195 = vmatprep.subr.bf16.mxu0 %v2412_v58  ;;  %2174 = vmatpush3.bf16.msra.mxu1 %v2413_v59 }
  0x6e   :  { %2175 = vmatprep.subr.bf16.mxu1 %v2415_v61 }
  0x70   :  { %2196 = vmatpush3.bf16.msra.mxu0 %v2414_v60 }
  0x71   :  { %2197 = vmatprep.subr.bf16.mxu0 %v2416_v62  ;;  %2176 = vmatpush3.bf16.msra.mxu1 %v2417_v63 }
  0x72   :  { %2177 = vmatprep.subr.bf16.mxu1 %v2419_v1 }
  0x74   :  { %2198 = vmatpush3.bf16.msra.mxu0 %v2418_v0 }
  0x75   :  { %2199 = vmatprep.subr.bf16.mxu0 %v2420_v3  ;;  %2178 = vmatpush3.bf16.msra.mxu1 %v2421_v4 }
  0x76   :  { %2179 = vmatprep.subr.bf16.mxu1 %v2423_v6 }
  0x78   :  { %2200 = vmatpush3.bf16.msra.mxu0 %v2422_v5 }
  0x79   :  { %2201 = vmatprep.subr.bf16.mxu0 %v2424_v7  ;;  %2180 = vmatpush3.bf16.msra.mxu1 %v2425_v8 }
  0x7a   :  { %2181 = vmatprep.subr.bf16.mxu1 %v2427_v10 }
  0x7c   :  { %2202 = vmatpush3.bf16.msra.mxu0 %v2426_v9 }
  0x7d   :  { %2203 = vmatprep.subr.bf16.mxu0 %v2428_v11  ;;  %2182 = vmatpush3.bf16.msra.mxu1 %v2429_v12 }
  0x7e   :  { %2211 = vmatprep.subr.bf16.mxu1 %v2431_v14 }
  0x80   :  { %2204 = vmatpush3.bf16.msra.mxu0 %v2430_v13 }
  0x81   :  { %2233 = vmatprep.subr.bf16.mxu0 %v2432_v15 }
  0xe3   :  { %v2918_v16 = vpop.f32.mrf.mxu0  ;;  %v2920_v17 = vpop.f32.mrf.mxu1 }
  0xe4   :  { %v746_v18 = vsel %vm745_vm1, %v2918_v16, 0.0  ;;  %v827_v19 = vmul.f32 %v2918_v16, %v2918_v16  ;;  %v760_v20 = vsel %vm745_vm1, %v2920_v17, 0.0  ;;  %v829_v21 = vmul.f32 %v2920_v17, %v2920_v17 }
  0xe5   :  { %v747_v22 = vrot.slane %v746_v18, 4  ;;  %v761_v23 = vrot.slane %v760_v20, 4  ;;  %v2930_v24 = vpop.f32.mrf.mxu0  ;;  %v2932_v25 = vpop.f32.mrf.mxu1 }
  0xe6   :  { %v837_v26 = vsel %vm745_vm1, %v827_v19, 0.0  ;;  %v851_v27 = vsel %vm745_vm1, %v829_v21, 0.0  ;;  %v753_v28 = vsel %vm745_vm1, %v2930_v24, 0.0  ;;  %v828_v29 = vmul.f32 %v2930_v24, %v2930_v24 }
  0xe7   :  { %v748_v30 = vadd.f32 %v747_v22, %v746_v18  ;;  %v838_v31 = vrot.slane %v837_v26, 4  ;;  %v762_v32 = vadd.f32 %v761_v23, %v760_v20  ;;  %v852_v33 = vrot.slane %v851_v27, 4  ;;  %v578_v34 = vpop.f32.mrf.mxu0  ;;  %v619_v35 = vpop.f32.mrf.mxu1 }
  0xe8   :  { %v754_v36 = vrot.slane %v753_v28, 4  ;;  %v844_v37 = vsel %vm745_vm1, %v828_v29, 0.0  ;;  %v767_v38 = vsel %vm745_vm1, %v2932_v25, 0.0  ;;  %v830_v2 = vmul.f32 %v2932_v25, %v2932_v25 }
  0xe9   :  { %v749_v39 = vrot.slane %v748_v30, 2  ;;  %v839_v40 = vadd.f32 %v838_v31, %v837_v26  ;;  %v763_v41 = vrot.slane %v762_v32, 2  ;;  %v853_v42 = vadd.f32 %v852_v33, %v851_v27  ;;  %v579_v43 = vpop.f32.mrf.mxu0  ;;  %v620_v44 = vpop.f32.mrf.mxu1 }
  0xea   :  { %v755_v45 = vadd.f32 %v754_v36, %v753_v28  ;;  %v845_v46 = vrot.slane %v844_v37, 4  ;;  %v768_v47 = vrot.slane %v767_v38, 4  ;;  %v858_v48 = vsel %vm745_vm1, %v830_v2, 0.0 }
  0xeb   :  { %v750_v49 = vadd.f32 %v749_v39, %v748_v30  ;;  %v840_v50 = vrot.slane %v839_v40, 2  ;;  %v764_v51 = vadd.f32 %v763_v41, %v762_v32  ;;  %v854_v52 = vrot.slane %v853_v42, 2 }
  0xec   :  { %v756_v53 = vrot.slane %v755_v45, 2  ;;  %v846_v54 = vadd.f32 %v845_v46, %v844_v37  ;;  %v769_v55 = vadd.f32 %v768_v47, %v767_v38  ;;  %v859_v56 = vrot.slane %v858_v48, 4 }
  0xed   :  { %v751_v57 = vrot.slane %v750_v49, 1  ;;  %v841_v58 = vadd.f32 %v840_v50, %v839_v40  ;;  %v765_v59 = vrot.slane %v764_v51, 1  ;;  %v855_v60 = vadd.f32 %v854_v52, %v853_v42  ;;  %v2975_v52 = vld [vmem:[%s3279_s2] sm:$0xff] }
  0xee   :  { %v757_v61 = vadd.f32 %v756_v53, %v755_v45  ;;  %v847_v62 = vrot.slane %v846_v54, 2  ;;  %v770_v63 = vrot.slane %v769_v55, 2  ;;  %v860_v0 = vadd.f32 %v859_v56, %v858_v48 }
  0xef   :  { %v752_v1 = vadd.f32 %v751_v57, %v750_v49  ;;  %v842_v3 = vrot.slane %v841_v58, 1  ;;  %v766_v4 = vadd.f32 %v765_v59, %v764_v51  ;;  %v856_v5 = vrot.slane %v855_v60, 1 }
  0xf0   :  { %v758_v6 = vrot.slane %v757_v61, 1  ;;  %v848_v7 = vadd.f32 %v847_v62, %v846_v54  ;;  %v771_v8 = vadd.f32 %v770_v63, %v769_v55  ;;  %v861_v9 = vrot.slane %v860_v0, 2  ;;  %v2980_v54 = vld [vmem:[%s3280_s3] sm:$0xff] }
  0xf1   :  { %v2946_v10 = vmul.f32 0.5, %v752_v1  ;;  %v843_v11 = vadd.f32 %v842_v3, %v841_v58  ;;  %v2948_v12 = vmul.f32 0.5, %v766_v4  ;;  %v857_v13 = vadd.f32 %v856_v5, %v855_v60 }
  0xf2   :  { %v759_v14 = vadd.f32 %v758_v6, %v757_v61  ;;  %v849_v15 = vrot.slane %v848_v7, 1  ;;  %v772_v18 = vrot.slane %v771_v8, 1  ;;  %v862_v19 = vadd.f32 %v861_v9, %v860_v0 }
  0xf3   :  { %v907_v20 = vmul.f32 0.5, %v843_v11  ;;  %v917_v21 = vmul.f32 %v2946_v10, %v2946_v10  ;;  %v909_v22 = vmul.f32 0.5, %v857_v13  ;;  %v919_v23 = vmul.f32 %v2948_v12, %v2948_v12 }
  0xf4   :  { %v2954_v26 = vmul.f32 0.5, %v759_v14  ;;  %v850_v27 = vadd.f32 %v849_v15, %v848_v7  ;;  %v773_v29 = vadd.f32 %v772_v18, %v771_v8  ;;  %v863_v30 = vrot.slane %v862_v19, 1 }
  0xf5   :  { %v927_v28 = vsub.f32 %v907_v20, %v917_v21  ;;  %v991_v31 = vlaneseq  ;;  %v929_v32 = vsub.f32 %v909_v22, %v919_v23  ;;  %v947_v5 = vsub.f32 %v2918_v16, %v2946_v10 }
  0xf6   :  { %v908_v33 = vmul.f32 0.5, %v850_v27  ;;  %v918_v34 = vmul.f32 %v2954_v26, %v2954_v26  ;;  %v2958_v36 = vmul.f32 0.5, %v773_v29  ;;  %v864_v37 = vadd.f32 %v863_v30, %v862_v19 }
  0xf7   :  { %v937_v35 = vmax.f32 %v927_v28, 0.0  ;;  %v939_v38 = vmax.f32 %v929_v32, 0.0  ;;  %v2962_v42 = vshrl.u32 %v991_v31, 7  ;;  %v949_v27 = vsub.f32 %v2920_v17, %v2948_v12 }
  0xf8   :  { %v928_v2 = vsub.f32 %v908_v33, %v918_v34  ;;  %v910_v40 = vmul.f32 0.5, %v864_v37  ;;  %v920_v41 = vmul.f32 %v2958_v36, %v2958_v36  ;;  %v948_v28 = vsub.f32 %v2930_v24, %v2954_v26 }
  0xf9   :  { %v957_v39 = vadd.f32 1e-05, %v937_v35  ;;  %v959_v43 = vadd.f32 1e-05, %v939_v38  ;;  %v2965_v48 = vsub.s32 0, %v2962_v42  ;;  %v1001_v49 = vsub.s32 2, %v2962_v42 }
  0xfa   :  { %v938_v44 = vmax.f32 %v928_v2, 0.0  ;;  %v930_v45 = vsub.f32 %v910_v40, %v920_v41  ;;  %v2969_v50 = vsub.s32 1, %v2962_v42  ;;  %v1005_v51 = vsub.s32 3, %v2962_v42 }
  0xfb   :  { %2479 = vrsqrt.f32 %v957_v39  ;;  %v994_v55 = vrot.slane %v2975_v52, %v2965_v48  ;;  %v2985_v56 = vrot.slane %v2975_v52, %v1001_v49  ;;  %v1058_v62 = vrot.slane %v2980_v54, %v2965_v48 }
  0xfc   :  { %2481 = vrsqrt.f32 %v959_v43  ;;  %v958_v46 = vadd.f32 1e-05, %v938_v44  ;;  %v940_v47 = vmax.f32 %v930_v45, 0.0  ;;  %v998_v57 = vrot.slane %v2975_v52, %v2969_v50 }
  0xfd   :  { %v2990_v58 = vrot.slane %v2975_v52, %v1005_v51  ;;  %v1062_v61 = vrot.slane %v2980_v54, %v2969_v50  ;;  %v3001_v63 = vrot.slane %v2980_v54, %v1001_v49  ;;  %v3018_v11 = vrot.slane %v2980_v54, %v1005_v51 }
  0xfe   :  { %2483 = vrsqrt.f32 %v958_v46  ;;  %v960_v53 = vadd.f32 1e-05, %v940_v47  ;;  %v950_v32 = vsub.f32 %v2932_v25, %v2958_v36 }
 0x100   :  { %2485 = vrsqrt.f32 %v960_v53 }
 0x103   :  { %v2992_v59 = vpop.f32.mrf.mxu0  ;;  %v2994_v60 = vpop.f32.mrf.mxu1 }
 0x104   :  { %v774_v0 = vsel %vm745_vm1, %v2992_v59, 0.0  ;;  %v831_v1 = vmul.f32 %v2992_v59, %v2992_v59  ;;  %v788_v3 = vsel %vm745_vm1, %v2994_v60, 0.0  ;;  %v833_v4 = vmul.f32 %v2994_v60, %v2994_v60 }
 0x105   :  { %v775_v6 = vrot.slane %v774_v0, 4  ;;  %v789_v7 = vrot.slane %v788_v3, 4  ;;  %v3013_v8 = vpop.f32.mrf.mxu0  ;;  %v3015_v9 = vpop.f32.mrf.mxu1 }
 0x106   :  { %v865_v13 = vsel %vm745_vm1, %v831_v1, 0.0  ;;  %v879_v14 = vsel %vm745_vm1, %v833_v4, 0.0  ;;  %v781_v15 = vsel %vm745_vm1, %v3013_v8, 0.0  ;;  %v832_v18 = vmul.f32 %v3013_v8, %v3013_v8 }
 0x107   :  { %v776_v16 = vadd.f32 %v775_v6, %v774_v0  ;;  %v866_v10 = vrot.slane %v865_v13, 4  ;;  %v790_v19 = vadd.f32 %v789_v7, %v788_v3  ;;  %v880_v20 = vrot.slane %v879_v14, 4  ;;  %v660_v21 = vpop.f32.mrf.mxu0  ;;  %v701_v22 = vpop.f32.mrf.mxu1 }
 0x108   :  { %v2480_v23 = vpop.eup %2479  ;;  %v782_v29 = vrot.slane %v781_v15, 4  ;;  %v872_v30 = vsel %vm745_vm1, %v832_v18, 0.0  ;;  %v834_v17 = vmul.f32 %v3015_v9, %v3015_v9  ;;  %v795_v41 = vsel %vm745_vm1, %v3015_v9, 0.0 }
 0x109   :  { %v2482_v31 = vpop.eup %2481  ;;  %v777_v33 = vrot.slane %v776_v16, 2  ;;  %v867_v34 = vadd.f32 %v866_v10, %v865_v13  ;;  %v791_v35 = vrot.slane %v790_v19, 2  ;;  %v661_v37 = vpop.f32.mrf.mxu0  ;;  %v881_v2 = vadd.f32 %v880_v20, %v879_v14 }
 0x10a   :  { %v702_v38 = vpop.f32.mrf.mxu1  ;;  %v783_v39 = vadd.f32 %v782_v29, %v781_v15  ;;  %v873_v40 = vrot.slane %v872_v30, 4  ;;  %v977_v44 = vmul.f32 %v2480_v23, %v947_v5  ;;  %v979_v25 = vmul.f32 %v2482_v31, %v949_v27 }
 0x10b   :  { %v778_v12 = vadd.f32 %v777_v33, %v776_v16  ;;  %v868_v24 = vrot.slane %v867_v34, 2  ;;  %v792_v26 = vadd.f32 %v791_v35, %v790_v19  ;;  %v2484_v43 = vpop.eup %2483  ;;  %v882_v36 = vrot.slane %v881_v2, 2 }
 0x10c   :  { %v784_v45 = vrot.slane %v783_v39, 2  ;;  %v874_v51 = vadd.f32 %v873_v40, %v872_v30  ;;  %v796_v1 = vrot.slane %v795_v41, 4  ;;  %v886_v3 = vsel %vm745_vm1, %v834_v17, 0.0 }
 0x10d   :  { %v779_v46 = vrot.slane %v778_v12, 1  ;;  %v869_v47 = vadd.f32 %v868_v24, %v867_v34  ;;  %v793_v49 = vrot.slane %v792_v26, 1  ;;  %v883_v53 = vadd.f32 %v882_v36, %v881_v2  ;;  %v2486_v14 = vpop.eup %2485 }
 0x10e   :  { %v785_v0 = vadd.f32 %v784_v45, %v783_v39  ;;  %v978_v4 = vmul.f32 %v2484_v43, %v948_v28  ;;  %v875_v5 = vrot.slane %v874_v51, 2  ;;  %v797_v16 = vadd.f32 %v796_v1, %v795_v41 }
 0x10f   :  { %v780_v6 = vadd.f32 %v779_v46, %v778_v12  ;;  %v870_v7 = vrot.slane %v869_v47, 1  ;;  %v794_v13 = vadd.f32 %v793_v49, %v792_v26  ;;  %v884_v15 = vrot.slane %v883_v53, 1 }
 0x110   :  { %v786_v18 = vrot.slane %v785_v0, 1  ;;  %v887_v21 = vrot.slane %v886_v3, 4  ;;  %v876_v27 = vadd.f32 %v875_v5, %v874_v51  ;;  %v798_v29 = vrot.slane %v797_v16, 2 }
 0x111   :  { %v3038_v10 = vmul.f32 0.5, %v780_v6  ;;  %v871_v19 = vadd.f32 %v870_v7, %v869_v47  ;;  %v3040_v20 = vmul.f32 0.5, %v794_v13  ;;  %v885_v22 = vadd.f32 %v884_v15, %v883_v53  ;;  %v2435_v7 = vld [vmem:[%s3281_s4 + $0x170] sm:$0xff]  }
 0x112   :  { %v787_v23 = vadd.f32 %v786_v18, %v785_v0  ;;  %v1041_v28 = vmul.f32 %v994_v55, %v977_v44  ;;  %v980_v34 = vmul.f32 %v2486_v14, %v950_v32  ;;  %v877_v38 = vrot.slane %v876_v27, 1 }
 0x113   :  { %v911_v30 = vmul.f32 0.5, %v871_v19  ;;  %v921_v31 = vmul.f32 %v3038_v10, %v3038_v10  ;;  %v923_v33 = vmul.f32 %v3040_v20, %v3040_v20  ;;  %v913_v35 = vmul.f32 0.5, %v885_v22  ;;  %v2434_v22 = vld [vmem:[%s3281_s4 + $0x1b8] sm:$0xff]  }
 0x114   :  { %v3049_v37 = vmul.f32 0.5, %v787_v23  ;;  %v799_v39 = vadd.f32 %v798_v29, %v797_v16  ;;  %v888_v40 = vadd.f32 %v887_v21, %v886_v3  ;;  %v1042_v17 = vmul.f32 %v998_v57, %v978_v4  ;;  %v2437_v21 = vld [vmem:[%s3281_s4 + $0x130] sm:$0xff]  }
 0x115   :  { %v931_v2 = vsub.f32 %v911_v30, %v921_v31  ;;  %v1043_v55 = vmul.f32 %v2985_v56, %v979_v25  ;;  %v933_v12 = vsub.f32 %v913_v35, %v923_v33  ;;  %v878_v24 = vadd.f32 %v877_v38, %v876_v27  ;;  %v2436_v29 = vld [vmem:[%s3281_s4 + $0x1f0] sm:$0xff]   ;;  %v2441_v30 = vld [vmem:[%s3281_s4 + $0x128] sm:$0xff]  }
 0x116   :  { %v922_v26 = vmul.f32 %v3049_v37, %v3049_v37  ;;  %v800_v32 = vrot.slane %v799_v39, 1  ;;  %v889_v43 = vrot.slane %v888_v40, 2  ;;  %v1106_v44 = vadd.f32 %v1062_v61, %v1042_v17  ;;  %v2438_v33 = vld [vmem:[%s3281_s4 + $0x1b0] sm:$0xff]   ;;  %v2440_v17 = vld [vmem:[%s3281_s4 + $0x1e8] sm:$0xff]  }
 0x117   :  { %v941_v41 = vmax.f32 %v931_v2, 0.0  ;;  %v943_v36 = vmax.f32 %v933_v12, 0.0  ;;  %v912_v45 = vmul.f32 0.5, %v878_v24  ;;  %v1044_v46 = vmul.f32 %v2990_v58, %v980_v34  ;;  %v2433_v58 = vld [vmem:[%s3281_s4 + $0x138] sm:$0xff]   ;;  %v2443_v34 = vld [vmem:[%s3281_s4 + $0x160] sm:$0xff]  }
 0x118   :  { %v1105_v56 = vadd.f32 %v1058_v62, %v1041_v28  ;;  %v801_v25 = vadd.f32 %v800_v32, %v799_v39  ;;  %v890_v47 = vadd.f32 %v889_v43, %v888_v40  ;;  %v1116_v49 = vmax.f32 %v1106_v44, 0.0 }
 0x119   :  { %v961_v57 = vadd.f32 1e-05, %v941_v41  ;;  %v932_v51 = vsub.f32 %v912_v45, %v922_v26  ;;  %v1108_v53 = vadd.f32 %v3018_v11, %v1044_v46  ;;  %v963_v13 = vadd.f32 1e-05, %v943_v36  ;;  %v2445_v36 = vld [vmem:[%s3281_s4 + $0x120] sm:$0xff]  }
 0x11a   :  { %v1115_v0 = vmax.f32 %v1105_v56, 0.0  ;;  %v3065_v1 = vmul.f32 0.5, %v801_v25  ;;  %v891_v3 = vrot.slane %v890_v47, 1  ;;  %v1126_v61 = vpack.c.bf16 %v1116_v49, %v1116_v49  ;;  %v2442_v56 = vld [vmem:[%s3281_s4 + $0x1a8] sm:$0xff]   ;;  %v2447_v25 = vld [vmem:[%s3281_s4 + $0x158] sm:$0xff]   ;;  %v2444_v49 = vld [vmem:[%s3281_s4 + $0x1e0] sm:$0xff]  }
 0x11b   :  { %2487 = vrsqrt.f32 %v961_v57  ;;  %v942_v4 = vmax.f32 %v932_v51, 0.0  ;;  %v1118_v6 = vmax.f32 %v1108_v53, 0.0  ;;  %v1107_v15 = vadd.f32 %v3001_v63, %v1043_v55  ;;  %v2439_v63 = vld [vmem:[%s3281_s4 + $0x168] sm:$0xff]  }
 0x11c   :  { %v1125_v62 = vpack.c.bf16 %v1115_v0, %v1115_v0  ;;  %v892_v14 = vadd.f32 %v891_v3, %v890_v47  ;;  %v924_v11 = vmul.f32 %v3065_v1, %v3065_v1  ;;  %1814 = vmatprep.mubr.bf16.mxu1 %v1126_v61  ;;  %v1009_v2 = vsub.s32 4, %v2962_v42 }
 0x11d   :  { %v962_v18 = vadd.f32 1e-05, %v942_v4  ;;  %v1128_v5 = vpack.c.bf16 %v1118_v6, %v1118_v6  ;;  %v1117_v19 = vmax.f32 %v1107_v15, 0.0  ;;  %v1017_v39 = vsub.s32 6, %v2962_v42 }
 0x11e   :  { %1815 = vmatmul.mubr.bf16.vlgmr.msra.gmra.mxu1 %v1125_v62  ;;  %v914_v16 = vmul.f32 0.5, %v892_v14  ;;  %v1013_v32 = vsub.s32 5, %v2962_v42  ;;  %v951_v61 = vsub.f32 %v2992_v59, %v3038_v10  ;;  %v2449_v14 = vld [vmem:[%s3281_s4 + $0x118] sm:$0xff]   ;;  %v952_v59 = vsub.f32 %v3013_v8, %v3049_v37  ;;  %v2446_v10 = vld [vmem:[%s3281_s4 + $0x1a0] sm:$0xff]  }
 0x11f   :  { %2212 = vmatpush3.bf16.msra.mxu1 %v2433_v58  ;;  %2489 = vrsqrt.f32 %v962_v18  ;;  %1854 = vmatprep.mubr.bf16.mxu0 %v1128_v5  ;;  %v1127_v27 = vpack.c.bf16 %v1117_v19, %v1117_v19  ;;  %v1010_v58 = vrot.slane %v2975_v52, %v1009_v2  ;;  %v3135_v4 = vrot.slane %v2975_v52, %v1017_v39  ;;  %v2451_v5 = vld [vmem:[%s3281_s4 + $0x150] sm:$0xff]   ;;  %v2448_v8 = vld [vmem:[%s3281_s4 + $0x1d8] sm:$0xff]  }
 0x120   :  { %2213 = vmatprep.subr.bf16.mxu1 %v2435_v7  ;;  %2491 = vrsqrt.f32 %v963_v13  ;;  %v934_v23 = vsub.f32 %v914_v16, %v924_v11  ;;  %v1014_v11 = vrot.slane %v2975_v52, %v1013_v32  ;;  %v1021_v37 = vsub.s32 7, %v2962_v42  ;;  %v2454_v42 = vld [vmem:[%s3281_s4 + $0x190] sm:$0xff]  }
 0x121   :  { %1855 = vmatmul.mubr.bf16.vlgmr.msra.gmra.mxu0 %v1127_v27 }
 0x122   :  { %v944_v28 = vmax.f32 %v934_v23, 0.0  ;;  %2234 = vmatpush3.bf16.msra.mxu0 %v2434_v22 }
 0x123   :  { %2214 = vmatpush3.bf16.msra.mxu1 %v2437_v21  ;;  %v3091_v31 = vpop.f32.mrf.mxu0  ;;  %2235 = vmatprep.subr.bf16.mxu0 %v2436_v29  ;;  %v1078_v29 = vrot.slane %v2980_v54, %v1013_v32  ;;  %v2452_v32 = vld [vmem:[%s3281_s4 + $0x1d0] sm:$0xff]  }
 0x124   :  { %2215 = vmatprep.subr.bf16.mxu1 %v2439_v63  ;;  %v802_v35 = vsel %vm745_vm1, %v3091_v31, 0.0  ;;  %v835_v38 = vmul.f32 %v3091_v31, %v3091_v31  ;;  %v964_v40 = vadd.f32 1e-05, %v944_v28  ;;  %v1074_v28 = vrot.slane %v2980_v54, %v1009_v2 }
 0x125   :  { %v803_v55 = vrot.slane %v802_v35, 4  ;;  %v3108_v12 = vpop.f32.mrf.mxu0 }
 0x126   :  { %v893_v24 = vsel %vm745_vm1, %v835_v38, 0.0  ;;  %v809_v26 = vsel %vm745_vm1, %v3108_v12, 0.0  ;;  %v836_v41 = vmul.f32 %v3108_v12, %v3108_v12  ;;  %2493 = vrsqrt.f32 %v964_v40  ;;  %2236 = vmatpush3.bf16.msra.mxu0 %v2438_v33  ;;  %v2453_v38 = vld [vmem:[%s3281_s4 + $0x110] sm:$0xff]  }
 0x127   :  { %2216 = vmatpush3.bf16.msra.mxu1 %v2441_v30  ;;  %v804_v43 = vadd.f32 %v803_v55, %v802_v35  ;;  %v894_v44 = vrot.slane %v893_v24, 4  ;;  %v810_v45 = vrot.slane %v809_v26, 4  ;;  %v742_v46 = vpop.f32.mrf.mxu0  ;;  %2237 = vmatprep.subr.bf16.mxu0 %v2440_v17  ;;  %v953_v30 = vsub.f32 %v2994_v60, %v3040_v20  ;;  %v2450_v55 = vld [vmem:[%s3281_s4 + $0x198] sm:$0xff]   ;;  %v2455_v60 = vld [vmem:[%s3281_s4 + $0x148] sm:$0xff]  }
 0x128   :  { %2217 = vmatprep.subr.bf16.mxu1 %v2443_v34  ;;  %v900_v57 = vsel %vm745_vm1, %v836_v41, 0.0  ;;  %v2488_v47 = vpop.eup %2487  ;;  %v954_v46 = vsub.f32 %v3015_v9, %v3065_v1  ;;  %v2459_v9 = vld [vmem:[%s3281_s4 + $0x140] sm:$0xff]  }
 0x129   :  { %v805_v51 = vrot.slane %v804_v43, 2  ;;  %v895_v53 = vadd.f32 %v894_v44, %v893_v24  ;;  %v811_v0 = vadd.f32 %v810_v45, %v809_v26  ;;  %v743_v3 = vpop.f32.mrf.mxu0  ;;  %v901_v6 = vrot.slane %v900_v57, 4 }
 0x12a   :  { %v981_v15 = vmul.f32 %v2488_v47, %v951_v61  ;;  %2238 = vmatpush3.bf16.msra.mxu0 %v2442_v56  ;;  %v1082_v45 = vrot.slane %v2980_v54, %v1017_v39  ;;  %v2457_v47 = vld [vmem:[%s3281_s4 + $0x108] sm:$0xff]   ;;  %v1086_v39 = vrot.slane %v2980_v54, %v1021_v37  ;;  %v2461_v54 = vld [vmem:[%s3281_s4 + $0x100] sm:$0xff]  }
 0x12b   :  { %v806_v62 = vadd.f32 %v805_v51, %v804_v43  ;;  %v896_v7 = vrot.slane %v895_v53, 2  ;;  %2218 = vmatpush3.bf16.msra.mxu1 %v2445_v36  ;;  %v812_v13 = vrot.slane %v811_v0, 2  ;;  %v902_v18 = vadd.f32 %v901_v6, %v900_v57  ;;  %2239 = vmatprep.subr.bf16.mxu0 %v2444_v49 }
 0x12c   :  { %2219 = vmatprep.subr.bf16.mxu1 %v2447_v25  ;;  %v2490_v16 = vpop.eup %2489  ;;  %v1045_v40 = vmul.f32 %v1010_v58, %v981_v15  ;;  %v1022_v36 = vrot.slane %v2975_v52, %v1021_v37  ;;  %v2456_v58 = vld [vmem:[%s3281_s4 + $0x1c8] sm:$0xff]   ;;  %v2463_v15 = vld [vmem:[%s3281_s4 + $0x278] sm:$0xff]  }
 0x12d   :  { %v807_v19 = vrot.slane %v806_v62, 1  ;;  %v897_v21 = vadd.f32 %v896_v7, %v895_v53  ;;  %v813_v22 = vadd.f32 %v812_v13, %v811_v0  ;;  %v2492_v63 = vpop.eup %2491  ;;  %v982_v23 = vmul.f32 %v2490_v16, %v952_v59 }
 0x12e   :  { %v903_v27 = vrot.slane %v902_v18, 2  ;;  %2240 = vmatpush3.bf16.msra.mxu0 %v2446_v10  ;;  %v983_v2 = vmul.f32 %v2492_v63, %v953_v30  ;;  %v1109_v51 = vadd.f32 %v1074_v28, %v1045_v40  ;;  %v2460_v10 = vld [vmem:[%s3281_s4 + $0x1c0] sm:$0xff]   ;;  %v2465_v63 = vld [vmem:[%s3281_s4 + $0x270] sm:$0xff]   ;;  %v2467_v28 = vld [vmem:[%s3281_s4 + $0x268] sm:$0xff]  }
 0x12f   :  { %v808_v33 = vadd.f32 %v807_v19, %v806_v62  ;;  %v898_v34 = vrot.slane %v897_v21, 1  ;;  %v814_v35 = vrot.slane %v813_v22, 1  ;;  %2220 = vmatpush3.bf16.msra.mxu1 %v2449_v14  ;;  %v1046_v20 = vmul.f32 %v1014_v11, %v982_v23  ;;  %2241 = vmatprep.subr.bf16.mxu0 %v2448_v8  ;;  %v2458_v14 = vld [vmem:[%s3281_s4 + $0x188] sm:$0xff]   ;;  %v2462_v8 = vld [vmem:[%s3281_s4 + $0x180] sm:$0xff]  }
 0x130   :  { %v904_v17 = vadd.f32 %v903_v27, %v902_v18  ;;  %2221 = vmatprep.subr.bf16.mxu1 %v2451_v5  ;;  %v1047_v53 = vmul.f32 %v3135_v4, %v983_v2  ;;  %v1119_v11 = vmax.f32 %v1109_v51, 0.0 }
 0x131   :  { %v3166_v24 = vmul.f32 0.5, %v808_v33  ;;  %v899_v26 = vadd.f32 %v898_v34, %v897_v21  ;;  %v815_v41 = vadd.f32 %v814_v35, %v813_v22  ;;  %v1110_v44 = vadd.f32 %v1078_v29, %v1046_v20  ;;  %v2464_v21 = vld [vmem:[%s3281_s4 + $0x238] sm:$0xff]   ;;  %v2466_v29 = vld [vmem:[%s3281_s4 + $0x230] sm:$0xff]   ;;  %v2468_v33 = vld [vmem:[%s3281_s4 + $0x228] sm:$0xff]  }
 0x132   :  { %v905_v43 = vrot.slane %v904_v17, 1  ;;  %2242 = vmatpush3.bf16.msra.mxu0 %v2450_v55  ;;  %v1111_v5 = vadd.f32 %v1082_v45, %v1047_v53  ;;  %v1129_v37 = vpack.c.bf16 %v1119_v11, %v1119_v11  ;;  %v2469_v34 = vld [vmem:[%s3281_s4 + $0x260] sm:$0xff]  }
 0x133   :  { %v915_v56 = vmul.f32 0.5, %v899_v26  ;;  %v925_v57 = vmul.f32 %v3166_v24, %v3166_v24  ;;  %v3179_v25 = vmul.f32 0.5, %v815_v41  ;;  %2222 = vmatpush3.bf16.msra.mxu1 %v2453_v38  ;;  %v2494_v49 = vpop.eup %2493  ;;  %v1120_v1 = vmax.f32 %v1110_v44, 0.0  ;;  %2243 = vmatprep.subr.bf16.mxu0 %v2452_v32  ;;  %v2470_v35 = vld [vmem:[%s3281_s4 + $0x220] sm:$0xff]   ;;  %v2471_v38 = vld [vmem:[%s3281_s4 + $0x258] sm:$0xff]  }
 0x134   :  { %v906_v52 = vadd.f32 %v905_v43, %v904_v17  ;;  %2223 = vmatprep.subr.bf16.mxu1 %v2455_v60  ;;  %v984_v0 = vmul.f32 %v2494_v49, %v954_v46  ;;  %v1121_v27 = vmax.f32 %v1111_v5, 0.0  ;;  %v988_v17 = vld [vmem:[%s3279_s2 + $0x8] sm:$0x3]  ;;  %v955_v55 = vsub.f32 %v3091_v31, %v3166_v24  ;;  %v2472_v26 = vld [vmem:[%s3281_s4 + $0x218] sm:$0xff]   ;;  %v2473_v31 = vld [vmem:[%s3281_s4 + $0x250] sm:$0xff]  }
 0x135   :  { %v935_v3 = vsub.f32 %v915_v56, %v925_v57  ;;  %v926_v61 = vmul.f32 %v3179_v25, %v3179_v25  ;;  %v1130_v62 = vpack.c.bf16 %v1120_v1, %v1120_v1  ;;  %v956_v60 = vsub.f32 %v3108_v12, %v3179_v25  ;;  %v1052_v41 = vld [vmem:[%s3280_s3 + $0x8] sm:$0x3] }
 0x136   :  { %v916_v6 = vmul.f32 0.5, %v906_v52  ;;  %v1048_v13 = vmul.f32 %v1022_v36, %v984_v0  ;;  %2244 = vmatpush3.bf16.msra.mxu0 %v2454_v42  ;;  %v1131_v30 = vpack.c.bf16 %v1121_v27, %v1121_v27  ;;  %v1030_v20 = vrot.slane %v988_v17, %v2969_v50  ;;  %v2474_v36 = vld [vmem:[%s3281_s4 + $0x210] sm:$0xff]   ;;  %v2475_v46 = vld [vmem:[%s3281_s4 + $0x248] sm:$0xff]  }
 0x137   :  { %v945_v7 = vmax.f32 %v935_v3, 0.0  ;;  %2224 = vmatpush3.bf16.msra.mxu1 %v2457_v47  ;;  %2245 = vmatprep.subr.bf16.mxu0 %v2456_v58  ;;  %v1026_v43 = vrot.slane %v988_v17, %v2965_v48  ;;  %v1094_v12 = vrot.slane %v1052_v41, %v2969_v50  ;;  %v1090_v56 = vrot.slane %v1052_v41, %v2965_v48  ;;  %v2476_v50 = vld [vmem:[%s3281_s4 + $0x208] sm:$0xff]   ;;  %v2477_v47 = vld [vmem:[%s3281_s4 + $0x240] sm:$0xff]  }
 0x138   :  { %v936_v4 = vsub.f32 %v916_v6, %v926_v61  ;;  %2225 = vmatprep.subr.bf16.mxu1 %v2459_v9  ;;  %1894 = vmatprep.mubr.bf16.mxu1 %v1130_v62  ;;  %v1112_v18 = vadd.f32 %v1086_v39, %v1048_v13  ;;  %v2478_v48 = vld [vmem:[%s3281_s4 + $0x200] sm:$0xff]  }
 0x139   :  { %v965_v59 = vadd.f32 1e-05, %v945_v7 }
 0x13a   :  { %v946_v16 = vmax.f32 %v936_v4, 0.0  ;;  %v1122_v19 = vmax.f32 %v1112_v18, 0.0  ;;  %2246 = vmatpush3.bf16.msra.mxu0 %v2458_v14 }
 0x13b   :  { %2226 = vmatpush3.bf16.msra.mxu1 %v2461_v54  ;;  %2495 = vrsqrt.f32 %v965_v59  ;;  %2247 = vmatprep.subr.bf16.mxu0 %v2460_v10  ;;  %v2077_v59 = vld [vmem:[%s3282_s5] ss:$0 sm:$0xff] }
 0x13c   :  { %v966_v22 = vadd.f32 1e-05, %v946_v16  ;;  %2255 = vmatprep.subr.bf16.mxu1 %v2463_v15  ;;  %v1132_v23 = vpack.c.bf16 %v1122_v19, %v1122_v19 }
 0x13e   :  { %2497 = vrsqrt.f32 %v966_v22  ;;  %1895 = vmatmul.mubr.bf16.vlgmr.msra.gmra.mxu1 %v1129_v37  ;;  %1934 = vmatprep.mubr.bf16.mxu0 %v1132_v23 }
 0x13f   :  { %2256 = vmatpush3.bf16.msra.mxu1 %v2464_v21  ;;  %2248 = vmatpush3.bf16.msra.mxu0 %v2462_v8 }
 0x140   :  { %2257 = vmatprep.subr.bf16.mxu1 %v2465_v63 }
 0x142   :  { %1935 = vmatmul.mubr.bf16.vlgmr.msra.gmra.mxu0 %v1131_v30 }
 0x143   :  { %2258 = vmatpush3.bf16.msra.mxu1 %v2466_v29 }
 0x144   :  { %2259 = vmatprep.subr.bf16.mxu1 %v2467_v28 }
 0x147   :  { %2260 = vmatpush3.bf16.msra.mxu1 %v2468_v33 }
 0x148   :  { %2261 = vmatprep.subr.bf16.mxu1 %v2469_v34  ;;  %v2496_v40 = vpop.eup %2495 }
 0x149   :  { %v985_v32 = vmul.f32 %v2496_v40, %v955_v55 }
 0x14b   :  { %v2498_v2 = vpop.eup %2497  ;;  %2262 = vmatpush3.bf16.msra.mxu1 %v2470_v35  ;;  %v1049_v45 = vmul.f32 %v1026_v43, %v985_v32 }
 0x14c   :  { %v986_v44 = vmul.f32 %v2498_v2, %v956_v60  ;;  %2263 = vmatprep.subr.bf16.mxu1 %v2471_v38 }
 0x14d   :  { %v1113_v52 = vadd.f32 %v1090_v56, %v1049_v45 }
 0x14e   :  { %v1050_v24 = vmul.f32 %v1030_v20, %v986_v44 }
 0x14f   :  { %2264 = vmatpush3.bf16.msra.mxu1 %v2472_v26  ;;  %v1123_v42 = vmax.f32 %v1113_v52, 0.0 }
 0x150   :  { %2265 = vmatprep.subr.bf16.mxu1 %v2473_v31  ;;  %v1114_v57 = vadd.f32 %v1094_v12, %v1050_v24 }
 0x151   :  { %v1133_v9 = vpack.c.bf16 %v1123_v42, %v1123_v42 }
 0x152   :  { %v1124_v25 = vmax.f32 %v1114_v57, 0.0 }
 0x153   :  { %2266 = vmatpush3.bf16.msra.mxu1 %v2474_v36 }
 0x154   :  { %2267 = vmatprep.subr.bf16.mxu1 %v2475_v46  ;;  %v1134_v49 = vpack.c.bf16 %v1124_v25, %v1124_v25 }
 0x156   :  { %1974 = vmatprep.mubr.bf16.mxu1 %v1134_v49 }
 0x157   :  { %2268 = vmatpush3.bf16.msra.mxu1 %v2476_v50 }
 0x158   :  { %2269 = vmatprep.subr.bf16.mxu1 %v2477_v47 }
 0x15b   :  { %2270 = vmatpush3.bf16.msra.mxu1 %v2478_v48 }
 0x15e   :  { %1975 = vmatmul.mubr.bf16.vlgmr.msra.gmra.mxu1 %v1133_v9 }
 0x1de   :  { %v2183_v1 = vpop.f32.mrf.mxu1 }
 0x1e0   :  { %v2184_v39 = vpop.f32.mrf.mxu1 }
 0x1e1   :  { %v2205_v53 = vpop.f32.mrf.mxu0  ;;  %v2185_v15 = vadd.f32 %v2184_v39, %v2183_v1 }
 0x1e2   :  { %v2186_v51 = vpop.f32.mrf.mxu1 }
 0x1e3   :  { %v2206_v3 = vpop.f32.mrf.mxu0  ;;  %v1817_v10 = vadd.f32 %v2185_v15, %v2077_v59 }
 0x1e4   :  { %v2187_v0 = vpop.f32.mrf.mxu1  ;;  %v2207_v18 = vadd.f32 %v2206_v3, %v2205_v53 }
 0x1e5   :  { %v2208_v61 = vpop.f32.mrf.mxu0 }
 0x1e6   :  { %v1857_v16 = vadd.f32 %v2207_v18, %v1817_v10 }
 0x1e7   :  { %v2209_v58 = vpop.f32.mrf.mxu0 }
 0x1fe   :  { %v2227_v6 = vpop.f32.mrf.mxu1 }
 0x200   :  { %v2228_v62 = vpop.f32.mrf.mxu1 }
 0x201   :  { %v2229_v5 = vadd.f32 %v2228_v62, %v2227_v6 }
 0x202   :  { %v2230_v7 = vpop.f32.mrf.mxu1  ;;  %v2249_v54 = vpop.f32.mrf.mxu0 }
 0x203   :  { %v1897_v19 = vadd.f32 %v2229_v5, %v1857_v16 }
 0x204   :  { %v2231_v13 = vpop.f32.mrf.mxu1  ;;  %v2250_v4 = vpop.f32.mrf.mxu0 }
 0x205   :  { %v2251_v22 = vadd.f32 %v2250_v4, %v2249_v54 }
 0x206   :  { %v2252_v14 = vpop.f32.mrf.mxu0 }
 0x207   :  { %v1937_v37 = vadd.f32 %v2251_v22, %v1897_v19 }
 0x208   :  { %v2253_v11 = vpop.f32.mrf.mxu0 }
 0x21e   :  { %v2271_v21 = vpop.f32.mrf.mxu1 }
 0x220   :  { %v2272_v8 = vpop.f32.mrf.mxu1 }
 0x221   :  { %v2273_v63 = vadd.f32 %v2272_v8, %v2271_v21 }
 0x222   :  { %v2274_v23 = vpop.f32.mrf.mxu1 }
 0x223   :  { %v1977_v27 = vadd.f32 %v2273_v63, %v1937_v37 }
 0x224   :  { %v2275_v29 = vpop.f32.mrf.mxu1 }
 0x225   :  { %1982 = vst [vmem:[#allocation2] sm:$0x3] %v1977_v27 }
 0x226   :  { %2510 = shalt.err (!%p2507_p4)
}
 0x227   :  { %1992 = dma.vmem_to_hbm [thread:$0]  %s1990_s23, 32, %s3283_s6, [#allocation3]  }
 0x228   :  { %2519 = dma.done.wait [#allocation3], 32  }
 0x229   :  { %2520 = vsyncadd [#allocation3], 4294967264 }
 0x22a   :  { %1996 = vsyncpa [#allocation3], 1 }

</bundles_post_ra>
